<compile_context>
chip_gen: v5e
topology: v5e:2x2
jax: 0.10.0
libtpu: 0.0.40
codegen_flags: <defaults>
</compile_context>

<pallas_src>
import jax
import jax.numpy as jnp
from jax.experimental import pallas as pl
from jax.experimental.pallas import tpu as pltpu

HIDDEN_DIM = 768


def _sentiment_kernel(emb_ref, poolw_ref,
                      wenc_ref, benc_ref,
                      w1_ref, b1_ref,
                      w2_ref, b2_ref,
                      out_ref):
    """One batch tile: encoder Linear+ReLU, masked mean pooling, classifier MLP.

    emb_ref   : (TB*S, H) bf16 token embeddings, pre-flattened (tile aligned)
    poolw_ref : (TB*S, 1) f32  pooling weights = mask / clamp(sum(mask), 1)
    wenc/w1/w2: (H, H)    bf16 (stored (in, out): kernel computes x @ W + b)
    benc/b1/b2: (1, H)    f32
    out_ref   : (TB, H)
    """
    tb, h = out_ref.shape
    s = emb_ref.shape[0] // tb

    # ---- encoder: Linear(H, H) + ReLU over every token --------------------
    # One MXU matmul with M = TB*S; the bf16 slab arrives already flattened so
    # no in-kernel relayout is needed.
    reps = jnp.dot(emb_ref[...], wenc_ref[...],
                   preferred_element_type=jnp.float32)              # (TB*S, H) f32
    reps = jnp.maximum(reps + benc_ref[...], 0.0)

    # ---- pooling: attention-mask-weighted mean over the sequence ----------
    # Weights are pre-normalized in the wrapper, so this is a lane-broadcast
    # VPU multiply plus a sublane reduce over S (the (TB*S,H)->(TB,S,H) f32
    # reshape is 8-sublane aligned, hence free). No M=1 batched matvecs and no
    # in-kernel divide.
    weighted = reps * poolw_ref[...]                                # (TB*S, H) f32
    pooled = jnp.sum(weighted.reshape(tb, s, h), axis=1)            # (TB, H)  f32

    # ---- classifier: Linear -> ReLU -> Dropout(identity @ eval) -> Linear -
    h1 = jnp.dot(pooled.astype(jnp.bfloat16), w1_ref[...],
                 preferred_element_type=jnp.float32)
    h1 = jnp.maximum(h1 + b1_ref[...], 0.0)
    # Dropout(p=0.1) is the identity at inference time.
    out = jnp.dot(h1.astype(jnp.bfloat16), w2_ref[...],
                  preferred_element_type=jnp.float32)
    out_ref[...] = (out + b2_ref[...]).astype(out_ref.dtype)


def _vmem_capacity_bytes():
    """Physical VMEM per TensorCore; conservative (v7x) fallback if unknown."""
    try:
        info = pltpu.get_tpu_info()
        for attr in ("vmem_capacity_bytes", "vmem_size_bytes", "vmem_bytes"):
            v = getattr(info, attr, None)
            if v:
                return int(v)
    except Exception:
        pass
    return 64 * 1024 * 1024


def _pick_block_b(B, S, H, vmem_limit_bytes):
    """Largest batch tile (multiple of 8) whose pipeline footprint fits VMEM."""
    # Resident weights/biases (double-buffered by the default pipeline).
    weight_bytes = 2 * (3 * H * H * 2 + 3 * H * 4)
    # Per batch-row footprint: bf16 emb tile + f32 pool weights + output, all
    # double-buffered, plus in-kernel f32 temporaries (reps / weighted sums).
    per_row = (2 * (S * H * 2)        # emb, bf16, 2 buffers
               + 2 * (S * 4)          # pooling weights
               + 2 * (H * 4)          # output tile
               + 2 * (S * H * 4)      # f32 reps + weighted temporaries
               + 2 * (H * 4))         # pooled / h1 temporaries
    budget = int(vmem_limit_bytes * 0.8) - weight_bytes
    max_rows = max(8, (budget // per_row) // 8 * 8)
    Bp8 = pl.cdiv(max(B, 1), 8) * 8
    if Bp8 <= max_rows:
        return int(Bp8)                     # whole batch in one grid step
    return int(min(max_rows, 512))          # biggest tile that fits (cap 512)


def sentiment_classifier_forward(tokens, attn_mask, params, *, block_b=None,
                                 out_dtype=jnp.float32):
    """tokens: (B, S) int32, attn_mask: (B, S) -> (B, HIDDEN_DIM) out_dtype."""
    B, S = tokens.shape
    H = HIDDEN_DIM

    # Generation-aware scoped-VMEM cap (~48 MiB on v7x, ~96 MiB on v5e/v6e).
    vmem_cap = _vmem_capacity_bytes()
    vmem_limit = max(32 * 1024 * 1024,
                     min(int(vmem_cap * 3 // 4), 100 * 1024 * 1024))

    if block_b is None:
        block_b = _pick_block_b(B, S, H, vmem_limit)
    block_b = max(8, (int(block_b) // 8) * 8)

    Bp = pl.cdiv(B, block_b) * block_b
    num_blocks = Bp // block_b
    if Bp != B:
        tokens = jnp.pad(tokens, ((0, Bp - B), (0, 0)))
        attn_mask = jnp.pad(attn_mask, ((0, Bp - B), (0, 0)))

    # Glue: embedding gather stays in plain JAX (bf16 end-to-end, no f32 round
    # trip) and is pre-flattened so the kernel block is exactly tile aligned.
    # TODO(synk): move the gather in-kernel (tokens via PrefetchScalarGridSpec
    # in SMEM + per-row async_copy from an HBM pl.ANY table) once S is large
    # enough for the extra activation round trip to matter; at S=8 it is noise
    # and 1536-byte per-token row DMAs would dominate.
    emb = params["embedding"][tokens].reshape(Bp * S, H)             # bf16

    # Pooling weights precomputed: mask / clamp(sum(mask), 1), as a column so
    # the kernel only does a lane-broadcast multiply.
    mask_f = attn_mask.astype(jnp.float32)
    denom = jnp.maximum(jnp.sum(mask_f, axis=1, keepdims=True), 1.0)
    poolw = (mask_f / denom).reshape(Bp * S, 1)                      # f32

    weight_spec = pl.BlockSpec((H, H), lambda b: (0, 0))             # VMEM resident
    bias_spec = pl.BlockSpec((1, H), lambda b: (0, 0))

    # Megacore sharding only pays once activation traffic rivals the weight
    # traffic it duplicates across the two v7x TensorCores.
    act_bytes = Bp * S * H * 2
    weight_bytes = 3 * H * H * 2
    dims = ("parallel",) if (num_blocks > 1 and act_bytes >= 4 * weight_bytes) \
        else ("arbitrary",)

    flops = 2 * Bp * S * H * H + 2 * Bp * S * H + 4 * Bp * H * H
    bytes_accessed = (Bp * S * H * 2 + Bp * S * 4
                      + 3 * H * H * 2 + 3 * H * 4
                      + Bp * H * jnp.dtype(out_dtype).itemsize)

    out = pl.pallas_call(
        _sentiment_kernel,
        out_shape=jax.ShapeDtypeStruct((Bp, H), out_dtype),
        grid_spec=pltpu.PrefetchScalarGridSpec(
            num_scalar_prefetch=0,
            grid=(num_blocks,),
            in_specs=[
                pl.BlockSpec((block_b * S, H), lambda b: (b, 0)),    # emb slab
                pl.BlockSpec((block_b * S, 1), lambda b: (b, 0)),    # pool weights
                weight_spec, bias_spec,                              # encoder
                weight_spec, bias_spec,                              # classifier L1
                weight_spec, bias_spec,                              # classifier L2
            ],
            out_specs=pl.BlockSpec((block_b, H), lambda b: (b, 0)),
        ),
        compiler_params=pltpu.CompilerParams(
            dimension_semantics=dims,
            vmem_limit_bytes=vmem_limit,
        ),
        cost_estimate=pl.CostEstimate(
            flops=flops, transcendentals=0, bytes_accessed=bytes_accessed),
    )(
        emb, poolw,
        params["w_enc"], params["b_enc"],
        params["w1"], params["b1"],
        params["w2"], params["b2"],
    )
    return out[:B]


def _reference_forward(tokens, attn_mask, params):
    """Plain-JAX reference with the same dtypes/accumulation as the kernel."""
    emb = params["embedding"][tokens]                                # (B,S,H) bf16
    reps = jnp.einsum("bsh,hk->bsk", emb, params["w_enc"],
                      preferred_element_type=jnp.float32) + params["b_enc"]
    reps = jnp.maximum(reps, 0.0)
    m = attn_mask.astype(jnp.float32)
    denom = jnp.maximum(jnp.sum(m, axis=1, keepdims=True), 1.0)
    pooled = jnp.einsum("bs,bsh->bh", m, reps) / denom
    h1 = jnp.maximum(jnp.dot(pooled.astype(jnp.bfloat16), params["w1"],
                             preferred_element_type=jnp.float32) + params["b1"], 0.0)
    return jnp.dot(h1.astype(jnp.bfloat16), params["w2"],
                   preferred_element_type=jnp.float32) + params["b2"]


def init_params(key, vocab_size=1000):
    H = HIDDEN_DIM
    ks = jax.random.split(key, 6)
    scale = 1.0 / jnp.sqrt(jnp.float32(H))
    return {
        "embedding": (jax.random.normal(ks[0], (vocab_size, H), jnp.float32)
                      * 0.02).astype(jnp.bfloat16),
        "w_enc": (jax.random.normal(ks[1], (H, H), jnp.float32)
                  * scale).astype(jnp.bfloat16),
        "b_enc": jnp.zeros((1, H), jnp.float32),
        "w1": (jax.random.normal(ks[2], (H, H), jnp.float32)
               * scale).astype(jnp.bfloat16),
        "b1": jax.random.normal(ks[3], (1, H), jnp.float32) * 0.01,
        "w2": (jax.random.normal(ks[4], (H, H), jnp.float32)
               * scale).astype(jnp.bfloat16),
        "b2": jax.random.normal(ks[5], (1, H), jnp.float32) * 0.01,
    }


if __name__ == "__main__":
    key = jax.random.PRNGKey(0)
    k_tok, k_param = jax.random.split(key)

    B, S, V = 16, 8, 1000
    tokens = jax.random.randint(k_tok, (B, S), 0, V, dtype=jnp.int32)
    # Mask: varying valid lengths per sequence (some padded rows).
    lengths = (jnp.arange(B, dtype=jnp.int32) % S) + 1
    attn_mask = (jnp.arange(S)[None, :] < lengths[:, None]).astype(jnp.float32)

    params = init_params(k_param, vocab_size=V)

    fwd = jax.jit(sentiment_classifier_forward)
    out = jax.block_until_ready(fwd(tokens, attn_mask, params))

    assert out.shape == (B, HIDDEN_DIM)
    assert bool(jnp.all(jnp.isfinite(out)))

    ref = _reference_forward(tokens, attn_mask, params)
    max_err = float(jnp.max(jnp.abs(out.astype(jnp.float32) - ref)))
    assert max_err < 1e-2, f"kernel/reference mismatch: max abs err {max_err}"

    print("KERNEL_OK")
</pallas_src>

<mosaic_0001>
module attributes {stable_mosaic.version = 11 : i64} {
  func.func @_sentiment_kernel(%arg0: i32, %arg1: memref<128x768xbf16, #tpu.memory_space<vmem>>, %arg2: memref<128x1xf32, #tpu.memory_space<vmem>>, %arg3: memref<768x768xbf16, #tpu.memory_space<vmem>>, %arg4: memref<1x768xf32, #tpu.memory_space<vmem>>, %arg5: memref<768x768xbf16, #tpu.memory_space<vmem>>, %arg6: memref<1x768xf32, #tpu.memory_space<vmem>>, %arg7: memref<768x768xbf16, #tpu.memory_space<vmem>>, %arg8: memref<1x768xf32, #tpu.memory_space<vmem>>, %arg9: memref<16x768xf32, #tpu.memory_space<vmem>>) attributes {dimension_semantics = [#tpu.dimension_semantics<arbitrary>], iteration_bounds = array<i64: 1>, scalar_prefetch = 0 : i64, scratch_operands = 0 : i64, tpu.core_type = #tpu.core_type<tc>, window_params = [{transform_indices = @transform_0, window_bounds = array<i64: 128, 768>}, {transform_indices = @transform_1, window_bounds = array<i64: 128, 1>}, {pipeline_mode = #tpu.pipeline_mode<synchronous>, transform_indices = @transform_2, window_bounds = array<i64: 768, 768>}, {pipeline_mode = #tpu.pipeline_mode<synchronous>, transform_indices = @transform_3, window_bounds = array<i64: 1, 768>}, {pipeline_mode = #tpu.pipeline_mode<synchronous>, transform_indices = @transform_4, window_bounds = array<i64: 768, 768>}, {pipeline_mode = #tpu.pipeline_mode<synchronous>, transform_indices = @transform_5, window_bounds = array<i64: 1, 768>}, {pipeline_mode = #tpu.pipeline_mode<synchronous>, transform_indices = @transform_6, window_bounds = array<i64: 768, 768>}, {pipeline_mode = #tpu.pipeline_mode<synchronous>, transform_indices = @transform_7, window_bounds = array<i64: 1, 768>}, {transform_indices = @transform_8, window_bounds = array<i64: 16, 768>}]} {
    %c0 = arith.constant 0 : index
    %c0_0 = arith.constant 0 : index
    %0 = vector.load %arg1[%c0, %c0_0] : memref<128x768xbf16, #tpu.memory_space<vmem>>, vector<128x768xbf16>
    %c0_1 = arith.constant 0 : index
    %c0_2 = arith.constant 0 : index
    %1 = vector.load %arg3[%c0_1, %c0_2] : memref<768x768xbf16, #tpu.memory_space<vmem>>, vector<768x768xbf16>
    %cst = arith.constant dense<0.000000e+00> : vector<128x768xf32>
    %2 = tpu.matmul %0, %1, %cst {dimension_numbers = #tpu.dot_dimension_numbers<[1], [0], [0], [1], [0, 0, 1, 1], [], []>} : vector<128x768xbf16>, vector<768x768xbf16>, vector<128x768xf32> -> vector<128x768xf32>
    %c0_3 = arith.constant 0 : index
    %c0_4 = arith.constant 0 : index
    %3 = vector.load %arg4[%c0_3, %c0_4] : memref<1x768xf32, #tpu.memory_space<vmem>>, vector<1x768xf32>
    %4 = vector.broadcast %3 : vector<1x768xf32> to vector<128x768xf32>
    %5 = arith.addf %2, %4 : vector<128x768xf32>
    %cst_5 = arith.constant 0.000000e+00 : f32
    %6 = vector.broadcast %cst_5 : f32 to vector<128x768xf32>
    %7 = arith.maximumf %5, %6 : vector<128x768xf32>
    %c0_6 = arith.constant 0 : index
    %c0_7 = arith.constant 0 : index
    %8 = vector.load %arg2[%c0_6, %c0_7] : memref<128x1xf32, #tpu.memory_space<vmem>>, vector<128x1xf32>
    %9 = vector.broadcast %8 : vector<128x1xf32> to vector<128x768xf32>
    %10 = arith.mulf %7, %9 : vector<128x768xf32>
    %11 = vector.shape_cast %10 : vector<128x768xf32> to vector<16x8x768xf32>
    %cst_8 = arith.constant dense<0.000000e+00> : vector<16x768xf32>
    %12 = vector.multi_reduction <add>, %11, %cst_8 [1] : vector<16x8x768xf32> to vector<16x768xf32>
    %13 = arith.truncf %12 : vector<16x768xf32> to vector<16x768xbf16>
    %c0_9 = arith.constant 0 : index
    %c0_10 = arith.constant 0 : index
    %14 = vector.load %arg5[%c0_9, %c0_10] : memref<768x768xbf16, #tpu.memory_space<vmem>>, vector<768x768xbf16>
    %cst_11 = arith.constant dense<0.000000e+00> : vector<16x768xf32>
    %15 = tpu.matmul %13, %14, %cst_11 {dimension_numbers = #tpu.dot_dimension_numbers<[1], [0], [0], [1], [0, 0, 1, 1], [], []>} : vector<16x768xbf16>, vector<768x768xbf16>, vector<16x768xf32> -> vector<16x768xf32>
    %c0_12 = arith.constant 0 : index
    %c0_13 = arith.constant 0 : index
    %16 = vector.load %arg6[%c0_12, %c0_13] : memref<1x768xf32, #tpu.memory_space<vmem>>, vector<1x768xf32>
    %17 = vector.broadcast %16 : vector<1x768xf32> to vector<16x768xf32>
    %18 = arith.addf %15, %17 : vector<16x768xf32>
    %cst_14 = arith.constant 0.000000e+00 : f32
    %19 = vector.broadcast %cst_14 : f32 to vector<16x768xf32>
    %20 = arith.maximumf %18, %19 : vector<16x768xf32>
    %21 = arith.truncf %20 : vector<16x768xf32> to vector<16x768xbf16>
    %c0_15 = arith.constant 0 : index
    %c0_16 = arith.constant 0 : index
    %22 = vector.load %arg7[%c0_15, %c0_16] : memref<768x768xbf16, #tpu.memory_space<vmem>>, vector<768x768xbf16>
    %cst_17 = arith.constant dense<0.000000e+00> : vector<16x768xf32>
    %23 = tpu.matmul %21, %22, %cst_17 {dimension_numbers = #tpu.dot_dimension_numbers<[1], [0], [0], [1], [0, 0, 1, 1], [], []>} : vector<16x768xbf16>, vector<768x768xbf16>, vector<16x768xf32> -> vector<16x768xf32>
    %c0_18 = arith.constant 0 : index
    %c0_19 = arith.constant 0 : index
    %24 = vector.load %arg8[%c0_18, %c0_19] : memref<1x768xf32, #tpu.memory_space<vmem>>, vector<1x768xf32>
    %25 = vector.broadcast %24 : vector<1x768xf32> to vector<16x768xf32>
    %26 = arith.addf %23, %25 : vector<16x768xf32>
    %c0_20 = arith.constant 0 : index
    %c0_21 = arith.constant 0 : index
    %27 = vector.load %arg9[%c0_20, %c0_21] : memref<16x768xf32, #tpu.memory_space<vmem>>, vector<16x768xf32>
    tpu.vector_store %arg9[%c0_20, %c0_21], %26 {strides = array<i32>} : memref<16x768xf32, #tpu.memory_space<vmem>>, vector<16x768xf32>,
    return
  }
  func.func @transform_0(%arg0: i32) -> (i32, i32) {
    %c0_i32 = arith.constant 0 : i32
    %c0_i32_0 = arith.constant 0 : i32
    return %arg0, %c0_i32 : i32, i32
  }
  func.func @transform_1(%arg0: i32) -> (i32, i32) {
    %c0_i32 = arith.constant 0 : i32
    %c0_i32_0 = arith.constant 0 : i32
    return %arg0, %c0_i32 : i32, i32
  }
  func.func @transform_2(%arg0: i32) -> (i32, i32) {
    %c0_i32 = arith.constant 0 : i32
    %c0_i32_0 = arith.constant 0 : i32
    %c0_i32_1 = arith.constant 0 : i32
    return %c0_i32, %c0_i32_0 : i32, i32
  }
  func.func @transform_3(%arg0: i32) -> (i32, i32) {
    %c0_i32 = arith.constant 0 : i32
    %c0_i32_0 = arith.constant 0 : i32
    %c0_i32_1 = arith.constant 0 : i32
    return %c0_i32, %c0_i32_0 : i32, i32
  }
  func.func @transform_4(%arg0: i32) -> (i32, i32) {
    %c0_i32 = arith.constant 0 : i32
    %c0_i32_0 = arith.constant 0 : i32
    %c0_i32_1 = arith.constant 0 : i32
    return %c0_i32, %c0_i32_0 : i32, i32
  }
  func.func @transform_5(%arg0: i32) -> (i32, i32) {
    %c0_i32 = arith.constant 0 : i32
    %c0_i32_0 = arith.constant 0 : i32
    %c0_i32_1 = arith.constant 0 : i32
    return %c0_i32, %c0_i32_0 : i32, i32
  }
  func.func @transform_6(%arg0: i32) -> (i32, i32) {
    %c0_i32 = arith.constant 0 : i32
    %c0_i32_0 = arith.constant 0 : i32
    %c0_i32_1 = arith.constant 0 : i32
    return %c0_i32, %c0_i32_0 : i32, i32
  }
  func.func @transform_7(%arg0: i32) -> (i32, i32) {
    %c0_i32 = arith.constant 0 : i32
    %c0_i32_0 = arith.constant 0 : i32
    %c0_i32_1 = arith.constant 0 : i32
    return %c0_i32, %c0_i32_0 : i32, i32
  }
  func.func @transform_8(%arg0: i32) -> (i32, i32) {
    %c0_i32 = arith.constant 0 : i32
    %c0_i32_0 = arith.constant 0 : i32
    return %arg0, %c0_i32 : i32, i32
  }
}

</mosaic_0001>

<bundles_post_ra>
// kernel: sentiment_classifier_forward.1
= control target key start
LH: loop header
LB: loop body
LE: loop exit
PB: predicated region body
PF: predicated region fallthrough
CT: control target
= control target key end

     0   :  { %13 = vsyncpa [#allocation3], 0  ;;  %s17667_s0 = inlined_call_operand.vmem [shape: bf16[128,768], index: 0, kind: input, shape index: {}]   ;;  %s17668_s1 = inlined_call_operand.vmem [shape: f32[128,1], index: 1, kind: input, shape index: {}]   ;;  %s17669_s2 = inlined_call_operand.vmem [shape: bf16[768,768], index: 2, kind: input, shape index: {}]   ;;  %s17670_s3 = inlined_call_operand.vmem [shape: f32[1,768], index: 3, kind: input, shape index: {}]   ;;  %s17671_s4 = inlined_call_operand.hbm [shape: bf16[768,768], index: 4, kind: input, shape index: {}]   ;;  %s17672_s5 = inlined_call_operand.vmem [shape: f32[1,768], index: 5, kind: input, shape index: {}]   ;;  %s17673_s6 = inlined_call_operand.hbm [shape: bf16[768,768], index: 6, kind: input, shape index: {}]   ;;  %s17674_s7 = inlined_call_operand.vmem [shape: f32[1,768], index: 7, kind: input, shape index: {}]   ;;  %s17675_s8 = inlined_call_operand.hbm [shape: f32[16,768], index: 8, kind: output, shape index: {}]  }
   0x1   :  { %14 = vsyncpa [#allocation6], 0 }
   0x2   :  { %15 = vsyncpa [#allocation4], 0  ;;  %s28_s29 = sshll.u32 %s17671_s4, 4  ;;  %s14305_s30 = smov [#allocation2]   ;;  %s29_s29 = int_to_ptr.hbm [resolvable:$true] %s28_s29 }
   0x3   :  { %s30_s9 = sshll.u32 %s14305_s30, 4  ;;  %s43_s12 = sshll.u32 %s17673_s6, 4  ;;  %s31_s9 = int_to_ptr.vmem [resolvable:$true] %s30_s9  ;;  %s44_s12 = int_to_ptr.hbm [resolvable:$true] %s43_s12 }
   0x4   :  { %s14306_s13 = smov 384   ;;  %s14307_s14 = smov 24  }
   0x5   :  { %36 = dma.hbm_to_vmem [thread:$0]  %s29_s29, 36864, %s31_s9, [#allocation3], %s14306_s13, %s14306_s13, %s14307_s14  }
   0x6   :  { %s14308_s15 = smov [#allocation5]  }
   0x7   :  { %s45_s16 = sshll.u32 %s14308_s15, 4  ;;  %s46_s16 = int_to_ptr.vmem [resolvable:$true] %s45_s16 }
   0x8   :  { %51 = dma.hbm_to_vmem [thread:$0]  %s44_s12, 36864, %s46_s16, [#allocation6], %s14306_s13, %s14306_s13, %s14307_s14  }
   0x9   :  { %14299 = dma.done.wait [#allocation3], 36864  }
   0xa   :  { %14300 = vsyncadd [#allocation3], 4294930432 }
   0xb   :  { %14301 = dma.done.wait [#allocation6], 36864  }
   0xc   :  { %14302 = vsyncadd [#allocation6], 4294930432  ;;  %v10015_v0 = vld [vmem:[%s17669_s2 + $0x150] sm:$0xf]  ;;  %v13394_v1 = vld [vmem:[%s17669_s2 + $0x164] sm:$0xf0] }
   0xd   :  { %v10207_v2 = vld [vmem:[%s17669_s2 + $0x2d0] sm:$0xf]  ;;  %v10016_v3 = vor.u32 %v13394_v1, %v10015_v0  ;;  %v13442_v4 = vld [vmem:[%s17669_s2 + $0x2e4] sm:$0xf0]  ;;  %v9991_v11 = vld [vmem:[%s17669_s2 + $0x120] sm:$0xf] }
   0xe   :  { %v10399_v5 = vld [vmem:[%s17669_s2 + $0x450] sm:$0xf]  ;;  %v13490_v6 = vld [vmem:[%s17669_s2 + $0x464] sm:$0xf0]  ;;  %v10208_v7 = vor.u32 %v13442_v4, %v10207_v2  ;;  %v13388_v13 = vld [vmem:[%s17669_s2 + $0x134] sm:$0xf0] }
   0xf   :  { %v10400_v8 = vor.u32 %v13490_v6, %v10399_v5  ;;  %v10591_v9 = vld [vmem:[%s17669_s2 + $0x5d0] sm:$0xf]  ;;  %v13538_v10 = vld [vmem:[%s17669_s2 + $0x5e4] sm:$0xf0]  ;;  %2092 = vmatpush.bf16.msra.mxu0 %v10016_v3  ;;  %v10183_v14 = vld [vmem:[%s17669_s2 + $0x2a0] sm:$0xf]  ;;  %v9992_v16 = vor.u32 %v13388_v13, %v9991_v11 }
  0x10   :  { %v10592_v12 = vor.u32 %v13538_v10, %v10591_v9  ;;  %v13436_v15 = vld [vmem:[%s17669_s2 + $0x2b4] sm:$0xf0]  ;;  %2141 = vmatpush.bf16.msra.mxu1 %v10208_v7  ;;  %v10375_v18 = vld [vmem:[%s17669_s2 + $0x420] sm:$0xf]  ;;  %v9967_v23 = vld [vmem:[%s17669_s2 + $0xf0] sm:$0xf] }
  0x11   :  { %2190 = vmatpush.bf16.msra.mxu2 %v10400_v8  ;;  %v10184_v17 = vor.u32 %v13436_v15, %v10183_v14  ;;  %v13484_v19 = vld [vmem:[%s17669_s2 + $0x434] sm:$0xf0]  ;;  %v10567_v20 = vld [vmem:[%s17669_s2 + $0x5a0] sm:$0xf]  ;;  %v13382_v24 = vld [vmem:[%s17669_s2 + $0x104] sm:$0xf0] }
  0x12   :  { %2239 = vmatpush.bf16.msra.mxu3 %v10592_v12  ;;  %v10376_v21 = vor.u32 %v13484_v19, %v10375_v18  ;;  %v13532_v22 = vld [vmem:[%s17669_s2 + $0x5b4] sm:$0xf0]  ;;  %v10159_v26 = vld [vmem:[%s17669_s2 + $0x270] sm:$0xf]  ;;  %v13430_v27 = vld [vmem:[%s17669_s2 + $0x284] sm:$0xf0]  ;;  %v9968_v29 = vor.u32 %v13382_v24, %v9967_v23 }
  0x13   :  { %v10568_v25 = vor.u32 %v13532_v22, %v10567_v20  ;;  %v10351_v28 = vld [vmem:[%s17669_s2 + $0x3f0] sm:$0xf]  ;;  %2093 = vmatpush.bf16.msra.mxu0 %v9992_v16  ;;  %v13478_v30 = vld [vmem:[%s17669_s2 + $0x404] sm:$0xf0]  ;;  %v10160_v33 = vor.u32 %v13430_v27, %v10159_v26  ;;  %v9943_v35 = vld [vmem:[%s17669_s2 + $0xc0] sm:$0xf] }
  0x14   :  { %v10543_v31 = vld [vmem:[%s17669_s2 + $0x570] sm:$0xf]  ;;  %v13526_v32 = vld [vmem:[%s17669_s2 + $0x584] sm:$0xf0]  ;;  %2142 = vmatpush.bf16.msra.mxu1 %v10184_v17  ;;  %v10352_v34 = vor.u32 %v13478_v30, %v10351_v28  ;;  %v13376_v36 = vld [vmem:[%s17669_s2 + $0xd4] sm:$0xf0] }
  0x15   :  { %2191 = vmatpush.bf16.msra.mxu2 %v10376_v21  ;;  %v10135_v37 = vld [vmem:[%s17669_s2 + $0x240] sm:$0xf]  ;;  %v10544_v38 = vor.u32 %v13526_v32, %v10543_v31  ;;  %v13424_v39 = vld [vmem:[%s17669_s2 + $0x254] sm:$0xf0]  ;;  %v9944_v44 = vor.u32 %v13376_v36, %v9943_v35  ;;  %v9919_v47 = vld [vmem:[%s17669_s2 + $0x90] sm:$0xf] }
  0x16   :  { %2240 = vmatpush.bf16.msra.mxu3 %v10568_v25  ;;  %v10327_v40 = vld [vmem:[%s17669_s2 + $0x3c0] sm:$0xf]  ;;  %v13472_v41 = vld [vmem:[%s17669_s2 + $0x3d4] sm:$0xf0]  ;;  %v10136_v45 = vor.u32 %v13424_v39, %v10135_v37  ;;  %v13370_v48 = vld [vmem:[%s17669_s2 + $0xa4] sm:$0xf0] }
  0x17   :  { %v10519_v42 = vld [vmem:[%s17669_s2 + $0x540] sm:$0xf]  ;;  %v13520_v43 = vld [vmem:[%s17669_s2 + $0x554] sm:$0xf0]  ;;  %2094 = vmatpush.bf16.msra.mxu0 %v9968_v29  ;;  %v10328_v46 = vor.u32 %v13472_v41, %v10327_v40  ;;  %v10111_v49 = vld [vmem:[%s17669_s2 + $0x210] sm:$0xf]  ;;  %v9920_v56 = vor.u32 %v13370_v48, %v9919_v47 }
  0x18   :  { %2143 = vmatpush.bf16.msra.mxu1 %v10160_v33  ;;  %v10520_v50 = vor.u32 %v13520_v43, %v10519_v42  ;;  %v13418_v51 = vld [vmem:[%s17669_s2 + $0x224] sm:$0xf0]  ;;  %v10303_v52 = vld [vmem:[%s17669_s2 + $0x390] sm:$0xf]  ;;  %v9895_v59 = vld [vmem:[%s17669_s2 + $0x60] sm:$0xf] }
  0x19   :  { %2192 = vmatpush.bf16.msra.mxu2 %v10352_v34  ;;  %v13466_v53 = vld [vmem:[%s17669_s2 + $0x3a4] sm:$0xf0]  ;;  %v10495_v54 = vld [vmem:[%s17669_s2 + $0x510] sm:$0xf]  ;;  %v10112_v57 = vor.u32 %v13418_v51, %v10111_v49  ;;  %v13364_v60 = vld [vmem:[%s17669_s2 + $0x74] sm:$0xf0] }
  0x1a   :  { %2241 = vmatpush.bf16.msra.mxu3 %v10544_v38  ;;  %v13514_v55 = vld [vmem:[%s17669_s2 + $0x524] sm:$0xf0]  ;;  %v10304_v58 = vor.u32 %v13466_v53, %v10303_v52  ;;  %v10087_v61 = vld [vmem:[%s17669_s2 + $0x1e0] sm:$0xf]  ;;  %v13412_v63 = vld [vmem:[%s17669_s2 + $0x1f4] sm:$0xf0]  ;;  %v9896_v4 = vor.u32 %v13364_v60, %v9895_v59 }
  0x1b   :  { %2095 = vmatpush.bf16.msra.mxu0 %v9944_v44  ;;  %v10496_v62 = vor.u32 %v13514_v55, %v10495_v54  ;;  %v10279_v0 = vld [vmem:[%s17669_s2 + $0x360] sm:$0xf]  ;;  %v13460_v1 = vld [vmem:[%s17669_s2 + $0x374] sm:$0xf0]  ;;  %v10088_v5 = vor.u32 %v13412_v63, %v10087_v61  ;;  %v9871_v7 = vld [vmem:[%s17669_s2 + $0x30] sm:$0xf] }
  0x1c   :  { %2144 = vmatpush.bf16.msra.mxu1 %v10136_v45  ;;  %v10471_v2 = vld [vmem:[%s17669_s2 + $0x4e0] sm:$0xf]  ;;  %v13508_v3 = vld [vmem:[%s17669_s2 + $0x4f4] sm:$0xf0]  ;;  %v10280_v6 = vor.u32 %v13460_v1, %v10279_v0  ;;  %v13358_v8 = vld [vmem:[%s17669_s2 + $0x44] sm:$0xf0] }
  0x1d   :  { %2193 = vmatpush.bf16.msra.mxu2 %v10328_v46  ;;  %v10063_v9 = vld [vmem:[%s17669_s2 + $0x1b0] sm:$0xf]  ;;  %v10472_v10 = vor.u32 %v13508_v3, %v10471_v2  ;;  %v13406_v11 = vld [vmem:[%s17669_s2 + $0x1c4] sm:$0xf0]  ;;  %v9872_v16 = vor.u32 %v13358_v8, %v9871_v7  ;;  %v9847_v19 = vld [vmem:[%s17669_s2] sm:$0xf] }
  0x1e   :  { %2242 = vmatpush.bf16.msra.mxu3 %v10520_v50  ;;  %v10255_v12 = vld [vmem:[%s17669_s2 + $0x330] sm:$0xf]  ;;  %v13454_v13 = vld [vmem:[%s17669_s2 + $0x344] sm:$0xf0]  ;;  %v10064_v17 = vor.u32 %v13406_v11, %v10063_v9  ;;  %v13352_v20 = vld [vmem:[%s17669_s2 + $0x14] sm:$0xf0] }
  0x1f   :  { %2096 = vmatpush.bf16.msra.mxu0 %v9920_v56  ;;  %v10447_v14 = vld [vmem:[%s17669_s2 + $0x4b0] sm:$0xf]  ;;  %v13502_v15 = vld [vmem:[%s17669_s2 + $0x4c4] sm:$0xf0]  ;;  %v10256_v18 = vor.u32 %v13454_v13, %v10255_v12  ;;  %v10039_v21 = vld [vmem:[%s17669_s2 + $0x180] sm:$0xf]  ;;  %v9848_v28 = vor.u32 %v13352_v20, %v9847_v19 }
  0x20   :  { %2145 = vmatpush.bf16.msra.mxu1 %v10112_v57  ;;  %v10448_v22 = vor.u32 %v13502_v15, %v10447_v14  ;;  %v13400_v23 = vld [vmem:[%s17669_s2 + $0x194] sm:$0xf0]  ;;  %v10231_v24 = vld [vmem:[%s17669_s2 + $0x300] sm:$0xf]  ;;  %v13301_v31 = vld [vmem:[%s17667_s0 + $0x4] sm:$0xf] }
  0x21   :  { %2194 = vmatpush.bf16.msra.mxu2 %v10304_v58  ;;  %v13448_v25 = vld [vmem:[%s17669_s2 + $0x314] sm:$0xf0]  ;;  %v10423_v26 = vld [vmem:[%s17669_s2 + $0x480] sm:$0xf]  ;;  %v10040_v32 = vor.u32 %v13400_v23, %v10039_v21  ;;  %v9657_v34 = vld [vmem:[%s17667_s0 + $0x18] sm:$0xf0] }
  0x22   :  { %2243 = vmatpush.bf16.msra.mxu3 %v10496_v62  ;;  %v13496_v27 = vld [vmem:[%s17669_s2 + $0x494] sm:$0xf0]  ;;  %v9655_v29 = vld [vmem:[%s17667_s0] sm:$0xf]  ;;  %v10232_v33 = vor.u32 %v13448_v25, %v10231_v24  ;;  %v9663_v35 = vld [vmem:[%s17667_s0 + $0x8] sm:$0xf]  ;;  %v14582_v41 = vor.u32 %v13301_v31, %v9657_v34 }
  0x23   :  { %2097 = vmatpush.bf16.msra.mxu0 %v9896_v4  ;;  %v13304_v30 = vld [vmem:[%s17667_s0 + $0x14] sm:$0xf0]  ;;  %v13305_v36 = vld [vmem:[%s17667_s0 + $0x1c] sm:$0xf0]  ;;  %v10424_v37 = vor.u32 %v13496_v27, %v10423_v26  ;;  %v13302_v38 = vld [vmem:[%s17667_s0 + $0xc] sm:$0xf] }
  0x24   :  { %2146 = vmatpush.bf16.msra.mxu1 %v10088_v5  ;;  %v9665_v39 = vld [vmem:[%s17667_s0 + $0x20] sm:$0xf0]  ;;  %v14580_v40 = vor.u32 %v13304_v30, %v9655_v29  ;;  %17836 = vst [vmem:[#allocation12_spill] sm:$0xff] %v14582_v41  ;;  %v14584_v42 = vor.u32 %v13305_v36, %v9663_v35  ;;  %v9679_v44 = vld [vmem:[%s17667_s0 + $0x30] sm:$0xf]  ;;  %vm5310_vm0 = vcmask 1041409  }
  0x25   :  { %2195 = vmatpush.bf16.msra.mxu2 %v10280_v6  ;;  %v14586_v43 = vor.u32 %v13302_v38, %v9665_v39  ;;  %v13310_v45 = vld [vmem:[%s17667_s0 + $0x44] sm:$0xf0]  ;;  %v13307_v46 = vld [vmem:[%s17667_s0 + $0x34] sm:$0xf]  ;;  %v9681_v47 = vld [vmem:[%s17667_s0 + $0x48] sm:$0xf0] }
  0x26   :  { %2244 = vmatpush.bf16.msra.mxu3 %v10472_v10  ;;  %17835 = vst [vmem:[#allocation11_spill] sm:$0xff] %v14580_v40  ;;  %v9687_v48 = vld [vmem:[%s17667_s0 + $0x38] sm:$0xf]  ;;  %v13311_v49 = vld [vmem:[%s17667_s0 + $0x4c] sm:$0xf0]  ;;  %v14616_v52 = vor.u32 %v13310_v45, %v9679_v44  ;;  %v14618_v53 = vor.u32 %v13307_v46, %v9681_v47  ;;  %vm5312_vm1 = vcmask 1042434  }
  0x27   :  { %2098 = vmatpush.bf16.msra.mxu0 %v9872_v16  ;;  %17837 = vst [vmem:[#allocation13_spill] sm:$0xff] %v14584_v42  ;;  %v13308_v50 = vld [vmem:[%s17667_s0 + $0x3c] sm:$0xf]  ;;  %v9689_v51 = vld [vmem:[%s17667_s0 + $0x50] sm:$0xf0]  ;;  %v14620_v54 = vor.u32 %v13311_v49, %v9687_v48  ;;  %vm5314_vm2 = vcmask 1043459  }
  0x28   :  { %2147 = vmatpush.bf16.msra.mxu1 %v10064_v17  ;;  %17838 = vst [vmem:[#allocation14_spill] sm:$0xff] %v14586_v43  ;;  %v14622_v55 = vor.u32 %v13308_v50, %v9689_v51  ;;  %v9703_v56 = vld [vmem:[%s17667_s0 + $0x60] sm:$0xf]  ;;  %v13316_v57 = vld [vmem:[%s17667_s0 + $0x74] sm:$0xf0]  ;;  %vm5316_vm3 = vcmask 1044484  }
  0x29   :  { %2196 = vmatpush.bf16.msra.mxu2 %v10256_v18  ;;  %17839 = vst [vmem:[#allocation15_spill] sm:$0xff] %v14616_v52  ;;  %v13313_v58 = vld [vmem:[%s17667_s0 + $0x64] sm:$0xf]  ;;  %v9705_v59 = vld [vmem:[%s17667_s0 + $0x78] sm:$0xf0]  ;;  %v14652_v0 = vor.u32 %v13316_v57, %v9703_v56  ;;  %vm5318_vm4 = vcmask 1045509  }
  0x2a   :  { %2245 = vmatpush.bf16.msra.mxu3 %v10448_v22  ;;  %17840 = vst [vmem:[#allocation16_spill] sm:$0xff] %v14618_v53  ;;  %v9711_v60 = vld [vmem:[%s17667_s0 + $0x68] sm:$0xf]  ;;  %v13317_v61 = vld [vmem:[%s17667_s0 + $0x7c] sm:$0xf0]  ;;  %v14654_v1 = vor.u32 %v13313_v58, %v9705_v59  ;;  %vm5320_vm5 = vcmask 1046534  }
  0x2b   :  { %2099 = vmatpush.bf16.msra.mxu0 %v9848_v28  ;;  %17841 = vst [vmem:[#allocation17_spill] sm:$0xff] %v14620_v54  ;;  %v13314_v62 = vld [vmem:[%s17667_s0 + $0x6c] sm:$0xf]  ;;  %v9713_v63 = vld [vmem:[%s17667_s0 + $0x80] sm:$0xf0]  ;;  %v14656_v2 = vor.u32 %v13317_v61, %v9711_v60  ;;  %vm5322_vm6 = vcmask 1047559  }
  0x2c   :  { %2148 = vmatpush.bf16.msra.mxu1 %v10040_v32  ;;  %17842 = vst [vmem:[#allocation18_spill] sm:$0xff] %v14622_v55  ;;  %v14658_v3 = vor.u32 %v13314_v62, %v9713_v63  ;;  %v9727_v4 = vld [vmem:[%s17667_s0 + $0x90] sm:$0xf]  ;;  %v13322_v5 = vld [vmem:[%s17667_s0 + $0xa4] sm:$0xf0]  ;;  %s14311_s6 = smov 768  }
  0x2d   :  { %2197 = vmatpush.bf16.msra.mxu2 %v10232_v33  ;;  %17843 = vst [vmem:[#allocation19_spill] sm:$0xff] %v14652_v0  ;;  %v13319_v6 = vld [vmem:[%s17667_s0 + $0x94] sm:$0xf]  ;;  %v9729_v7 = vld [vmem:[%s17667_s0 + $0xa8] sm:$0xf0]  ;;  %v14688_v12 = vor.u32 %v13322_v5, %v9727_v4  ;;  %s14312_s20 = smov 48  }
  0x2e   :  { %2246 = vmatpush.bf16.msra.mxu3 %v10424_v37  ;;  %2100 = vmatmul.bf16.vlgmr.msra.gmra.mxu0 %v14580_v40  ;;  %17844 = vst [vmem:[#allocation20_spill] sm:$0xff] %v14654_v1  ;;  %v9735_v8 = vld [vmem:[%s17667_s0 + $0x98] sm:$0xf]  ;;  %v13323_v9 = vld [vmem:[%s17667_s0 + $0xac] sm:$0xf0]  ;;  %v14690_v13 = vor.u32 %v13319_v6, %v9729_v7 }
  0x2f   :  { %2149 = vmatmul.bf16.vlgmr.msra.gmra.mxu1 %v14582_v41  ;;  %17845 = vst [vmem:[#allocation21_spill] sm:$0xff] %v14656_v2  ;;  %v13320_v10 = vld [vmem:[%s17667_s0 + $0x9c] sm:$0xf]  ;;  %v9737_v11 = vld [vmem:[%s17667_s0 + $0xb0] sm:$0xf0]  ;;  %v14692_v14 = vor.u32 %v13323_v9, %v9735_v8 }
  0x30   :  { %2198 = vmatmul.bf16.vlgmr.msra.gmra.mxu2 %v14584_v42  ;;  %17846 = vst [vmem:[#allocation22_spill] sm:$0xff] %v14658_v3  ;;  %v14694_v15 = vor.u32 %v13320_v10, %v9737_v11  ;;  %v9751_v16 = vld [vmem:[%s17667_s0 + $0xc0] sm:$0xf]  ;;  %v13328_v17 = vld [vmem:[%s17667_s0 + $0xd4] sm:$0xf0] }
  0x31   :  { %2247 = vmatmul.bf16.vlgmr.msra.gmra.mxu3 %v14586_v43  ;;  %17847 = vst [vmem:[#allocation23_spill] sm:$0xff] %v14688_v12  ;;  %v13325_v18 = vld [vmem:[%s17667_s0 + $0xc4] sm:$0xf]  ;;  %v9753_v19 = vld [vmem:[%s17667_s0 + $0xd8] sm:$0xf0]  ;;  %v14724_v24 = vor.u32 %v13328_v17, %v9751_v16 }
  0x32   :  { %17848 = vst [vmem:[#allocation24_spill] sm:$0xff] %v14690_v13  ;;  %v9759_v20 = vld [vmem:[%s17667_s0 + $0xc8] sm:$0xf]  ;;  %v13329_v21 = vld [vmem:[%s17667_s0 + $0xdc] sm:$0xf0]  ;;  %v14726_v25 = vor.u32 %v13325_v18, %v9753_v19 }
  0x33   :  { %17849 = vst [vmem:[#allocation25_spill] sm:$0xff] %v14692_v14  ;;  %v13326_v22 = vld [vmem:[%s17667_s0 + $0xcc] sm:$0xf]  ;;  %v9761_v23 = vld [vmem:[%s17667_s0 + $0xe0] sm:$0xf0]  ;;  %v14728_v26 = vor.u32 %v13329_v21, %v9759_v20 }
  0x34   :  { %17850 = vst [vmem:[#allocation26_spill] sm:$0xff] %v14694_v15  ;;  %v14730_v27 = vor.u32 %v13326_v22, %v9761_v23  ;;  %v10783_v28 = vld [vmem:[%s17669_s2 + $0x750] sm:$0xf]  ;;  %v13586_v29 = vld [vmem:[%s17669_s2 + $0x764] sm:$0xf0] }
  0x35   :  { %17851 = vst [vmem:[#allocation27_spill] sm:$0xff] %v14724_v24  ;;  %v10975_v30 = vld [vmem:[%s17669_s2 + $0x8d0] sm:$0xf]  ;;  %v10784_v31 = vor.u32 %v13586_v29, %v10783_v28  ;;  %v13634_v32 = vld [vmem:[%s17669_s2 + $0x8e4] sm:$0xf0] }
  0x36   :  { %17852 = vst [vmem:[#allocation28_spill] sm:$0xff] %v14726_v25  ;;  %v13391_v33 = vld [vmem:[%s17669_s2 + $0x154] sm:$0xf]  ;;  %v10017_v34 = vld [vmem:[%s17669_s2 + $0x168] sm:$0xf0]  ;;  %v10976_v35 = vor.u32 %v13634_v32, %v10975_v30 }
  0x37   :  { %v10020_v36 = vor.u32 %v13391_v33, %v10017_v34  ;;  %v13439_v37 = vld [vmem:[%s17669_s2 + $0x2d4] sm:$0xf]  ;;  %v10209_v38 = vld [vmem:[%s17669_s2 + $0x2e8] sm:$0xf0]  ;;  %v10759_v39 = vld [vmem:[%s17669_s2 + $0x720] sm:$0xf]  ;;  %2288 = vmatpush.bf16.msrb.mxu0 %v10784_v31 }
  0x38   :  { %v10212_v44 = vor.u32 %v13439_v37, %v10209_v38  ;;  %v13580_v45 = vld [vmem:[%s17669_s2 + $0x734] sm:$0xf0]  ;;  %v10951_v46 = vld [vmem:[%s17669_s2 + $0x8a0] sm:$0xf]  ;;  %2337 = vmatpush.bf16.msrb.mxu1 %v10976_v35  ;;  %v13385_v50 = vld [vmem:[%s17669_s2 + $0x124] sm:$0xf] }
  0x39   :  { %v13628_v47 = vld [vmem:[%s17669_s2 + $0x8b4] sm:$0xf0]  ;;  %2386 = vmatpush.bf16.msrb.mxu2 %v10020_v36  ;;  %v10760_v48 = vor.u32 %v13580_v45, %v10759_v39  ;;  %v9993_v51 = vld [vmem:[%s17669_s2 + $0x138] sm:$0xf0]  ;;  %v13433_v56 = vld [vmem:[%s17669_s2 + $0x2a4] sm:$0xf] }
  0x3a   :  { %v10952_v49 = vor.u32 %v13628_v47, %v10951_v46  ;;  %2435 = vmatpush.bf16.msrb.mxu3 %v10212_v44  ;;  %v9996_v57 = vor.u32 %v13385_v50, %v9993_v51  ;;  %v10185_v58 = vld [vmem:[%s17669_s2 + $0x2b8] sm:$0xf0]  ;;  %v10735_v59 = vld [vmem:[%s17669_s2 + $0x6f0] sm:$0xf]  ;;  %v13574_v60 = vld [vmem:[%s17669_s2 + $0x704] sm:$0xf0] }
  0x3b   :  { %v9775_v61 = vld [vmem:[%s17667_s0 + $0xf0] sm:$0xf]  ;;  %v13334_v62 = vld [vmem:[%s17667_s0 + $0x104] sm:$0xf0]  ;;  %v10188_v63 = vor.u32 %v13433_v56, %v10185_v58  ;;  %v13379_v6 = vld [vmem:[%s17669_s2 + $0xf4] sm:$0xf]  ;;  %2289 = vmatpush.bf16.msrb.mxu0 %v10760_v48  ;;  %v10736_v7 = vor.u32 %v13574_v60, %v10735_v59 }
  0x3c   :  { %v10927_v4 = vld [vmem:[%s17669_s2 + $0x870] sm:$0xf]  ;;  %v13622_v5 = vld [vmem:[%s17669_s2 + $0x884] sm:$0xf0]  ;;  %v9969_v8 = vld [vmem:[%s17669_s2 + $0x108] sm:$0xf0]  ;;  %2338 = vmatpush.bf16.msrb.mxu1 %v10952_v49  ;;  %v14841_v31 = vor.u32 %v13334_v62, %v9775_v61 }
  0x3d   :  { %v13427_v9 = vld [vmem:[%s17669_s2 + $0x274] sm:$0xf]  ;;  %v10161_v10 = vld [vmem:[%s17669_s2 + $0x288] sm:$0xf0]  ;;  %v9783_v17 = vld [vmem:[%s17667_s0 + $0xf8] sm:$0xf]  ;;  %2387 = vmatpush.bf16.msrb.mxu2 %v9996_v57  ;;  %v10928_v18 = vor.u32 %v13622_v5, %v10927_v4  ;;  %v9972_v19 = vor.u32 %v13379_v6, %v9969_v8 }
  0x3e   :  { %2105 = vmatmul.bf16.gmra.mxu0 %v14616_v52  ;;  %v13331_v11 = vld [vmem:[%s17667_s0 + $0xf4] sm:$0xf]  ;;  %v9777_v16 = vld [vmem:[%s17667_s0 + $0x108] sm:$0xf0]  ;;  %v13335_v20 = vld [vmem:[%s17667_s0 + $0x10c] sm:$0xf0]  ;;  %2436 = vmatpush.bf16.msrb.mxu3 %v10188_v63  ;;  %v10164_v23 = vor.u32 %v13427_v9, %v10161_v10 }
  0x3f   :  { %2154 = vmatmul.bf16.gmra.mxu1 %v14618_v53  ;;  %v13332_v21 = vld [vmem:[%s17667_s0 + $0xfc] sm:$0xf]  ;;  %v9785_v22 = vld [vmem:[%s17667_s0 + $0x110] sm:$0xf0]  ;;  %v10711_v28 = vld [vmem:[%s17669_s2 + $0x6c0] sm:$0xf]  ;;  %2290 = vmatpush.bf16.msrb.mxu0 %v10736_v7  ;;  %v14852_v35 = vor.u32 %v13331_v11, %v9777_v16  ;;  %v14854_v36 = vor.u32 %v13335_v20, %v9783_v17 }
  0x40   :  { %2203 = vmatmul.bf16.gmra.mxu2 %v14620_v54  ;;  %v13568_v29 = vld [vmem:[%s17669_s2 + $0x6d4] sm:$0xf0]  ;;  %v10903_v30 = vld [vmem:[%s17669_s2 + $0x840] sm:$0xf]  ;;  %17853 = vst [vmem:[#allocation29_spill] sm:$0xff] %v14841_v31  ;;  %2339 = vmatpush.bf16.msrb.mxu1 %v10928_v18  ;;  %v14862_v39 = vor.u32 %v13332_v21, %v9785_v22 }
  0x41   :  { %2252 = vmatmul.bf16.gmra.mxu3 %v14622_v55  ;;  %v13616_v32 = vld [vmem:[%s17669_s2 + $0x854] sm:$0xf0]  ;;  %v13373_v33 = vld [vmem:[%s17669_s2 + $0xc4] sm:$0xf]  ;;  %v9945_v34 = vld [vmem:[%s17669_s2 + $0xd8] sm:$0xf0]  ;;  %2388 = vmatpush.bf16.msrb.mxu2 %v9972_v19  ;;  %v10712_v44 = vor.u32 %v13568_v29, %v10711_v28 }
  0x42   :  { %17854 = vst [vmem:[#allocation30_spill] sm:$0xff] %v14852_v35  ;;  %v13421_v37 = vld [vmem:[%s17669_s2 + $0x244] sm:$0xf]  ;;  %v10137_v38 = vld [vmem:[%s17669_s2 + $0x258] sm:$0xf0]  ;;  %2437 = vmatpush.bf16.msrb.mxu3 %v10164_v23  ;;  %v10904_v45 = vor.u32 %v13616_v32, %v10903_v30  ;;  %v9948_v46 = vor.u32 %v13373_v33, %v9945_v34 }
  0x43   :  { %17855 = vst [vmem:[#allocation31_spill] sm:$0xff] %v14862_v39  ;;  %v10140_v47 = vor.u32 %v13421_v37, %v10137_v38  ;;  %v10687_v48 = vld [vmem:[%s17669_s2 + $0x690] sm:$0xf]  ;;  %v13562_v49 = vld [vmem:[%s17669_s2 + $0x6a4] sm:$0xf0]  ;;  %2291 = vmatpush.bf16.msrb.mxu0 %v10712_v44 }
  0x44   :  { %v10879_v50 = vld [vmem:[%s17669_s2 + $0x810] sm:$0xf]  ;;  %v10688_v51 = vor.u32 %v13562_v49, %v10687_v48  ;;  %v13610_v56 = vld [vmem:[%s17669_s2 + $0x824] sm:$0xf0]  ;;  %v13367_v57 = vld [vmem:[%s17669_s2 + $0x94] sm:$0xf]  ;;  %2340 = vmatpush.bf16.msrb.mxu1 %v10904_v45 }
  0x45   :  { %v9921_v58 = vld [vmem:[%s17669_s2 + $0xa8] sm:$0xf0]  ;;  %2389 = vmatpush.bf16.msrb.mxu2 %v9948_v46  ;;  %v10880_v59 = vor.u32 %v13610_v56, %v10879_v50  ;;  %v13415_v61 = vld [vmem:[%s17669_s2 + $0x214] sm:$0xf]  ;;  %v10663_v63 = vld [vmem:[%s17669_s2 + $0x660] sm:$0xf] }
  0x46   :  { %v9924_v60 = vor.u32 %v13367_v57, %v9921_v58  ;;  %v10113_v62 = vld [vmem:[%s17669_s2 + $0x228] sm:$0xf0]  ;;  %2438 = vmatpush.bf16.msrb.mxu3 %v10140_v47  ;;  %v13556_v5 = vld [vmem:[%s17669_s2 + $0x674] sm:$0xf0]  ;;  %v10855_v6 = vld [vmem:[%s17669_s2 + $0x7e0] sm:$0xf] }
  0x47   :  { %v10116_v4 = vor.u32 %v13415_v61, %v10113_v62  ;;  %v13604_v7 = vld [vmem:[%s17669_s2 + $0x7f4] sm:$0xf0]  ;;  %v13361_v8 = vld [vmem:[%s17669_s2 + $0x64] sm:$0xf]  ;;  %v9897_v9 = vld [vmem:[%s17669_s2 + $0x78] sm:$0xf0]  ;;  %2292 = vmatpush.bf16.msrb.mxu0 %v10688_v51  ;;  %v10664_v11 = vor.u32 %v13556_v5, %v10663_v63 }
  0x48   :  { %v13409_v10 = vld [vmem:[%s17669_s2 + $0x1e4] sm:$0xf]  ;;  %v10089_v16 = vld [vmem:[%s17669_s2 + $0x1f8] sm:$0xf0]  ;;  %v9799_v17 = vld [vmem:[%s17667_s0 + $0x120] sm:$0xf]  ;;  %2341 = vmatpush.bf16.msrb.mxu1 %v10880_v59  ;;  %v10856_v19 = vor.u32 %v13604_v7, %v10855_v6  ;;  %v9900_v20 = vor.u32 %v13361_v8, %v9897_v9 }
  0x49   :  { %v13340_v18 = vld [vmem:[%s17667_s0 + $0x134] sm:$0xf0]  ;;  %2390 = vmatpush.bf16.msrb.mxu2 %v9924_v60  ;;  %v10639_v21 = vld [vmem:[%s17669_s2 + $0x630] sm:$0xf]  ;;  %v13550_v22 = vld [vmem:[%s17669_s2 + $0x644] sm:$0xf0]  ;;  %v10092_v28 = vor.u32 %v13409_v10, %v10089_v16 }
  0x4a   :  { %v10831_v23 = vld [vmem:[%s17669_s2 + $0x7b0] sm:$0xf]  ;;  %2439 = vmatpush.bf16.msrb.mxu3 %v10116_v4  ;;  %v13598_v29 = vld [vmem:[%s17669_s2 + $0x7c4] sm:$0xf0]  ;;  %v13355_v30 = vld [vmem:[%s17669_s2 + $0x34] sm:$0xf]  ;;  %v10640_v46 = vor.u32 %v13550_v22, %v10639_v21  ;;  %v14964_v51 = vor.u32 %v13340_v18, %v9799_v17 }
  0x4b   :  { %v9873_v32 = vld [vmem:[%s17669_s2 + $0x48] sm:$0xf0]  ;;  %v13337_v33 = vld [vmem:[%s17667_s0 + $0x124] sm:$0xf]  ;;  %v13403_v34 = vld [vmem:[%s17669_s2 + $0x1b4] sm:$0xf]  ;;  %2293 = vmatpush.bf16.msrb.mxu0 %v10664_v11  ;;  %v10832_v49 = vor.u32 %v13598_v29, %v10831_v23 }
  0x4c   :  { %v10065_v37 = vld [vmem:[%s17669_s2 + $0x1c8] sm:$0xf0]  ;;  %v9801_v38 = vld [vmem:[%s17667_s0 + $0x138] sm:$0xf0]  ;;  %v9807_v44 = vld [vmem:[%s17667_s0 + $0x128] sm:$0xf]  ;;  %2342 = vmatpush.bf16.msrb.mxu1 %v10856_v19  ;;  %v9876_v50 = vor.u32 %v13355_v30, %v9873_v32 }
  0x4d   :  { %v13341_v45 = vld [vmem:[%s17667_s0 + $0x13c] sm:$0xf0]  ;;  %v13338_v47 = vld [vmem:[%s17667_s0 + $0x12c] sm:$0xf]  ;;  %v9809_v48 = vld [vmem:[%s17667_s0 + $0x140] sm:$0xf0]  ;;  %2391 = vmatpush.bf16.msrb.mxu2 %v9900_v20  ;;  %v10068_v56 = vor.u32 %v13403_v34, %v10065_v37  ;;  %v14975_v60 = vor.u32 %v13337_v33, %v9801_v38 }
  0x4e   :  { %2110 = vmatmul.bf16.gmra.mxu0 %v14652_v0  ;;  %17856 = vst [vmem:[#allocation32_spill] sm:$0xff] %v14964_v51  ;;  %2440 = vmatpush.bf16.msrb.mxu3 %v10092_v28  ;;  %v10615_v57 = vld [vmem:[%s17669_s2 + $0x600] sm:$0xf]  ;;  %v13544_v58 = vld [vmem:[%s17669_s2 + $0x614] sm:$0xf0]  ;;  %v14977_v61 = vor.u32 %v13341_v45, %v9807_v44  ;;  %v14988_v5 = vor.u32 %v13338_v47, %v9809_v48  ;;  %v14309_v33 = vmov 0  }
  0x4f   :  { %2159 = vmatmul.bf16.gmra.mxu1 %v14654_v1  ;;  %v10807_v59 = vld [vmem:[%s17669_s2 + $0x780] sm:$0xf]  ;;  %17857 = vst [vmem:[#allocation33_spill] sm:$0xff] %v14975_v60  ;;  %v13592_v62 = vld [vmem:[%s17669_s2 + $0x794] sm:$0xf0]  ;;  %2294 = vmatpush.bf16.msrb.mxu0 %v10640_v46  ;;  %v10616_v6 = vor.u32 %v13544_v58, %v10615_v57  ;;  %v3953_v38 = vld [vmem:[%s17668_s1 + $0x8] sm:$0xff] }
  0x50   :  { %2208 = vmatmul.bf16.gmra.mxu2 %v14656_v2  ;;  %17858 = vst [vmem:[#allocation34_spill] sm:$0xff] %v14977_v61  ;;  %v13349_v63 = vld [vmem:[%s17669_s2 + $0x4] sm:$0xf]  ;;  %v9849_v4 = vld [vmem:[%s17669_s2 + $0x18] sm:$0xf0]  ;;  %2343 = vmatpush.bf16.msrb.mxu1 %v10832_v49  ;;  %v10808_v9 = vor.u32 %v13592_v62, %v10807_v59 }
  0x51   :  { %2257 = vmatmul.bf16.gmra.mxu3 %v14658_v3  ;;  %17859 = vst [vmem:[#allocation35_spill] sm:$0xff] %v14988_v5  ;;  %v13397_v7 = vld [vmem:[%s17669_s2 + $0x184] sm:$0xf]  ;;  %v10041_v8 = vld [vmem:[%s17669_s2 + $0x198] sm:$0xf0]  ;;  %2392 = vmatpush.bf16.msrb.mxu2 %v9876_v50  ;;  %v9852_v10 = vor.u32 %v13349_v63, %v9849_v4 }
  0x52   :  { %2441 = vmatpush.bf16.msrb.mxu3 %v10068_v56  ;;  %v10044_v11 = vor.u32 %v13397_v7, %v10041_v8  ;;  %v9823_v16 = vld [vmem:[%s17667_s0 + $0x150] sm:$0xf]  ;;  %v13346_v17 = vld [vmem:[%s17667_s0 + $0x164] sm:$0xf0]  ;;  %v13343_v18 = vld [vmem:[%s17667_s0 + $0x154] sm:$0xf]  ;;  %14221 = vset.pattern.permute.xlu0 %v14309_v33 }
  0x53   :  { %2295 = vmatpush.bf16.msrb.mxu0 %v10616_v6  ;;  %v9825_v19 = vld [vmem:[%s17667_s0 + $0x168] sm:$0xf0]  ;;  %v9831_v20 = vld [vmem:[%s17667_s0 + $0x158] sm:$0xf]  ;;  %v13347_v21 = vld [vmem:[%s17667_s0 + $0x16c] sm:$0xf0]  ;;  %v15024_v28 = vor.u32 %v13346_v17, %v9823_v16  ;;  %14222 = vset.pattern.permute.xlu1 %v14309_v33 }
  0x54   :  { %2344 = vmatpush.bf16.msrb.mxu1 %v10808_v9  ;;  %v13344_v22 = vld [vmem:[%s17667_s0 + $0x15c] sm:$0xf]  ;;  %v9833_v23 = vld [vmem:[%s17667_s0 + $0x170] sm:$0xf0]  ;;  %v15026_v29 = vor.u32 %v13343_v18, %v9825_v19  ;;  %v15028_v30 = vor.u32 %v13347_v21, %v9831_v20  ;;  %v3952_v34 = vld [vmem:[%s17668_s1] sm:$0xff]  ;;  %14223 = vset.pattern.permute.xlu2 %v14309_v33 }
  0x55   :  { %2393 = vmatpush.bf16.msrb.mxu2 %v9852_v10  ;;  %17860 = vst [vmem:[#allocation36_spill] sm:$0xff] %v15024_v28  ;;  %v15030_v32 = vor.u32 %v13344_v22, %v9833_v23  ;;  %3970 = vperm.xlu0 %14221, %v3952_v34   ;;  %v15042_v37 = vld [vmem:[%s17670_s3] sm:$0x3f]  ;;  %v9671_v44 = vld [vmem:[%s17667_s0 + $0x10] sm:$0xf]  ;;  %v3961_v16 = vld [vmem:[%s17668_s1 + $0x48] sm:$0xff] }
  0x56   :  { %2442 = vmatpush.bf16.msrb.mxu3 %v10044_v11  ;;  %17861 = vst [vmem:[#allocation37_spill] sm:$0xff] %v15026_v29  ;;  %v13306_v45 = vld [vmem:[%s17667_s0 + $0x24] sm:$0xf0]  ;;  %v15054_v46 = vperm.slane %v15042_v37, 0  ;;  %v13303_v47 = vld [vmem:[%s17667_s0 + $0x14] sm:$0xf] }
  0x57   :  { %17862 = vst [vmem:[#allocation38_spill] sm:$0xff] %v15028_v30  ;;  %v9673_v48 = vld [vmem:[%s17667_s0 + $0x28] sm:$0xf0]  ;;  %v15062_v49 = vor.u32 %v13306_v45, %v9671_v44  ;;  %v3960_v62 = vld [vmem:[%s17668_s1 + $0x40] sm:$0xff]  ;;  %v3955_v17 = vld [vmem:[%s17668_s1 + $0x18] sm:$0xff] }
  0x58   :  { %17863 = vst [vmem:[#allocation39_spill] sm:$0xff] %v15030_v32  ;;  %v15064_v56 = vor.u32 %v13303_v47, %v9673_v48  ;;  %4010 = vperm.xlu1 %14222, %v3960_v62   ;;  %v9695_v18 = vld [vmem:[%s17667_s0 + $0x40] sm:$0xf]  ;;  %v13312_v19 = vld [vmem:[%s17667_s0 + $0x54] sm:$0xf0] }
  0x59   :  { %17864 = vst [vmem:[#allocation40_spill] sm:$0xff] %v15062_v49  ;;  %v13309_v20 = vld [vmem:[%s17667_s0 + $0x44] sm:$0xf]  ;;  %v9697_v21 = vld [vmem:[%s17667_s0 + $0x58] sm:$0xf0]  ;;  %v15095_v23 = vor.u32 %v13312_v19, %v9695_v18 }
  0x5a   :  { %17865 = vst [vmem:[#allocation41_spill] sm:$0xff] %v15064_v56  ;;  %v15097_v44 = vor.u32 %v13309_v20, %v9697_v21  ;;  %v13318_v18 = vld [vmem:[%s17667_s0 + $0x84] sm:$0xf0]  ;;  %v13315_v19 = vld [vmem:[%s17667_s0 + $0x74] sm:$0xf] }
  0x5b   :  { %17866 = vst [vmem:[#allocation42_spill] sm:$0xff] %v15095_v23  ;;  %v9721_v20 = vld [vmem:[%s17667_s0 + $0x88] sm:$0xf0] }
  0x5c   :  { %17867 = vst [vmem:[#allocation43_spill] sm:$0xff] %v15097_v44 }
  0x5d   :  { %3975 = vperm.xlu0 %14221, %v3953_v38  }
  0x5e   :  { %2115 = vmatmul.bf16.gmra.mxu0 %v14688_v12 }
  0x5f   :  { %2164 = vmatmul.bf16.gmra.mxu1 %v14690_v13 }
  0x60   :  { %2213 = vmatmul.bf16.gmra.mxu2 %v14692_v14  ;;  %4015 = vperm.xlu1 %14222, %v3961_v16   ;;  %v3964_v16 = vld [vmem:[%s17668_s1 + $0x60] sm:$0xff] }
  0x61   :  { %2262 = vmatmul.bf16.gmra.mxu3 %v14694_v15 }
  0x65   :  { %3985 = vperm.xlu0 %14221, %v3955_v17   ;;  %v9719_v17 = vld [vmem:[%s17667_s0 + $0x70] sm:$0xf] }
  0x6d   :  { %4030 = vperm.xlu0 %14221, %v3964_v16  }
  0x6e   :  { %2120 = vmatmul.bf16.gmra.mxu0 %v14724_v24 }
  0x6f   :  { %2169 = vmatmul.bf16.gmra.mxu1 %v14726_v25 }
  0x70   :  { %2218 = vmatmul.bf16.gmra.mxu2 %v14728_v26 }
  0x71   :  { %2267 = vmatmul.bf16.gmra.mxu3 %v14730_v27 }
  0x7e   :  { %2125 = vmatmul.bf16.gmra.mxu0 %v14841_v31 }
  0x7f   :  { %2174 = vmatmul.bf16.gmra.mxu1 %v14852_v35 }
  0x80   :  { %2223 = vmatmul.bf16.gmra.mxu2 %v14854_v36 }
  0x81   :  { %2272 = vmatmul.bf16.gmra.mxu3 %v14862_v39 }
  0x8e   :  { %2130 = vmatmul.bf16.gmra.mxu0 %v14964_v51 }
  0x8f   :  { %2179 = vmatmul.bf16.gmra.mxu1 %v14975_v60 }
  0x90   :  { %2228 = vmatmul.bf16.gmra.mxu2 %v14977_v61 }
  0x91   :  { %2277 = vmatmul.bf16.gmra.mxu3 %v14988_v5 }
  0x9e   :  { %2135 = vmatmul.bf16.gmra.mxu0 %v15024_v28 }
  0x9f   :  { %2184 = vmatmul.bf16.gmra.mxu1 %v15026_v29 }
  0xa0   :  { %2233 = vmatmul.bf16.gmra.mxu2 %v15028_v30 }
  0xa1   :  { %2282 = vmatmul.bf16.gmra.mxu3 %v15030_v32 }
  0xab   :  { %v2101_v50 = vpop.f32.mrf.mxu0 }
  0xac   :  { %v2102_v57 = vadd.f32 %v2101_v50, %v15054_v46  ;;  %v2150_v58 = vpop.f32.mrf.mxu1 }
  0xae   :  { %v2151_v59 = vadd.f32 %v2150_v58, %v2102_v57  ;;  %2296 = vmatmul.bf16.vlgmr.msrb.gmra.mxu0 %v15062_v49  ;;  %v3963_v57 = vld [vmem:[%s17668_s1 + $0x58] sm:$0xff] }
  0xaf   :  { %2345 = vmatmul.bf16.vlgmr.msrb.gmra.mxu1 %v15064_v56  ;;  %4025 = vperm.xlu1 %14222, %v3963_v57  }
  0xb0   :  { %2394 = vmatmul.bf16.vlgmr.msrb.gmra.mxu2 %v14580_v40 }
  0xb1   :  { %2443 = vmatmul.bf16.vlgmr.msrb.gmra.mxu3 %v14582_v41 }
  0xb3   :  { %v2199_v63 = vpop.f32.mrf.mxu2  ;;  %v2103_v7 = vpop.f32.mrf.mxu0 }
  0xb4   :  { %v2200_v4 = vadd.f32 %v2199_v63, %v2151_v59  ;;  %v2248_v6 = vpop.f32.mrf.mxu3  ;;  %v2104_v8 = vadd.f32 %v2103_v7, %v15054_v46  ;;  %v2152_v9 = vpop.f32.mrf.mxu1 }
  0xb6   :  { %v15075_v10 = vadd.f32 %v2248_v6, %v2200_v4  ;;  %v2153_v11 = vadd.f32 %v2152_v9, %v2104_v8  ;;  %v3957_v9 = vld [vmem:[%s17668_s1 + $0x28] sm:$0xff] }
  0xb7   :  { %3995 = vperm.xlu1 %14222, %v3957_v9  }
  0xbb   :  { %v2201_v22 = vpop.f32.mrf.mxu2  ;;  %v2106_v38 = vpop.f32.mrf.mxu0 }
  0xbc   :  { %v2202_v33 = vadd.f32 %v2201_v22, %v2153_v11  ;;  %v2250_v34 = vpop.f32.mrf.mxu3  ;;  %v2107_v45 = vadd.f32 %v2106_v38, %v15054_v46  ;;  %v2155_v47 = vpop.f32.mrf.mxu1  ;;  %v3954_v11 = vld [vmem:[%s17668_s1 + $0x10] sm:$0xff]  ;;  %v15133_v22 = vor.u32 %v13318_v18, %v9719_v17  ;;  %v3956_v18 = vld [vmem:[%s17668_s1 + $0x20] sm:$0xff] }
  0xbd   :  { %3980 = vperm.xlu2 %14223, %v3954_v11  }
  0xbe   :  { %v15100_v48 = vadd.f32 %v2250_v34, %v2202_v33  ;;  %v2156_v50 = vadd.f32 %v2155_v47, %v2107_v45  ;;  %2301 = vmatmul.bf16.gmra.mxu0 %v15095_v23  ;;  %17868 = vst [vmem:[#allocation44_spill] sm:$0xff] %v15133_v22  ;;  %v15135_v45 = vor.u32 %v13315_v19, %v9721_v20  ;;  %v9743_v19 = vld [vmem:[%s17667_s0 + $0xa0] sm:$0xf]  ;;  %v13324_v20 = vld [vmem:[%s17667_s0 + $0xb4] sm:$0xf0] }
  0xbf   :  { %2350 = vmatmul.bf16.gmra.mxu1 %v15097_v44 }
  0xc0   :  { %2399 = vmatmul.bf16.gmra.mxu2 %v14616_v52  ;;  %17869 = vst [vmem:[#allocation45_spill] sm:$0xff] %v15135_v45 }
  0xc1   :  { %2448 = vmatmul.bf16.gmra.mxu3 %v14618_v53 }
  0xc3   :  { %v2204_v58 = vpop.f32.mrf.mxu2  ;;  %v2108_v63 = vpop.f32.mrf.mxu0 }
  0xc4   :  { %v2205_v59 = vadd.f32 %v2204_v58, %v2156_v50  ;;  %v2253_v62 = vpop.f32.mrf.mxu3  ;;  %v2109_v4 = vadd.f32 %v2108_v63, %v15054_v46  ;;  %v2157_v6 = vpop.f32.mrf.mxu1 }
  0xc6   :  { %v15110_v7 = vadd.f32 %v2253_v62, %v2205_v59  ;;  %v2158_v8 = vadd.f32 %v2157_v6, %v2109_v4  ;;  %v3962_v59 = vld [vmem:[%s17668_s1 + $0x50] sm:$0xff] }
  0xc7   :  { %v3958_v62 = vld [vmem:[%s17668_s1 + $0x30] sm:$0xff]  ;;  %4020 = vperm.xlu2 %14223, %v3962_v59  }
  0xc8   :  { %4000 = vperm.xlu0 %14221, %v3958_v62  }
  0xcb   :  { %v2206_v21 = vpop.f32.mrf.mxu2  ;;  %v2111_v38 = vpop.f32.mrf.mxu0 }
  0xcc   :  { %v2207_v33 = vadd.f32 %v2206_v21, %v2158_v8  ;;  %v2255_v34 = vpop.f32.mrf.mxu3  ;;  %v2112_v47 = vadd.f32 %v2111_v38, %v15054_v46  ;;  %v2160_v50 = vpop.f32.mrf.mxu1  ;;  %v13321_v21 = vld [vmem:[%s17667_s0 + $0xa4] sm:$0xf]  ;;  %v15168_v38 = vor.u32 %v13324_v20, %v9743_v19 }
  0xce   :  { %v15138_v57 = vadd.f32 %v2255_v34, %v2207_v33  ;;  %v2161_v58 = vadd.f32 %v2160_v50, %v2112_v47  ;;  %2306 = vmatmul.bf16.gmra.mxu0 %v15133_v22  ;;  %v9745_v33 = vld [vmem:[%s17667_s0 + $0xb8] sm:$0xf0]  ;;  %17870 = vst [vmem:[#allocation46_spill] sm:$0xff] %v15168_v38 }
  0xcf   :  { %2355 = vmatmul.bf16.gmra.mxu1 %v15135_v45  ;;  %3990 = vperm.xlu2 %14223, %v3956_v18   ;;  %v15170_v59 = vor.u32 %v13321_v21, %v9745_v33  ;;  %v3965_v33 = vld [vmem:[%s17668_s1 + $0x68] sm:$0xff] }
  0xd0   :  { %2404 = vmatmul.bf16.gmra.mxu2 %v14652_v0 }
  0xd1   :  { %2453 = vmatmul.bf16.gmra.mxu3 %v14654_v1  ;;  %17871 = vst [vmem:[#allocation47_spill] sm:$0xff] %v15170_v59  ;;  %v9791_v1 = vld [vmem:[%s17667_s0 + $0x100] sm:$0xf] }
  0xd3   :  { %v2209_v63 = vpop.f32.mrf.mxu2  ;;  %v2113_v8 = vpop.f32.mrf.mxu0 }
  0xd4   :  { %v2210_v4 = vadd.f32 %v2209_v63, %v2161_v58  ;;  %v2258_v6 = vpop.f32.mrf.mxu3  ;;  %v2114_v9 = vadd.f32 %v2113_v8, %v15054_v46  ;;  %v2162_v11 = vpop.f32.mrf.mxu1 }
  0xd6   :  { %v15151_v16 = vadd.f32 %v2258_v6, %v2210_v4  ;;  %v2163_v17 = vadd.f32 %v2162_v11, %v2114_v9 }
  0xd7   :  { %4035 = vperm.xlu2 %14223, %v3965_v33  }
  0xdb   :  { %v2211_v34 = vpop.f32.mrf.mxu2  ;;  %v2116_v58 = vpop.f32.mrf.mxu0 }
  0xdc   :  { %v2212_v47 = vadd.f32 %v2211_v34, %v2163_v17  ;;  %v2260_v50 = vpop.f32.mrf.mxu3  ;;  %v2117_v62 = vadd.f32 %v2116_v58, %v15054_v46  ;;  %v2165_v63 = vpop.f32.mrf.mxu1  ;;  %v9767_v34 = vld [vmem:[%s17667_s0 + $0xd0] sm:$0xf]  ;;  %v9769_v58 = vld [vmem:[%s17667_s0 + $0xe8] sm:$0xf0] }
  0xde   :  { %v15173_v4 = vadd.f32 %v2260_v50, %v2212_v47  ;;  %v2166_v6 = vadd.f32 %v2165_v63, %v2117_v62  ;;  %2311 = vmatmul.bf16.gmra.mxu0 %v15168_v38  ;;  %v13330_v47 = vld [vmem:[%s17667_s0 + $0xe4] sm:$0xf0]  ;;  %v13327_v50 = vld [vmem:[%s17667_s0 + $0xd4] sm:$0xf] }
  0xdf   :  { %2360 = vmatmul.bf16.gmra.mxu1 %v15170_v59  ;;  %v15197_v63 = vor.u32 %v13330_v47, %v9767_v34  ;;  %v13535_v47 = vld [vmem:[%s17669_s2 + $0x5d4] sm:$0xf] }
  0xe0   :  { %2409 = vmatmul.bf16.gmra.mxu2 %v14688_v12 }
  0xe1   :  { %2458 = vmatmul.bf16.gmra.mxu3 %v14690_v13  ;;  %17872 = vst [vmem:[#allocation48_spill] sm:$0xff] %v15197_v63  ;;  %v13487_v13 = vld [vmem:[%s17669_s2 + $0x454] sm:$0xf] }
  0xe3   :  { %v2214_v8 = vpop.f32.mrf.mxu2  ;;  %v2118_v17 = vpop.f32.mrf.mxu0 }
  0xe4   :  { %v2215_v9 = vadd.f32 %v2214_v8, %v2166_v6  ;;  %v2263_v11 = vpop.f32.mrf.mxu3  ;;  %v2119_v18 = vadd.f32 %v2118_v17, %v15054_v46  ;;  %v2167_v19 = vpop.f32.mrf.mxu1 }
  0xe6   :  { %v15180_v20 = vadd.f32 %v2263_v11, %v2215_v9  ;;  %v2168_v21 = vadd.f32 %v2167_v19, %v2119_v18  ;;  %v15199_v11 = vor.u32 %v13327_v50, %v9769_v58  ;;  %v10593_v50 = vld [vmem:[%s17669_s2 + $0x5e8] sm:$0xf0]  ;;  %v13583_v58 = vld [vmem:[%s17669_s2 + $0x754] sm:$0xf] }
  0xe8   :  { %17873 = vst [vmem:[#allocation49_spill] sm:$0xff] %v15199_v11 }
  0xeb   :  { %v2216_v62 = vpop.f32.mrf.mxu2  ;;  %v2121_v9 = vpop.f32.mrf.mxu0 }
  0xec   :  { %v2217_v6 = vadd.f32 %v2216_v62, %v2168_v21  ;;  %v2265_v8 = vpop.f32.mrf.mxu3  ;;  %v2122_v17 = vadd.f32 %v2121_v9, %v15054_v46  ;;  %v2170_v18 = vpop.f32.mrf.mxu1  ;;  %v10401_v21 = vld [vmem:[%s17669_s2 + $0x468] sm:$0xf0]  ;;  %v3959_v62 = vld [vmem:[%s17668_s1 + $0x38] sm:$0xff] }
  0xed   :  { %v10404_v34 = vor.u32 %v13487_v13, %v10401_v21  ;;  %v10785_v13 = vld [vmem:[%s17669_s2 + $0x768] sm:$0xf0]  ;;  %4005 = vperm.xlu2 %14223, %v3959_v62  }
  0xee   :  { %v15202_v19 = vadd.f32 %v2265_v8, %v2217_v6  ;;  %v2171_v33 = vadd.f32 %v2170_v18, %v2122_v17  ;;  %2316 = vmatmul.bf16.gmra.mxu0 %v15197_v63  ;;  %v10596_v6 = vor.u32 %v13535_v47, %v10593_v50  ;;  %v13631_v8 = vld [vmem:[%s17669_s2 + $0x8d4] sm:$0xf]  ;;  %v10788_v9 = vor.u32 %v13583_v58, %v10785_v13  ;;  %v10977_v17 = vld [vmem:[%s17669_s2 + $0x8e8] sm:$0xf0]  ;;  %v13481_v47 = vld [vmem:[%s17669_s2 + $0x424] sm:$0xf] }
  0xef   :  { %2365 = vmatmul.bf16.gmra.mxu1 %v15199_v11  ;;  %2484 = vmatpush.bf16.msra.mxu0 %v10404_v34  ;;  %v10980_v21 = vor.u32 %v13631_v8, %v10977_v17  ;;  %v10377_v50 = vld [vmem:[%s17669_s2 + $0x438] sm:$0xf0]  ;;  %v13529_v34 = vld [vmem:[%s17669_s2 + $0x5a4] sm:$0xf] }
  0xf0   :  { %2414 = vmatmul.bf16.gmra.mxu2 %v14724_v24  ;;  %2533 = vmatpush.bf16.msra.mxu1 %v10596_v6  ;;  %v10569_v6 = vld [vmem:[%s17669_s2 + $0x5b8] sm:$0xf0]  ;;  %v13577_v8 = vld [vmem:[%s17669_s2 + $0x724] sm:$0xf] }
  0xf1   :  { %2463 = vmatmul.bf16.gmra.mxu3 %v14726_v25  ;;  %2582 = vmatpush.bf16.msra.mxu2 %v10788_v9  ;;  %v10380_v25 = vor.u32 %v13481_v47, %v10377_v50  ;;  %v10761_v17 = vld [vmem:[%s17669_s2 + $0x738] sm:$0xf0]  ;;  %v13625_v9 = vld [vmem:[%s17669_s2 + $0x8a4] sm:$0xf] }
  0xf2   :  { %2631 = vmatpush.bf16.msra.mxu3 %v10980_v21  ;;  %v10953_v47 = vld [vmem:[%s17669_s2 + $0x8b8] sm:$0xf0]  ;;  %v13336_v21 = vld [vmem:[%s17667_s0 + $0x114] sm:$0xf0] }
  0xf3   :  { %v2219_v18 = vpop.f32.mrf.mxu2  ;;  %v2123_v13 = vpop.f32.mrf.mxu0  ;;  %2485 = vmatpush.bf16.msra.mxu0 %v10380_v25  ;;  %v15298_v53 = vor.u32 %v13336_v21, %v9791_v1  ;;  %v10521_v21 = vld [vmem:[%s17669_s2 + $0x558] sm:$0xf0] }
  0xf4   :  { %v2220_v58 = vadd.f32 %v2219_v18, %v2171_v33  ;;  %v2268_v62 = vpop.f32.mrf.mxu3  ;;  %v2124_v24 = vadd.f32 %v2123_v13, %v15054_v46  ;;  %v2172_v12 = vpop.f32.mrf.mxu1  ;;  %v10572_v33 = vor.u32 %v13529_v34, %v10569_v6  ;;  %v10764_v18 = vor.u32 %v13577_v8, %v10761_v17  ;;  %v13333_v6 = vld [vmem:[%s17667_s0 + $0x104] sm:$0xf]  ;;  %v13523_v8 = vld [vmem:[%s17669_s2 + $0x574] sm:$0xf]  ;;  %v10737_v17 = vld [vmem:[%s17669_s2 + $0x708] sm:$0xf0] }
  0xf5   :  { %v10956_v34 = vor.u32 %v13625_v9, %v10953_v47  ;;  %v13619_v47 = vld [vmem:[%s17669_s2 + $0x874] sm:$0xf]  ;;  %17874 = vst [vmem:[#allocation50_spill] sm:$0xff] %v15298_v53 }
  0xf6   :  { %v15260_v50 = vadd.f32 %v2268_v62, %v2220_v58  ;;  %v2173_v13 = vadd.f32 %v2172_v12, %v2124_v24  ;;  %2534 = vmatpush.bf16.msra.mxu1 %v10572_v33  ;;  %v13475_v58 = vld [vmem:[%s17669_s2 + $0x3f4] sm:$0xf]  ;;  %v10353_v62 = vld [vmem:[%s17669_s2 + $0x408] sm:$0xf0]  ;;  %2583 = vmatpush.bf16.msra.mxu2 %v10764_v18  ;;  %v9793_v33 = vld [vmem:[%s17667_s0 + $0x118] sm:$0xf0] }
  0xf7   :  { %v10356_v25 = vor.u32 %v13475_v58, %v10353_v62  ;;  %v10545_v12 = vld [vmem:[%s17669_s2 + $0x588] sm:$0xf0]  ;;  %v13571_v24 = vld [vmem:[%s17669_s2 + $0x6f4] sm:$0xf]  ;;  %2632 = vmatpush.bf16.msra.mxu3 %v10956_v34  ;;  %v13469_v34 = vld [vmem:[%s17669_s2 + $0x3c4] sm:$0xf] }
  0xf8   :  { %v10548_v9 = vor.u32 %v13523_v8, %v10545_v12  ;;  %v10740_v18 = vor.u32 %v13571_v24, %v10737_v17  ;;  %v10929_v58 = vld [vmem:[%s17669_s2 + $0x888] sm:$0xf0]  ;;  %v10329_v8 = vld [vmem:[%s17669_s2 + $0x3d8] sm:$0xf0]  ;;  %v13517_v12 = vld [vmem:[%s17669_s2 + $0x544] sm:$0xf] }
  0xf9   :  { %2486 = vmatpush.bf16.msra.mxu0 %v10356_v25  ;;  %v10932_v62 = vor.u32 %v13619_v47, %v10929_v58  ;;  %v15309_v47 = vor.u32 %v13333_v6, %v9793_v33  ;;  %v10332_v1 = vor.u32 %v13469_v34, %v10329_v8  ;;  %v10713_v58 = vld [vmem:[%s17669_s2 + $0x6d8] sm:$0xf0]  ;;  %v10524_v6 = vor.u32 %v13517_v12, %v10521_v21  ;;  %v10305_v12 = vld [vmem:[%s17669_s2 + $0x3a8] sm:$0xf0] }
  0xfa   :  { %2535 = vmatpush.bf16.msra.mxu1 %v10548_v9  ;;  %2584 = vmatpush.bf16.msra.mxu2 %v10740_v18  ;;  %v13565_v9 = vld [vmem:[%s17669_s2 + $0x6c4] sm:$0xf]  ;;  %v10905_v34 = vld [vmem:[%s17669_s2 + $0x858] sm:$0xf0] }
  0xfb   :  { %v2221_v0 = vpop.f32.mrf.mxu2  ;;  %v2126_v25 = vpop.f32.mrf.mxu0  ;;  %17875 = vst [vmem:[#allocation51_spill] sm:$0xff] %v15309_v47  ;;  %2633 = vmatpush.bf16.msra.mxu3 %v10932_v62  ;;  %v10716_v33 = vor.u32 %v13565_v9, %v10713_v58  ;;  %v13613_v18 = vld [vmem:[%s17669_s2 + $0x844] sm:$0xf]  ;;  %v13463_v62 = vld [vmem:[%s17669_s2 + $0x394] sm:$0xf] }
  0xfc   :  { %v2222_v24 = vadd.f32 %v2221_v0, %v2173_v13  ;;  %v2270_v17 = vpop.f32.mrf.mxu3  ;;  %v2127_v0 = vadd.f32 %v2126_v25, %v15054_v46  ;;  %v2175_v13 = vpop.f32.mrf.mxu1  ;;  %v10908_v52 = vor.u32 %v13613_v18, %v10905_v34  ;;  %v10497_v25 = vld [vmem:[%s17669_s2 + $0x528] sm:$0xf0]  ;;  %v13607_v58 = vld [vmem:[%s17669_s2 + $0x814] sm:$0xf]  ;;  %v10281_v34 = vld [vmem:[%s17669_s2 + $0x378] sm:$0xf0] }
  0xfd   :  { %2487 = vmatpush.bf16.msra.mxu0 %v10332_v1  ;;  %v13559_v1 = vld [vmem:[%s17669_s2 + $0x694] sm:$0xf]  ;;  %v10689_v9 = vld [vmem:[%s17669_s2 + $0x6a8] sm:$0xf0] }
  0xfe   :  { %v15327_v8 = vadd.f32 %v2270_v17, %v2222_v24  ;;  %v2176_v41 = vadd.f32 %v2175_v13, %v2127_v0  ;;  %2321 = vmatmul.bf16.gmra.mxu0 %v15298_v53  ;;  %2536 = vmatpush.bf16.msra.mxu1 %v10524_v6  ;;  %v10308_v24 = vor.u32 %v13463_v62, %v10305_v12  ;;  %v13511_v17 = vld [vmem:[%s17669_s2 + $0x514] sm:$0xf]  ;;  %v10881_v0 = vld [vmem:[%s17669_s2 + $0x828] sm:$0xf0]  ;;  %v13505_v62 = vld [vmem:[%s17669_s2 + $0x4e4] sm:$0xf] }
  0xff   :  { %2370 = vmatmul.bf16.gmra.mxu1 %v15309_v47  ;;  %2585 = vmatpush.bf16.msra.mxu2 %v10716_v33  ;;  %v10500_v21 = vor.u32 %v13511_v17, %v10497_v25  ;;  %v10692_v13 = vor.u32 %v13559_v1, %v10689_v9  ;;  %v10884_v6 = vor.u32 %v13607_v58, %v10881_v0  ;;  %v13457_v33 = vld [vmem:[%s17669_s2 + $0x364] sm:$0xf]  ;;  %v10473_v25 = vld [vmem:[%s17669_s2 + $0x4f8] sm:$0xf0] }
 0x100   :  { %2419 = vmatmul.bf16.gmra.mxu2 %v14841_v31  ;;  %2634 = vmatpush.bf16.msra.mxu3 %v10908_v52  ;;  %v13553_v1 = vld [vmem:[%s17669_s2 + $0x664] sm:$0xf] }
 0x101   :  { %2468 = vmatmul.bf16.gmra.mxu3 %v14852_v35  ;;  %2488 = vmatpush.bf16.msra.mxu0 %v10308_v24  ;;  %v10284_v24 = vor.u32 %v13457_v33, %v10281_v34  ;;  %v10857_v33 = vld [vmem:[%s17669_s2 + $0x7f8] sm:$0xf0]  ;;  %v9815_v35 = vld [vmem:[%s17667_s0 + $0x130] sm:$0xf] }
 0x102   :  { %2537 = vmatpush.bf16.msra.mxu1 %v10500_v21  ;;  %v10665_v21 = vld [vmem:[%s17669_s2 + $0x678] sm:$0xf0] }
 0x103   :  { %v2224_v18 = vpop.f32.mrf.mxu2  ;;  %v2128_v52 = vpop.f32.mrf.mxu0  ;;  %2586 = vmatpush.bf16.msra.mxu2 %v10692_v13  ;;  %v10668_v0 = vor.u32 %v13553_v1, %v10665_v21  ;;  %v13342_v13 = vld [vmem:[%s17667_s0 + $0x144] sm:$0xf0]  ;;  %v10449_v1 = vld [vmem:[%s17669_s2 + $0x4c8] sm:$0xf0]  ;;  %v13547_v21 = vld [vmem:[%s17669_s2 + $0x634] sm:$0xf] }
 0x104   :  { %v2225_v12 = vadd.f32 %v2224_v18, %v2176_v41  ;;  %v2273_v17 = vpop.f32.mrf.mxu3  ;;  %v2129_v9 = vadd.f32 %v2128_v52, %v15054_v46  ;;  %v2177_v58 = vpop.f32.mrf.mxu1  ;;  %v10476_v41 = vor.u32 %v13505_v62, %v10473_v25  ;;  %v13601_v18 = vld [vmem:[%s17669_s2 + $0x7e4] sm:$0xf]  ;;  %2635 = vmatpush.bf16.msra.mxu3 %v10884_v6  ;;  %v13339_v25 = vld [vmem:[%s17667_s0 + $0x134] sm:$0xf]  ;;  %v15420_v40 = vor.u32 %v13342_v13, %v9815_v35  ;;  %v10425_v13 = vld [vmem:[%s17669_s2 + $0x498] sm:$0xf0] }
 0x105   :  { %2489 = vmatpush.bf16.msra.mxu0 %v10284_v24  ;;  %v10860_v62 = vor.u32 %v13601_v18, %v10857_v33  ;;  %v13499_v6 = vld [vmem:[%s17669_s2 + $0x4b4] sm:$0xf] }
 0x106   :  { %v15382_v34 = vadd.f32 %v2273_v17, %v2225_v12  ;;  %v2178_v52 = vadd.f32 %v2177_v58, %v2129_v9  ;;  %2538 = vmatpush.bf16.msra.mxu1 %v10476_v41  ;;  %v13451_v12 = vld [vmem:[%s17669_s2 + $0x334] sm:$0xf]  ;;  %v10257_v17 = vld [vmem:[%s17669_s2 + $0x348] sm:$0xf0]  ;;  %v10452_v41 = vor.u32 %v13499_v6, %v10449_v1  ;;  %17876 = vst [vmem:[#allocation52_spill] sm:$0xff] %v15420_v40 }
 0x107   :  { %v10260_v24 = vor.u32 %v13451_v12, %v10257_v17  ;;  %v10641_v9 = vld [vmem:[%s17669_s2 + $0x648] sm:$0xf0]  ;;  %2587 = vmatpush.bf16.msra.mxu2 %v10668_v0  ;;  %v13595_v33 = vld [vmem:[%s17669_s2 + $0x7b4] sm:$0xf]  ;;  %v13445_v0 = vld [vmem:[%s17669_s2 + $0x304] sm:$0xf] }
 0x108   :  { %v9817_v58 = vld [vmem:[%s17667_s0 + $0x148] sm:$0xf0]  ;;  %v10644_v18 = vor.u32 %v13547_v21, %v10641_v9  ;;  %2636 = vmatpush.bf16.msra.mxu3 %v10860_v62  ;;  %v10233_v6 = vld [vmem:[%s17669_s2 + $0x318] sm:$0xf0]  ;;  %v13493_v1 = vld [vmem:[%s17669_s2 + $0x484] sm:$0xf] }
 0x109   :  { %v10833_v12 = vld [vmem:[%s17669_s2 + $0x7c8] sm:$0xf0]  ;;  %2490 = vmatpush.bf16.msra.mxu0 %v10260_v24  ;;  %v15431_v9 = vor.u32 %v13339_v25, %v9817_v58  ;;  %v10236_v35 = vor.u32 %v13445_v0, %v10233_v6  ;;  %v13589_v58 = vld [vmem:[%s17669_s2 + $0x784] sm:$0xf]  ;;  %v10809_v0 = vld [vmem:[%s17669_s2 + $0x798] sm:$0xf0] }
 0x10a   :  { %v10836_v17 = vor.u32 %v13595_v33, %v10833_v12  ;;  %2539 = vmatpush.bf16.msra.mxu1 %v10452_v41  ;;  %v13541_v41 = vld [vmem:[%s17669_s2 + $0x604] sm:$0xf]  ;;  %v10617_v33 = vld [vmem:[%s17669_s2 + $0x618] sm:$0xf0]  ;;  %v10812_v32 = vor.u32 %v13589_v58, %v10809_v0 }
 0x10b   :  { %v2226_v31 = vpop.f32.mrf.mxu2  ;;  %v2131_v24 = vpop.f32.mrf.mxu0  ;;  %17877 = vst [vmem:[#allocation53_spill] sm:$0xff] %v15431_v9  ;;  %2588 = vmatpush.bf16.msra.mxu2 %v10644_v18  ;;  %v10620_v25 = vor.u32 %v13541_v41, %v10617_v33  ;;  %v3966_v18 = vld [vmem:[%s17668_s1 + $0x70] sm:$0xff]  ;;  %v9839_v33 = vld [vmem:[%s17667_s0 + $0x160] sm:$0xf] }
 0x10c   :  { %v2227_v21 = vadd.f32 %v2226_v31, %v2178_v52  ;;  %v2275_v62 = vpop.f32.mrf.mxu3  ;;  %v2132_v12 = vadd.f32 %v2131_v24, %v15054_v46  ;;  %v2180_v31 = vpop.f32.mrf.mxu1  ;;  %v10428_v52 = vor.u32 %v13493_v1, %v10425_v13  ;;  %2637 = vmatpush.bf16.msra.mxu3 %v10836_v17  ;;  %4040 = vperm.xlu1 %14222, %v3966_v18  }
 0x10d   :  { %2491 = vmatpush.bf16.msra.mxu0 %v10236_v35 }
 0x10e   :  { %v15449_v6 = vadd.f32 %v2275_v62, %v2227_v21  ;;  %v2181_v30 = vadd.f32 %v2180_v31, %v2132_v12  ;;  %2326 = vmatmul.bf16.gmra.mxu0 %v15420_v40  ;;  %2540 = vmatpush.bf16.msra.mxu1 %v10428_v52  ;;  %v13348_v12 = vld [vmem:[%s17667_s0 + $0x174] sm:$0xf0] }
 0x10f   :  { %2375 = vmatmul.bf16.gmra.mxu1 %v15431_v9  ;;  %2589 = vmatpush.bf16.msra.mxu2 %v10620_v25  ;;  %v3967_v31 = vld [vmem:[%s17668_s1 + $0x78] sm:$0xff]  ;;  %v15476_v25 = vor.u32 %v13348_v12, %v9839_v33 }
 0x110   :  { %2424 = vmatmul.bf16.gmra.mxu2 %v14964_v51  ;;  %2638 = vmatpush.bf16.msra.mxu3 %v10812_v32  ;;  %v9841_v32 = vld [vmem:[%s17667_s0 + $0x178] sm:$0xf0] }
 0x111   :  { %2473 = vmatmul.bf16.gmra.mxu3 %v14975_v60  ;;  %4045 = vperm.xlu0 %14221, %v3967_v31   ;;  %17878 = vst [vmem:[#allocation54_spill] sm:$0xff] %v15476_v25 }
 0x113   :  { %v2229_v17 = vpop.f32.mrf.mxu2  ;;  %v2133_v62 = vpop.f32.mrf.mxu0 }
 0x114   :  { %v2230_v1 = vadd.f32 %v2229_v17, %v2181_v30  ;;  %v2278_v21 = vpop.f32.mrf.mxu3  ;;  %v2134_v24 = vadd.f32 %v2133_v62, %v15054_v46  ;;  %v2182_v35 = vpop.f32.mrf.mxu1  ;;  %v13345_v30 = vld [vmem:[%s17667_s0 + $0x164] sm:$0xf] }
 0x115   :  { %v15478_v17 = vor.u32 %v13345_v30, %v9841_v32 }
 0x116   :  { %v15459_v13 = vadd.f32 %v2278_v21, %v2230_v1  ;;  %v2183_v41 = vadd.f32 %v2182_v35, %v2134_v24 }
 0x117   :  { %17879 = vst [vmem:[#allocation55_spill] sm:$0xff] %v15478_v17 }
 0x11b   :  { %v2231_v52 = vpop.f32.mrf.mxu2  ;;  %v2136_v18 = vpop.f32.mrf.mxu0 }
 0x11c   :  { %v2232_v58 = vadd.f32 %v2231_v52, %v2183_v41  ;;  %v2280_v0 = vpop.f32.mrf.mxu3  ;;  %v2137_v1 = vadd.f32 %v2136_v18, %v15054_v46  ;;  %v2185_v21 = vpop.f32.mrf.mxu1 }
 0x11e   :  { %v15481_v62 = vadd.f32 %v2280_v0, %v2232_v58  ;;  %v2186_v24 = vadd.f32 %v2185_v21, %v2137_v1  ;;  %2331 = vmatmul.bf16.gmra.mxu0 %v15476_v25 }
 0x11f   :  { %2380 = vmatmul.bf16.gmra.mxu1 %v15478_v17 }
 0x120   :  { %2429 = vmatmul.bf16.gmra.mxu2 %v15024_v28 }
 0x121   :  { %2478 = vmatmul.bf16.gmra.mxu3 %v15026_v29  ;;  %v15493_v29 = vpop.permute.xlu0 %3970 }
 0x122   :  { %17880 = vst [vmem:[#allocation56_spill] sm:$0xff] %v15493_v29 }
 0x123   :  { %v2234_v35 = vpop.f32.mrf.mxu2  ;;  %v2138_v12 = vpop.f32.mrf.mxu0 }
 0x124   :  { %v2235_v41 = vadd.f32 %v2234_v35, %v2186_v24  ;;  %v2283_v33 = vpop.f32.mrf.mxu3  ;;  %v2139_v30 = vadd.f32 %v2138_v12, %v15054_v46  ;;  %v2187_v32 = vpop.f32.mrf.mxu1  ;;  %v15499_v46 = vperm.slane %v15042_v37, 1 }
 0x126   :  { %v15488_v31 = vadd.f32 %v2283_v33, %v2235_v41  ;;  %v2188_v52 = vadd.f32 %v2187_v32, %v2139_v30 }
 0x129   :  { %v15507_v37 = vpop.permute.xlu0 %3975 }
 0x12a   :  { %17881 = vst [vmem:[#allocation57_spill] sm:$0xff] %v15507_v37 }
 0x12b   :  { %v2236_v58 = vpop.f32.mrf.mxu2  ;;  %v2297_v1 = vpop.f32.mrf.mxu0 }
 0x12c   :  { %v2237_v0 = vadd.f32 %v2236_v58, %v2188_v52  ;;  %v2285_v18 = vpop.f32.mrf.mxu3  ;;  %v2298_v21 = vadd.f32 %v2297_v1, %v15075_v10  ;;  %v2346_v60 = vpop.f32.mrf.mxu1 }
 0x12e   :  { %v15491_v28 = vadd.f32 %v2285_v18, %v2237_v0  ;;  %v2347_v24 = vadd.f32 %v2346_v60, %v2298_v21  ;;  %2492 = vmatmul.bf16.vlgmr.msra.gmra.mxu0 %v14584_v42 }
 0x12f   :  { %2541 = vmatmul.bf16.vlgmr.msra.gmra.mxu1 %v14586_v43 }
 0x130   :  { %2590 = vmatmul.bf16.vlgmr.msra.gmra.mxu2 %v15062_v49  ;;  %v3856_v35 = vmax.f32 %v2347_v24, 0.0  ;;  %v15509_v24 = vpop.permute.xlu1 %4010  ;;  %v15512_v49 = vpop.permute.xlu2 %3980 }
 0x131   :  { %2639 = vmatmul.bf16.vlgmr.msra.gmra.mxu3 %v15064_v56  ;;  %17882 = vst [vmem:[#allocation58_spill] sm:$0xff] %v15509_v24 }
 0x132   :  { %v4048_v10 = vmul.f32 %v15493_v29, %v3856_v35  ;;  %17883 = vst [vmem:[#allocation59_spill] sm:$0xff] %v15512_v49 }
 0x133   :  { %v2395_v41 = vpop.f32.mrf.mxu2  ;;  %v2299_v30 = vpop.f32.mrf.mxu0 }
 0x134   :  { %v2396_v33 = vadd.f32 %v2395_v41, %v15499_v46  ;;  %v2444_v12 = vpop.f32.mrf.mxu3  ;;  %v4144_v60 = vrot.slane %v4048_v10, 4  ;;  %v2300_v32 = vadd.f32 %v2299_v30, %v15100_v48  ;;  %v2348_v52 = vpop.f32.mrf.mxu1 }
 0x136   :  { %v15505_v58 = vadd.f32 %v2444_v12, %v2396_v33  ;;  %v4145_v0 = vadd.f32 %v4144_v60, %v4048_v10  ;;  %v2349_v18 = vadd.f32 %v2348_v52, %v2300_v32 }
 0x138   :  { %v4146_v1 = vrot.slane %v4145_v0, 2  ;;  %v3862_v21 = vmax.f32 %v2349_v18, 0.0 }
 0x13a   :  { %v4147_v35 = vadd.f32 %v4146_v1, %v4145_v0  ;;  %v4054_v56 = vmul.f32 %v15507_v37, %v3862_v21 }
 0x13b   :  { %v2397_v41 = vpop.f32.mrf.mxu2  ;;  %v2302_v30 = vpop.f32.mrf.mxu0 }
 0x13c   :  { %v2398_v51 = vadd.f32 %v2397_v41, %v15499_v46  ;;  %v2446_v48 = vpop.f32.mrf.mxu3  ;;  %v4180_v33 = vrot.slane %v4054_v56, 4  ;;  %v2303_v10 = vadd.f32 %v2302_v30, %v15110_v7  ;;  %v2351_v12 = vpop.f32.mrf.mxu1  ;;  %v4148_v32 = vrot.slane %v4147_v35, 1 }
 0x13e   :  { %v15516_v60 = vadd.f32 %v2446_v48, %v2398_v51  ;;  %v4181_v52 = vadd.f32 %v4180_v33, %v4054_v56  ;;  %v2352_v18 = vadd.f32 %v2351_v12, %v2303_v10  ;;  %2497 = vmatmul.bf16.gmra.mxu0 %v14620_v54  ;;  %v4149_v21 = vadd.f32 %v4148_v32, %v4147_v35  ;;  %v15523_v51 = vpop.permute.xlu1 %4015 }
 0x13f   :  { %2546 = vmatmul.bf16.gmra.mxu1 %v14622_v55 }
 0x140   :  { %17884 = vst [vmem:[#allocation60_spill] sm:$0xff] %v15516_v60  ;;  %2595 = vmatmul.bf16.gmra.mxu2 %v15095_v23  ;;  %v4182_v0 = vrot.slane %v4181_v52, 2  ;;  %v3868_v1 = vmax.f32 %v2352_v18, 0.0  ;;  %v15529_v18 = vpop.permute.xlu2 %4020  ;;  %v4720_v35 = vpack.c.bf16 %v4149_v21, %v4149_v21 }
 0x141   :  { %2644 = vmatmul.bf16.gmra.mxu3 %v15097_v44  ;;  %17886 = vst [vmem:[#allocation62_spill] sm:$0xff] %v15529_v18 }
 0x142   :  { %v4183_v41 = vadd.f32 %v4182_v0, %v4181_v52  ;;  %v4060_v7 = vmul.f32 %v15512_v49, %v3868_v1  ;;  %v15531_v1 = vpop.permute.xlu0 %3985  ;;  %v5214_v54 = vunpack.c.l.b16 %v4720_v35 }
 0x143   :  { %v2400_v30 = vpop.f32.mrf.mxu2  ;;  %v2304_v33 = vpop.f32.mrf.mxu0 }
 0x144   :  { %v2401_v56 = vadd.f32 %v2400_v30, %v15499_v46  ;;  %v2449_v48 = vpop.f32.mrf.mxu3  ;;  %v4184_v10 = vrot.slane %v4183_v41, 1  ;;  %v4216_v12 = vrot.slane %v4060_v7, 4  ;;  %v2305_v37 = vadd.f32 %v2304_v33, %v15138_v57  ;;  %v2353_v23 = vpop.f32.mrf.mxu1 }
 0x146   :  { %v15527_v55 = vadd.f32 %v2449_v48, %v2401_v56  ;;  %v4185_v32 = vadd.f32 %v4184_v10, %v4183_v41  ;;  %v4217_v52 = vadd.f32 %v4216_v12, %v4060_v7  ;;  %v2354_v0 = vadd.f32 %v2353_v23, %v2305_v37  ;;  %v15539_v12 = vpop.permute.xlu1 %4025 }
 0x147   :  { %17887 = vst [vmem:[#allocation63_spill] sm:$0xff] %v15539_v12 }
 0x148   :  { %17885 = vst [vmem:[#allocation61_spill] sm:$0xff] %v15527_v55  ;;  %v4726_v44 = vpack.c.bf16 %v4185_v32, %v4185_v32  ;;  %v4218_v49 = vrot.slane %v4217_v52, 2  ;;  %v3874_v30 = vmax.f32 %v2354_v0, 0.0  ;;  %v15544_v32 = vpop.permute.xlu2 %3990 }
 0x149   :  { %17888 = vst [vmem:[#allocation64_spill] sm:$0xff] %v15544_v32 }
 0x14a   :  { %v5220_v29 = vunpack.c.l.b16 %v4726_v44  ;;  %v4219_v60 = vadd.f32 %v4218_v49, %v4217_v52  ;;  %v4066_v57 = vmul.f32 %v15531_v1, %v3874_v30 }
 0x14b   :  { %v2402_v33 = vpop.f32.mrf.mxu2  ;;  %v2307_v55 = vpop.f32.mrf.mxu0 }
 0x14c   :  { %v2403_v56 = vadd.f32 %v2402_v33, %v15499_v46  ;;  %v2451_v48 = vpop.f32.mrf.mxu3  ;;  %v5311_v21 = vsel %vm5310_vm0, %v5220_v29, %v5214_v54  ;;  %v4220_v41 = vrot.slane %v4219_v60, 1  ;;  %v4252_v23 = vrot.slane %v4066_v57, 4  ;;  %v2356_v7 = vpop.f32.mrf.mxu1 }
 0x14d   :  { %v2308_v37 = vadd.f32 %v2307_v55, %v15151_v16 }
 0x14e   :  { %v15537_v10 = vadd.f32 %v2451_v48, %v2403_v56  ;;  %v4221_v44 = vadd.f32 %v4220_v41, %v4219_v60  ;;  %v4253_v49 = vadd.f32 %v4252_v23, %v4066_v57  ;;  %2502 = vmatmul.bf16.gmra.mxu0 %v14656_v2 }
 0x14f   :  { %v2357_v35 = vadd.f32 %v2356_v7, %v2308_v37  ;;  %2551 = vmatmul.bf16.gmra.mxu1 %v14658_v3 }
 0x150   :  { %2600 = vmatmul.bf16.gmra.mxu2 %v15133_v22  ;;  %v4732_v54 = vpack.c.bf16 %v4221_v44, %v4221_v44  ;;  %v4254_v29 = vrot.slane %v4253_v49, 2  ;;  %v15553_v44 = vpop.permute.xlu0 %4030 }
 0x151   :  { %v3880_v52 = vmax.f32 %v2357_v35, 0.0  ;;  %2649 = vmatmul.bf16.gmra.mxu3 %v15135_v45  ;;  %17889 = vst [vmem:[#allocation65_spill] sm:$0xff] %v15553_v44 }
 0x152   :  { %v5226_v55 = vunpack.c.l.b16 %v4732_v54  ;;  %v4255_v16 = vadd.f32 %v4254_v29, %v4253_v49  ;;  %v15555_v29 = vpop.permute.xlu1 %3995 }
 0x153   :  { %v4072_v60 = vmul.f32 %v15544_v32, %v3880_v52  ;;  %v2405_v0 = vpop.f32.mrf.mxu2  ;;  %v2309_v33 = vpop.f32.mrf.mxu0  ;;  %17890 = vst [vmem:[#allocation66_spill] sm:$0xff] %v15555_v29 }
 0x154   :  { %v2406_v30 = vadd.f32 %v2405_v0, %v15499_v46  ;;  %v2454_v57 = vpop.f32.mrf.mxu3  ;;  %v5313_v56 = vsel %vm5312_vm1, %v5226_v55, %v5311_v21  ;;  %v4256_v48 = vrot.slane %v4255_v16, 1  ;;  %v2310_v23 = vadd.f32 %v2309_v33, %v15173_v4  ;;  %v2358_v37 = vpop.f32.mrf.mxu1 }
 0x155   :  { %v4288_v41 = vrot.slane %v4072_v60, 4 }
 0x156   :  { %v15551_v7 = vadd.f32 %v2454_v57, %v2406_v30  ;;  %v4257_v35 = vadd.f32 %v4256_v48, %v4255_v16  ;;  %v2359_v54 = vadd.f32 %v2358_v37, %v2310_v23  ;;  %v15563_v37 = vpop.permute.xlu2 %4035 }
 0x157   :  { %v4289_v49 = vadd.f32 %v4288_v41, %v4072_v60  ;;  %17891 = vst [vmem:[#allocation67_spill] sm:$0xff] %v15563_v37 }
 0x158   :  { %v4738_v52 = vpack.c.bf16 %v4257_v35, %v4257_v35  ;;  %v3886_v45 = vmax.f32 %v2359_v54, 0.0 }
 0x159   :  { %v4290_v0 = vrot.slane %v4289_v49, 2 }
 0x15a   :  { %v5232_v22 = vunpack.c.l.b16 %v4738_v52  ;;  %v4078_v55 = vmul.f32 %v15555_v29, %v3886_v45  ;;  %v15568_v45 = vpop.permute.xlu0 %4000 }
 0x15b   :  { %v4291_v21 = vadd.f32 %v4290_v0, %v4289_v49  ;;  %v2407_v32 = vpop.f32.mrf.mxu2  ;;  %v2312_v57 = vpop.f32.mrf.mxu0  ;;  %17892 = vst [vmem:[#allocation68_spill] sm:$0xff] %v15568_v45 }
 0x15c   :  { %v2408_v4 = vadd.f32 %v2407_v32, %v15499_v46  ;;  %v2456_v30 = vpop.f32.mrf.mxu3  ;;  %v5315_v33 = vsel %vm5314_vm2, %v5232_v22, %v5313_v56  ;;  %v4324_v60 = vrot.slane %v4078_v55, 4  ;;  %v2313_v48 = vadd.f32 %v2312_v57, %v15180_v20  ;;  %v2361_v41 = vpop.f32.mrf.mxu1 }
 0x15d   :  { %v4292_v16 = vrot.slane %v4291_v21, 1 }
 0x15e   :  { %v15561_v23 = vadd.f32 %v2456_v30, %v2408_v4  ;;  %v4325_v49 = vadd.f32 %v4324_v60, %v4078_v55  ;;  %v2362_v54 = vadd.f32 %v2361_v41, %v2313_v48  ;;  %2507 = vmatmul.bf16.gmra.mxu0 %v14692_v14 }
 0x15f   :  { %v4293_v35 = vadd.f32 %v4292_v16, %v4291_v21  ;;  %2556 = vmatmul.bf16.gmra.mxu1 %v14694_v15 }
 0x160   :  { %2605 = vmatmul.bf16.gmra.mxu2 %v15168_v38  ;;  %v4326_v32 = vrot.slane %v4325_v49, 2  ;;  %v3892_v56 = vmax.f32 %v2362_v54, 0.0 }
 0x161   :  { %v4744_v22 = vpack.c.bf16 %v4293_v35, %v4293_v35  ;;  %2654 = vmatmul.bf16.gmra.mxu3 %v15170_v59 }
 0x162   :  { %v4327_v52 = vadd.f32 %v4326_v32, %v4325_v49  ;;  %v4084_v0 = vmul.f32 %v15568_v45, %v3892_v56  ;;  %v15577_v49 = vpop.permute.xlu2 %4005 }
 0x163   :  { %v5238_v20 = vunpack.c.l.b16 %v4744_v22  ;;  %v2410_v21 = vpop.f32.mrf.mxu2  ;;  %v2314_v30 = vpop.f32.mrf.mxu0 }
 0x164   :  { %v2411_v55 = vadd.f32 %v2410_v21, %v15499_v46  ;;  %v2459_v4 = vpop.f32.mrf.mxu3  ;;  %v4328_v16 = vrot.slane %v4327_v52, 1  ;;  %v4360_v60 = vrot.slane %v4084_v0, 4  ;;  %v2315_v48 = vadd.f32 %v2314_v30, %v15202_v19  ;;  %v2363_v41 = vpop.f32.mrf.mxu1 }
 0x165   :  { %v5317_v57 = vsel %vm5316_vm3, %v5238_v20, %v5315_v33 }
 0x166   :  { %v15575_v35 = vadd.f32 %v2459_v4, %v2411_v55  ;;  %v4329_v54 = vadd.f32 %v4328_v16, %v4327_v52  ;;  %v4361_v59 = vadd.f32 %v4360_v60, %v4084_v0  ;;  %v2364_v22 = vadd.f32 %v2363_v41, %v2315_v48 }
 0x168   :  { %v4750_v32 = vpack.c.bf16 %v4329_v54, %v4329_v54  ;;  %v4362_v56 = vrot.slane %v4361_v59, 2  ;;  %v3898_v38 = vmax.f32 %v2364_v22, 0.0  ;;  %v13491_v22 = vld [vmem:[%s17669_s2 + $0x46c] sm:$0xf0] }
 0x16a   :  { %v5244_v21 = vunpack.c.l.b16 %v4750_v32  ;;  %v4363_v45 = vadd.f32 %v4362_v56, %v4361_v59  ;;  %v4090_v33 = vmul.f32 %v15577_v49, %v3898_v38  ;;  %v10023_v38 = vld [vmem:[%s17669_s2 + $0x158] sm:$0xf]  ;;  %v13395_v59 = vld [vmem:[%s17669_s2 + $0x16c] sm:$0xf0] }
 0x16b   :  { %v2412_v20 = vpop.f32.mrf.mxu2  ;;  %v2317_v30 = vpop.f32.mrf.mxu0 }
 0x16c   :  { %v2413_v29 = vadd.f32 %v2412_v20, %v15499_v46  ;;  %v2461_v19 = vpop.f32.mrf.mxu3  ;;  %v4364_v55 = vrot.slane %v4363_v45, 1  ;;  %v4396_v4 = vrot.slane %v4090_v33, 4  ;;  %v2318_v52 = vadd.f32 %v2317_v30, %v15260_v50  ;;  %v2366_v0 = vpop.f32.mrf.mxu1  ;;  %v10215_v50 = vld [vmem:[%s17669_s2 + $0x2d8] sm:$0xf] }
 0x16d   :  { %v5319_v16 = vsel %vm5318_vm4, %v5244_v21, %v5317_v57  ;;  %v10407_v57 = vld [vmem:[%s17669_s2 + $0x458] sm:$0xf] }
 0x16e   :  { %v15583_v60 = vadd.f32 %v2461_v19, %v2413_v29  ;;  %v4365_v48 = vadd.f32 %v4364_v55, %v4363_v45  ;;  %v4397_v41 = vadd.f32 %v4396_v4, %v4090_v33  ;;  %v2367_v54 = vadd.f32 %v2366_v0, %v2318_v52  ;;  %2512 = vmatmul.bf16.gmra.mxu0 %v14728_v26  ;;  %v13443_v45 = vld [vmem:[%s17669_s2 + $0x2ec] sm:$0xf0]  ;;  %v10599_v20 = vld [vmem:[%s17669_s2 + $0x5d8] sm:$0xf] }
 0x16f   :  { %2561 = vmatmul.bf16.gmra.mxu1 %v14730_v27  ;;  %v10024_v29 = vor.u32 %v13395_v59, %v10023_v38  ;;  %v10216_v33 = vor.u32 %v13443_v45, %v10215_v50  ;;  %v13539_v19 = vld [vmem:[%s17669_s2 + $0x5ec] sm:$0xf0]  ;;  %v10408_v30 = vor.u32 %v13491_v22, %v10407_v57  ;;  %v13389_v38 = vld [vmem:[%s17669_s2 + $0x13c] sm:$0xf0]  ;;  %v10191_v59 = vld [vmem:[%s17669_s2 + $0x2a8] sm:$0xf] }
 0x170   :  { %2610 = vmatmul.bf16.gmra.mxu2 %v15197_v63  ;;  %v4756_v32 = vpack.c.bf16 %v4365_v48, %v4365_v48  ;;  %v4398_v56 = vrot.slane %v4397_v41, 2  ;;  %v3904_v21 = vmax.f32 %v2367_v54, 0.0  ;;  %v10600_v55 = vor.u32 %v13539_v19, %v10599_v20  ;;  %v9999_v54 = vld [vmem:[%s17669_s2 + $0x128] sm:$0xf]  ;;  %v13437_v57 = vld [vmem:[%s17669_s2 + $0x2bc] sm:$0xf0] }
 0x171   :  { %2659 = vmatmul.bf16.gmra.mxu3 %v15199_v11  ;;  %2680 = vmatpush.bf16.msrb.mxu0 %v10024_v29  ;;  %v10000_v45 = vor.u32 %v13389_v38, %v9999_v54  ;;  %v10383_v22 = vld [vmem:[%s17669_s2 + $0x428] sm:$0xf]  ;;  %v10192_v19 = vor.u32 %v13437_v57, %v10191_v59  ;;  %v9975_v59 = vld [vmem:[%s17669_s2 + $0xf8] sm:$0xf] }
 0x172   :  { %v5250_v4 = vunpack.c.l.b16 %v4756_v32  ;;  %v4399_v52 = vadd.f32 %v4398_v56, %v4397_v41  ;;  %v4096_v0 = vmul.f32 %v15509_v24, %v3904_v21  ;;  %2729 = vmatpush.bf16.msrb.mxu1 %v10216_v33  ;;  %2778 = vmatpush.bf16.msrb.mxu2 %v10408_v30  ;;  %v13485_v32 = vld [vmem:[%s17669_s2 + $0x43c] sm:$0xf0]  ;;  %v10575_v30 = vld [vmem:[%s17669_s2 + $0x5a8] sm:$0xf] }
 0x173   :  { %v2415_v48 = vpop.f32.mrf.mxu2  ;;  %v2319_v41 = vpop.f32.mrf.mxu0  ;;  %2827 = vmatpush.bf16.msrb.mxu3 %v10600_v55  ;;  %v13533_v55 = vld [vmem:[%s17669_s2 + $0x5bc] sm:$0xf0]  ;;  %v10384_v54 = vor.u32 %v13485_v32, %v10383_v22  ;;  %v10551_v32 = vld [vmem:[%s17669_s2 + $0x578] sm:$0xf] }
 0x174   :  { %v2416_v50 = vadd.f32 %v2415_v48, %v15499_v46  ;;  %v2464_v29 = vpop.f32.mrf.mxu3  ;;  %v4400_v56 = vrot.slane %v4399_v52, 1  ;;  %v4432_v21 = vrot.slane %v4096_v0, 4  ;;  %v2320_v33 = vadd.f32 %v2319_v41, %v15327_v8  ;;  %v2368_v20 = vpop.f32.mrf.mxu1  ;;  %v13383_v41 = vld [vmem:[%s17669_s2 + $0x10c] sm:$0xf0] }
 0x175   :  { %2681 = vmatpush.bf16.msrb.mxu0 %v10000_v45  ;;  %v10576_v38 = vor.u32 %v13533_v55, %v10575_v30  ;;  %v5321_v11 = vsel %vm5320_vm5, %v5250_v4, %v5319_v16  ;;  %v13431_v16 = vld [vmem:[%s17669_s2 + $0x28c] sm:$0xf0]  ;;  %v10359_v4 = vld [vmem:[%s17669_s2 + $0x3f8] sm:$0xf]  ;;  %v9951_v55 = vld [vmem:[%s17669_s2 + $0xc8] sm:$0xf] }
 0x176   :  { %v15640_v48 = vadd.f32 %v2464_v29, %v2416_v50  ;;  %v4401_v63 = vadd.f32 %v4400_v56, %v4399_v52  ;;  %v4433_v24 = vadd.f32 %v4432_v21, %v4096_v0  ;;  %v2369_v8 = vadd.f32 %v2368_v20, %v2320_v33  ;;  %2730 = vmatpush.bf16.msrb.mxu1 %v10192_v19  ;;  %v10167_v50 = vld [vmem:[%s17669_s2 + $0x278] sm:$0xf]  ;;  %v13479_v52 = vld [vmem:[%s17669_s2 + $0x40c] sm:$0xf0] }
 0x177   :  { %2779 = vmatpush.bf16.msrb.mxu2 %v10384_v54  ;;  %2828 = vmatpush.bf16.msrb.mxu3 %v10576_v38  ;;  %v9976_v29 = vor.u32 %v13383_v41, %v9975_v59  ;;  %v10168_v22 = vor.u32 %v13431_v16, %v10167_v50  ;;  %v13527_v56 = vld [vmem:[%s17669_s2 + $0x58c] sm:$0xf0]  ;;  %v10360_v21 = vor.u32 %v13479_v52, %v10359_v4  ;;  %v13377_v54 = vld [vmem:[%s17669_s2 + $0xdc] sm:$0xf0]  ;;  %v10143_v38 = vld [vmem:[%s17669_s2 + $0x248] sm:$0xf] }
 0x178   :  { %v4762_v0 = vpack.c.bf16 %v4401_v63, %v4401_v63  ;;  %v4434_v45 = vrot.slane %v4433_v24, 2  ;;  %v3910_v57 = vmax.f32 %v2369_v8, 0.0  ;;  %v10552_v33 = vor.u32 %v13527_v56, %v10551_v32  ;;  %v13425_v50 = vld [vmem:[%s17669_s2 + $0x25c] sm:$0xf0] }
 0x179   :  { %2682 = vmatpush.bf16.msrb.mxu0 %v9976_v29  ;;  %v9952_v41 = vor.u32 %v13377_v54, %v9951_v55  ;;  %v10335_v29 = vld [vmem:[%s17669_s2 + $0x3c8] sm:$0xf]  ;;  %v13473_v16 = vld [vmem:[%s17669_s2 + $0x3dc] sm:$0xf0]  ;;  %v9927_v54 = vld [vmem:[%s17669_s2 + $0x98] sm:$0xf] }
 0x17a   :  { %v5256_v20 = vunpack.c.l.b16 %v4762_v0  ;;  %v4435_v19 = vadd.f32 %v4434_v45, %v4433_v24  ;;  %v4102_v30 = vmul.f32 %v15523_v51, %v3910_v57  ;;  %2731 = vmatpush.bf16.msrb.mxu1 %v10168_v22  ;;  %v10144_v57 = vor.u32 %v13425_v50, %v10143_v38  ;;  %v10527_v22 = vld [vmem:[%s17669_s2 + $0x548] sm:$0xf]  ;;  %v13521_v32 = vld [vmem:[%s17669_s2 + $0x55c] sm:$0xf0]  ;;  %v13371_v38 = vld [vmem:[%s17669_s2 + $0xac] sm:$0xf0] }
 0x17b   :  { %v2417_v63 = vpop.f32.mrf.mxu2  ;;  %v2322_v24 = vpop.f32.mrf.mxu0  ;;  %2780 = vmatpush.bf16.msrb.mxu2 %v10360_v21  ;;  %2829 = vmatpush.bf16.msrb.mxu3 %v10552_v33  ;;  %v10336_v21 = vor.u32 %v13473_v16, %v10335_v29  ;;  %v10528_v33 = vor.u32 %v13521_v32, %v10527_v22  ;;  %v10503_v29 = vld [vmem:[%s17669_s2 + $0x518] sm:$0xf]  ;;  %v13515_v16 = vld [vmem:[%s17669_s2 + $0x52c] sm:$0xf0] }
 0x17c   :  { %v2418_v8 = vadd.f32 %v2417_v63, %v15499_v46  ;;  %v2466_v59 = vpop.f32.mrf.mxu3  ;;  %v4436_v4 = vrot.slane %v4435_v19, 1  ;;  %v4468_v52 = vrot.slane %v4102_v30, 4  ;;  %v2323_v0 = vadd.f32 %v2322_v24, %v15382_v34  ;;  %v2371_v45 = vpop.f32.mrf.mxu1 }
 0x17d   :  { %2683 = vmatpush.bf16.msrb.mxu0 %v9952_v41  ;;  %v15697_v63 = vsel %vm5322_vm6, %v5256_v20, %v5321_v11  ;;  %v9928_v11 = vor.u32 %v13371_v38, %v9927_v54  ;;  %v13419_v20 = vld [vmem:[%s17669_s2 + $0x22c] sm:$0xf0]  ;;  %v13413_v38 = vld [vmem:[%s17669_s2 + $0x1fc] sm:$0xf0] }
 0x17e   :  { %v15694_v56 = vadd.f32 %v2466_v59, %v2418_v8  ;;  %v4469_v55 = vadd.f32 %v4468_v52, %v4102_v30  ;;  %v2372_v34 = vadd.f32 %v2371_v45, %v2323_v0  ;;  %2517 = vmatmul.bf16.gmra.mxu0 %v14854_v36  ;;  %2732 = vmatpush.bf16.msrb.mxu1 %v10144_v57  ;;  %v10119_v8 = vld [vmem:[%s17669_s2 + $0x218] sm:$0xf]  ;;  %v13467_v59 = vld [vmem:[%s17669_s2 + $0x3ac] sm:$0xf0] }
 0x17f   :  { %2566 = vmatmul.bf16.gmra.mxu1 %v14862_v39  ;;  %v10311_v30 = vld [vmem:[%s17669_s2 + $0x398] sm:$0xf]  ;;  %2781 = vmatpush.bf16.msrb.mxu2 %v10336_v21  ;;  %v10120_v50 = vor.u32 %v13419_v20, %v10119_v8  ;;  %v10504_v0 = vor.u32 %v13515_v16, %v10503_v29  ;;  %v4437_v45 = vadd.f32 %v4436_v4, %v4435_v19  ;;  %v9903_v21 = vld [vmem:[%s17669_s2 + $0x68] sm:$0xf]  ;;  %v13509_v29 = vld [vmem:[%s17669_s2 + $0x4fc] sm:$0xf0] }
 0x180   :  { %2615 = vmatmul.bf16.gmra.mxu2 %v15298_v53  ;;  %v4470_v24 = vrot.slane %v4469_v55, 2  ;;  %v3916_v41 = vmax.f32 %v2372_v34, 0.0  ;;  %2830 = vmatpush.bf16.msrb.mxu3 %v10528_v33  ;;  %v10312_v52 = vor.u32 %v13467_v59, %v10311_v30  ;;  %v13365_v34 = vld [vmem:[%s17669_s2 + $0x7c] sm:$0xf0]  ;;  %v10095_v33 = vld [vmem:[%s17669_s2 + $0x1e8] sm:$0xf] }
 0x181   :  { %2664 = vmatmul.bf16.gmra.mxu3 %v15309_v47  ;;  %2684 = vmatpush.bf16.msrb.mxu0 %v9928_v11  ;;  %v10287_v8 = vld [vmem:[%s17669_s2 + $0x368] sm:$0xf]  ;;  %v13461_v11 = vld [vmem:[%s17669_s2 + $0x37c] sm:$0xf0] }
 0x182   :  { %v4471_v57 = vadd.f32 %v4470_v24, %v4469_v55  ;;  %v4108_v22 = vmul.f32 %v15529_v18, %v3916_v41  ;;  %2733 = vmatpush.bf16.msrb.mxu1 %v10120_v50  ;;  %v9904_v55 = vor.u32 %v13365_v34, %v9903_v21  ;;  %v10096_v41 = vor.u32 %v13413_v38, %v10095_v33  ;;  %v10479_v50 = vld [vmem:[%s17669_s2 + $0x4e8] sm:$0xf]  ;;  %v13359_v33 = vld [vmem:[%s17669_s2 + $0x4c] sm:$0xf0] }
 0x183   :  { %v2420_v32 = vpop.f32.mrf.mxu2  ;;  %v2324_v4 = vpop.f32.mrf.mxu0  ;;  %2782 = vmatpush.bf16.msrb.mxu2 %v10312_v52  ;;  %v10480_v21 = vor.u32 %v13509_v29, %v10479_v50  ;;  %v4768_v34 = vpack.c.bf16 %v4437_v45, %v4437_v45  ;;  %v9879_v52 = vld [vmem:[%s17669_s2 + $0x38] sm:$0xf]  ;;  %v13407_v45 = vld [vmem:[%s17669_s2 + $0x1cc] sm:$0xf0] }
 0x184   :  { %v2421_v54 = vadd.f32 %v2420_v32, %v15499_v46  ;;  %v2469_v19 = vpop.f32.mrf.mxu3  ;;  %v4472_v20 = vrot.slane %v4471_v57, 1  ;;  %v4504_v30 = vrot.slane %v4108_v22, 4  ;;  %v2325_v59 = vadd.f32 %v2324_v4, %v15449_v6  ;;  %v2373_v24 = vpop.f32.mrf.mxu1  ;;  %2831 = vmatpush.bf16.msrb.mxu3 %v10504_v0  ;;  %v10071_v0 = vld [vmem:[%s17669_s2 + $0x1b8] sm:$0xf] }
 0x185   :  { %2685 = vmatpush.bf16.msrb.mxu0 %v9904_v55  ;;  %v10288_v32 = vor.u32 %v13461_v11, %v10287_v8  ;;  %v10072_v8 = vor.u32 %v13407_v45, %v10071_v0  ;;  %v10455_v11 = vld [vmem:[%s17669_s2 + $0x4b8] sm:$0xf]  ;;  %v13401_v0 = vld [vmem:[%s17669_s2 + $0x19c] sm:$0xf0] }
 0x186   :  { %v15754_v16 = vadd.f32 %v2469_v19, %v2421_v54  ;;  %v4473_v47 = vadd.f32 %v4472_v20, %v4471_v57  ;;  %v4505_v6 = vadd.f32 %v4504_v30, %v4108_v22  ;;  %v2374_v4 = vadd.f32 %v2373_v24, %v2325_v59  ;;  %2734 = vmatpush.bf16.msrb.mxu1 %v10096_v41  ;;  %v10263_v57 = vld [vmem:[%s17669_s2 + $0x338] sm:$0xf]  ;;  %v13455_v22 = vld [vmem:[%s17669_s2 + $0x34c] sm:$0xf0]  ;;  %v13449_v45 = vld [vmem:[%s17669_s2 + $0x31c] sm:$0xf0] }
 0x187   :  { %v9880_v54 = vor.u32 %v13359_v33, %v9879_v52  ;;  %2783 = vmatpush.bf16.msrb.mxu2 %v10288_v32  ;;  %v13503_v20 = vld [vmem:[%s17669_s2 + $0x4cc] sm:$0xf0]  ;;  %v10264_v30 = vor.u32 %v13455_v22, %v10263_v57  ;;  %v5262_v24 = vunpack.c.l.b16 %v4768_v34  ;;  %v9855_v32 = vld [vmem:[%s17669_s2 + $0x8] sm:$0xf] }
 0x188   :  { %v4774_v19 = vpack.c.bf16 %v4473_v47, %v4473_v47  ;;  %v4506_v55 = vrot.slane %v4505_v6, 2  ;;  %v3922_v38 = vmax.f32 %v2374_v4, 0.0  ;;  %2832 = vmatpush.bf16.msrb.mxu3 %v10480_v21  ;;  %v10456_v59 = vor.u32 %v13503_v20, %v10455_v11  ;;  %v13353_v4 = vld [vmem:[%s17669_s2 + $0x1c] sm:$0xf0]  ;;  %v10047_v21 = vld [vmem:[%s17669_s2 + $0x188] sm:$0xf] }
 0x189   :  { %2686 = vmatpush.bf16.msrb.mxu0 %v9880_v54  ;;  %v9856_v33 = vor.u32 %v13353_v4, %v9855_v32  ;;  %v10239_v54 = vld [vmem:[%s17669_s2 + $0x308] sm:$0xf]  ;;  %v13497_v11 = vld [vmem:[%s17669_s2 + $0x49c] sm:$0xf0] }
 0x18a   :  { %v5268_v41 = vunpack.c.l.b16 %v4774_v19  ;;  %v4507_v50 = vadd.f32 %v4506_v55, %v4505_v6  ;;  %v4114_v47 = vmul.f32 %v15539_v12, %v3922_v38  ;;  %2735 = vmatpush.bf16.msrb.mxu1 %v10072_v8  ;;  %v10431_v8 = vld [vmem:[%s17669_s2 + $0x488] sm:$0xf] }
 0x18b   :  { %v2422_v29 = vpop.f32.mrf.mxu2  ;;  %v2327_v6 = vpop.f32.mrf.mxu0  ;;  %2784 = vmatpush.bf16.msrb.mxu2 %v10264_v30 }
 0x18c   :  { %v2423_v34 = vadd.f32 %v2422_v29, %v15499_v46  ;;  %v2471_v52 = vpop.f32.mrf.mxu3  ;;  %v5359_v57 = vsel %vm5310_vm0, %v5268_v41, %v5262_v24  ;;  %v4508_v22 = vrot.slane %v4507_v50, 1  ;;  %v4540_v19 = vrot.slane %v4114_v47, 4  ;;  %v2376_v38 = vpop.f32.mrf.mxu1  ;;  %2833 = vmatpush.bf16.msrb.mxu3 %v10456_v59 }
 0x18d   :  { %v2328_v55 = vadd.f32 %v2327_v6, %v15459_v13  ;;  %2687 = vmatpush.bf16.msrb.mxu0 %v9856_v33  ;;  %v10048_v29 = vor.u32 %v13401_v0, %v10047_v21  ;;  %v10240_v24 = vor.u32 %v13449_v45, %v10239_v54  ;;  %v10432_v13 = vor.u32 %v13497_v11, %v10431_v8 }
 0x18e   :  { %v15808_v20 = vadd.f32 %v2471_v52, %v2423_v34  ;;  %v4509_v41 = vadd.f32 %v4508_v22, %v4507_v50  ;;  %v4541_v32 = vadd.f32 %v4540_v19, %v4114_v47  ;;  %2522 = vmatmul.bf16.gmra.mxu0 %v14977_v61 }
 0x18f   :  { %v2377_v4 = vadd.f32 %v2376_v38, %v2328_v55  ;;  %2571 = vmatmul.bf16.gmra.mxu1 %v14988_v5  ;;  %2785 = vmatpush.bf16.msrb.mxu2 %v10240_v24 }
 0x190   :  { %2620 = vmatmul.bf16.gmra.mxu2 %v15420_v40  ;;  %v4780_v30 = vpack.c.bf16 %v4509_v41, %v4509_v41  ;;  %v4542_v6 = vrot.slane %v4541_v32, 2  ;;  %2736 = vmatpush.bf16.msrb.mxu1 %v10048_v29 }
 0x191   :  { %v3928_v53 = vmax.f32 %v2377_v4, 0.0  ;;  %2669 = vmatmul.bf16.gmra.mxu3 %v15431_v9 }
 0x192   :  { %2834 = vmatpush.bf16.msrb.mxu3 %v10432_v13  ;;  %v5274_v59 = vunpack.c.l.b16 %v4780_v30  ;;  %v4543_v21 = vadd.f32 %v4542_v6, %v4541_v32 }
 0x193   :  { %v4120_v50 = vmul.f32 %v15553_v44, %v3928_v53  ;;  %v2425_v47 = vpop.f32.mrf.mxu2  ;;  %v2329_v33 = vpop.f32.mrf.mxu0 }
 0x194   :  { %v2426_v34 = vadd.f32 %v2425_v47, %v15499_v46  ;;  %v2474_v52 = vpop.f32.mrf.mxu3  ;;  %v5360_v0 = vsel %vm5312_vm1, %v5274_v59, %v5359_v57  ;;  %v4544_v54 = vrot.slane %v4543_v21, 1  ;;  %v2330_v22 = vadd.f32 %v2329_v33, %v15481_v62  ;;  %v2378_v19 = vpop.f32.mrf.mxu1 }
 0x195   :  { %v4576_v45 = vrot.slane %v4120_v50, 4 }
 0x196   :  { %v15818_v55 = vadd.f32 %v2474_v52, %v2426_v34  ;;  %v4545_v38 = vadd.f32 %v4544_v54, %v4543_v21  ;;  %v2379_v11 = vadd.f32 %v2378_v19, %v2330_v22  ;;  %v17894_v22 = vld [vmem:[#allocation39_spill] sm:$0xff]  ;;  %v15829_v19 = vpop.permute.xlu1 %4040 }
 0x197   :  { %v4577_v8 = vadd.f32 %v4576_v45, %v4120_v50  ;;  %v17893_v45 = vld [vmem:[#allocation38_spill] sm:$0xff]  ;;  %17895 = vst [vmem:[#allocation69_spill] sm:$0xff] %v15829_v19 }
 0x198   :  { %v4786_v29 = vpack.c.bf16 %v4545_v38, %v4545_v38  ;;  %v3934_v53 = vmax.f32 %v2379_v11, 0.0 }
 0x199   :  { %v4578_v24 = vrot.slane %v4577_v8, 2 }
 0x19a   :  { %v5280_v41 = vunpack.c.l.b16 %v4786_v29  ;;  %v4126_v4 = vmul.f32 %v15563_v37, %v3934_v53 }
 0x19b   :  { %v4579_v32 = vadd.f32 %v4578_v24, %v4577_v8  ;;  %v2427_v13 = vpop.f32.mrf.mxu2  ;;  %v2332_v6 = vpop.f32.mrf.mxu0 }
 0x19c   :  { %v2428_v57 = vadd.f32 %v2427_v13, %v15499_v46  ;;  %v2476_v30 = vpop.f32.mrf.mxu3  ;;  %v5361_v62 = vsel %vm5314_vm2, %v5280_v41, %v5360_v0  ;;  %v4612_v47 = vrot.slane %v4126_v4, 4  ;;  %v2333_v21 = vadd.f32 %v2332_v6, %v15488_v31  ;;  %v2381_v50 = vpop.f32.mrf.mxu1 }
 0x19d   :  { %v4580_v59 = vrot.slane %v4579_v32, 1 }
 0x19e   :  { %v15824_v34 = vadd.f32 %v2476_v30, %v2428_v57  ;;  %v4613_v33 = vadd.f32 %v4612_v47, %v4126_v4  ;;  %v2382_v54 = vadd.f32 %v2381_v50, %v2333_v21  ;;  %2527 = vmatmul.bf16.gmra.mxu0 %v17893_v45 }
 0x19f   :  { %v4581_v52 = vadd.f32 %v4580_v59, %v4579_v32  ;;  %2576 = vmatmul.bf16.gmra.mxu1 %v17894_v22 }
 0x1a0   :  { %2625 = vmatmul.bf16.gmra.mxu2 %v15476_v25  ;;  %v4614_v0 = vrot.slane %v4613_v33, 2  ;;  %v3940_v8 = vmax.f32 %v2382_v54, 0.0  ;;  %v17901_v25 = vld [vmem:[#allocation61_spill] sm:$0xff] }
 0x1a1   :  { %v4792_v38 = vpack.c.bf16 %v4581_v52, %v4581_v52  ;;  %2674 = vmatmul.bf16.gmra.mxu3 %v15478_v17  ;;  %v15838_v52 = vpop.permute.xlu0 %4045 }
 0x1a2   :  { %v4615_v11 = vadd.f32 %v4614_v0, %v4613_v33  ;;  %v4132_v29 = vmul.f32 %v15829_v19, %v3940_v8  ;;  %17896 = vst [vmem:[#allocation70_spill] sm:$0xff] %v15838_v52 }
 0x1a3   :  { %v5286_v31 = vunpack.c.l.b16 %v4792_v38  ;;  %v2430_v24 = vpop.f32.mrf.mxu2  ;;  %v2334_v32 = vpop.f32.mrf.mxu0 }
 0x1a4   :  { %v2431_v53 = vadd.f32 %v2430_v24, %v15499_v46  ;;  %v2479_v41 = vpop.f32.mrf.mxu3  ;;  %v4616_v13 = vrot.slane %v4615_v11, 1  ;;  %v4648_v57 = vrot.slane %v4132_v29, 4  ;;  %v2335_v30 = vadd.f32 %v2334_v32, %v15491_v28  ;;  %v2383_v6 = vpop.f32.mrf.mxu1 }
 0x1a5   :  { %v5362_v4 = vsel %vm5316_vm3, %v5286_v31, %v5361_v62 }
 0x1a6   :  { %v15836_v59 = vadd.f32 %v2479_v41, %v2431_v53  ;;  %v4617_v47 = vadd.f32 %v4616_v13, %v4615_v11  ;;  %v4649_v21 = vadd.f32 %v4648_v57, %v4132_v29  ;;  %v2384_v50 = vadd.f32 %v2383_v6, %v2335_v30 }
 0x1a8   :  { %v4798_v33 = vpack.c.bf16 %v4617_v47, %v4617_v47  ;;  %v4650_v54 = vrot.slane %v4649_v21, 2  ;;  %v3946_v38 = vmax.f32 %v2384_v50, 0.0  ;;  %v17897_v47 = vld [vmem:[#allocation11_spill] sm:$0xff] }
 0x1aa   :  { %v5292_v0 = vunpack.c.l.b16 %v4798_v33  ;;  %v4651_v8 = vadd.f32 %v4650_v54, %v4649_v21  ;;  %v4138_v24 = vmul.f32 %v15838_v52, %v3946_v38  ;;  %v17898_v21 = vld [vmem:[#allocation12_spill] sm:$0xff] }
 0x1ab   :  { %v2432_v62 = vpop.f32.mrf.mxu2  ;;  %v2493_v28 = vpop.f32.mrf.mxu0 }
 0x1ac   :  { %v2433_v31 = vadd.f32 %v2432_v62, %v15499_v46  ;;  %v2481_v17 = vpop.f32.mrf.mxu3  ;;  %v5363_v53 = vsel %vm5318_vm4, %v5292_v0, %v5362_v4  ;;  %v4652_v41 = vrot.slane %v4651_v8, 1  ;;  %v4684_v11 = vrot.slane %v4138_v24, 4  ;;  %v2542_v32 = vpop.f32.mrf.mxu1 }
 0x1ad   :  { %v2494_v29 = vadd.f32 %v2493_v28, %v15505_v58 }
 0x1ae   :  { %v15844_v13 = vadd.f32 %v2481_v17, %v2433_v31  ;;  %v4653_v57 = vadd.f32 %v4652_v41, %v4651_v8  ;;  %v4685_v30 = vadd.f32 %v4684_v11, %v4138_v24  ;;  %2688 = vmatmul.bf16.vlgmr.msrb.gmra.mxu0 %v17897_v47  ;;  %v17899_v24 = vld [vmem:[#allocation60_spill] sm:$0xff] }
 0x1af   :  { %v2543_v6 = vadd.f32 %v2542_v32, %v2494_v29  ;;  %2737 = vmatmul.bf16.vlgmr.msrb.gmra.mxu1 %v17898_v21 }
 0x1b0   :  { %2786 = vmatmul.bf16.vlgmr.msrb.gmra.mxu2 %v14584_v42  ;;  %v4804_v46 = vpack.c.bf16 %v4653_v57, %v4653_v57  ;;  %v4686_v50 = vrot.slane %v4685_v30, 2  ;;  %v17900_v57 = vld [vmem:[#allocation56_spill] sm:$0xff] }
 0x1b1   :  { %2835 = vmatmul.bf16.vlgmr.msrb.gmra.mxu3 %v14586_v43 }
 0x1b2   :  { %v5298_v4 = vunpack.c.l.b16 %v4804_v46  ;;  %v4687_v33 = vadd.f32 %v4686_v50, %v4685_v30 }
 0x1b3   :  { %v2591_v54 = vpop.f32.mrf.mxu2  ;;  %v2495_v17 = vpop.f32.mrf.mxu0 }
 0x1b4   :  { %v2592_v58 = vadd.f32 %v2591_v54, %v2543_v6  ;;  %v2640_v38 = vpop.f32.mrf.mxu3  ;;  %v5364_v0 = vsel %vm5320_vm5, %v5298_v4, %v5363_v53  ;;  %v4688_v8 = vrot.slane %v4687_v33, 1  ;;  %v2496_v62 = vadd.f32 %v2495_v17, %v17899_v24  ;;  %v2544_v31 = vpop.f32.mrf.mxu1 }
 0x1b6   :  { %v2641_v28 = vadd.f32 %v2640_v38, %v2592_v58  ;;  %v4689_v41 = vadd.f32 %v4688_v8, %v4687_v33  ;;  %v2545_v11 = vadd.f32 %v2544_v31, %v2496_v62  ;;  %v17903_v38 = vld [vmem:[#allocation15_spill] sm:$0xff]  ;;  %v17904_v31 = vld [vmem:[#allocation16_spill] sm:$0xff] }
 0x1b8   :  { %v3857_v29 = vmax.f32 %v2641_v28, 0.0  ;;  %v4810_v32 = vpack.c.bf16 %v4689_v41, %v4689_v41  ;;  %v17905_v28 = vld [vmem:[#allocation17_spill] sm:$0xff]  ;;  %v17906_v41 = vld [vmem:[#allocation18_spill] sm:$0xff] }
 0x1ba   :  { %v4049_v42 = vmul.f32 %v17900_v57, %v3857_v29  ;;  %v5304_v43 = vunpack.c.l.b16 %v4810_v32 }
 0x1bb   :  { %v2593_v46 = vpop.f32.mrf.mxu2  ;;  %v2498_v54 = vpop.f32.mrf.mxu0 }
 0x1bc   :  { %v4150_v30 = vrot.slane %v4049_v42, 4  ;;  %v2594_v50 = vadd.f32 %v2593_v46, %v2545_v11  ;;  %v2642_v6 = vpop.f32.mrf.mxu3  ;;  %v2499_v9 = vadd.f32 %v2498_v54, %v17901_v25  ;;  %v2547_v53 = vpop.f32.mrf.mxu1  ;;  %v5365_v4 = vsel %vm5322_vm6, %v5304_v43, %v5364_v0  ;;  %v17907_v11 = vld [vmem:[#allocation57_spill] sm:$0xff] }
 0x1bd   :  { %v15856_v33 = vpack.c.b16 %v5365_v4, %v15697_v63 }
 0x1be   :  { %v4151_v17 = vadd.f32 %v4150_v30, %v4049_v42  ;;  %v2643_v24 = vadd.f32 %v2642_v6, %v2594_v50  ;;  %v2548_v58 = vadd.f32 %v2547_v53, %v2499_v9  ;;  %2693 = vmatmul.bf16.gmra.mxu0 %v17903_v38 }
 0x1bf   :  { %17902 = vst [vmem:[#allocation60_spill] sm:$0xff] %v15856_v33  ;;  %2742 = vmatmul.bf16.gmra.mxu1 %v17904_v31 }
 0x1c0   :  { %v4152_v8 = vrot.slane %v4151_v17, 2  ;;  %v3863_v62 = vmax.f32 %v2643_v24, 0.0  ;;  %2791 = vmatmul.bf16.gmra.mxu2 %v17905_v28 }
 0x1c1   :  { %2840 = vmatmul.bf16.gmra.mxu3 %v17906_v41  ;;  %v17908_v41 = vld [vmem:[#allocation59_spill] sm:$0xff] }
 0x1c2   :  { %v4153_v25 = vadd.f32 %v4152_v8, %v4151_v17  ;;  %v4055_v29 = vmul.f32 %v17907_v11, %v3863_v62 }
 0x1c3   :  { %v2596_v43 = vpop.f32.mrf.mxu2  ;;  %v2500_v63 = vpop.f32.mrf.mxu0 }
 0x1c4   :  { %v4186_v42 = vrot.slane %v4055_v29, 4  ;;  %v2597_v0 = vadd.f32 %v2596_v43, %v2548_v58  ;;  %v2645_v32 = vpop.f32.mrf.mxu3  ;;  %v2501_v9 = vadd.f32 %v2500_v63, %v15537_v10  ;;  %v2549_v46 = vpop.f32.mrf.mxu1  ;;  %v4154_v30 = vrot.slane %v4153_v25, 1 }
 0x1c6   :  { %v4187_v50 = vadd.f32 %v4186_v42, %v4055_v29  ;;  %v2646_v6 = vadd.f32 %v2645_v32, %v2597_v0  ;;  %v2550_v54 = vadd.f32 %v2549_v46, %v2501_v9  ;;  %v4155_v24 = vadd.f32 %v4154_v30, %v4153_v25  ;;  %v17909_v32 = vld [vmem:[#allocation19_spill] sm:$0xff]  ;;  %v17910_v30 = vld [vmem:[#allocation20_spill] sm:$0xff] }
 0x1c8   :  { %v4188_v53 = vrot.slane %v4187_v50, 2  ;;  %v3869_v4 = vmax.f32 %v2646_v6, 0.0  ;;  %v4721_v63 = vpack.c.bf16 %v4155_v24, %v4155_v24 }
 0x1ca   :  { %v4189_v33 = vadd.f32 %v4188_v53, %v4187_v50  ;;  %v4061_v17 = vmul.f32 %v17908_v41, %v3869_v4  ;;  %v5215_v50 = vunpack.c.l.b16 %v4721_v63 }
 0x1cb   :  { %v2598_v8 = vpop.f32.mrf.mxu2  ;;  %v2503_v43 = vpop.f32.mrf.mxu0 }
 0x1cc   :  { %v4190_v62 = vrot.slane %v4189_v33, 1  ;;  %v4222_v28 = vrot.slane %v4061_v17, 4  ;;  %v2599_v11 = vadd.f32 %v2598_v8, %v2550_v54  ;;  %v2647_v58 = vpop.f32.mrf.mxu3  ;;  %v2504_v57 = vadd.f32 %v2503_v43, %v15551_v7  ;;  %v2552_v10 = vpop.f32.mrf.mxu1 }
 0x1ce   :  { %v4191_v40 = vadd.f32 %v4190_v62, %v4189_v33  ;;  %v4223_v29 = vadd.f32 %v4222_v28, %v4061_v17  ;;  %v2648_v42 = vadd.f32 %v2647_v58, %v2599_v11  ;;  %v2553_v0 = vadd.f32 %v2552_v10, %v2504_v57  ;;  %2698 = vmatmul.bf16.gmra.mxu0 %v17909_v32 }
 0x1cf   :  { %2747 = vmatmul.bf16.gmra.mxu1 %v17910_v30 }
 0x1d0   :  { %v4727_v25 = vpack.c.bf16 %v4191_v40, %v4191_v40  ;;  %v4224_v9 = vrot.slane %v4223_v29, 2  ;;  %v3875_v46 = vmax.f32 %v2648_v42, 0.0  ;;  %2796 = vmatmul.bf16.gmra.mxu2 %v14656_v2 }
 0x1d1   :  { %2845 = vmatmul.bf16.gmra.mxu3 %v14658_v3 }
 0x1d2   :  { %v5221_v6 = vunpack.c.l.b16 %v4727_v25  ;;  %v4225_v7 = vadd.f32 %v4224_v9, %v4223_v29  ;;  %v4067_v54 = vmul.f32 %v15531_v1, %v3875_v46  ;;  %v17911_v9 = vld [vmem:[#allocation64_spill] sm:$0xff] }
 0x1d3   :  { %v2601_v33 = vpop.f32.mrf.mxu2  ;;  %v2505_v4 = vpop.f32.mrf.mxu0 }
 0x1d4   :  { %v5324_v28 = vsel %vm5310_vm0, %v5221_v6, %v5215_v50  ;;  %v4226_v57 = vrot.slane %v4225_v7, 1  ;;  %v4258_v11 = vrot.slane %v4067_v54, 4  ;;  %v2602_v53 = vadd.f32 %v2601_v33, %v2553_v0  ;;  %v2650_v40 = vpop.f32.mrf.mxu3  ;;  %v2554_v17 = vpop.f32.mrf.mxu1 }
 0x1d5   :  { %v2506_v24 = vadd.f32 %v2505_v4, %v15561_v23  ;;  %v17912_v4 = vld [vmem:[#allocation23_spill] sm:$0xff] }
 0x1d6   :  { %v4227_v8 = vadd.f32 %v4226_v57, %v4225_v7  ;;  %v4259_v62 = vadd.f32 %v4258_v11, %v4067_v54  ;;  %v2651_v58 = vadd.f32 %v2650_v40, %v2602_v53 }
 0x1d7   :  { %v2555_v43 = vadd.f32 %v2554_v17, %v2506_v24 }
 0x1d8   :  { %v4733_v10 = vpack.c.bf16 %v4227_v8, %v4227_v8  ;;  %v4260_v63 = vrot.slane %v4259_v62, 2  ;;  %v3881_v29 = vmax.f32 %v2651_v58, 0.0 }
 0x1da   :  { %v5227_v42 = vunpack.c.l.b16 %v4733_v10  ;;  %v4261_v25 = vadd.f32 %v4260_v63, %v4259_v62  ;;  %v4073_v46 = vmul.f32 %v17911_v9, %v3881_v29  ;;  %v17913_v62 = vld [vmem:[#allocation24_spill] sm:$0xff] }
 0x1db   :  { %v2603_v50 = vpop.f32.mrf.mxu2  ;;  %v2508_v23 = vpop.f32.mrf.mxu0 }
 0x1dc   :  { %v5325_v6 = vsel %vm5312_vm1, %v5227_v42, %v5324_v28  ;;  %v4262_v0 = vrot.slane %v4261_v25, 1  ;;  %v4294_v33 = vrot.slane %v4073_v46, 4  ;;  %v2604_v3 = vadd.f32 %v2603_v50, %v2555_v43  ;;  %v2652_v2 = vpop.f32.mrf.mxu3  ;;  %v2557_v54 = vpop.f32.mrf.mxu1  ;;  %v17914_v43 = vld [vmem:[#allocation66_spill] sm:$0xff] }
 0x1dd   :  { %v2509_v7 = vadd.f32 %v2508_v23, %v15575_v35 }
 0x1de   :  { %v4263_v57 = vadd.f32 %v4262_v0, %v4261_v25  ;;  %v4295_v11 = vadd.f32 %v4294_v33, %v4073_v46  ;;  %v2653_v53 = vadd.f32 %v2652_v2, %v2604_v3  ;;  %2703 = vmatmul.bf16.gmra.mxu0 %v17912_v4 }
 0x1df   :  { %v2558_v40 = vadd.f32 %v2557_v54, %v2509_v7  ;;  %2752 = vmatmul.bf16.gmra.mxu1 %v17913_v62 }
 0x1e0   :  { %v4739_v24 = vpack.c.bf16 %v4263_v57, %v4263_v57  ;;  %v4296_v17 = vrot.slane %v4295_v11, 2  ;;  %v3887_v8 = vmax.f32 %v2653_v53, 0.0  ;;  %2801 = vmatmul.bf16.gmra.mxu2 %v14692_v14 }
 0x1e1   :  { %2850 = vmatmul.bf16.gmra.mxu3 %v14694_v15 }
 0x1e2   :  { %v5233_v28 = vunpack.c.l.b16 %v4739_v24  ;;  %v4297_v58 = vadd.f32 %v4296_v17, %v4295_v11  ;;  %v4079_v35 = vmul.f32 %v17914_v43, %v3887_v8  ;;  %v17915_v17 = vld [vmem:[#allocation68_spill] sm:$0xff] }
 0x1e3   :  { %v2606_v10 = vpop.f32.mrf.mxu2  ;;  %v2510_v25 = vpop.f32.mrf.mxu0 }
 0x1e4   :  { %v5326_v63 = vsel %vm5314_vm2, %v5233_v28, %v5325_v6  ;;  %v4298_v2 = vrot.slane %v4297_v58, 1  ;;  %v4330_v3 = vrot.slane %v4079_v35, 4  ;;  %v2607_v29 = vadd.f32 %v2606_v10, %v2558_v40  ;;  %v2655_v42 = vpop.f32.mrf.mxu3  ;;  %v2559_v50 = vpop.f32.mrf.mxu1 }
 0x1e5   :  { %v2511_v46 = vadd.f32 %v2510_v25, %v15583_v60  ;;  %v17916_v25 = vld [vmem:[#allocation27_spill] sm:$0xff] }
 0x1e6   :  { %v4299_v0 = vadd.f32 %v4298_v2, %v4297_v58  ;;  %v4331_v33 = vadd.f32 %v4330_v3, %v4079_v35  ;;  %v2656_v23 = vadd.f32 %v2655_v42, %v2607_v29 }
 0x1e7   :  { %v2560_v7 = vadd.f32 %v2559_v50, %v2511_v46  ;;  %v10791_v46 = vld [vmem:[%s17669_s2 + $0x758] sm:$0xf] }
 0x1e8   :  { %v4745_v54 = vpack.c.bf16 %v4299_v0, %v4299_v0  ;;  %v4332_v57 = vrot.slane %v4331_v33, 2  ;;  %v3893_v11 = vmax.f32 %v2656_v23, 0.0  ;;  %v10983_v50 = vld [vmem:[%s17669_s2 + $0x8d8] sm:$0xf]  ;;  %v17917_v23 = vld [vmem:[#allocation28_spill] sm:$0xff] }
 0x1ea   :  { %v5239_v53 = vunpack.c.l.b16 %v4745_v54  ;;  %v4333_v24 = vadd.f32 %v4332_v57, %v4331_v33  ;;  %v4085_v8 = vmul.f32 %v17915_v17, %v3893_v11  ;;  %v10025_v57 = vld [vmem:[%s17669_s2 + $0x170] sm:$0xf0]  ;;  %v13440_v11 = vld [vmem:[%s17669_s2 + $0x2dc] sm:$0xf] }
 0x1eb   :  { %v2608_v6 = vpop.f32.mrf.mxu2  ;;  %v2513_v60 = vpop.f32.mrf.mxu0 }
 0x1ec   :  { %v5327_v28 = vsel %vm5316_vm3, %v5239_v53, %v5326_v63  ;;  %v4334_v40 = vrot.slane %v4333_v24, 1  ;;  %v4366_v10 = vrot.slane %v4085_v8, 4  ;;  %v2609_v15 = vadd.f32 %v2608_v6, %v2560_v7  ;;  %v2657_v14 = vpop.f32.mrf.mxu3  ;;  %v2562_v35 = vpop.f32.mrf.mxu1  ;;  %v13587_v63 = vld [vmem:[%s17669_s2 + $0x76c] sm:$0xf0]  ;;  %v13392_v7 = vld [vmem:[%s17669_s2 + $0x15c] sm:$0xf] }
 0x1ed   :  { %v2514_v58 = vadd.f32 %v2513_v60, %v15640_v48  ;;  %v10217_v53 = vld [vmem:[%s17669_s2 + $0x2f0] sm:$0xf0] }
 0x1ee   :  { %v4335_v2 = vadd.f32 %v4334_v40, %v4333_v24  ;;  %v4367_v3 = vadd.f32 %v4366_v10, %v4085_v8  ;;  %v2658_v29 = vadd.f32 %v2657_v14, %v2609_v15  ;;  %2708 = vmatmul.bf16.gmra.mxu0 %v17916_v25  ;;  %v10792_v14 = vor.u32 %v13587_v63, %v10791_v46  ;;  %v13635_v15 = vld [vmem:[%s17669_s2 + $0x8ec] sm:$0xf0] }
 0x1ef   :  { %v2563_v42 = vadd.f32 %v2562_v35, %v2514_v58  ;;  %2757 = vmatmul.bf16.gmra.mxu1 %v17917_v23  ;;  %v10984_v54 = vor.u32 %v13635_v15, %v10983_v50  ;;  %v10028_v40 = vor.u32 %v13392_v7, %v10025_v57  ;;  %v10220_v60 = vor.u32 %v13440_v11, %v10217_v53  ;;  %v10767_v58 = vld [vmem:[%s17669_s2 + $0x728] sm:$0xf]  ;;  %v13581_v35 = vld [vmem:[%s17669_s2 + $0x73c] sm:$0xf0]  ;;  %v10193_v57 = vld [vmem:[%s17669_s2 + $0x2c0] sm:$0xf0] }
 0x1f0   :  { %v4751_v48 = vpack.c.bf16 %v4335_v2, %v4335_v2  ;;  %v4368_v0 = vrot.slane %v4367_v3, 2  ;;  %v3899_v33 = vmax.f32 %v2658_v29, 0.0  ;;  %2806 = vmatmul.bf16.gmra.mxu2 %v14728_v26  ;;  %2876 = vmatpush.bf16.msra.mxu0 %v10792_v14  ;;  %v10959_v2 = vld [vmem:[%s17669_s2 + $0x8a8] sm:$0xf]  ;;  %v10768_v7 = vor.u32 %v13581_v35, %v10767_v58  ;;  %v13575_v58 = vld [vmem:[%s17669_s2 + $0x70c] sm:$0xf0] }
 0x1f1   :  { %2855 = vmatmul.bf16.gmra.mxu3 %v14730_v27  ;;  %2925 = vmatpush.bf16.msra.mxu1 %v10984_v54  ;;  %v13434_v54 = vld [vmem:[%s17669_s2 + $0x2ac] sm:$0xf]  ;;  %v10935_v35 = vld [vmem:[%s17669_s2 + $0x878] sm:$0xf] }
 0x1f2   :  { %v5245_v24 = vunpack.c.l.b16 %v4751_v48  ;;  %v4369_v8 = vadd.f32 %v4368_v0, %v4367_v3  ;;  %v4091_v6 = vmul.f32 %v15577_v49, %v3899_v33  ;;  %2974 = vmatpush.bf16.msra.mxu2 %v10028_v40  ;;  %v13629_v0 = vld [vmem:[%s17669_s2 + $0x8bc] sm:$0xf0]  ;;  %v13386_v33 = vld [vmem:[%s17669_s2 + $0x12c] sm:$0xf]  ;;  %3023 = vmatpush.bf16.msra.mxu3 %v10220_v60  ;;  %v10743_v60 = vld [vmem:[%s17669_s2 + $0x6f8] sm:$0xf] }
 0x1f3   :  { %v2611_v10 = vpop.f32.mrf.mxu2  ;;  %v2515_v48 = vpop.f32.mrf.mxu0 }
 0x1f4   :  { %v5328_v3 = vsel %vm5318_vm4, %v5245_v24, %v5327_v28  ;;  %v4370_v29 = vrot.slane %v4369_v8, 1  ;;  %v4402_v46 = vrot.slane %v4091_v6, 4  ;;  %v2612_v63 = vadd.f32 %v2611_v10, %v2563_v42  ;;  %v2660_v50 = vpop.f32.mrf.mxu3  ;;  %v2564_v15 = vpop.f32.mrf.mxu1  ;;  %v10001_v42 = vld [vmem:[%s17669_s2 + $0x140] sm:$0xf0]  ;;  %2877 = vmatpush.bf16.msra.mxu0 %v10768_v7  ;;  %v17918_v7 = vld [vmem:[#allocation58_spill] sm:$0xff] }
 0x1f5   :  { %v2516_v14 = vadd.f32 %v2515_v48, %v15694_v56  ;;  %v10960_v28 = vor.u32 %v13629_v0, %v10959_v2  ;;  %v10004_v56 = vor.u32 %v13386_v33, %v10001_v42  ;;  %v10196_v10 = vor.u32 %v13434_v54, %v10193_v57  ;;  %v9977_v48 = vld [vmem:[%s17669_s2 + $0x110] sm:$0xf0]  ;;  %v13428_v0 = vld [vmem:[%s17669_s2 + $0x27c] sm:$0xf] }
 0x1f6   :  { %v4371_v11 = vadd.f32 %v4370_v29, %v4369_v8  ;;  %v4403_v53 = vadd.f32 %v4402_v46, %v4091_v6  ;;  %v2661_v24 = vadd.f32 %v2660_v50, %v2612_v63  ;;  %v10744_v29 = vor.u32 %v13575_v58, %v10743_v60  ;;  %v13623_v46 = vld [vmem:[%s17669_s2 + $0x88c] sm:$0xf0]  ;;  %v13380_v63 = vld [vmem:[%s17669_s2 + $0xfc] sm:$0xf]  ;;  %v10169_v33 = vld [vmem:[%s17669_s2 + $0x290] sm:$0xf0] }
 0x1f7   :  { %v2565_v40 = vadd.f32 %v2564_v15, %v2516_v14  ;;  %2926 = vmatpush.bf16.msra.mxu1 %v10960_v28  ;;  %2975 = vmatpush.bf16.msra.mxu2 %v10004_v56  ;;  %v10936_v50 = vor.u32 %v13623_v46, %v10935_v35  ;;  %v9980_v42 = vor.u32 %v13380_v63, %v9977_v48  ;;  %v10911_v56 = vld [vmem:[%s17669_s2 + $0x848] sm:$0xf]  ;;  %v10145_v48 = vld [vmem:[%s17669_s2 + $0x260] sm:$0xf0] }
 0x1f8   :  { %v4757_v8 = vpack.c.bf16 %v4371_v11, %v4371_v11  ;;  %v4404_v6 = vrot.slane %v4403_v53, 2  ;;  %v3905_v2 = vmax.f32 %v2661_v24, 0.0  ;;  %3024 = vmatpush.bf16.msra.mxu3 %v10196_v10  ;;  %2878 = vmatpush.bf16.msra.mxu0 %v10744_v29  ;;  %v10172_v57 = vor.u32 %v13428_v0, %v10169_v33  ;;  %v10719_v11 = vld [vmem:[%s17669_s2 + $0x6c8] sm:$0xf]  ;;  %v13569_v24 = vld [vmem:[%s17669_s2 + $0x6dc] sm:$0xf0] }
 0x1f9   :  { %v10720_v63 = vor.u32 %v13569_v24, %v10719_v11  ;;  %v10695_v11 = vld [vmem:[%s17669_s2 + $0x698] sm:$0xf]  ;;  %v13563_v24 = vld [vmem:[%s17669_s2 + $0x6ac] sm:$0xf0] }
 0x1fa   :  { %v5251_v14 = vunpack.c.l.b16 %v4757_v8  ;;  %v4405_v15 = vadd.f32 %v4404_v6, %v4403_v53  ;;  %v4097_v28 = vmul.f32 %v17918_v7, %v3905_v2  ;;  %v13617_v6 = vld [vmem:[%s17669_s2 + $0x85c] sm:$0xf0]  ;;  %v13374_v2 = vld [vmem:[%s17669_s2 + $0xcc] sm:$0xf] }
 0x1fb   :  { %v2613_v54 = vpop.f32.mrf.mxu2  ;;  %2927 = vmatpush.bf16.msra.mxu1 %v10936_v50  ;;  %v2518_v8 = vpop.f32.mrf.mxu0  ;;  %2976 = vmatpush.bf16.msra.mxu2 %v9980_v42  ;;  %v13422_v50 = vld [vmem:[%s17669_s2 + $0x24c] sm:$0xf] }
 0x1fc   :  { %v5329_v53 = vsel %vm5320_vm5, %v5251_v14, %v5328_v3  ;;  %v4406_v10 = vrot.slane %v4405_v15, 1  ;;  %v4438_v60 = vrot.slane %v4097_v28, 4  ;;  %v2614_v58 = vadd.f32 %v2613_v54, %v2565_v40  ;;  %v2662_v35 = vpop.f32.mrf.mxu3  ;;  %v2567_v46 = vpop.f32.mrf.mxu1  ;;  %3025 = vmatpush.bf16.msra.mxu3 %v10172_v57  ;;  %v9953_v40 = vld [vmem:[%s17669_s2 + $0xe0] sm:$0xf0]  ;;  %v17919_v54 = vld [vmem:[#allocation29_spill] sm:$0xff]  ;;  %2879 = vmatpush.bf16.msra.mxu0 %v10720_v63 }
 0x1fd   :  { %v2519_v29 = vadd.f32 %v2518_v8, %v15754_v16  ;;  %v10912_v3 = vor.u32 %v13617_v6, %v10911_v56  ;;  %v9956_v16 = vor.u32 %v13374_v2, %v9953_v40  ;;  %v10148_v57 = vor.u32 %v13422_v50, %v10145_v48  ;;  %v9929_v2 = vld [vmem:[%s17669_s2 + $0xb0] sm:$0xf0] }
 0x1fe   :  { %v4407_v0 = vadd.f32 %v4406_v10, %v4405_v15  ;;  %v4439_v33 = vadd.f32 %v4438_v60, %v4097_v28  ;;  %v2663_v14 = vadd.f32 %v2662_v35, %v2614_v58  ;;  %2713 = vmatmul.bf16.gmra.mxu0 %v17919_v54  ;;  %v10887_v15 = vld [vmem:[%s17669_s2 + $0x818] sm:$0xf]  ;;  %v13611_v58 = vld [vmem:[%s17669_s2 + $0x82c] sm:$0xf0]  ;;  %v13368_v35 = vld [vmem:[%s17669_s2 + $0x9c] sm:$0xf]  ;;  %v10696_v8 = vor.u32 %v13563_v24, %v10695_v11 }
 0x1ff   :  { %v2568_v42 = vadd.f32 %v2567_v46, %v2519_v29  ;;  %2928 = vmatpush.bf16.msra.mxu1 %v10912_v3  ;;  %v17920_v60 = vld [vmem:[#allocation30_spill] sm:$0xff]  ;;  %v10888_v6 = vor.u32 %v13611_v58, %v10887_v15  ;;  %v10121_v46 = vld [vmem:[%s17669_s2 + $0x230] sm:$0xf0]  ;;  %2977 = vmatpush.bf16.msra.mxu2 %v9956_v16  ;;  %v9932_v63 = vor.u32 %v13368_v35, %v9929_v2  ;;  %v13557_v11 = vld [vmem:[%s17669_s2 + $0x67c] sm:$0xf0] }
 0x200   :  { %v4763_v28 = vpack.c.bf16 %v4407_v0, %v4407_v0  ;;  %v4440_v56 = vrot.slane %v4439_v33, 2  ;;  %v3911_v10 = vmax.f32 %v2663_v14, 0.0  ;;  %2762 = vmatmul.bf16.gmra.mxu1 %v17920_v60  ;;  %2811 = vmatmul.bf16.gmra.mxu2 %v14854_v36  ;;  %v13416_v29 = vld [vmem:[%s17669_s2 + $0x21c] sm:$0xf]  ;;  %v10671_v14 = vld [vmem:[%s17669_s2 + $0x668] sm:$0xf] }
 0x201   :  { %2860 = vmatmul.bf16.gmra.mxu3 %v14862_v39  ;;  %v10124_v0 = vor.u32 %v13416_v29, %v10121_v46  ;;  %v13362_v58 = vld [vmem:[%s17669_s2 + $0x6c] sm:$0xf]  ;;  %2880 = vmatpush.bf16.msra.mxu0 %v10696_v8  ;;  %v10672_v2 = vor.u32 %v13557_v11, %v10671_v14  ;;  %v10097_v46 = vld [vmem:[%s17669_s2 + $0x200] sm:$0xf0]  ;;  %v10647_v11 = vld [vmem:[%s17669_s2 + $0x638] sm:$0xf] }
 0x202   :  { %v5257_v3 = vunpack.c.l.b16 %v4763_v28  ;;  %v4441_v40 = vadd.f32 %v4440_v56, %v4439_v33  ;;  %v4103_v50 = vmul.f32 %v15523_v51, %v3911_v10  ;;  %3026 = vmatpush.bf16.msra.mxu3 %v10148_v57  ;;  %v10863_v33 = vld [vmem:[%s17669_s2 + $0x7e8] sm:$0xf]  ;;  %v13605_v10 = vld [vmem:[%s17669_s2 + $0x7fc] sm:$0xf0]  ;;  %v13410_v29 = vld [vmem:[%s17669_s2 + $0x1ec] sm:$0xf] }
 0x203   :  { %v2616_v48 = vpop.f32.mrf.mxu2  ;;  %2929 = vmatpush.bf16.msra.mxu1 %v10888_v6  ;;  %v2520_v56 = vpop.f32.mrf.mxu0  ;;  %2978 = vmatpush.bf16.msra.mxu2 %v9932_v63  ;;  %v10100_v14 = vor.u32 %v13410_v29, %v10097_v46  ;;  %v13599_v63 = vld [vmem:[%s17669_s2 + $0x7cc] sm:$0xf0]  ;;  %v10623_v29 = vld [vmem:[%s17669_s2 + $0x608] sm:$0xf]  ;;  %v13545_v46 = vld [vmem:[%s17669_s2 + $0x61c] sm:$0xf0] }
 0x204   :  { %v16031_v24 = vsel %vm5322_vm6, %v5257_v3, %v5329_v53  ;;  %v4442_v16 = vrot.slane %v4441_v40, 1  ;;  %v4474_v57 = vrot.slane %v4103_v50, 4  ;;  %v2617_v15 = vadd.f32 %v2616_v48, %v2568_v42  ;;  %v2665_v28 = vpop.f32.mrf.mxu3  ;;  %v2569_v6 = vpop.f32.mrf.mxu1  ;;  %v9905_v42 = vld [vmem:[%s17669_s2 + $0x80] sm:$0xf0]  ;;  %v17922_v39 = vld [vmem:[#allocation33_spill] sm:$0xff] }
 0x205   :  { %v2521_v35 = vadd.f32 %v2520_v56, %v15808_v20  ;;  %v10864_v53 = vor.u32 %v13605_v10, %v10863_v33  ;;  %v9908_v8 = vor.u32 %v13362_v58, %v9905_v42  ;;  %v13551_v33 = vld [vmem:[%s17669_s2 + $0x64c] sm:$0xf0]  ;;  %v10839_v56 = vld [vmem:[%s17669_s2 + $0x7b8] sm:$0xf]  ;;  %2881 = vmatpush.bf16.msra.mxu0 %v10672_v2  ;;  %v9881_v58 = vld [vmem:[%s17669_s2 + $0x50] sm:$0xf0] }
 0x206   :  { %v4475_v3 = vadd.f32 %v4474_v57, %v4103_v50  ;;  %v2666_v48 = vadd.f32 %v2665_v28, %v2617_v15  ;;  %3027 = vmatpush.bf16.msra.mxu3 %v10124_v0  ;;  %v13356_v0 = vld [vmem:[%s17669_s2 + $0x3c] sm:$0xf]  ;;  %v4443_v15 = vadd.f32 %v4442_v16, %v4441_v40  ;;  %v10648_v28 = vor.u32 %v13551_v33, %v10647_v11 }
 0x207   :  { %v2570_v20 = vadd.f32 %v2569_v6, %v2521_v35  ;;  %2930 = vmatpush.bf16.msra.mxu1 %v10864_v53  ;;  %v10840_v10 = vor.u32 %v13599_v63, %v10839_v56  ;;  %v13404_v35 = vld [vmem:[%s17669_s2 + $0x1bc] sm:$0xf]  ;;  %v10073_v6 = vld [vmem:[%s17669_s2 + $0x1d0] sm:$0xf0]  ;;  %2979 = vmatpush.bf16.msra.mxu2 %v9908_v8  ;;  %v9884_v40 = vor.u32 %v13356_v0, %v9881_v58  ;;  %v13593_v56 = vld [vmem:[%s17669_s2 + $0x79c] sm:$0xf0] }
 0x208   :  { %v4476_v50 = vrot.slane %v4475_v3, 2  ;;  %v3917_v57 = vmax.f32 %v2666_v48, 0.0  ;;  %v10076_v2 = vor.u32 %v13404_v35, %v10073_v6  ;;  %v13398_v35 = vld [vmem:[%s17669_s2 + $0x18c] sm:$0xf]  ;;  %v10049_v6 = vld [vmem:[%s17669_s2 + $0x1a0] sm:$0xf0] }
 0x209   :  { %2882 = vmatpush.bf16.msra.mxu0 %v10648_v28  ;;  %v17921_v28 = vld [vmem:[#allocation32_spill] sm:$0xff] }
 0x20a   :  { %v4477_v53 = vadd.f32 %v4476_v50, %v4475_v3  ;;  %v4109_v42 = vmul.f32 %v15529_v18, %v3917_v57  ;;  %3028 = vmatpush.bf16.msra.mxu3 %v10100_v14  ;;  %v10815_v3 = vld [vmem:[%s17669_s2 + $0x788] sm:$0xf]  ;;  %v13350_v50 = vld [vmem:[%s17669_s2 + $0xc] sm:$0xf]  ;;  %v4769_v57 = vpack.c.bf16 %v4443_v15, %v4443_v15 }
 0x20b   :  { %v2618_v16 = vpop.f32.mrf.mxu2  ;;  %2931 = vmatpush.bf16.msra.mxu1 %v10840_v10  ;;  %v2523_v33 = vpop.f32.mrf.mxu0  ;;  %v10624_v10 = vor.u32 %v13545_v46, %v10623_v29  ;;  %v10816_v58 = vor.u32 %v13593_v56, %v10815_v3  ;;  %2980 = vmatpush.bf16.msra.mxu2 %v9884_v40  ;;  %v10052_v46 = vor.u32 %v13398_v35, %v10049_v6 }
 0x20c   :  { %v4478_v48 = vrot.slane %v4477_v53, 1  ;;  %v4510_v11 = vrot.slane %v4109_v42, 4  ;;  %v2619_v8 = vadd.f32 %v2618_v16, %v2570_v20  ;;  %v2667_v14 = vpop.f32.mrf.mxu3  ;;  %v2524_v63 = vadd.f32 %v2523_v33, %v15818_v55  ;;  %v2572_v0 = vpop.f32.mrf.mxu1  ;;  %v9857_v20 = vld [vmem:[%s17669_s2 + $0x20] sm:$0xf0] }
 0x20d   :  { %v9860_v29 = vor.u32 %v13350_v50, %v9857_v20  ;;  %2883 = vmatpush.bf16.msra.mxu0 %v10624_v10 }
 0x20e   :  { %v4479_v16 = vadd.f32 %v4478_v48, %v4477_v53  ;;  %v4511_v15 = vadd.f32 %v4510_v11, %v4109_v42  ;;  %v2668_v18 = vadd.f32 %v2667_v14, %v2619_v8  ;;  %3029 = vmatpush.bf16.msra.mxu3 %v10076_v2  ;;  %v2573_v55 = vadd.f32 %v2572_v0, %v2524_v63 }
 0x20f   :  { %2718 = vmatmul.bf16.gmra.mxu0 %v17921_v28  ;;  %2932 = vmatpush.bf16.msra.mxu1 %v10816_v58  ;;  %v5263_v53 = vunpack.c.l.b16 %v4769_v57 }
 0x210   :  { %v4775_v3 = vpack.c.bf16 %v4479_v16, %v4479_v16  ;;  %v4512_v33 = vrot.slane %v4511_v15, 2  ;;  %v3923_v56 = vmax.f32 %v2668_v18, 0.0  ;;  %2767 = vmatmul.bf16.gmra.mxu1 %v17922_v39  ;;  %2816 = vmatmul.bf16.gmra.mxu2 %v14977_v61 }
 0x211   :  { %2865 = vmatmul.bf16.gmra.mxu3 %v14988_v5  ;;  %2981 = vmatpush.bf16.msra.mxu2 %v9860_v29 }
 0x212   :  { %v5269_v42 = vunpack.c.l.b16 %v4775_v3  ;;  %v4513_v40 = vadd.f32 %v4512_v33, %v4511_v15  ;;  %v4115_v2 = vmul.f32 %v15539_v12, %v3923_v56  ;;  %3030 = vmatpush.bf16.msra.mxu3 %v10052_v46 }
 0x213   :  { %v2621_v48 = vpop.f32.mrf.mxu2  ;;  %v2525_v63 = vpop.f32.mrf.mxu0 }
 0x214   :  { %v5366_v11 = vsel %vm5310_vm0, %v5269_v42, %v5263_v53  ;;  %v4514_v8 = vrot.slane %v4513_v40, 1  ;;  %v4546_v14 = vrot.slane %v4115_v2, 4  ;;  %v2622_v18 = vadd.f32 %v2621_v48, %v2573_v55  ;;  %v2670_v50 = vpop.f32.mrf.mxu3  ;;  %v2574_v58 = vpop.f32.mrf.mxu1 }
 0x215   :  { %v2526_v0 = vadd.f32 %v2525_v63, %v15824_v34  ;;  %v17923_v63 = vld [vmem:[#allocation36_spill] sm:$0xff] }
 0x216   :  { %v4515_v20 = vadd.f32 %v4514_v8, %v4513_v40  ;;  %v4547_v10 = vadd.f32 %v4546_v14, %v4115_v2  ;;  %v2671_v57 = vadd.f32 %v2670_v50, %v2622_v18 }
 0x217   :  { %v2575_v35 = vadd.f32 %v2574_v58, %v2526_v0 }
 0x218   :  { %v4781_v6 = vpack.c.bf16 %v4515_v20, %v4515_v20  ;;  %v4548_v16 = vrot.slane %v4547_v10, 2  ;;  %v3929_v15 = vmax.f32 %v2671_v57, 0.0 }
 0x21a   :  { %v5275_v29 = vunpack.c.l.b16 %v4781_v6  ;;  %v4549_v46 = vadd.f32 %v4548_v16, %v4547_v10  ;;  %v4121_v3 = vmul.f32 %v15553_v44, %v3929_v15  ;;  %v17924_v10 = vld [vmem:[#allocation37_spill] sm:$0xff] }
 0x21b   :  { %v2623_v33 = vpop.f32.mrf.mxu2  ;;  %v2528_v34 = vpop.f32.mrf.mxu0 }
 0x21c   :  { %v5367_v56 = vsel %vm5312_vm1, %v5275_v29, %v5366_v11  ;;  %v4550_v55 = vrot.slane %v4549_v46, 1  ;;  %v4582_v53 = vrot.slane %v4121_v3, 4  ;;  %v2624_v42 = vadd.f32 %v2623_v33, %v2575_v35  ;;  %v2672_v48 = vpop.f32.mrf.mxu3  ;;  %v2577_v2 = vpop.f32.mrf.mxu1 }
 0x21d   :  { %v2529_v40 = vadd.f32 %v2528_v34, %v15836_v59 }
 0x21e   :  { %v4551_v8 = vadd.f32 %v4550_v55, %v4549_v46  ;;  %v4583_v14 = vadd.f32 %v4582_v53, %v4121_v3  ;;  %v2673_v18 = vadd.f32 %v2672_v48, %v2624_v42 }
 0x21f   :  { %v2578_v50 = vadd.f32 %v2577_v2, %v2529_v40  ;;  %2723 = vmatmul.bf16.gmra.mxu0 %v17923_v63 }
 0x220   :  { %v4787_v0 = vpack.c.bf16 %v4551_v8, %v4551_v8  ;;  %v4584_v58 = vrot.slane %v4583_v14, 2  ;;  %v3935_v20 = vmax.f32 %v2673_v18, 0.0  ;;  %2772 = vmatmul.bf16.gmra.mxu1 %v17924_v10  ;;  %2821 = vmatmul.bf16.gmra.mxu2 %v17893_v45 }
 0x221   :  { %2870 = vmatmul.bf16.gmra.mxu3 %v17894_v22 }
 0x222   :  { %v5281_v11 = vunpack.c.l.b16 %v4787_v0  ;;  %v4585_v57 = vadd.f32 %v4584_v58, %v4583_v14  ;;  %v4127_v59 = vmul.f32 %v15563_v37, %v3935_v20  ;;  %v16119_v14 = vld [vmem:[%s17670_s3] sm:$0x3f]  ;;  %v17938_v37 = vld [vmem:[#allocation52_spill] sm:$0xff] }
 0x223   :  { %v2626_v35 = vpop.f32.mrf.mxu2  ;;  %v2530_v3 = vpop.f32.mrf.mxu0 }
 0x224   :  { %v5368_v6 = vsel %vm5314_vm2, %v5281_v11, %v5367_v56  ;;  %v4586_v16 = vrot.slane %v4585_v57, 1  ;;  %v4618_v15 = vrot.slane %v4127_v59, 4  ;;  %v2627_v29 = vadd.f32 %v2626_v35, %v2578_v50  ;;  %v2675_v46 = vpop.f32.mrf.mxu3  ;;  %v2579_v55 = vpop.f32.mrf.mxu1 }
 0x225   :  { %v2531_v33 = vadd.f32 %v2530_v3, %v15844_v13  ;;  %v16122_v56 = vperm.slane %v16119_v14, 2 }
 0x226   :  { %v4587_v53 = vadd.f32 %v4586_v16, %v4585_v57  ;;  %v4619_v42 = vadd.f32 %v4618_v15, %v4127_v59  ;;  %v2676_v48 = vadd.f32 %v2675_v46, %v2627_v29 }
 0x227   :  { %v2580_v34 = vadd.f32 %v2579_v55, %v2531_v33  ;;  %v17925_v55 = vld [vmem:[#allocation40_spill] sm:$0xff] }
 0x228   :  { %v4793_v40 = vpack.c.bf16 %v4587_v53, %v4587_v53  ;;  %v4620_v2 = vrot.slane %v4619_v42, 2  ;;  %v3941_v8 = vmax.f32 %v2676_v48, 0.0 }
 0x22a   :  { %v5287_v18 = vunpack.c.l.b16 %v4793_v40  ;;  %v4621_v50 = vadd.f32 %v4620_v2, %v4619_v42  ;;  %v4133_v13 = vmul.f32 %v15829_v19, %v3941_v8  ;;  %v17926_v40 = vld [vmem:[#allocation41_spill] sm:$0xff] }
 0x22b   :  { %v2628_v0 = vpop.f32.mrf.mxu2  ;;  %v2689_v35 = vpop.f32.mrf.mxu0 }
 0x22c   :  { %v5369_v58 = vsel %vm5316_vm3, %v5287_v18, %v5368_v6  ;;  %v4622_v20 = vrot.slane %v4621_v50, 1  ;;  %v4654_v11 = vrot.slane %v4133_v13, 4  ;;  %v2629_v57 = vadd.f32 %v2628_v0, %v2580_v34  ;;  %v2677_v59 = vpop.f32.mrf.mxu3  ;;  %v2738_v15 = vpop.f32.mrf.mxu1 }
 0x22d   :  { %v2690_v16 = vadd.f32 %v2689_v35, %v16122_v56 }
 0x22e   :  { %v4623_v29 = vadd.f32 %v4622_v20, %v4621_v50  ;;  %v4655_v46 = vadd.f32 %v4654_v11, %v4133_v13  ;;  %v2678_v3 = vadd.f32 %v2677_v59, %v2629_v57 }
 0x22f   :  { %v2739_v33 = vadd.f32 %v2738_v15, %v2690_v16  ;;  %2884 = vmatmul.bf16.vlgmr.msra.gmra.mxu0 %v17925_v55 }
 0x230   :  { %v4799_v53 = vpack.c.bf16 %v4623_v29, %v4623_v29  ;;  %v4656_v42 = vrot.slane %v4655_v46, 2  ;;  %v3947_v48 = vmax.f32 %v2678_v3, 0.0  ;;  %2933 = vmatmul.bf16.vlgmr.msra.gmra.mxu1 %v17926_v40  ;;  %2982 = vmatmul.bf16.vlgmr.msra.gmra.mxu2 %v17897_v47 }
 0x231   :  { %3031 = vmatmul.bf16.vlgmr.msra.gmra.mxu3 %v17898_v21 }
 0x232   :  { %v5293_v6 = vunpack.c.l.b16 %v4799_v53  ;;  %v4657_v34 = vadd.f32 %v4656_v42, %v4655_v46  ;;  %v4139_v2 = vmul.f32 %v15838_v52, %v3947_v48 }
 0x233   :  { %v2787_v8 = vpop.f32.mrf.mxu2  ;;  %v2691_v11 = vpop.f32.mrf.mxu0 }
 0x234   :  { %v5370_v18 = vsel %vm5318_vm4, %v5293_v6, %v5369_v58  ;;  %v4658_v50 = vrot.slane %v4657_v34, 1  ;;  %v4690_v13 = vrot.slane %v4139_v2, 4  ;;  %v2788_v0 = vadd.f32 %v2787_v8, %v2739_v33  ;;  %v2836_v20 = vpop.f32.mrf.mxu3  ;;  %v2740_v59 = vpop.f32.mrf.mxu1 }
 0x235   :  { %v2692_v57 = vadd.f32 %v2691_v11, %v16122_v56 }
 0x236   :  { %v4659_v35 = vadd.f32 %v4658_v50, %v4657_v34  ;;  %v4691_v16 = vadd.f32 %v4690_v13, %v4139_v2  ;;  %v16134_v15 = vadd.f32 %v2836_v20, %v2788_v0  ;;  %v17927_v50 = vld [vmem:[#allocation42_spill] sm:$0xff]  ;;  %v17928_v0 = vld [vmem:[#allocation43_spill] sm:$0xff] }
 0x237   :  { %v2741_v29 = vadd.f32 %v2740_v59, %v2692_v57 }
 0x238   :  { %v4805_v3 = vpack.c.bf16 %v4659_v35, %v4659_v35  ;;  %v4692_v46 = vrot.slane %v4691_v16, 2 }
 0x23a   :  { %v5299_v53 = vunpack.c.l.b16 %v4805_v3  ;;  %v4693_v42 = vadd.f32 %v4692_v46, %v4691_v16 }
 0x23b   :  { %v2789_v48 = vpop.f32.mrf.mxu2  ;;  %v2694_v8 = vpop.f32.mrf.mxu0 }
 0x23c   :  { %v5371_v58 = vsel %vm5320_vm5, %v5299_v53, %v5370_v18  ;;  %v4694_v6 = vrot.slane %v4693_v42, 1  ;;  %v2790_v21 = vadd.f32 %v2789_v48, %v2741_v29  ;;  %v2838_v33 = vpop.f32.mrf.mxu3  ;;  %v2695_v47 = vadd.f32 %v2694_v8, %v16122_v56  ;;  %v2743_v11 = vpop.f32.mrf.mxu1 }
 0x23e   :  { %v4695_v52 = vadd.f32 %v4694_v6, %v4693_v42  ;;  %v16138_v34 = vadd.f32 %v2838_v33, %v2790_v21  ;;  %v2744_v2 = vadd.f32 %v2743_v11, %v2695_v47  ;;  %v17930_v11 = vld [vmem:[#allocation44_spill] sm:$0xff] }
 0x23f   :  { %2889 = vmatmul.bf16.gmra.mxu0 %v17927_v50 }
 0x240   :  { %v4811_v13 = vpack.c.bf16 %v4695_v52, %v4695_v52  ;;  %2938 = vmatmul.bf16.gmra.mxu1 %v17928_v0  ;;  %2987 = vmatmul.bf16.gmra.mxu2 %v17903_v38  ;;  %v17936_v38 = vld [vmem:[#allocation50_spill] sm:$0xff] }
 0x241   :  { %3036 = vmatmul.bf16.gmra.mxu3 %v17904_v31 }
 0x242   :  { %v5305_v18 = vunpack.c.l.b16 %v4811_v13 }
 0x243   :  { %v2792_v20 = vpop.f32.mrf.mxu2  ;;  %v2696_v16 = vpop.f32.mrf.mxu0 }
 0x244   :  { %v5372_v57 = vsel %vm5322_vm6, %v5305_v18, %v5371_v58  ;;  %v2793_v59 = vadd.f32 %v2792_v20, %v2744_v2  ;;  %v2841_v35 = vpop.f32.mrf.mxu3  ;;  %v2697_v47 = vadd.f32 %v2696_v16, %v16122_v56  ;;  %v2745_v29 = vpop.f32.mrf.mxu1 }
 0x245   :  { %v16146_v21 = vpack.c.b16 %v5372_v57, %v16031_v24  ;;  %v17931_v24 = vld [vmem:[#allocation45_spill] sm:$0xff] }
 0x246   :  { %v16149_v52 = vadd.f32 %v2841_v35, %v2793_v59  ;;  %v2746_v3 = vadd.f32 %v2745_v29, %v2697_v47 }
 0x247   :  { %17929 = vst [vmem:[#allocation61_spill] sm:$0xff] %v16146_v21 }
 0x24b   :  { %v2794_v46 = vpop.f32.mrf.mxu2  ;;  %v2699_v48 = vpop.f32.mrf.mxu0 }
 0x24c   :  { %v2795_v53 = vadd.f32 %v2794_v46, %v2746_v3  ;;  %v2843_v42 = vpop.f32.mrf.mxu3  ;;  %v2700_v6 = vadd.f32 %v2699_v48, %v16122_v56  ;;  %v2748_v33 = vpop.f32.mrf.mxu1 }
 0x24e   :  { %v16152_v58 = vadd.f32 %v2843_v42, %v2795_v53  ;;  %v2749_v8 = vadd.f32 %v2748_v33, %v2700_v6  ;;  %v17932_v33 = vld [vmem:[#allocation46_spill] sm:$0xff] }
 0x24f   :  { %2894 = vmatmul.bf16.gmra.mxu0 %v17930_v11 }
 0x250   :  { %2943 = vmatmul.bf16.gmra.mxu1 %v17931_v24  ;;  %2992 = vmatmul.bf16.gmra.mxu2 %v17909_v32 }
 0x251   :  { %3041 = vmatmul.bf16.gmra.mxu3 %v17910_v30  ;;  %v17934_v30 = vld [vmem:[#allocation48_spill] sm:$0xff] }
 0x253   :  { %v2797_v2 = vpop.f32.mrf.mxu2  ;;  %v2701_v20 = vpop.f32.mrf.mxu0 }
 0x254   :  { %v2798_v13 = vadd.f32 %v2797_v2, %v2749_v8  ;;  %v2846_v18 = vpop.f32.mrf.mxu3  ;;  %v2702_v57 = vadd.f32 %v2701_v20, %v16122_v56  ;;  %v2750_v59 = vpop.f32.mrf.mxu1  ;;  %v17933_v8 = vld [vmem:[#allocation47_spill] sm:$0xff] }
 0x256   :  { %v16159_v35 = vadd.f32 %v2846_v18, %v2798_v13  ;;  %v2751_v16 = vadd.f32 %v2750_v59, %v2702_v57 }
 0x25b   :  { %v2799_v47 = vpop.f32.mrf.mxu2  ;;  %v2704_v46 = vpop.f32.mrf.mxu0 }
 0x25c   :  { %v2800_v29 = vadd.f32 %v2799_v47, %v2751_v16  ;;  %v2848_v3 = vpop.f32.mrf.mxu3  ;;  %v2705_v53 = vadd.f32 %v2704_v46, %v16122_v56  ;;  %v2753_v42 = vpop.f32.mrf.mxu1 }
 0x25e   :  { %v16162_v48 = vadd.f32 %v2848_v3, %v2800_v29  ;;  %v2754_v6 = vadd.f32 %v2753_v42, %v2705_v53 }
 0x25f   :  { %2899 = vmatmul.bf16.gmra.mxu0 %v17932_v33 }
 0x260   :  { %2948 = vmatmul.bf16.gmra.mxu1 %v17933_v8  ;;  %2997 = vmatmul.bf16.gmra.mxu2 %v17912_v4 }
 0x261   :  { %3046 = vmatmul.bf16.gmra.mxu3 %v17913_v62 }
 0x263   :  { %v2802_v2 = vpop.f32.mrf.mxu2  ;;  %v2706_v20 = vpop.f32.mrf.mxu0 }
 0x264   :  { %v2803_v13 = vadd.f32 %v2802_v2, %v2754_v6  ;;  %v2851_v18 = vpop.f32.mrf.mxu3  ;;  %v2707_v57 = vadd.f32 %v2706_v20, %v16122_v56  ;;  %v2755_v59 = vpop.f32.mrf.mxu1  ;;  %v13488_v6 = vld [vmem:[%s17669_s2 + $0x45c] sm:$0xf]  ;;  %v10409_v2 = vld [vmem:[%s17669_s2 + $0x470] sm:$0xf0] }
 0x265   :  { %v10412_v20 = vor.u32 %v13488_v6, %v10409_v2  ;;  %v13482_v6 = vld [vmem:[%s17669_s2 + $0x42c] sm:$0xf]  ;;  %v10385_v2 = vld [vmem:[%s17669_s2 + $0x440] sm:$0xf0] }
 0x266   :  { %v16169_v16 = vadd.f32 %v2851_v18, %v2803_v13  ;;  %v2756_v47 = vadd.f32 %v2755_v59, %v2707_v57  ;;  %v13536_v13 = vld [vmem:[%s17669_s2 + $0x5dc] sm:$0xf]  ;;  %v17935_v18 = vld [vmem:[#allocation49_spill] sm:$0xff] }
 0x267   :  { %v13584_v57 = vld [vmem:[%s17669_s2 + $0x75c] sm:$0xf]  ;;  %v10793_v59 = vld [vmem:[%s17669_s2 + $0x770] sm:$0xf0]  ;;  %3072 = vmatpush.bf16.msrb.mxu0 %v10412_v20  ;;  %v10388_v20 = vor.u32 %v13482_v6, %v10385_v2  ;;  %v10961_v6 = vld [vmem:[%s17669_s2 + $0x8c0] sm:$0xf0] }
 0x26b   :  { %v2804_v29 = vpop.f32.mrf.mxu2  ;;  %v2709_v53 = vpop.f32.mrf.mxu0  ;;  %3073 = vmatpush.bf16.msrb.mxu0 %v10388_v20  ;;  %v10745_v20 = vld [vmem:[%s17669_s2 + $0x710] sm:$0xf0] }
 0x26c   :  { %v2805_v3 = vadd.f32 %v2804_v29, %v2756_v47  ;;  %v2853_v46 = vpop.f32.mrf.mxu3  ;;  %v2710_v42 = vadd.f32 %v2709_v53, %v16122_v56  ;;  %v2758_v21 = vpop.f32.mrf.mxu1  ;;  %v10796_v29 = vor.u32 %v13584_v57, %v10793_v59 }
 0x26e   :  { %v16172_v4 = vadd.f32 %v2853_v46, %v2805_v3  ;;  %v2759_v62 = vadd.f32 %v2758_v21, %v2710_v42  ;;  %v10601_v21 = vld [vmem:[%s17669_s2 + $0x5f0] sm:$0xf0]  ;;  %v13632_v3 = vld [vmem:[%s17669_s2 + $0x8dc] sm:$0xf]  ;;  %3170 = vmatpush.bf16.msrb.mxu2 %v10796_v29  ;;  %v13578_v29 = vld [vmem:[%s17669_s2 + $0x72c] sm:$0xf] }
 0x26f   :  { %2904 = vmatmul.bf16.gmra.mxu0 %v17934_v30  ;;  %v10604_v47 = vor.u32 %v13536_v13, %v10601_v21  ;;  %v10985_v46 = vld [vmem:[%s17669_s2 + $0x8f0] sm:$0xf0]  ;;  %v13530_v13 = vld [vmem:[%s17669_s2 + $0x5ac] sm:$0xf] }
 0x270   :  { %2953 = vmatmul.bf16.gmra.mxu1 %v17935_v18  ;;  %3002 = vmatmul.bf16.gmra.mxu2 %v17916_v25  ;;  %v10988_v53 = vor.u32 %v13632_v3, %v10985_v46  ;;  %v10769_v3 = vld [vmem:[%s17669_s2 + $0x740] sm:$0xf0] }
 0x271   :  { %3051 = vmatmul.bf16.gmra.mxu3 %v17917_v23  ;;  %3121 = vmatpush.bf16.msrb.mxu1 %v10604_v47  ;;  %v10577_v47 = vld [vmem:[%s17669_s2 + $0x5c0] sm:$0xf0] }
 0x272   :  { %3219 = vmatpush.bf16.msrb.mxu3 %v10988_v53  ;;  %v13626_v53 = vld [vmem:[%s17669_s2 + $0x8ac] sm:$0xf] }
 0x273   :  { %v2807_v42 = vpop.f32.mrf.mxu2  ;;  %v2711_v59 = vpop.f32.mrf.mxu0  ;;  %v10964_v25 = vor.u32 %v13626_v53, %v10961_v6  ;;  %v13470_v53 = vld [vmem:[%s17669_s2 + $0x3cc] sm:$0xf]  ;;  %v10337_v6 = vld [vmem:[%s17669_s2 + $0x3e0] sm:$0xf0] }
 0x274   :  { %v2808_v21 = vadd.f32 %v2807_v42, %v2759_v62  ;;  %v2856_v57 = vpop.f32.mrf.mxu3  ;;  %v2712_v46 = vadd.f32 %v2711_v59, %v16122_v56  ;;  %v2760_v23 = vpop.f32.mrf.mxu1  ;;  %v10580_v62 = vor.u32 %v13530_v13, %v10577_v47  ;;  %v10772_v42 = vor.u32 %v13578_v29, %v10769_v3  ;;  %v13476_v13 = vld [vmem:[%s17669_s2 + $0x3fc] sm:$0xf]  ;;  %v10361_v59 = vld [vmem:[%s17669_s2 + $0x410] sm:$0xf0] }
 0x275   :  { %v13524_v47 = vld [vmem:[%s17669_s2 + $0x57c] sm:$0xf] }
 0x276   :  { %v16227_v2 = vadd.f32 %v2856_v57, %v2808_v21  ;;  %v2761_v32 = vadd.f32 %v2760_v23, %v2712_v46  ;;  %3122 = vmatpush.bf16.msrb.mxu1 %v10580_v62  ;;  %3171 = vmatpush.bf16.msrb.mxu2 %v10772_v42  ;;  %v10364_v21 = vor.u32 %v13476_v13, %v10361_v59  ;;  %v10553_v23 = vld [vmem:[%s17669_s2 + $0x590] sm:$0xf0]  ;;  %v13572_v57 = vld [vmem:[%s17669_s2 + $0x6fc] sm:$0xf]  ;;  %v13518_v13 = vld [vmem:[%s17669_s2 + $0x54c] sm:$0xf] }
 0x277   :  { %3220 = vmatpush.bf16.msrb.mxu3 %v10964_v25  ;;  %v10556_v29 = vor.u32 %v13524_v47, %v10553_v23  ;;  %v10748_v3 = vor.u32 %v13572_v57, %v10745_v20  ;;  %v13620_v46 = vld [vmem:[%s17669_s2 + $0x87c] sm:$0xf]  ;;  %v10937_v25 = vld [vmem:[%s17669_s2 + $0x890] sm:$0xf0]  ;;  %v10529_v57 = vld [vmem:[%s17669_s2 + $0x560] sm:$0xf0] }
 0x278   :  { %3074 = vmatpush.bf16.msrb.mxu0 %v10364_v21  ;;  %v10940_v62 = vor.u32 %v13620_v46, %v10937_v25  ;;  %v10340_v21 = vor.u32 %v13470_v53, %v10337_v6  ;;  %v13566_v20 = vld [vmem:[%s17669_s2 + $0x6cc] sm:$0xf] }
 0x27a   :  { %3123 = vmatpush.bf16.msrb.mxu1 %v10556_v29  ;;  %3172 = vmatpush.bf16.msrb.mxu2 %v10748_v3  ;;  %v10721_v29 = vld [vmem:[%s17669_s2 + $0x6e0] sm:$0xf0] }
 0x27b   :  { %v2809_v42 = vpop.f32.mrf.mxu2  ;;  %v2714_v23 = vpop.f32.mrf.mxu0  ;;  %3221 = vmatpush.bf16.msrb.mxu3 %v10940_v62  ;;  %v10724_v25 = vor.u32 %v13566_v20, %v10721_v29  ;;  %v13614_v62 = vld [vmem:[%s17669_s2 + $0x84c] sm:$0xf]  ;;  %v13560_v20 = vld [vmem:[%s17669_s2 + $0x69c] sm:$0xf]  ;;  %v10697_v29 = vld [vmem:[%s17669_s2 + $0x6b0] sm:$0xf0] }
 0x27c   :  { %v2810_v59 = vadd.f32 %v2809_v42, %v2761_v32  ;;  %v2858_v47 = vpop.f32.mrf.mxu3  ;;  %v2715_v3 = vadd.f32 %v2714_v23, %v16122_v56  ;;  %v10532_v32 = vor.u32 %v13518_v13, %v10529_v57  ;;  %v10913_v42 = vld [vmem:[%s17669_s2 + $0x860] sm:$0xf0]  ;;  %3075 = vmatpush.bf16.msrb.mxu0 %v10340_v21  ;;  %v13464_v13 = vld [vmem:[%s17669_s2 + $0x39c] sm:$0xf]  ;;  %v10313_v23 = vld [vmem:[%s17669_s2 + $0x3b0] sm:$0xf0] }
 0x27d   :  { %v2763_v46 = vpop.f32.mrf.mxu1  ;;  %v10916_v6 = vor.u32 %v13614_v62, %v10913_v42  ;;  %v13512_v57 = vld [vmem:[%s17669_s2 + $0x51c] sm:$0xf]  ;;  %v10505_v21 = vld [vmem:[%s17669_s2 + $0x530] sm:$0xf0] }
 0x27e   :  { %v16278_v53 = vadd.f32 %v2858_v47, %v2810_v59  ;;  %v2764_v31 = vadd.f32 %v2763_v46, %v2715_v3  ;;  %3124 = vmatpush.bf16.msrb.mxu1 %v10532_v32  ;;  %v17937_v59 = vld [vmem:[#allocation51_spill] sm:$0xff]  ;;  %v10316_v47 = vor.u32 %v13464_v13, %v10313_v23  ;;  %3173 = vmatpush.bf16.msrb.mxu2 %v10724_v25  ;;  %v13608_v32 = vld [vmem:[%s17669_s2 + $0x81c] sm:$0xf]  ;;  %v10889_v62 = vld [vmem:[%s17669_s2 + $0x830] sm:$0xf0] }
 0x27f   :  { %2909 = vmatmul.bf16.gmra.mxu0 %v17936_v38  ;;  %v10508_v3 = vor.u32 %v13512_v57, %v10505_v21  ;;  %v10700_v46 = vor.u32 %v13560_v20, %v10697_v29  ;;  %3222 = vmatpush.bf16.msrb.mxu3 %v10916_v6  ;;  %v10892_v42 = vor.u32 %v13608_v32, %v10889_v62  ;;  %v13458_v23 = vld [vmem:[%s17669_s2 + $0x36c] sm:$0xf]  ;;  %v10289_v25 = vld [vmem:[%s17669_s2 + $0x380] sm:$0xf0] }
 0x280   :  { %2958 = vmatmul.bf16.gmra.mxu1 %v17937_v59  ;;  %3007 = vmatmul.bf16.gmra.mxu2 %v17919_v54  ;;  %v13506_v57 = vld [vmem:[%s17669_s2 + $0x4ec] sm:$0xf]  ;;  %v10292_v6 = vor.u32 %v13458_v23, %v10289_v25  ;;  %v10673_v32 = vld [vmem:[%s17669_s2 + $0x680] sm:$0xf0] }
 0x281   :  { %3056 = vmatmul.bf16.gmra.mxu3 %v17920_v60  ;;  %3076 = vmatpush.bf16.msrb.mxu0 %v10316_v47  ;;  %v10481_v47 = vld [vmem:[%s17669_s2 + $0x500] sm:$0xf0]  ;;  %v13602_v23 = vld [vmem:[%s17669_s2 + $0x7ec] sm:$0xf] }
 0x282   :  { %3125 = vmatpush.bf16.msrb.mxu1 %v10508_v3  ;;  %v13554_v3 = vld [vmem:[%s17669_s2 + $0x66c] sm:$0xf]  ;;  %3174 = vmatpush.bf16.msrb.mxu2 %v10700_v46  ;;  %v10865_v25 = vld [vmem:[%s17669_s2 + $0x800] sm:$0xf0]  ;;  %v13452_v46 = vld [vmem:[%s17669_s2 + $0x33c] sm:$0xf] }
 0x283   :  { %v2812_v13 = vpop.f32.mrf.mxu2  ;;  %v2716_v29 = vpop.f32.mrf.mxu0  ;;  %3223 = vmatpush.bf16.msrb.mxu3 %v10892_v42  ;;  %v10868_v19 = vor.u32 %v13602_v23, %v10865_v25  ;;  %v10457_v42 = vld [vmem:[%s17669_s2 + $0x4d0] sm:$0xf0]  ;;  %v13446_v23 = vld [vmem:[%s17669_s2 + $0x30c] sm:$0xf] }
 0x284   :  { %v2813_v21 = vadd.f32 %v2812_v13, %v2764_v31  ;;  %v2861_v20 = vpop.f32.mrf.mxu3  ;;  %v2717_v62 = vadd.f32 %v2716_v29, %v16122_v56  ;;  %v10484_v31 = vor.u32 %v13506_v57, %v10481_v47  ;;  %v10676_v13 = vor.u32 %v13554_v3, %v10673_v32  ;;  %v10265_v57 = vld [vmem:[%s17669_s2 + $0x350] sm:$0xf0]  ;;  %v13500_v29 = vld [vmem:[%s17669_s2 + $0x4bc] sm:$0xf]  ;;  %v13494_v25 = vld [vmem:[%s17669_s2 + $0x48c] sm:$0xf] }
 0x285   :  { %v2765_v60 = vpop.f32.mrf.mxu1  ;;  %3077 = vmatpush.bf16.msrb.mxu0 %v10292_v6  ;;  %v10268_v47 = vor.u32 %v13452_v46, %v10265_v57  ;;  %v13596_v3 = vld [vmem:[%s17669_s2 + $0x7bc] sm:$0xf]  ;;  %v10841_v32 = vld [vmem:[%s17669_s2 + $0x7d0] sm:$0xf0] }
 0x286   :  { %v16333_v54 = vadd.f32 %v2861_v20, %v2813_v21  ;;  %v2766_v22 = vadd.f32 %v2765_v60, %v2717_v62  ;;  %3126 = vmatpush.bf16.msrb.mxu1 %v10484_v31  ;;  %v13548_v60 = vld [vmem:[%s17669_s2 + $0x63c] sm:$0xf]  ;;  %v10649_v21 = vld [vmem:[%s17669_s2 + $0x650] sm:$0xf0]  ;;  %3175 = vmatpush.bf16.msrb.mxu2 %v10676_v13  ;;  %v10460_v20 = vor.u32 %v13500_v29, %v10457_v42  ;;  %v10241_v13 = vld [vmem:[%s17669_s2 + $0x320] sm:$0xf0] }
 0x287   :  { %v10652_v6 = vor.u32 %v13548_v60, %v10649_v21  ;;  %3224 = vmatpush.bf16.msrb.mxu3 %v10868_v19  ;;  %v10844_v62 = vor.u32 %v13596_v3, %v10841_v32  ;;  %v10244_v19 = vor.u32 %v13446_v23, %v10241_v13  ;;  %v13542_v42 = vld [vmem:[%s17669_s2 + $0x60c] sm:$0xf]  ;;  %v10625_v60 = vld [vmem:[%s17669_s2 + $0x620] sm:$0xf0] }
 0x288   :  { %v10628_v3 = vor.u32 %v13542_v42, %v10625_v60  ;;  %v13590_v32 = vld [vmem:[%s17669_s2 + $0x78c] sm:$0xf] }
 0x289   :  { %3078 = vmatpush.bf16.msrb.mxu0 %v10268_v47  ;;  %v10433_v47 = vld [vmem:[%s17669_s2 + $0x4a0] sm:$0xf0] }
 0x28a   :  { %3127 = vmatpush.bf16.msrb.mxu1 %v10460_v20  ;;  %3176 = vmatpush.bf16.msrb.mxu2 %v10652_v6  ;;  %v17939_v6 = vld [vmem:[#allocation53_spill] sm:$0xff] }
 0x28b   :  { %v2814_v31 = vpop.f32.mrf.mxu2  ;;  %3225 = vmatpush.bf16.msrb.mxu3 %v10844_v62 }
 0x28c   :  { %v2815_v46 = vadd.f32 %v2814_v31, %v2766_v22  ;;  %v2863_v57 = vpop.f32.mrf.mxu3  ;;  %v2719_v29 = vpop.f32.mrf.mxu0  ;;  %v10436_v22 = vor.u32 %v13494_v25, %v10433_v47  ;;  %v10817_v31 = vld [vmem:[%s17669_s2 + $0x7a0] sm:$0xf0] }
 0x28d   :  { %v2720_v21 = vadd.f32 %v2719_v29, %v16122_v56  ;;  %v2768_v20 = vpop.f32.mrf.mxu1  ;;  %3079 = vmatpush.bf16.msrb.mxu0 %v10244_v19  ;;  %v10820_v13 = vor.u32 %v13590_v32, %v10817_v31 }
 0x28e   :  { %v16384_v23 = vadd.f32 %v2863_v57, %v2815_v46  ;;  %3128 = vmatpush.bf16.msrb.mxu1 %v10436_v22  ;;  %3177 = vmatpush.bf16.msrb.mxu2 %v10628_v3 }
 0x28f   :  { %v2769_v45 = vadd.f32 %v2768_v20, %v2720_v21  ;;  %2914 = vmatmul.bf16.gmra.mxu0 %v17938_v37  ;;  %3226 = vmatpush.bf16.msrb.mxu3 %v10820_v13  ;;  %v17940_v13 = vld [vmem:[#allocation54_spill] sm:$0xff] }
 0x290   :  { %2963 = vmatmul.bf16.gmra.mxu1 %v17939_v6  ;;  %3012 = vmatmul.bf16.gmra.mxu2 %v17921_v28 }
 0x291   :  { %3061 = vmatmul.bf16.gmra.mxu3 %v17922_v39 }
 0x293   :  { %v2817_v25 = vpop.f32.mrf.mxu2 }
 0x294   :  { %v2818_v29 = vadd.f32 %v2817_v25, %v2769_v45  ;;  %v2866_v47 = vpop.f32.mrf.mxu3  ;;  %v2721_v46 = vpop.f32.mrf.mxu0  ;;  %v17941_v45 = vld [vmem:[#allocation55_spill] sm:$0xff] }
 0x295   :  { %v2722_v62 = vadd.f32 %v2721_v46, %v16122_v56  ;;  %v2770_v57 = vpop.f32.mrf.mxu1 }
 0x296   :  { %v16391_v19 = vadd.f32 %v2866_v47, %v2818_v29 }
 0x297   :  { %v2771_v42 = vadd.f32 %v2770_v57, %v2722_v62 }
 0x29b   :  { %v2819_v60 = vpop.f32.mrf.mxu2 }
 0x29c   :  { %v2820_v21 = vadd.f32 %v2819_v60, %v2771_v42  ;;  %v2868_v20 = vpop.f32.mrf.mxu3  ;;  %v2724_v22 = vpop.f32.mrf.mxu0 }
 0x29d   :  { %v2725_v32 = vadd.f32 %v2724_v22, %v16122_v56  ;;  %v2773_v31 = vpop.f32.mrf.mxu1 }
 0x29e   :  { %v16394_v39 = vadd.f32 %v2868_v20, %v2820_v21 }
 0x29f   :  { %v2774_v3 = vadd.f32 %v2773_v31, %v2725_v32  ;;  %2919 = vmatmul.bf16.gmra.mxu0 %v17940_v13 }
 0x2a0   :  { %2968 = vmatmul.bf16.gmra.mxu1 %v17941_v45  ;;  %3017 = vmatmul.bf16.gmra.mxu2 %v17923_v63  ;;  %v17943_v45 = vld [vmem:[#allocation13_spill] sm:$0xff] }
 0x2a1   :  { %3066 = vmatmul.bf16.gmra.mxu3 %v17924_v10 }
 0x2a3   :  { %v2822_v25 = vpop.f32.mrf.mxu2 }
 0x2a4   :  { %v2823_v29 = vadd.f32 %v2822_v25, %v2774_v3  ;;  %v2871_v47 = vpop.f32.mrf.mxu3  ;;  %v2726_v46 = vpop.f32.mrf.mxu0  ;;  %v17944_v3 = vld [vmem:[#allocation14_spill] sm:$0xff] }
 0x2a5   :  { %v2727_v62 = vadd.f32 %v2726_v46, %v16122_v56  ;;  %v2775_v57 = vpop.f32.mrf.mxu1  ;;  %v16410_v56 = vperm.slane %v16119_v14, 3 }
 0x2a6   :  { %v16401_v42 = vadd.f32 %v2871_v47, %v2823_v29  ;;  %v17945_v29 = vld [vmem:[#allocation56_spill] sm:$0xff] }
 0x2a7   :  { %v2776_v60 = vadd.f32 %v2775_v57, %v2727_v62 }
 0x2ab   :  { %v2824_v21 = vpop.f32.mrf.mxu2 }
 0x2ac   :  { %v2825_v20 = vadd.f32 %v2824_v21, %v2776_v60  ;;  %v2873_v22 = vpop.f32.mrf.mxu3  ;;  %v2885_v32 = vpop.f32.mrf.mxu0 }
 0x2ad   :  { %v2886_v31 = vadd.f32 %v2885_v32, %v16134_v15  ;;  %v2934_v28 = vpop.f32.mrf.mxu1 }
 0x2ae   :  { %v16404_v63 = vadd.f32 %v2873_v22, %v2825_v20 }
 0x2af   :  { %v2935_v10 = vadd.f32 %v2934_v28, %v2886_v31  ;;  %3080 = vmatmul.bf16.vlgmr.msrb.gmra.mxu0 %v17943_v45 }
 0x2b0   :  { %17942 = vst [vmem:[#allocation66_spill] sm:$0xff] %v16404_v63  ;;  %3129 = vmatmul.bf16.vlgmr.msrb.gmra.mxu1 %v17944_v3  ;;  %3178 = vmatmul.bf16.vlgmr.msrb.gmra.mxu2 %v17925_v55  ;;  %v17946_v55 = vld [vmem:[#allocation57_spill] sm:$0xff] }
 0x2b1   :  { %v3858_v25 = vmax.f32 %v2935_v10, 0.0  ;;  %3227 = vmatmul.bf16.vlgmr.msrb.gmra.mxu3 %v17926_v40 }
 0x2b3   :  { %v4050_v47 = vmul.f32 %v17945_v29, %v3858_v25  ;;  %v2983_v46 = vpop.f32.mrf.mxu2 }
 0x2b4   :  { %v2984_v15 = vadd.f32 %v2983_v46, %v16410_v56  ;;  %v3032_v62 = vpop.f32.mrf.mxu3  ;;  %v2887_v57 = vpop.f32.mrf.mxu0 }
 0x2b5   :  { %v4156_v28 = vrot.slane %v4050_v47, 4  ;;  %v2888_v60 = vadd.f32 %v2887_v57, %v16138_v34  ;;  %v2936_v21 = vpop.f32.mrf.mxu1  ;;  %v17947_v57 = vld [vmem:[#allocation17_spill] sm:$0xff] }
 0x2b6   :  { %v16416_v20 = vadd.f32 %v3032_v62, %v2984_v15 }
 0x2b7   :  { %v4157_v22 = vadd.f32 %v4156_v28, %v4050_v47  ;;  %v2937_v32 = vadd.f32 %v2936_v21, %v2888_v60  ;;  %v17948_v28 = vld [vmem:[#allocation18_spill] sm:$0xff] }
 0x2b9   :  { %v4158_v14 = vrot.slane %v4157_v22, 2  ;;  %v3864_v31 = vmax.f32 %v2937_v32, 0.0 }
 0x2bb   :  { %v4159_v10 = vadd.f32 %v4158_v14, %v4157_v22  ;;  %v4056_v40 = vmul.f32 %v17946_v55, %v3864_v31  ;;  %v2985_v3 = vpop.f32.mrf.mxu2 }
 0x2bc   :  { %v2986_v25 = vadd.f32 %v2985_v3, %v16410_v56  ;;  %v3034_v29 = vpop.f32.mrf.mxu3  ;;  %v2890_v46 = vpop.f32.mrf.mxu0 }
 0x2bd   :  { %v4192_v45 = vrot.slane %v4056_v40, 4  ;;  %v2891_v63 = vadd.f32 %v2890_v46, %v16149_v52  ;;  %v2939_v13 = vpop.f32.mrf.mxu1  ;;  %v4160_v15 = vrot.slane %v4159_v10, 1 }
 0x2be   :  { %v16421_v34 = vadd.f32 %v3034_v29, %v2986_v25 }
 0x2bf   :  { %v4193_v62 = vadd.f32 %v4192_v45, %v4056_v40  ;;  %v2940_v47 = vadd.f32 %v2939_v13, %v2891_v63  ;;  %3085 = vmatmul.bf16.gmra.mxu0 %v17947_v57  ;;  %v4161_v3 = vadd.f32 %v4160_v15, %v4159_v10 }
 0x2c0   :  { %3134 = vmatmul.bf16.gmra.mxu1 %v17948_v28  ;;  %3183 = vmatmul.bf16.gmra.mxu2 %v17927_v50 }
 0x2c1   :  { %v4194_v60 = vrot.slane %v4193_v62, 2  ;;  %v3870_v21 = vmax.f32 %v2940_v47, 0.0  ;;  %3232 = vmatmul.bf16.gmra.mxu3 %v17928_v0  ;;  %v4722_v46 = vpack.c.bf16 %v4161_v3, %v4161_v3 }
 0x2c3   :  { %v4195_v22 = vadd.f32 %v4194_v60, %v4193_v62  ;;  %v4062_v52 = vmul.f32 %v17908_v41, %v3870_v21  ;;  %v2988_v32 = vpop.f32.mrf.mxu2  ;;  %v5216_v60 = vunpack.c.l.b16 %v4722_v46 }
 0x2c4   :  { %v2989_v29 = vadd.f32 %v2988_v32, %v16410_v56  ;;  %v3037_v14 = vpop.f32.mrf.mxu3  ;;  %v2892_v40 = vpop.f32.mrf.mxu0 }
 0x2c5   :  { %v4196_v63 = vrot.slane %v4195_v22, 1  ;;  %v4228_v13 = vrot.slane %v4062_v52, 4  ;;  %v2893_v45 = vadd.f32 %v2892_v40, %v16152_v58  ;;  %v2941_v31 = vpop.f32.mrf.mxu1 }
 0x2c6   :  { %v16430_v25 = vadd.f32 %v3037_v14, %v2989_v29 }
 0x2c7   :  { %v4197_v47 = vadd.f32 %v4196_v63, %v4195_v22  ;;  %v4229_v50 = vadd.f32 %v4228_v13, %v4062_v52  ;;  %v2942_v0 = vadd.f32 %v2941_v31, %v2893_v45  ;;  %v17950_v45 = vld [vmem:[#allocation22_spill] sm:$0xff] }
 0x2c9   :  { %v4728_v10 = vpack.c.bf16 %v4197_v47, %v4197_v47  ;;  %v4230_v15 = vrot.slane %v4229_v50, 2  ;;  %v3876_v62 = vmax.f32 %v2942_v0, 0.0 }
 0x2cb   :  { %v5222_v21 = vunpack.c.l.b16 %v4728_v10  ;;  %v4231_v41 = vadd.f32 %v4230_v15, %v4229_v50  ;;  %v4068_v32 = vmul.f32 %v15531_v1, %v3876_v62  ;;  %v2990_v55 = vpop.f32.mrf.mxu2  ;;  %v17949_v50 = vld [vmem:[#allocation21_spill] sm:$0xff] }
 0x2cc   :  { %v2991_v28 = vadd.f32 %v2990_v55, %v16410_v56  ;;  %v3039_v57 = vpop.f32.mrf.mxu3  ;;  %v2895_v58 = vpop.f32.mrf.mxu0 }
 0x2cd   :  { %v5331_v29 = vsel %vm5310_vm0, %v5222_v21, %v5216_v60  ;;  %v4232_v14 = vrot.slane %v4231_v41, 1  ;;  %v4264_v3 = vrot.slane %v4068_v32, 4  ;;  %v2896_v22 = vadd.f32 %v2895_v58, %v16159_v35  ;;  %v2944_v52 = vpop.f32.mrf.mxu1 }
 0x2ce   :  { %v16436_v40 = vadd.f32 %v3039_v57, %v2991_v28 }
 0x2cf   :  { %v4233_v0 = vadd.f32 %v4232_v14, %v4231_v41  ;;  %v4265_v63 = vadd.f32 %v4264_v3, %v4068_v32  ;;  %v2945_v13 = vadd.f32 %v2944_v52, %v2896_v22  ;;  %3090 = vmatmul.bf16.gmra.mxu0 %v17949_v50 }
 0x2d0   :  { %3139 = vmatmul.bf16.gmra.mxu1 %v17950_v45  ;;  %3188 = vmatmul.bf16.gmra.mxu2 %v17930_v11 }
 0x2d1   :  { %v4734_v55 = vpack.c.bf16 %v4233_v0, %v4233_v0  ;;  %v4266_v31 = vrot.slane %v4265_v63, 2  ;;  %v3882_v46 = vmax.f32 %v2945_v13, 0.0  ;;  %3237 = vmatmul.bf16.gmra.mxu3 %v17931_v24 }
 0x2d3   :  { %v5228_v47 = vunpack.c.l.b16 %v4734_v55  ;;  %v4267_v10 = vadd.f32 %v4266_v31, %v4265_v63  ;;  %v4074_v35 = vmul.f32 %v17911_v9, %v3882_v46  ;;  %v2993_v57 = vpop.f32.mrf.mxu2 }
 0x2d4   :  { %v2994_v41 = vadd.f32 %v2993_v57, %v16410_v56  ;;  %v3042_v28 = vpop.f32.mrf.mxu3  ;;  %v2897_v15 = vpop.f32.mrf.mxu0 }
 0x2d5   :  { %v5332_v62 = vsel %vm5312_vm1, %v5228_v47, %v5331_v29  ;;  %v4268_v60 = vrot.slane %v4267_v10, 1  ;;  %v4300_v21 = vrot.slane %v4074_v35, 4  ;;  %v2898_v32 = vadd.f32 %v2897_v15, %v16162_v48  ;;  %v2946_v58 = vpop.f32.mrf.mxu1 }
 0x2d6   :  { %v16446_v14 = vadd.f32 %v3042_v28, %v2994_v41 }
 0x2d7   :  { %v4269_v3 = vadd.f32 %v4268_v60, %v4267_v10  ;;  %v4301_v22 = vadd.f32 %v4300_v21, %v4074_v35  ;;  %v2947_v52 = vadd.f32 %v2946_v58, %v2898_v32  ;;  %v17951_v58 = vld [vmem:[#allocation25_spill] sm:$0xff] }
 0x2d9   :  { %v4740_v0 = vpack.c.bf16 %v4269_v3, %v4269_v3  ;;  %v4302_v63 = vrot.slane %v4301_v22, 2  ;;  %v3888_v13 = vmax.f32 %v2947_v52, 0.0  ;;  %v17952_v3 = vld [vmem:[#allocation26_spill] sm:$0xff] }
 0x2db   :  { %v5234_v55 = vunpack.c.l.b16 %v4740_v0  ;;  %v4303_v31 = vadd.f32 %v4302_v63, %v4301_v22  ;;  %v4080_v46 = vmul.f32 %v17914_v43, %v3888_v13  ;;  %v2995_v57 = vpop.f32.mrf.mxu2 }
 0x2dc   :  { %v2996_v29 = vadd.f32 %v2995_v57, %v16410_v56  ;;  %v3044_v47 = vpop.f32.mrf.mxu3  ;;  %v2900_v24 = vpop.f32.mrf.mxu0 }
 0x2dd   :  { %v5333_v48 = vsel %vm5314_vm2, %v5234_v55, %v5332_v62  ;;  %v4304_v15 = vrot.slane %v4303_v31, 1  ;;  %v4336_v41 = vrot.slane %v4080_v46, 4  ;;  %v2901_v10 = vadd.f32 %v2900_v24, %v16169_v16  ;;  %v2949_v35 = vpop.f32.mrf.mxu1 }
 0x2de   :  { %v16452_v28 = vadd.f32 %v3044_v47, %v2996_v29 }
 0x2df   :  { %v4305_v60 = vadd.f32 %v4304_v15, %v4303_v31  ;;  %v4337_v21 = vadd.f32 %v4336_v41, %v4080_v46  ;;  %v2950_v32 = vadd.f32 %v2949_v35, %v2901_v10  ;;  %3095 = vmatmul.bf16.gmra.mxu0 %v17951_v58 }
 0x2e0   :  { %3144 = vmatmul.bf16.gmra.mxu1 %v17952_v3  ;;  %3193 = vmatmul.bf16.gmra.mxu2 %v17932_v33 }
 0x2e1   :  { %v4746_v22 = vpack.c.bf16 %v4305_v60, %v4305_v60  ;;  %v4338_v52 = vrot.slane %v4337_v21, 2  ;;  %v3894_v0 = vmax.f32 %v2950_v32, 0.0  ;;  %3242 = vmatmul.bf16.gmra.mxu3 %v17933_v8 }
 0x2e3   :  { %v5240_v62 = vunpack.c.l.b16 %v4746_v22  ;;  %v4339_v63 = vadd.f32 %v4338_v52, %v4337_v21  ;;  %v4086_v24 = vmul.f32 %v17915_v17, %v3894_v0  ;;  %v2998_v16 = vpop.f32.mrf.mxu2 }
 0x2e4   :  { %v2999_v13 = vadd.f32 %v2998_v16, %v16410_v56  ;;  %v3047_v55 = vpop.f32.mrf.mxu3  ;;  %v2902_v31 = vpop.f32.mrf.mxu0 }
 0x2e5   :  { %v5334_v46 = vsel %vm5316_vm3, %v5240_v62, %v5333_v48  ;;  %v4340_v57 = vrot.slane %v4339_v63, 1  ;;  %v4372_v29 = vrot.slane %v4086_v24, 4  ;;  %v2903_v47 = vadd.f32 %v2902_v31, %v16172_v4  ;;  %v2951_v15 = vpop.f32.mrf.mxu1 }
 0x2e6   :  { %v16462_v41 = vadd.f32 %v3047_v55, %v2999_v13 }
 0x2e7   :  { %v4341_v10 = vadd.f32 %v4340_v57, %v4339_v63  ;;  %v4373_v35 = vadd.f32 %v4372_v29, %v4086_v24  ;;  %v2952_v60 = vadd.f32 %v2951_v15, %v2903_v47  ;;  %v13444_v15 = vld [vmem:[%s17669_s2 + $0x2f4] sm:$0xf0] }
 0x2e9   :  { %v4752_v21 = vpack.c.bf16 %v4341_v10, %v4341_v10  ;;  %v4374_v32 = vrot.slane %v4373_v35, 2  ;;  %v3900_v22 = vmax.f32 %v2952_v60, 0.0  ;;  %v10415_v10 = vld [vmem:[%s17669_s2 + $0x460] sm:$0xf] }
 0x2eb   :  { %v5246_v52 = vunpack.c.l.b16 %v4752_v21  ;;  %v4375_v0 = vadd.f32 %v4374_v32, %v4373_v35  ;;  %v4092_v16 = vmul.f32 %v15577_v49, %v3900_v22  ;;  %v3000_v8 = vpop.f32.mrf.mxu2  ;;  %v13492_v35 = vld [vmem:[%s17669_s2 + $0x474] sm:$0xf0] }
 0x2ec   :  { %v3001_v48 = vadd.f32 %v3000_v8, %v16410_v56  ;;  %v3049_v62 = vpop.f32.mrf.mxu3  ;;  %v2905_v33 = vpop.f32.mrf.mxu0  ;;  %v10031_v8 = vld [vmem:[%s17669_s2 + $0x160] sm:$0xf] }
 0x2ed   :  { %v5335_v4 = vsel %vm5318_vm4, %v5246_v52, %v5334_v46  ;;  %v4376_v31 = vrot.slane %v4375_v0, 1  ;;  %v4408_v13 = vrot.slane %v4092_v16, 4  ;;  %v2906_v63 = vadd.f32 %v2905_v33, %v16227_v2  ;;  %v2954_v24 = vpop.f32.mrf.mxu1  ;;  %v13396_v46 = vld [vmem:[%s17669_s2 + $0x174] sm:$0xf0]  ;;  %v10223_v33 = vld [vmem:[%s17669_s2 + $0x2e0] sm:$0xf] }
 0x2ee   :  { %v16468_v55 = vadd.f32 %v3049_v62, %v3001_v48  ;;  %v10032_v2 = vor.u32 %v13396_v46, %v10031_v8  ;;  %v10224_v22 = vor.u32 %v13444_v15, %v10223_v33  ;;  %v10607_v52 = vld [vmem:[%s17669_s2 + $0x5e0] sm:$0xf]  ;;  %v10391_v15 = vld [vmem:[%s17669_s2 + $0x430] sm:$0xf] }
 0x2ef   :  { %v4377_v57 = vadd.f32 %v4376_v31, %v4375_v0  ;;  %v4409_v29 = vadd.f32 %v4408_v13, %v4092_v16  ;;  %v2955_v47 = vadd.f32 %v2954_v24, %v2906_v63  ;;  %3100 = vmatmul.bf16.gmra.mxu0 %v14728_v26  ;;  %v13540_v0 = vld [vmem:[%s17669_s2 + $0x5f4] sm:$0xf0]  ;;  %v10416_v16 = vor.u32 %v13492_v35, %v10415_v10  ;;  %v10007_v24 = vld [vmem:[%s17669_s2 + $0x130] sm:$0xf]  ;;  %v13486_v10 = vld [vmem:[%s17669_s2 + $0x444] sm:$0xf0] }
 0x2f0   :  { %3149 = vmatmul.bf16.gmra.mxu1 %v14730_v27  ;;  %3198 = vmatmul.bf16.gmra.mxu2 %v17934_v30  ;;  %v10608_v48 = vor.u32 %v13540_v0, %v10607_v52  ;;  %v10583_v52 = vld [vmem:[%s17669_s2 + $0x5b0] sm:$0xf]  ;;  %v13534_v0 = vld [vmem:[%s17669_s2 + $0x5c4] sm:$0xf0] }
 0x2f1   :  { %v4758_v60 = vpack.c.bf16 %v4377_v57, %v4377_v57  ;;  %v4410_v21 = vrot.slane %v4409_v29, 2  ;;  %v3906_v32 = vmax.f32 %v2955_v47, 0.0  ;;  %3247 = vmatmul.bf16.gmra.mxu3 %v17935_v18  ;;  %3268 = vmatpush.bf16.msra.mxu0 %v10032_v2  ;;  %v13390_v57 = vld [vmem:[%s17669_s2 + $0x144] sm:$0xf0]  ;;  %v10199_v47 = vld [vmem:[%s17669_s2 + $0x2b0] sm:$0xf] }
 0x2f2   :  { %3317 = vmatpush.bf16.msra.mxu1 %v10224_v22  ;;  %3366 = vmatpush.bf16.msra.mxu2 %v10416_v16  ;;  %v10008_v33 = vor.u32 %v13390_v57, %v10007_v24  ;;  %v13438_v2 = vld [vmem:[%s17669_s2 + $0x2c4] sm:$0xf0]  ;;  %v10584_v24 = vor.u32 %v13534_v0, %v10583_v52 }
 0x2f3   :  { %v5252_v62 = vunpack.c.l.b16 %v4758_v60  ;;  %v4411_v31 = vadd.f32 %v4410_v21, %v4409_v29  ;;  %v4098_v13 = vmul.f32 %v17918_v7, %v3906_v32  ;;  %v3003_v63 = vpop.f32.mrf.mxu2  ;;  %3415 = vmatpush.bf16.msra.mxu3 %v10608_v48  ;;  %v10200_v48 = vor.u32 %v13438_v2, %v10199_v47 }
 0x2f4   :  { %v3004_v8 = vadd.f32 %v3003_v63, %v16410_v56  ;;  %v3052_v46 = vpop.f32.mrf.mxu3  ;;  %v2907_v29 = vpop.f32.mrf.mxu0  ;;  %v10392_v63 = vor.u32 %v13486_v10, %v10391_v15 }
 0x2f5   :  { %v5336_v35 = vsel %vm5320_vm5, %v5252_v62, %v5335_v4  ;;  %v4412_v60 = vrot.slane %v4411_v31, 1  ;;  %v4444_v21 = vrot.slane %v4098_v13, 4  ;;  %v2908_v32 = vadd.f32 %v2907_v29, %v16278_v53  ;;  %v2956_v22 = vpop.f32.mrf.mxu1  ;;  %3269 = vmatpush.bf16.msra.mxu0 %v10008_v33  ;;  %v9983_v53 = vld [vmem:[%s17669_s2 + $0x100] sm:$0xf]  ;;  %v13384_v29 = vld [vmem:[%s17669_s2 + $0x114] sm:$0xf0] }
 0x2f6   :  { %v16526_v16 = vadd.f32 %v3052_v46, %v3004_v8  ;;  %v10175_v8 = vld [vmem:[%s17669_s2 + $0x280] sm:$0xf]  ;;  %3318 = vmatpush.bf16.msra.mxu1 %v10200_v48  ;;  %3367 = vmatpush.bf16.msra.mxu2 %v10392_v63  ;;  %v9984_v47 = vor.u32 %v13384_v29, %v9983_v53  ;;  %v13480_v46 = vld [vmem:[%s17669_s2 + $0x414] sm:$0xf0] }
 0x2f7   :  { %v4413_v4 = vadd.f32 %v4412_v60, %v4411_v31  ;;  %v4445_v62 = vadd.f32 %v4444_v21, %v4098_v13  ;;  %v2957_v57 = vadd.f32 %v2956_v22, %v2908_v32  ;;  %v13432_v31 = vld [vmem:[%s17669_s2 + $0x294] sm:$0xf0]  ;;  %v10367_v13 = vld [vmem:[%s17669_s2 + $0x400] sm:$0xf]  ;;  %3416 = vmatpush.bf16.msra.mxu3 %v10584_v24  ;;  %v9959_v24 = vld [vmem:[%s17669_s2 + $0xd0] sm:$0xf] }
 0x2f8   :  { %v10176_v10 = vor.u32 %v13432_v31, %v10175_v8  ;;  %v10559_v60 = vld [vmem:[%s17669_s2 + $0x580] sm:$0xf]  ;;  %v13528_v21 = vld [vmem:[%s17669_s2 + $0x594] sm:$0xf0]  ;;  %v10368_v32 = vor.u32 %v13480_v46, %v10367_v13  ;;  %v10343_v31 = vld [vmem:[%s17669_s2 + $0x3d0] sm:$0xf] }
 0x2f9   :  { %v4764_v33 = vpack.c.bf16 %v4413_v4, %v4413_v4  ;;  %v4446_v2 = vrot.slane %v4445_v62, 2  ;;  %v3912_v15 = vmax.f32 %v2957_v57, 0.0  ;;  %3270 = vmatpush.bf16.msra.mxu0 %v9984_v47  ;;  %v10560_v22 = vor.u32 %v13528_v21, %v10559_v60  ;;  %v13378_v4 = vld [vmem:[%s17669_s2 + $0xe4] sm:$0xf0]  ;;  %v10151_v57 = vld [vmem:[%s17669_s2 + $0x250] sm:$0xf] }
 0x2fa   :  { %3319 = vmatpush.bf16.msra.mxu1 %v10176_v10  ;;  %3368 = vmatpush.bf16.msra.mxu2 %v10368_v32  ;;  %v13426_v47 = vld [vmem:[%s17669_s2 + $0x264] sm:$0xf0]  ;;  %v10535_v60 = vld [vmem:[%s17669_s2 + $0x550] sm:$0xf] }
 0x2fb   :  { %v5258_v52 = vunpack.c.l.b16 %v4764_v33  ;;  %v4447_v0 = vadd.f32 %v4446_v2, %v4445_v62  ;;  %v4104_v48 = vmul.f32 %v15523_v51, %v3912_v15  ;;  %v3005_v63 = vpop.f32.mrf.mxu2  ;;  %v9960_v62 = vor.u32 %v13378_v4, %v9959_v24  ;;  %v13474_v13 = vld [vmem:[%s17669_s2 + $0x3e4] sm:$0xf0]  ;;  %3417 = vmatpush.bf16.msra.mxu3 %v10560_v22  ;;  %v13372_v22 = vld [vmem:[%s17669_s2 + $0xb4] sm:$0xf0] }
 0x2fc   :  { %v3006_v53 = vadd.f32 %v3005_v63, %v16410_v56  ;;  %v3054_v29 = vpop.f32.mrf.mxu3  ;;  %v2910_v8 = vpop.f32.mrf.mxu0  ;;  %v13522_v21 = vld [vmem:[%s17669_s2 + $0x564] sm:$0xf0]  ;;  %v10152_v63 = vor.u32 %v13426_v47, %v10151_v57  ;;  %v13420_v57 = vld [vmem:[%s17669_s2 + $0x234] sm:$0xf0] }
 0x2fd   :  { %v16573_v46 = vsel %vm5322_vm6, %v5258_v52, %v5336_v35  ;;  %v4448_v33 = vrot.slane %v4447_v0, 1  ;;  %v4480_v2 = vrot.slane %v4104_v48, 4  ;;  %v2911_v15 = vadd.f32 %v2910_v8, %v16333_v54  ;;  %v2959_v10 = vpop.f32.mrf.mxu1  ;;  %3271 = vmatpush.bf16.msra.mxu0 %v9960_v62  ;;  %v9935_v54 = vld [vmem:[%s17669_s2 + $0xa0] sm:$0xf]  ;;  %v13468_v62 = vld [vmem:[%s17669_s2 + $0x3b4] sm:$0xf0] }
 0x2fe   :  { %v16582_v32 = vadd.f32 %v3054_v29, %v3006_v53  ;;  %v10344_v35 = vor.u32 %v13474_v13, %v10343_v31  ;;  %v10536_v52 = vor.u32 %v13522_v21, %v10535_v60  ;;  %v10127_v53 = vld [vmem:[%s17669_s2 + $0x220] sm:$0xf]  ;;  %3320 = vmatpush.bf16.msra.mxu1 %v10152_v63  ;;  %v9911_v63 = vld [vmem:[%s17669_s2 + $0x70] sm:$0xf] }
 0x2ff   :  { %v4481_v24 = vadd.f32 %v4480_v2, %v4104_v48  ;;  %v2960_v4 = vadd.f32 %v2959_v10, %v2911_v15  ;;  %3105 = vmatmul.bf16.gmra.mxu0 %v14854_v36  ;;  %v17953_v29 = vld [vmem:[#allocation31_spill] sm:$0xff]  ;;  %v9936_v48 = vor.u32 %v13372_v22, %v9935_v54  ;;  %v10128_v13 = vor.u32 %v13420_v57, %v10127_v53  ;;  %v13516_v15 = vld [vmem:[%s17669_s2 + $0x534] sm:$0xf0]  ;;  %v13366_v53 = vld [vmem:[%s17669_s2 + $0x84] sm:$0xf0] }
 0x300   :  { %3154 = vmatmul.bf16.gmra.mxu1 %v17953_v29  ;;  %3203 = vmatmul.bf16.gmra.mxu2 %v17936_v38  ;;  %v10319_v8 = vld [vmem:[%s17669_s2 + $0x3a0] sm:$0xf]  ;;  %v4449_v21 = vadd.f32 %v4448_v33, %v4447_v0  ;;  %v17954_v22 = vld [vmem:[#allocation62_spill] sm:$0xff]  ;;  %v10295_v57 = vld [vmem:[%s17669_s2 + $0x370] sm:$0xf] }
 0x301   :  { %v4482_v47 = vrot.slane %v4481_v24, 2  ;;  %v3918_v31 = vmax.f32 %v2960_v4, 0.0  ;;  %3252 = vmatmul.bf16.gmra.mxu3 %v17937_v59  ;;  %v10511_v2 = vld [vmem:[%s17669_s2 + $0x520] sm:$0xf]  ;;  %3369 = vmatpush.bf16.msra.mxu2 %v10344_v35  ;;  %v10320_v10 = vor.u32 %v13468_v62, %v10319_v8  ;;  %v10103_v35 = vld [vmem:[%s17669_s2 + $0x1f0] sm:$0xf] }
 0x302   :  { %3418 = vmatpush.bf16.msra.mxu3 %v10536_v52  ;;  %v10512_v60 = vor.u32 %v13516_v15, %v10511_v2  ;;  %3272 = vmatpush.bf16.msra.mxu0 %v9936_v48  ;;  %v13414_v48 = vld [vmem:[%s17669_s2 + $0x204] sm:$0xf0]  ;;  %v10487_v15 = vld [vmem:[%s17669_s2 + $0x4f0] sm:$0xf]  ;;  %v4770_v30 = vpack.c.bf16 %v4449_v21, %v4449_v21  ;;  %v13408_v21 = vld [vmem:[%s17669_s2 + $0x1d4] sm:$0xf0] }
 0x303   :  { %v4483_v54 = vadd.f32 %v4482_v47, %v4481_v24  ;;  %v4110_v4 = vmul.f32 %v17954_v22, %v3918_v31  ;;  %v3008_v38 = vpop.f32.mrf.mxu2  ;;  %v9912_v24 = vor.u32 %v13366_v53, %v9911_v63  ;;  %v13462_v8 = vld [vmem:[%s17669_s2 + $0x384] sm:$0xf0]  ;;  %3321 = vmatpush.bf16.msra.mxu1 %v10128_v13  ;;  %v10104_v2 = vor.u32 %v13414_v48, %v10103_v35  ;;  %v9887_v13 = vld [vmem:[%s17669_s2 + $0x40] sm:$0xf]  ;;  %v13360_v35 = vld [vmem:[%s17669_s2 + $0x54] sm:$0xf0] }
 0x304   :  { %v3009_v52 = vadd.f32 %v3008_v38, %v16410_v56  ;;  %v3057_v0 = vpop.f32.mrf.mxu3  ;;  %v2912_v33 = vpop.f32.mrf.mxu0  ;;  %v13510_v63 = vld [vmem:[%s17669_s2 + $0x504] sm:$0xf0]  ;;  %v10296_v59 = vor.u32 %v13462_v8, %v10295_v57  ;;  %v10463_v57 = vld [vmem:[%s17669_s2 + $0x4c0] sm:$0xf]  ;;  %v13504_v8 = vld [vmem:[%s17669_s2 + $0x4d4] sm:$0xf0] }
 0x305   :  { %v4484_v62 = vrot.slane %v4483_v54, 1  ;;  %v4516_v47 = vrot.slane %v4110_v4, 4  ;;  %v2913_v31 = vadd.f32 %v2912_v33, %v16384_v23  ;;  %v2961_v38 = vpop.f32.mrf.mxu1  ;;  %3370 = vmatpush.bf16.msra.mxu2 %v10320_v10  ;;  %v10488_v18 = vor.u32 %v13510_v63, %v10487_v15  ;;  %v10079_v10 = vld [vmem:[%s17669_s2 + $0x1c0] sm:$0xf] }
 0x306   :  { %v16639_v53 = vadd.f32 %v3057_v0, %v3009_v52  ;;  %3419 = vmatpush.bf16.msra.mxu3 %v10512_v60  ;;  %3273 = vmatpush.bf16.msra.mxu0 %v9912_v24  ;;  %v9888_v60 = vor.u32 %v13360_v35, %v9887_v13  ;;  %v10080_v48 = vor.u32 %v13408_v21, %v10079_v10  ;;  %v13402_v35 = vld [vmem:[%s17669_s2 + $0x1a4] sm:$0xf0]  ;;  %v10247_v10 = vld [vmem:[%s17669_s2 + $0x310] sm:$0xf] }
 0x307   :  { %v4485_v11 = vadd.f32 %v4484_v62, %v4483_v54  ;;  %v4517_v23 = vadd.f32 %v4516_v47, %v4110_v4  ;;  %v2962_v33 = vadd.f32 %v2961_v38, %v2913_v31  ;;  %v10271_v54 = vld [vmem:[%s17669_s2 + $0x340] sm:$0xf]  ;;  %v13456_v4 = vld [vmem:[%s17669_s2 + $0x354] sm:$0xf0]  ;;  %3322 = vmatpush.bf16.msra.mxu1 %v10104_v2  ;;  %v10464_v47 = vor.u32 %v13504_v8, %v10463_v57  ;;  %v9863_v2 = vld [vmem:[%s17669_s2 + $0x10] sm:$0xf] }
 0x308   :  { %v10272_v62 = vor.u32 %v13456_v4, %v10271_v54  ;;  %v5264_v31 = vunpack.c.l.b16 %v4770_v30  ;;  %v13498_v57 = vld [vmem:[%s17669_s2 + $0x4a4] sm:$0xf0] }
 0x309   :  { %v4776_v52 = vpack.c.bf16 %v4485_v11, %v4485_v11  ;;  %v4518_v0 = vrot.slane %v4517_v23, 2  ;;  %v3924_v24 = vmax.f32 %v2962_v33, 0.0  ;;  %3371 = vmatpush.bf16.msra.mxu2 %v10296_v59  ;;  %v13354_v33 = vld [vmem:[%s17669_s2 + $0x24] sm:$0xf0] }
 0x30a   :  { %3420 = vmatpush.bf16.msra.mxu3 %v10488_v18  ;;  %3274 = vmatpush.bf16.msra.mxu0 %v9888_v60  ;;  %v10055_v18 = vld [vmem:[%s17669_s2 + $0x190] sm:$0xf]  ;;  %v9864_v13 = vor.u32 %v13354_v33, %v9863_v2  ;;  %v13450_v60 = vld [vmem:[%s17669_s2 + $0x324] sm:$0xf0] }
 0x30b   :  { %v5270_v38 = vunpack.c.l.b16 %v4776_v52  ;;  %v4519_v15 = vadd.f32 %v4518_v0, %v4517_v23  ;;  %v4116_v11 = vmul.f32 %v15539_v12, %v3924_v24  ;;  %v3010_v63 = vpop.f32.mrf.mxu2  ;;  %3323 = vmatpush.bf16.msra.mxu1 %v10080_v48  ;;  %v10439_v24 = vld [vmem:[%s17669_s2 + $0x490] sm:$0xf] }
 0x30c   :  { %v3011_v30 = vadd.f32 %v3010_v63, %v16410_v56  ;;  %v3059_v59 = vpop.f32.mrf.mxu3  ;;  %v2915_v23 = vpop.f32.mrf.mxu0  ;;  %v10056_v63 = vor.u32 %v13402_v35, %v10055_v18 }
 0x30d   :  { %v5373_v21 = vsel %vm5310_vm0, %v5270_v38, %v5264_v31  ;;  %v4520_v54 = vrot.slane %v4519_v15, 1  ;;  %v4552_v4 = vrot.slane %v4116_v11, 4  ;;  %v2916_v52 = vadd.f32 %v2915_v23, %v16391_v19  ;;  %v2964_v0 = vpop.f32.mrf.mxu1  ;;  %3372 = vmatpush.bf16.msra.mxu2 %v10272_v62 }
 0x30e   :  { %v16693_v8 = vadd.f32 %v3059_v59, %v3011_v30  ;;  %3421 = vmatpush.bf16.msra.mxu3 %v10464_v47  ;;  %v10248_v31 = vor.u32 %v13450_v60, %v10247_v10  ;;  %v10440_v19 = vor.u32 %v13498_v57, %v10439_v24  ;;  %3275 = vmatpush.bf16.msra.mxu0 %v9864_v13 }
 0x30f   :  { %v4521_v38 = vadd.f32 %v4520_v54, %v4519_v15  ;;  %v4553_v2 = vadd.f32 %v4552_v4, %v4116_v11  ;;  %v2965_v33 = vadd.f32 %v2964_v0, %v2916_v52  ;;  %3110 = vmatmul.bf16.gmra.mxu0 %v14977_v61  ;;  %3324 = vmatpush.bf16.msra.mxu1 %v10056_v63 }
 0x310   :  { %3159 = vmatmul.bf16.gmra.mxu1 %v14988_v5  ;;  %3208 = vmatmul.bf16.gmra.mxu2 %v17938_v37 }
 0x311   :  { %v4782_v48 = vpack.c.bf16 %v4521_v38, %v4521_v38  ;;  %v4554_v23 = vrot.slane %v4553_v2, 2  ;;  %v3930_v12 = vmax.f32 %v2965_v33, 0.0  ;;  %3257 = vmatmul.bf16.gmra.mxu3 %v17939_v6  ;;  %3373 = vmatpush.bf16.msra.mxu2 %v10248_v31 }
 0x312   :  { %3422 = vmatpush.bf16.msra.mxu3 %v10440_v19 }
 0x313   :  { %v5276_v62 = vunpack.c.l.b16 %v4782_v48  ;;  %v4555_v47 = vadd.f32 %v4554_v23, %v4553_v2  ;;  %v4122_v15 = vmul.f32 %v15553_v44, %v3930_v12  ;;  %v3013_v11 = vpop.f32.mrf.mxu2  ;;  %v17955_v2 = vld [vmem:[#allocation67_spill] sm:$0xff] }
 0x314   :  { %v3014_v18 = vadd.f32 %v3013_v11, %v16410_v56  ;;  %v3062_v30 = vpop.f32.mrf.mxu3  ;;  %v2917_v59 = vpop.f32.mrf.mxu0 }
 0x315   :  { %v5374_v35 = vsel %vm5312_vm1, %v5276_v62, %v5373_v21  ;;  %v4556_v10 = vrot.slane %v4555_v47, 1  ;;  %v4588_v60 = vrot.slane %v4122_v15, 4  ;;  %v2918_v54 = vadd.f32 %v2917_v59, %v16394_v39  ;;  %v2966_v4 = vpop.f32.mrf.mxu1 }
 0x316   :  { %v16703_v13 = vadd.f32 %v3062_v30, %v3014_v18 }
 0x317   :  { %v4557_v52 = vadd.f32 %v4556_v10, %v4555_v47  ;;  %v4589_v0 = vadd.f32 %v4588_v60, %v4122_v15  ;;  %v2967_v24 = vadd.f32 %v2966_v4, %v2918_v54  ;;  %v17956_v60 = vld [vmem:[#allocation38_spill] sm:$0xff]  ;;  %v17957_v54 = vld [vmem:[#allocation39_spill] sm:$0xff] }
 0x318   :  { %v17958_v4 = vld [vmem:[#allocation54_spill] sm:$0xff] }
 0x319   :  { %v4788_v57 = vpack.c.bf16 %v4557_v52, %v4557_v52  ;;  %v4590_v12 = vrot.slane %v4589_v0, 2  ;;  %v3936_v63 = vmax.f32 %v2967_v24, 0.0 }
 0x31b   :  { %v5282_v31 = vunpack.c.l.b16 %v4788_v57  ;;  %v4591_v38 = vadd.f32 %v4590_v12, %v4589_v0  ;;  %v4128_v33 = vmul.f32 %v17955_v2, %v3936_v63  ;;  %v3015_v19 = vpop.f32.mrf.mxu2 }
 0x31c   :  { %v3016_v21 = vadd.f32 %v3015_v19, %v16410_v56  ;;  %v3064_v48 = vpop.f32.mrf.mxu3  ;;  %v2920_v23 = vpop.f32.mrf.mxu0 }
 0x31d   :  { %v5375_v39 = vsel %vm5314_vm2, %v5282_v31, %v5374_v35  ;;  %v4592_v62 = vrot.slane %v4591_v38, 1  ;;  %v4624_v11 = vrot.slane %v4128_v33, 4  ;;  %v2921_v47 = vadd.f32 %v2920_v23, %v16401_v42  ;;  %v2969_v15 = vpop.f32.mrf.mxu1  ;;  %v17959_v35 = vld [vmem:[#allocation55_spill] sm:$0xff]  ;;  %v17960_v42 = vld [vmem:[#allocation69_spill] sm:$0xff] }
 0x31e   :  { %v16709_v18 = vadd.f32 %v3064_v48, %v3016_v21 }
 0x31f   :  { %v4593_v30 = vadd.f32 %v4592_v62, %v4591_v38  ;;  %v4625_v59 = vadd.f32 %v4624_v11, %v4128_v33  ;;  %v2970_v10 = vadd.f32 %v2969_v15, %v2921_v47  ;;  %3115 = vmatmul.bf16.gmra.mxu0 %v17956_v60  ;;  %v17961_v62 = vld [vmem:[#allocation66_spill] sm:$0xff] }
 0x320   :  { %3164 = vmatmul.bf16.gmra.mxu1 %v17957_v54  ;;  %3213 = vmatmul.bf16.gmra.mxu2 %v17958_v4 }
 0x321   :  { %v4794_v52 = vpack.c.bf16 %v4593_v30, %v4593_v30  ;;  %v4626_v0 = vrot.slane %v4625_v59, 2  ;;  %v3942_v24 = vmax.f32 %v2970_v10, 0.0  ;;  %3262 = vmatmul.bf16.gmra.mxu3 %v17959_v35 }
 0x323   :  { %v5288_v57 = vunpack.c.l.b16 %v4794_v52  ;;  %v4627_v12 = vadd.f32 %v4626_v0, %v4625_v59  ;;  %v4134_v63 = vmul.f32 %v17960_v42, %v3942_v24  ;;  %v3018_v31 = vpop.f32.mrf.mxu2 }
 0x324   :  { %v3019_v38 = vadd.f32 %v3018_v31, %v16410_v56  ;;  %v3067_v33 = vpop.f32.mrf.mxu3  ;;  %v2922_v19 = vpop.f32.mrf.mxu0  ;;  %v17962_v31 = vld [vmem:[#allocation70_spill] sm:$0xff] }
 0x325   :  { %v5376_v21 = vsel %vm5316_vm3, %v5288_v57, %v5375_v39  ;;  %v4628_v48 = vrot.slane %v4627_v12, 1  ;;  %v4660_v23 = vrot.slane %v4134_v63, 4  ;;  %v2923_v11 = vadd.f32 %v2922_v19, %v17961_v62  ;;  %v2971_v47 = vpop.f32.mrf.mxu1 }
 0x326   :  { %v16719_v15 = vadd.f32 %v3067_v33, %v3019_v38 }
 0x327   :  { %v4629_v30 = vadd.f32 %v4628_v48, %v4627_v12  ;;  %v4661_v10 = vadd.f32 %v4660_v23, %v4134_v63  ;;  %v2972_v52 = vadd.f32 %v2971_v47, %v2923_v11  ;;  %v17963_v47 = vld [vmem:[#allocation11_spill] sm:$0xff] }
 0x329   :  { %v4800_v59 = vpack.c.bf16 %v4629_v30, %v4629_v30  ;;  %v4662_v0 = vrot.slane %v4661_v10, 2  ;;  %v3948_v24 = vmax.f32 %v2972_v52, 0.0  ;;  %v17964_v30 = vld [vmem:[#allocation12_spill] sm:$0xff]  ;;  %v17966_v52 = vld [vmem:[#allocation14_spill] sm:$0xff] }
 0x32b   :  { %v5294_v35 = vunpack.c.l.b16 %v4800_v59  ;;  %v4663_v4 = vadd.f32 %v4662_v0, %v4661_v10  ;;  %v4140_v6 = vmul.f32 %v17962_v31, %v3948_v24  ;;  %v3020_v37 = vpop.f32.mrf.mxu2  ;;  %v17965_v10 = vld [vmem:[#allocation13_spill] sm:$0xff] }
 0x32c   :  { %v3021_v39 = vadd.f32 %v3020_v37, %v16410_v56  ;;  %v3069_v57 = vpop.f32.mrf.mxu3  ;;  %v3081_v42 = vpop.f32.mrf.mxu0 }
 0x32d   :  { %v5377_v19 = vsel %vm5318_vm4, %v5294_v35, %v5376_v21  ;;  %v4664_v62 = vrot.slane %v4663_v4, 1  ;;  %v4696_v38 = vrot.slane %v4140_v6, 4  ;;  %v3082_v12 = vadd.f32 %v3081_v42, %v16416_v20  ;;  %v3130_v63 = vpop.f32.mrf.mxu1 }
 0x32e   :  { %v16725_v33 = vadd.f32 %v3069_v57, %v3021_v39 }
 0x32f   :  { %v4665_v48 = vadd.f32 %v4664_v62, %v4663_v4  ;;  %v4697_v23 = vadd.f32 %v4696_v38, %v4140_v6  ;;  %v3131_v11 = vadd.f32 %v3130_v63, %v3082_v12  ;;  %3276 = vmatmul.bf16.vlgmr.msra.gmra.mxu0 %v17963_v47 }
 0x330   :  { %3325 = vmatmul.bf16.vlgmr.msra.gmra.mxu1 %v17964_v30  ;;  %3374 = vmatmul.bf16.vlgmr.msra.gmra.mxu2 %v17965_v10 }
 0x331   :  { %v4806_v37 = vpack.c.bf16 %v4665_v48, %v4665_v48  ;;  %v4698_v56 = vrot.slane %v4697_v23, 2  ;;  %3423 = vmatmul.bf16.vlgmr.msra.gmra.mxu3 %v17966_v52  ;;  %v17967_v48 = vld [vmem:[#allocation56_spill] sm:$0xff] }
 0x333   :  { %v5300_v35 = vunpack.c.l.b16 %v4806_v37  ;;  %v4699_v21 = vadd.f32 %v4698_v56, %v4697_v23  ;;  %v3179_v59 = vpop.f32.mrf.mxu2 }
 0x334   :  { %v3180_v20 = vadd.f32 %v3179_v59, %v3131_v11  ;;  %v3228_v42 = vpop.f32.mrf.mxu3  ;;  %v3083_v0 = vpop.f32.mrf.mxu0 }
 0x335   :  { %v5378_v4 = vsel %vm5320_vm5, %v5300_v35, %v5377_v19  ;;  %v4700_v6 = vrot.slane %v4699_v21, 1  ;;  %v3084_v24 = vadd.f32 %v3083_v0, %v16421_v34  ;;  %v3132_v39 = vpop.f32.mrf.mxu1  ;;  %v17969_v0 = vld [vmem:[#allocation15_spill] sm:$0xff] }
 0x336   :  { %v3229_v57 = vadd.f32 %v3228_v42, %v3180_v20 }
 0x337   :  { %v4701_v62 = vadd.f32 %v4700_v6, %v4699_v21  ;;  %v3133_v38 = vadd.f32 %v3132_v39, %v3084_v24  ;;  %v17970_v39 = vld [vmem:[#allocation16_spill] sm:$0xff] }
 0x338   :  { %v3859_v12 = vmax.f32 %v3229_v57, 0.0  ;;  %v17971_v57 = vld [vmem:[#allocation17_spill] sm:$0xff] }
 0x339   :  { %v4812_v63 = vpack.c.bf16 %v4701_v62, %v4701_v62  ;;  %v17972_v62 = vld [vmem:[#allocation18_spill] sm:$0xff] }
 0x33a   :  { %v4051_v10 = vmul.f32 %v17967_v48, %v3859_v12 }
 0x33b   :  { %v5306_v52 = vunpack.c.l.b16 %v4812_v63  ;;  %v3181_v37 = vpop.f32.mrf.mxu2 }
 0x33c   :  { %v4162_v23 = vrot.slane %v4051_v10, 4  ;;  %v3182_v56 = vadd.f32 %v3181_v37, %v3133_v38  ;;  %v3230_v11 = vpop.f32.mrf.mxu3  ;;  %v3086_v59 = vpop.f32.mrf.mxu0 }
 0x33d   :  { %v5379_v31 = vsel %vm5322_vm6, %v5306_v52, %v5378_v4  ;;  %v3087_v19 = vadd.f32 %v3086_v59, %v16430_v25  ;;  %v3135_v35 = vpop.f32.mrf.mxu1  ;;  %v17973_v4 = vld [vmem:[#allocation57_spill] sm:$0xff] }
 0x33e   :  { %v16737_v34 = vpack.c.b16 %v5379_v31, %v16573_v46  ;;  %v4163_v21 = vadd.f32 %v4162_v23, %v4051_v10  ;;  %v3231_v20 = vadd.f32 %v3230_v11, %v3182_v56 }
 0x33f   :  { %v3136_v42 = vadd.f32 %v3135_v35, %v3087_v19  ;;  %3281 = vmatmul.bf16.gmra.mxu0 %v17969_v0 }
 0x340   :  { %17968 = vst [vmem:[#allocation68_spill] sm:$0xff] %v16737_v34  ;;  %v4164_v6 = vrot.slane %v4163_v21, 2  ;;  %v3865_v24 = vmax.f32 %v3231_v20, 0.0  ;;  %3330 = vmatmul.bf16.gmra.mxu1 %v17970_v39  ;;  %3379 = vmatmul.bf16.gmra.mxu2 %v17971_v57 }
 0x341   :  { %3428 = vmatmul.bf16.gmra.mxu3 %v17972_v62  ;;  %v17974_v62 = vld [vmem:[#allocation59_spill] sm:$0xff] }
 0x342   :  { %v4165_v52 = vadd.f32 %v4164_v6, %v4163_v21  ;;  %v4057_v25 = vmul.f32 %v17973_v4, %v3865_v24 }
 0x343   :  { %v3184_v38 = vpop.f32.mrf.mxu2 }
 0x344   :  { %v4198_v12 = vrot.slane %v4057_v25, 4  ;;  %v3185_v46 = vadd.f32 %v3184_v38, %v3136_v42  ;;  %v3233_v31 = vpop.f32.mrf.mxu3  ;;  %v3088_v10 = vpop.f32.mrf.mxu0  ;;  %v4166_v23 = vrot.slane %v4165_v52, 1 }
 0x345   :  { %v3089_v63 = vadd.f32 %v3088_v10, %v16436_v40  ;;  %v3137_v37 = vpop.f32.mrf.mxu1 }
 0x346   :  { %v4199_v56 = vadd.f32 %v4198_v12, %v4057_v25  ;;  %v3234_v11 = vadd.f32 %v3233_v31, %v3185_v46  ;;  %v4167_v20 = vadd.f32 %v4166_v23, %v4165_v52  ;;  %v17975_v31 = vld [vmem:[#allocation19_spill] sm:$0xff]  ;;  %v17976_v23 = vld [vmem:[#allocation20_spill] sm:$0xff] }
 0x347   :  { %v3138_v59 = vadd.f32 %v3137_v37, %v3089_v63 }
 0x348   :  { %v4200_v19 = vrot.slane %v4199_v56, 2  ;;  %v3871_v35 = vmax.f32 %v3234_v11, 0.0  ;;  %v4723_v10 = vpack.c.bf16 %v4167_v20, %v4167_v20 }
 0x34a   :  { %v4201_v34 = vadd.f32 %v4200_v19, %v4199_v56  ;;  %v4063_v21 = vmul.f32 %v17974_v62, %v3871_v35  ;;  %v5217_v56 = vunpack.c.l.b16 %v4723_v10 }
 0x34b   :  { %v3186_v6 = vpop.f32.mrf.mxu2 }
 0x34c   :  { %v4202_v24 = vrot.slane %v4201_v34, 1  ;;  %v4234_v57 = vrot.slane %v4063_v21, 4  ;;  %v3187_v4 = vadd.f32 %v3186_v6, %v3138_v59  ;;  %v3235_v42 = vpop.f32.mrf.mxu3  ;;  %v3091_v38 = vpop.f32.mrf.mxu0 }
 0x34d   :  { %v3092_v48 = vadd.f32 %v3091_v38, %v16446_v14  ;;  %v3140_v40 = vpop.f32.mrf.mxu1 }
 0x34e   :  { %v4203_v39 = vadd.f32 %v4202_v24, %v4201_v34  ;;  %v4235_v25 = vadd.f32 %v4234_v57, %v4063_v21  ;;  %v3236_v12 = vadd.f32 %v3235_v42, %v3187_v4 }
 0x34f   :  { %v3141_v46 = vadd.f32 %v3140_v40, %v3092_v48  ;;  %3286 = vmatmul.bf16.gmra.mxu0 %v17975_v31 }
 0x350   :  { %v4729_v52 = vpack.c.bf16 %v4203_v39, %v4203_v39  ;;  %v4236_v63 = vrot.slane %v4235_v25, 2  ;;  %v3877_v37 = vmax.f32 %v3236_v12, 0.0  ;;  %3335 = vmatmul.bf16.gmra.mxu1 %v17976_v23  ;;  %3384 = vmatmul.bf16.gmra.mxu2 %v17949_v50 }
 0x351   :  { %3433 = vmatmul.bf16.gmra.mxu3 %v17950_v45 }
 0x352   :  { %v5223_v11 = vunpack.c.l.b16 %v4729_v52  ;;  %v4237_v14 = vadd.f32 %v4236_v63, %v4235_v25  ;;  %v4069_v59 = vmul.f32 %v15531_v1, %v3877_v37 }
 0x353   :  { %v3189_v34 = vpop.f32.mrf.mxu2 }
 0x354   :  { %v5338_v57 = vsel %vm5310_vm0, %v5223_v11, %v5217_v56  ;;  %v4238_v48 = vrot.slane %v4237_v14, 1  ;;  %v4270_v4 = vrot.slane %v4069_v59, 4  ;;  %v3190_v19 = vadd.f32 %v3189_v34, %v3141_v46  ;;  %v3238_v39 = vpop.f32.mrf.mxu3  ;;  %v3093_v35 = vpop.f32.mrf.mxu0 }
 0x355   :  { %v3094_v20 = vadd.f32 %v3093_v35, %v16452_v28  ;;  %v3142_v21 = vpop.f32.mrf.mxu1  ;;  %v17977_v35 = vld [vmem:[#allocation23_spill] sm:$0xff] }
 0x356   :  { %v4239_v6 = vadd.f32 %v4238_v48, %v4237_v14  ;;  %v4271_v24 = vadd.f32 %v4270_v4, %v4069_v59  ;;  %v3239_v42 = vadd.f32 %v3238_v39, %v3190_v19 }
 0x357   :  { %v3143_v38 = vadd.f32 %v3142_v21, %v3094_v20 }
 0x358   :  { %v4735_v40 = vpack.c.bf16 %v4239_v6, %v4239_v6  ;;  %v4272_v10 = vrot.slane %v4271_v24, 2  ;;  %v3883_v25 = vmax.f32 %v3239_v42, 0.0 }
 0x35a   :  { %v5229_v12 = vunpack.c.l.b16 %v4735_v40  ;;  %v4273_v52 = vadd.f32 %v4272_v10, %v4271_v24  ;;  %v4075_v63 = vmul.f32 %v17911_v9, %v3883_v25  ;;  %v17978_v24 = vld [vmem:[#allocation24_spill] sm:$0xff] }
 0x35b   :  { %v3191_v37 = vpop.f32.mrf.mxu2 }
 0x35c   :  { %v5339_v56 = vsel %vm5312_vm1, %v5229_v12, %v5338_v57  ;;  %v4274_v46 = vrot.slane %v4273_v52, 1  ;;  %v4306_v11 = vrot.slane %v4075_v63, 4  ;;  %v3192_v34 = vadd.f32 %v3191_v37, %v3143_v38  ;;  %v3240_v45 = vpop.f32.mrf.mxu3  ;;  %v3096_v28 = vpop.f32.mrf.mxu0 }
 0x35d   :  { %v3097_v14 = vadd.f32 %v3096_v28, %v16462_v41  ;;  %v3145_v59 = vpop.f32.mrf.mxu1 }
 0x35e   :  { %v4275_v48 = vadd.f32 %v4274_v46, %v4273_v52  ;;  %v4307_v4 = vadd.f32 %v4306_v11, %v4075_v63  ;;  %v3241_v19 = vadd.f32 %v3240_v45, %v3192_v34 }
 0x35f   :  { %v3146_v39 = vadd.f32 %v3145_v59, %v3097_v14  ;;  %3291 = vmatmul.bf16.gmra.mxu0 %v17977_v35 }
 0x360   :  { %v4741_v20 = vpack.c.bf16 %v4275_v48, %v4275_v48  ;;  %v4308_v21 = vrot.slane %v4307_v4, 2  ;;  %v3889_v6 = vmax.f32 %v3241_v19, 0.0  ;;  %3340 = vmatmul.bf16.gmra.mxu1 %v17978_v24  ;;  %3389 = vmatmul.bf16.gmra.mxu2 %v17951_v58 }
 0x361   :  { %3438 = vmatmul.bf16.gmra.mxu3 %v17952_v3 }
 0x362   :  { %v5235_v57 = vunpack.c.l.b16 %v4741_v20  ;;  %v4309_v42 = vadd.f32 %v4308_v21, %v4307_v4  ;;  %v4081_v41 = vmul.f32 %v17914_v43, %v3889_v6 }
 0x363   :  { %v3194_v38 = vpop.f32.mrf.mxu2 }
 0x364   :  { %v5340_v40 = vsel %vm5314_vm2, %v5235_v57, %v5339_v56  ;;  %v4310_v45 = vrot.slane %v4309_v42, 1  ;;  %v4342_v10 = vrot.slane %v4081_v41, 4  ;;  %v3195_v25 = vadd.f32 %v3194_v38, %v3146_v39  ;;  %v3243_v12 = vpop.f32.mrf.mxu3  ;;  %v3098_v52 = vpop.f32.mrf.mxu0 }
 0x365   :  { %v3099_v63 = vadd.f32 %v3098_v52, %v16468_v55  ;;  %v3147_v37 = vpop.f32.mrf.mxu1  ;;  %v17979_v52 = vld [vmem:[#allocation27_spill] sm:$0xff] }
 0x366   :  { %v4311_v46 = vadd.f32 %v4310_v45, %v4309_v42  ;;  %v4343_v11 = vadd.f32 %v4342_v10, %v4081_v41  ;;  %v3244_v34 = vadd.f32 %v3243_v12, %v3195_v25 }
 0x367   :  { %v3148_v28 = vadd.f32 %v3147_v37, %v3099_v63  ;;  %v10799_v63 = vld [vmem:[%s17669_s2 + $0x760] sm:$0xf] }
 0x368   :  { %v4747_v14 = vpack.c.bf16 %v4311_v46, %v4311_v46  ;;  %v4344_v59 = vrot.slane %v4343_v11, 2  ;;  %v3895_v48 = vmax.f32 %v3244_v34, 0.0  ;;  %v10991_v37 = vld [vmem:[%s17669_s2 + $0x8e0] sm:$0xf]  ;;  %v17980_v34 = vld [vmem:[#allocation28_spill] sm:$0xff] }
 0x36a   :  { %v5241_v4 = vunpack.c.l.b16 %v4747_v14  ;;  %v4345_v19 = vadd.f32 %v4344_v59, %v4343_v11  ;;  %v4087_v20 = vmul.f32 %v17915_v17, %v3895_v48  ;;  %v13636_v14 = vld [vmem:[%s17669_s2 + $0x8f4] sm:$0xf0]  ;;  %v13393_v59 = vld [vmem:[%s17669_s2 + $0x164] sm:$0xf] }
 0x36b   :  { %v3196_v56 = vpop.f32.mrf.mxu2  ;;  %v10992_v48 = vor.u32 %v13636_v14, %v10991_v37 }
 0x36c   :  { %v5341_v21 = vsel %vm5316_vm3, %v5241_v4, %v5340_v40  ;;  %v4346_v39 = vrot.slane %v4345_v19, 1  ;;  %v4378_v6 = vrot.slane %v4087_v20, 4  ;;  %v3197_v57 = vadd.f32 %v3196_v56, %v3148_v28  ;;  %v3245_v38 = vpop.f32.mrf.mxu3  ;;  %v3101_v55 = vpop.f32.mrf.mxu0  ;;  %v13588_v40 = vld [vmem:[%s17669_s2 + $0x774] sm:$0xf0]  ;;  %v10033_v4 = vld [vmem:[%s17669_s2 + $0x178] sm:$0xf0] }
 0x36d   :  { %v3102_v42 = vadd.f32 %v3101_v55, %v16526_v16  ;;  %v3150_v41 = vpop.f32.mrf.mxu1  ;;  %v10800_v28 = vor.u32 %v13588_v40, %v10799_v63  ;;  %3513 = vmatpush.bf16.msrb.mxu1 %v10992_v48  ;;  %v13435_v48 = vld [vmem:[%s17669_s2 + $0x2b4] sm:$0xf] }
 0x36e   :  { %v4347_v45 = vadd.f32 %v4346_v39, %v4345_v19  ;;  %v4379_v10 = vadd.f32 %v4378_v6, %v4087_v20  ;;  %v3246_v25 = vadd.f32 %v3245_v38, %v3197_v57  ;;  %v13441_v19 = vld [vmem:[%s17669_s2 + $0x2e4] sm:$0xf]  ;;  %v10225_v20 = vld [vmem:[%s17669_s2 + $0x2f8] sm:$0xf0]  ;;  %v10036_v57 = vor.u32 %v13393_v59, %v10033_v4  ;;  %v10201_v4 = vld [vmem:[%s17669_s2 + $0x2c8] sm:$0xf0] }
 0x36f   :  { %v3151_v12 = vadd.f32 %v3150_v41, %v3102_v42  ;;  %3296 = vmatmul.bf16.gmra.mxu0 %v17979_v52  ;;  %v10228_v55 = vor.u32 %v13441_v19, %v10225_v20  ;;  %v10775_v42 = vld [vmem:[%s17669_s2 + $0x730] sm:$0xf]  ;;  %v13582_v41 = vld [vmem:[%s17669_s2 + $0x744] sm:$0xf0] }
 0x370   :  { %v4753_v16 = vpack.c.bf16 %v4347_v45, %v4347_v45  ;;  %v4380_v46 = vrot.slane %v4379_v10, 2  ;;  %v3901_v11 = vmax.f32 %v3246_v25, 0.0  ;;  %3345 = vmatmul.bf16.gmra.mxu1 %v17980_v34  ;;  %3394 = vmatmul.bf16.gmra.mxu2 %v14728_v26  ;;  %v10967_v45 = vld [vmem:[%s17669_s2 + $0x8b0] sm:$0xf]  ;;  %v10776_v59 = vor.u32 %v13582_v41, %v10775_v42  ;;  %v13576_v42 = vld [vmem:[%s17669_s2 + $0x714] sm:$0xf0] }
 0x371   :  { %3443 = vmatmul.bf16.gmra.mxu3 %v14730_v27  ;;  %3464 = vmatpush.bf16.msrb.mxu0 %v10800_v28  ;;  %v10943_v41 = vld [vmem:[%s17669_s2 + $0x880] sm:$0xf] }
 0x372   :  { %v5247_v56 = vunpack.c.l.b16 %v4753_v16  ;;  %v4381_v39 = vadd.f32 %v4380_v46, %v4379_v10  ;;  %v4093_v6 = vmul.f32 %v15577_v49, %v3901_v11  ;;  %3562 = vmatpush.bf16.msrb.mxu2 %v10036_v57  ;;  %v13630_v46 = vld [vmem:[%s17669_s2 + $0x8c4] sm:$0xf0]  ;;  %v13387_v11 = vld [vmem:[%s17669_s2 + $0x134] sm:$0xf]  ;;  %3611 = vmatpush.bf16.msrb.mxu3 %v10228_v55  ;;  %v10751_v55 = vld [vmem:[%s17669_s2 + $0x700] sm:$0xf] }
 0x373   :  { %v3199_v38 = vpop.f32.mrf.mxu2 }
 0x374   :  { %v5342_v10 = vsel %vm5318_vm4, %v5247_v56, %v5341_v21  ;;  %v4382_v25 = vrot.slane %v4381_v39, 1  ;;  %v4414_v63 = vrot.slane %v4093_v6, 4  ;;  %v3200_v40 = vadd.f32 %v3199_v38, %v3151_v12  ;;  %v3248_v37 = vpop.f32.mrf.mxu3  ;;  %v3103_v16 = vpop.f32.mrf.mxu0  ;;  %v10009_v12 = vld [vmem:[%s17669_s2 + $0x148] sm:$0xf0] }
 0x375   :  { %v3104_v28 = vadd.f32 %v3103_v16, %v16582_v32  ;;  %v3152_v14 = vpop.f32.mrf.mxu1  ;;  %v10968_v21 = vor.u32 %v13630_v46, %v10967_v45  ;;  %v10012_v32 = vor.u32 %v13387_v11, %v10009_v12  ;;  %3465 = vmatpush.bf16.msrb.mxu0 %v10776_v59  ;;  %v10204_v38 = vor.u32 %v13435_v48, %v10201_v4  ;;  %v9985_v16 = vld [vmem:[%s17669_s2 + $0x118] sm:$0xf0]  ;;  %v13429_v46 = vld [vmem:[%s17669_s2 + $0x284] sm:$0xf]  ;;  %v10727_v4 = vld [vmem:[%s17669_s2 + $0x6d0] sm:$0xf] }
 0x376   :  { %v4383_v19 = vadd.f32 %v4382_v25, %v4381_v39  ;;  %v4415_v20 = vadd.f32 %v4414_v63, %v4093_v6  ;;  %v3249_v56 = vadd.f32 %v3248_v37, %v3200_v40  ;;  %v10752_v25 = vor.u32 %v13576_v42, %v10751_v55  ;;  %v13624_v63 = vld [vmem:[%s17669_s2 + $0x894] sm:$0xf0]  ;;  %v13381_v40 = vld [vmem:[%s17669_s2 + $0x104] sm:$0xf]  ;;  %v10177_v11 = vld [vmem:[%s17669_s2 + $0x298] sm:$0xf0] }
 0x377   :  { %v3153_v57 = vadd.f32 %v3152_v14, %v3104_v28  ;;  %3514 = vmatpush.bf16.msrb.mxu1 %v10968_v21  ;;  %3563 = vmatpush.bf16.msrb.mxu2 %v10012_v32  ;;  %v10944_v37 = vor.u32 %v13624_v63, %v10943_v41  ;;  %v9988_v21 = vor.u32 %v13381_v40, %v9985_v16  ;;  %v13423_v40 = vld [vmem:[%s17669_s2 + $0x254] sm:$0xf] }
 0x378   :  { %v4759_v39 = vpack.c.bf16 %v4383_v19, %v4383_v19  ;;  %v4416_v6 = vrot.slane %v4415_v20, 2  ;;  %v3907_v45 = vmax.f32 %v3249_v56, 0.0  ;;  %3612 = vmatpush.bf16.msrb.mxu3 %v10204_v38  ;;  %v10180_v48 = vor.u32 %v13429_v46, %v10177_v11  ;;  %v13570_v19 = vld [vmem:[%s17669_s2 + $0x6e4] sm:$0xf0]  ;;  %v10919_v56 = vld [vmem:[%s17669_s2 + $0x850] sm:$0xf] }
 0x379   :  { %3466 = vmatpush.bf16.msrb.mxu0 %v10752_v25  ;;  %v10728_v63 = vor.u32 %v13570_v19, %v10727_v4  ;;  %v13564_v4 = vld [vmem:[%s17669_s2 + $0x6b4] sm:$0xf0] }
 0x37a   :  { %v5253_v28 = vunpack.c.l.b16 %v4759_v39  ;;  %v4417_v14 = vadd.f32 %v4416_v6, %v4415_v20  ;;  %v4099_v59 = vmul.f32 %v17918_v7, %v3907_v45  ;;  %v13618_v39 = vld [vmem:[%s17669_s2 + $0x864] sm:$0xf0]  ;;  %v13375_v6 = vld [vmem:[%s17669_s2 + $0xd4] sm:$0xf] }
 0x37b   :  { %v3201_v12 = vpop.f32.mrf.mxu2  ;;  %3515 = vmatpush.bf16.msrb.mxu1 %v10944_v37  ;;  %3564 = vmatpush.bf16.msrb.mxu2 %v9988_v21  ;;  %v10153_v37 = vld [vmem:[%s17669_s2 + $0x268] sm:$0xf0]  ;;  %v17981_v21 = vld [vmem:[#allocation29_spill] sm:$0xff] }
 0x37c   :  { %v5343_v20 = vsel %vm5320_vm5, %v5253_v28, %v5342_v10  ;;  %v4418_v32 = vrot.slane %v4417_v14, 1  ;;  %v4450_v38 = vrot.slane %v4099_v59, 4  ;;  %v3202_v55 = vadd.f32 %v3201_v12, %v3153_v57  ;;  %v3250_v42 = vpop.f32.mrf.mxu3  ;;  %v3106_v41 = vpop.f32.mrf.mxu0  ;;  %3613 = vmatpush.bf16.msrb.mxu3 %v10180_v48  ;;  %v9961_v57 = vld [vmem:[%s17669_s2 + $0xe8] sm:$0xf0]  ;;  %v10703_v48 = vld [vmem:[%s17669_s2 + $0x6a0] sm:$0xf] }
 0x37d   :  { %v3107_v45 = vadd.f32 %v3106_v41, %v16639_v53  ;;  %v3155_v25 = vpop.f32.mrf.mxu1  ;;  %v10920_v10 = vor.u32 %v13618_v39, %v10919_v56  ;;  %v9964_v53 = vor.u32 %v13375_v6, %v9961_v57  ;;  %v10156_v12 = vor.u32 %v13423_v40, %v10153_v37  ;;  %3467 = vmatpush.bf16.msrb.mxu0 %v10728_v63  ;;  %v9937_v39 = vld [vmem:[%s17669_s2 + $0xb8] sm:$0xf0]  ;;  %v13417_v6 = vld [vmem:[%s17669_s2 + $0x224] sm:$0xf] }
 0x37e   :  { %v4419_v16 = vadd.f32 %v4418_v32, %v4417_v14  ;;  %v4451_v46 = vadd.f32 %v4450_v38, %v4099_v59  ;;  %v3251_v11 = vadd.f32 %v3250_v42, %v3202_v55  ;;  %v10895_v14 = vld [vmem:[%s17669_s2 + $0x820] sm:$0xf]  ;;  %v17982_v32 = vld [vmem:[#allocation30_spill] sm:$0xff]  ;;  %v13369_v55 = vld [vmem:[%s17669_s2 + $0xa4] sm:$0xf]  ;;  %v10704_v42 = vor.u32 %v13564_v4, %v10703_v48 }
 0x37f   :  { %v3156_v28 = vadd.f32 %v3155_v25, %v3107_v45  ;;  %3301 = vmatmul.bf16.gmra.mxu0 %v17981_v21  ;;  %3516 = vmatpush.bf16.msrb.mxu1 %v10920_v10  ;;  %v13612_v38 = vld [vmem:[%s17669_s2 + $0x834] sm:$0xf0]  ;;  %v10129_v45 = vld [vmem:[%s17669_s2 + $0x238] sm:$0xf0]  ;;  %v9940_v63 = vor.u32 %v13369_v55, %v9937_v39  ;;  %v13411_v39 = vld [vmem:[%s17669_s2 + $0x1f4] sm:$0xf] }
 0x380   :  { %v4765_v59 = vpack.c.bf16 %v4419_v16, %v4419_v16  ;;  %v4452_v19 = vrot.slane %v4451_v46, 2  ;;  %v3913_v56 = vmax.f32 %v3251_v11, 0.0  ;;  %3350 = vmatmul.bf16.gmra.mxu1 %v17982_v32  ;;  %3399 = vmatmul.bf16.gmra.mxu2 %v14854_v36  ;;  %v10896_v41 = vor.u32 %v13612_v38, %v10895_v14  ;;  %v10679_v16 = vld [vmem:[%s17669_s2 + $0x670] sm:$0xf]  ;;  %v13558_v11 = vld [vmem:[%s17669_s2 + $0x684] sm:$0xf0] }
 0x381   :  { %3448 = vmatmul.bf16.gmra.mxu3 %v17953_v29  ;;  %3565 = vmatpush.bf16.msrb.mxu2 %v9964_v53  ;;  %v10132_v37 = vor.u32 %v13417_v6, %v10129_v45  ;;  %v10105_v6 = vld [vmem:[%s17669_s2 + $0x208] sm:$0xf0] }
 0x382   :  { %v5259_v25 = vunpack.c.l.b16 %v4765_v59  ;;  %v4453_v10 = vadd.f32 %v4452_v19, %v4451_v46  ;;  %v4105_v57 = vmul.f32 %v15523_v51, %v3913_v56  ;;  %3614 = vmatpush.bf16.msrb.mxu3 %v10156_v12  ;;  %v10871_v46 = vld [vmem:[%s17669_s2 + $0x7f0] sm:$0xf]  ;;  %v13606_v19 = vld [vmem:[%s17669_s2 + $0x804] sm:$0xf0]  ;;  %v13363_v56 = vld [vmem:[%s17669_s2 + $0x74] sm:$0xf]  ;;  %3468 = vmatpush.bf16.msrb.mxu0 %v10704_v42 }
 0x383   :  { %v3204_v40 = vpop.f32.mrf.mxu2  ;;  %3517 = vmatpush.bf16.msrb.mxu1 %v10896_v41  ;;  %v10680_v41 = vor.u32 %v13558_v11, %v10679_v16  ;;  %v10655_v16 = vld [vmem:[%s17669_s2 + $0x640] sm:$0xf]  ;;  %v13552_v11 = vld [vmem:[%s17669_s2 + $0x654] sm:$0xf0] }
 0x384   :  { %v16912_v48 = vsel %vm5322_vm6, %v5259_v25, %v5343_v20  ;;  %v4454_v53 = vrot.slane %v4453_v10, 1  ;;  %v4486_v12 = vrot.slane %v4105_v57, 4  ;;  %v3205_v4 = vadd.f32 %v3204_v40, %v3156_v28  ;;  %v3253_v14 = vpop.f32.mrf.mxu3  ;;  %v3108_v59 = vpop.f32.mrf.mxu0  ;;  %v9913_v28 = vld [vmem:[%s17669_s2 + $0x88] sm:$0xf0] }
 0x385   :  { %v3109_v38 = vadd.f32 %v3108_v59, %v16693_v8  ;;  %v3157_v55 = vpop.f32.mrf.mxu1  ;;  %v10872_v20 = vor.u32 %v13606_v19, %v10871_v46  ;;  %3566 = vmatpush.bf16.msrb.mxu2 %v9940_v63  ;;  %v9916_v42 = vor.u32 %v13363_v56, %v9913_v28  ;;  %v10108_v40 = vor.u32 %v13411_v39, %v10105_v6  ;;  %v10847_v46 = vld [vmem:[%s17669_s2 + $0x7c0] sm:$0xf]  ;;  %v13600_v63 = vld [vmem:[%s17669_s2 + $0x7d4] sm:$0xf0]  ;;  %v9889_v19 = vld [vmem:[%s17669_s2 + $0x58] sm:$0xf0] }
 0x386   :  { %v4487_v45 = vadd.f32 %v4486_v12, %v4105_v57  ;;  %v3254_v25 = vadd.f32 %v3253_v14, %v3205_v4  ;;  %3615 = vmatpush.bf16.msrb.mxu3 %v10132_v37  ;;  %v13357_v37 = vld [vmem:[%s17669_s2 + $0x44] sm:$0xf]  ;;  %v4455_v4 = vadd.f32 %v4454_v53, %v4453_v10  ;;  %3469 = vmatpush.bf16.msrb.mxu0 %v10680_v41  ;;  %v10631_v28 = vld [vmem:[%s17669_s2 + $0x610] sm:$0xf]  ;;  %v13546_v39 = vld [vmem:[%s17669_s2 + $0x624] sm:$0xf0] }
 0x387   :  { %v3158_v8 = vadd.f32 %v3157_v55, %v3109_v38  ;;  %3518 = vmatpush.bf16.msrb.mxu1 %v10872_v20  ;;  %v10656_v14 = vor.u32 %v13552_v11, %v10655_v16  ;;  %v10848_v59 = vor.u32 %v13600_v63, %v10847_v46  ;;  %v13405_v56 = vld [vmem:[%s17669_s2 + $0x1c4] sm:$0xf]  ;;  %v10081_v38 = vld [vmem:[%s17669_s2 + $0x1d8] sm:$0xf0]  ;;  %v9892_v10 = vor.u32 %v13357_v37, %v9889_v19  ;;  %v10823_v6 = vld [vmem:[%s17669_s2 + $0x790] sm:$0xf] }
 0x388   :  { %v4488_v57 = vrot.slane %v4487_v45, 2  ;;  %v3919_v12 = vmax.f32 %v3254_v25, 0.0  ;;  %v10084_v41 = vor.u32 %v13405_v56, %v10081_v38  ;;  %v13594_v11 = vld [vmem:[%s17669_s2 + $0x7a4] sm:$0xf0]  ;;  %v13351_v46 = vld [vmem:[%s17669_s2 + $0x14] sm:$0xf]  ;;  %v10632_v37 = vor.u32 %v13546_v39, %v10631_v28 }
 0x389   :  { %3567 = vmatpush.bf16.msrb.mxu2 %v9916_v42  ;;  %v13399_v19 = vld [vmem:[%s17669_s2 + $0x194] sm:$0xf]  ;;  %v10057_v56 = vld [vmem:[%s17669_s2 + $0x1a8] sm:$0xf0] }
 0x38a   :  { %v4489_v55 = vadd.f32 %v4488_v57, %v4487_v45  ;;  %v4111_v20 = vmul.f32 %v17954_v22, %v3919_v12  ;;  %3616 = vmatpush.bf16.msrb.mxu3 %v10108_v40  ;;  %v4771_v57 = vpack.c.bf16 %v4455_v4, %v4455_v4  ;;  %3470 = vmatpush.bf16.msrb.mxu0 %v10656_v14  ;;  %v17983_v14 = vld [vmem:[#allocation32_spill] sm:$0xff]  ;;  %v17984_v22 = vld [vmem:[#allocation33_spill] sm:$0xff] }
 0x38b   :  { %v3206_v53 = vpop.f32.mrf.mxu2  ;;  %3519 = vmatpush.bf16.msrb.mxu1 %v10848_v59  ;;  %v10824_v59 = vor.u32 %v13594_v11, %v10823_v6  ;;  %v10060_v39 = vor.u32 %v13399_v19, %v10057_v56 }
 0x38c   :  { %v4490_v45 = vrot.slane %v4489_v55, 1  ;;  %v4522_v25 = vrot.slane %v4111_v20, 4  ;;  %v3207_v42 = vadd.f32 %v3206_v53, %v3158_v8  ;;  %v3255_v40 = vpop.f32.mrf.mxu3  ;;  %v3111_v16 = vpop.f32.mrf.mxu0  ;;  %v9865_v8 = vld [vmem:[%s17669_s2 + $0x28] sm:$0xf0] }
 0x38d   :  { %v3112_v12 = vadd.f32 %v3111_v16, %v16703_v13  ;;  %v3160_v63 = vpop.f32.mrf.mxu1  ;;  %3568 = vmatpush.bf16.msrb.mxu2 %v9892_v10  ;;  %v9868_v28 = vor.u32 %v13351_v46, %v9865_v8 }
 0x38e   :  { %v4491_v38 = vadd.f32 %v4490_v45, %v4489_v55  ;;  %v4523_v4 = vadd.f32 %v4522_v25, %v4111_v20  ;;  %v3256_v53 = vadd.f32 %v3255_v40, %v3207_v42  ;;  %3617 = vmatpush.bf16.msrb.mxu3 %v10084_v41  ;;  %3471 = vmatpush.bf16.msrb.mxu0 %v10632_v37  ;;  %v5265_v55 = vunpack.c.l.b16 %v4771_v57  ;;  %v17985_v41 = vld [vmem:[#allocation63_spill] sm:$0xff] }
 0x38f   :  { %v3161_v13 = vadd.f32 %v3160_v63, %v3112_v12  ;;  %3306 = vmatmul.bf16.gmra.mxu0 %v17983_v14  ;;  %3520 = vmatpush.bf16.msrb.mxu1 %v10824_v59 }
 0x390   :  { %v4777_v6 = vpack.c.bf16 %v4491_v38, %v4491_v38  ;;  %v4524_v16 = vrot.slane %v4523_v4, 2  ;;  %v3925_v11 = vmax.f32 %v3256_v53, 0.0  ;;  %3355 = vmatmul.bf16.gmra.mxu1 %v17984_v22  ;;  %3404 = vmatmul.bf16.gmra.mxu2 %v14977_v61 }
 0x391   :  { %3453 = vmatmul.bf16.gmra.mxu3 %v14988_v5  ;;  %3569 = vmatpush.bf16.msrb.mxu2 %v9868_v28 }
 0x392   :  { %v5271_v20 = vunpack.c.l.b16 %v4777_v6  ;;  %v4525_v10 = vadd.f32 %v4524_v16, %v4523_v4  ;;  %v4117_v45 = vmul.f32 %v17985_v41, %v3925_v11  ;;  %3618 = vmatpush.bf16.msrb.mxu3 %v10060_v39  ;;  %v18004_v41 = vld [vmem:[#allocation52_spill] sm:$0xff] }
 0x393   :  { %v3209_v25 = vpop.f32.mrf.mxu2 }
 0x394   :  { %v5380_v42 = vsel %vm5310_vm0, %v5271_v20, %v5265_v55  ;;  %v4526_v40 = vrot.slane %v4525_v10, 1  ;;  %v4558_v46 = vrot.slane %v4117_v45, 4  ;;  %v3210_v12 = vadd.f32 %v3209_v25, %v3161_v13  ;;  %v3258_v63 = vpop.f32.mrf.mxu3  ;;  %v3113_v59 = vpop.f32.mrf.mxu0 }
 0x395   :  { %v3114_v8 = vadd.f32 %v3113_v59, %v16709_v18  ;;  %v3162_v19 = vpop.f32.mrf.mxu1  ;;  %v17986_v59 = vld [vmem:[#allocation36_spill] sm:$0xff] }
 0x396   :  { %v4527_v56 = vadd.f32 %v4526_v40, %v4525_v10  ;;  %v4559_v37 = vadd.f32 %v4558_v46, %v4117_v45  ;;  %v3259_v57 = vadd.f32 %v3258_v63, %v3210_v12 }
 0x397   :  { %v3163_v38 = vadd.f32 %v3162_v19, %v3114_v8 }
 0x398   :  { %v4783_v4 = vpack.c.bf16 %v4527_v56, %v4527_v56  ;;  %v4560_v53 = vrot.slane %v4559_v37, 2  ;;  %v3931_v6 = vmax.f32 %v3259_v57, 0.0 }
 0x39a   :  { %v5277_v28 = vunpack.c.l.b16 %v4783_v4  ;;  %v4561_v39 = vadd.f32 %v4560_v53, %v4559_v37  ;;  %v4123_v16 = vmul.f32 %v15553_v44, %v3931_v6  ;;  %v17987_v37 = vld [vmem:[#allocation37_spill] sm:$0xff] }
 0x39b   :  { %v3211_v11 = vpop.f32.mrf.mxu2 }
 0x39c   :  { %v5381_v55 = vsel %vm5312_vm1, %v5277_v28, %v5380_v42  ;;  %v4562_v13 = vrot.slane %v4561_v39, 1  ;;  %v4594_v20 = vrot.slane %v4123_v16, 4  ;;  %v3212_v25 = vadd.f32 %v3211_v11, %v3163_v38  ;;  %v3260_v5 = vpop.f32.mrf.mxu3  ;;  %v3116_v18 = vpop.f32.mrf.mxu0 }
 0x39d   :  { %v3117_v10 = vadd.f32 %v3116_v18, %v16719_v15  ;;  %v3165_v45 = vpop.f32.mrf.mxu1 }
 0x39e   :  { %v4563_v40 = vadd.f32 %v4562_v13, %v4561_v39  ;;  %v4595_v46 = vadd.f32 %v4594_v20, %v4123_v16  ;;  %v3261_v12 = vadd.f32 %v3260_v5, %v3212_v25 }
 0x39f   :  { %v3166_v63 = vadd.f32 %v3165_v45, %v3117_v10  ;;  %3311 = vmatmul.bf16.gmra.mxu0 %v17986_v59 }
 0x3a0   :  { %v4789_v8 = vpack.c.bf16 %v4563_v40, %v4563_v40  ;;  %v4596_v19 = vrot.slane %v4595_v46, 2  ;;  %v3937_v56 = vmax.f32 %v3261_v12, 0.0  ;;  %3360 = vmatmul.bf16.gmra.mxu1 %v17987_v37  ;;  %3409 = vmatmul.bf16.gmra.mxu2 %v17956_v60  ;;  %v18002_v60 = vld [vmem:[#allocation50_spill] sm:$0xff] }
 0x3a1   :  { %3458 = vmatmul.bf16.gmra.mxu3 %v17957_v54 }
 0x3a2   :  { %v5283_v42 = vunpack.c.l.b16 %v4789_v8  ;;  %v4597_v57 = vadd.f32 %v4596_v19, %v4595_v46  ;;  %v4129_v15 = vmul.f32 %v17955_v2, %v3937_v56  ;;  %v17000_v46 = vld [vmem:[%s17670_s3] sm:$0x3f]  ;;  %v17988_v8 = vld [vmem:[#allocation69_spill] sm:$0xff]  ;;  %s9639_s3 = sshll.u32 %s17675_s8, 4  ;;  %s9640_s3 = int_to_ptr.hbm [resolvable:$true] %s9639_s3 }
 0x3a3   :  { %v3214_v38 = vpop.f32.mrf.mxu2 }
 0x3a4   :  { %v5382_v4 = vsel %vm5314_vm2, %v5283_v42, %v5381_v55  ;;  %v4598_v5 = vrot.slane %v4597_v57, 1  ;;  %v4630_v53 = vrot.slane %v4129_v15, 4  ;;  %v3215_v6 = vadd.f32 %v3214_v38, %v3166_v63  ;;  %v3263_v28 = vpop.f32.mrf.mxu3  ;;  %v3118_v39 = vpop.f32.mrf.mxu0 }
 0x3a5   :  { %v3119_v16 = vadd.f32 %v3118_v39, %v16725_v33  ;;  %v3167_v11 = vpop.f32.mrf.mxu1  ;;  %v17003_v55 = vperm.slane %v17000_v46, 4 }
 0x3a6   :  { %v4599_v13 = vadd.f32 %v4598_v5, %v4597_v57  ;;  %v4631_v20 = vadd.f32 %v4630_v53, %v4129_v15  ;;  %v3264_v25 = vadd.f32 %v3263_v28, %v3215_v6 }
 0x3a7   :  { %v3168_v18 = vadd.f32 %v3167_v11, %v3119_v16 }
 0x3a8   :  { %v4795_v10 = vpack.c.bf16 %v4599_v13, %v4599_v13  ;;  %v4632_v45 = vrot.slane %v4631_v20, 2  ;;  %v3943_v40 = vmax.f32 %v3264_v25, 0.0  ;;  %v17989_v13 = vld [vmem:[#allocation40_spill] sm:$0xff] }
 0x3aa   :  { %v5289_v12 = vunpack.c.l.b16 %v4795_v10  ;;  %v4633_v63 = vadd.f32 %v4632_v45, %v4631_v20  ;;  %v4135_v33 = vmul.f32 %v17988_v8, %v3943_v40  ;;  %v17990_v45 = vld [vmem:[#allocation41_spill] sm:$0xff]  ;;  %v17991_v40 = vld [vmem:[#allocation70_spill] sm:$0xff] }
 0x3ab   :  { %v3216_v19 = vpop.f32.mrf.mxu2 }
 0x3ac   :  { %v5383_v56 = vsel %vm5316_vm3, %v5289_v12, %v5382_v4  ;;  %v4634_v42 = vrot.slane %v4633_v63, 1  ;;  %v4666_v57 = vrot.slane %v4135_v33, 4  ;;  %v3217_v15 = vadd.f32 %v3216_v19, %v3168_v18  ;;  %v3265_v38 = vpop.f32.mrf.mxu3  ;;  %v3277_v5 = vpop.f32.mrf.mxu0 }
 0x3ad   :  { %v3278_v53 = vadd.f32 %v3277_v5, %v17003_v55  ;;  %v3326_v6 = vpop.f32.mrf.mxu1 }
 0x3ae   :  { %v4635_v28 = vadd.f32 %v4634_v42, %v4633_v63  ;;  %v4667_v39 = vadd.f32 %v4666_v57, %v4135_v33  ;;  %v3266_v16 = vadd.f32 %v3265_v38, %v3217_v15 }
 0x3af   :  { %v3327_v11 = vadd.f32 %v3326_v6, %v3278_v53  ;;  %3472 = vmatmul.bf16.vlgmr.msrb.gmra.mxu0 %v17989_v13 }
 0x3b0   :  { %v4801_v20 = vpack.c.bf16 %v4635_v28, %v4635_v28  ;;  %v4668_v25 = vrot.slane %v4667_v39, 2  ;;  %v3949_v10 = vmax.f32 %v3266_v16, 0.0  ;;  %3521 = vmatmul.bf16.vlgmr.msrb.gmra.mxu1 %v17990_v45  ;;  %3570 = vmatmul.bf16.vlgmr.msrb.gmra.mxu2 %v17963_v47 }
 0x3b1   :  { %3619 = vmatmul.bf16.vlgmr.msrb.gmra.mxu3 %v17964_v30 }
 0x3b2   :  { %v5295_v4 = vunpack.c.l.b16 %v4801_v20  ;;  %v4669_v18 = vadd.f32 %v4668_v25, %v4667_v39  ;;  %v4141_v12 = vmul.f32 %v17991_v40, %v3949_v10 }
 0x3b3   :  { %v3375_v19 = vpop.f32.mrf.mxu2 }
 0x3b4   :  { %v5384_v63 = vsel %vm5318_vm4, %v5295_v4, %v5383_v56  ;;  %v4670_v33 = vrot.slane %v4669_v18, 1  ;;  %v4702_v42 = vrot.slane %v4141_v12, 4  ;;  %v3376_v57 = vadd.f32 %v3375_v19, %v3327_v11  ;;  %v3424_v15 = vpop.f32.mrf.mxu3  ;;  %v3279_v38 = vpop.f32.mrf.mxu0 }
 0x3b5   :  { %v3280_v5 = vadd.f32 %v3279_v38, %v17003_v55  ;;  %v3328_v53 = vpop.f32.mrf.mxu1 }
 0x3b6   :  { %v4671_v6 = vadd.f32 %v4670_v33, %v4669_v18  ;;  %v4703_v28 = vadd.f32 %v4702_v42, %v4141_v12  ;;  %v17015_v47 = vadd.f32 %v3424_v15, %v3376_v57  ;;  %v17992_v33 = vld [vmem:[#allocation42_spill] sm:$0xff]  ;;  %v17993_v57 = vld [vmem:[#allocation43_spill] sm:$0xff]  ;;  %v17994_v15 = vld [vmem:[#allocation16_spill] sm:$0xff] }
 0x3b7   :  { %v3329_v30 = vadd.f32 %v3328_v53, %v3280_v5 }
 0x3b8   :  { %v4807_v16 = vpack.c.bf16 %v4671_v6, %v4671_v6  ;;  %v4704_v39 = vrot.slane %v4703_v28, 2 }
 0x3ba   :  { %v5301_v20 = vunpack.c.l.b16 %v4807_v16  ;;  %v4705_v25 = vadd.f32 %v4704_v39, %v4703_v28 }
 0x3bb   :  { %v3377_v10 = vpop.f32.mrf.mxu2 }
 0x3bc   :  { %v5385_v56 = vsel %vm5320_vm5, %v5301_v20, %v5384_v63  ;;  %v4706_v4 = vrot.slane %v4705_v25, 1  ;;  %v3378_v40 = vadd.f32 %v3377_v10, %v3329_v30  ;;  %v3426_v11 = vpop.f32.mrf.mxu3  ;;  %v3282_v19 = vpop.f32.mrf.mxu0 }
 0x3bd   :  { %v3283_v8 = vadd.f32 %v3282_v19, %v17003_v55  ;;  %v3331_v38 = vpop.f32.mrf.mxu1 }
 0x3be   :  { %v4707_v54 = vadd.f32 %v4706_v4, %v4705_v25  ;;  %v17019_v18 = vadd.f32 %v3426_v11, %v3378_v40 }
 0x3bf   :  { %v3332_v12 = vadd.f32 %v3331_v38, %v3283_v8  ;;  %3477 = vmatmul.bf16.gmra.mxu0 %v17992_v33  ;;  %v17996_v38 = vld [vmem:[#allocation44_spill] sm:$0xff] }
 0x3c0   :  { %v4813_v42 = vpack.c.bf16 %v4707_v54, %v4707_v54  ;;  %3526 = vmatmul.bf16.gmra.mxu1 %v17993_v57  ;;  %3575 = vmatmul.bf16.gmra.mxu2 %v17969_v0 }
 0x3c1   :  { %3624 = vmatmul.bf16.gmra.mxu3 %v17994_v15 }
 0x3c2   :  { %v5307_v63 = vunpack.c.l.b16 %v4813_v42 }
 0x3c3   :  { %v3380_v5 = vpop.f32.mrf.mxu2 }
 0x3c4   :  { %v5386_v53 = vsel %vm5322_vm6, %v5307_v63, %v5385_v56  ;;  %v3381_v6 = vadd.f32 %v3380_v5, %v3332_v12  ;;  %v3429_v28 = vpop.f32.mrf.mxu3  ;;  %v3284_v30 = vpop.f32.mrf.mxu0 }
 0x3c5   :  { %v17027_v40 = vpack.c.b16 %v5386_v53, %v16912_v48  ;;  %v3285_v8 = vadd.f32 %v3284_v30, %v17003_v55  ;;  %v3333_v16 = vpop.f32.mrf.mxu1  ;;  %v17997_v48 = vld [vmem:[#allocation45_spill] sm:$0xff] }
 0x3c6   :  { %v17030_v54 = vadd.f32 %v3429_v28, %v3381_v6 }
 0x3c7   :  { %17995 = vst [vmem:[#allocation58_spill] sm:$0xff] %v17027_v40  ;;  %v3334_v39 = vadd.f32 %v3333_v16, %v3285_v8 }
 0x3cb   :  { %v3382_v20 = vpop.f32.mrf.mxu2 }
 0x3cc   :  { %v3383_v0 = vadd.f32 %v3382_v20, %v3334_v39  ;;  %v3431_v25 = vpop.f32.mrf.mxu3  ;;  %v3287_v10 = vpop.f32.mrf.mxu0 }
 0x3cd   :  { %v3288_v4 = vadd.f32 %v3287_v10, %v17003_v55  ;;  %v3336_v11 = vpop.f32.mrf.mxu1  ;;  %v17999_v10 = vld [vmem:[#allocation47_spill] sm:$0xff] }
 0x3ce   :  { %v17033_v56 = vadd.f32 %v3431_v25, %v3383_v0  ;;  %v17998_v25 = vld [vmem:[#allocation46_spill] sm:$0xff] }
 0x3cf   :  { %v3337_v19 = vadd.f32 %v3336_v11, %v3288_v4  ;;  %3482 = vmatmul.bf16.gmra.mxu0 %v17996_v38 }
 0x3d0   :  { %3531 = vmatmul.bf16.gmra.mxu1 %v17997_v48  ;;  %3580 = vmatmul.bf16.gmra.mxu2 %v17975_v31 }
 0x3d1   :  { %3629 = vmatmul.bf16.gmra.mxu3 %v17976_v23 }
 0x3d3   :  { %v3385_v12 = vpop.f32.mrf.mxu2 }
 0x3d4   :  { %v3386_v42 = vadd.f32 %v3385_v12, %v3337_v19  ;;  %v3434_v15 = vpop.f32.mrf.mxu3  ;;  %v3289_v63 = vpop.f32.mrf.mxu0 }
 0x3d5   :  { %v3290_v5 = vadd.f32 %v3289_v63, %v17003_v55  ;;  %v3338_v53 = vpop.f32.mrf.mxu1 }
 0x3d6   :  { %v17040_v6 = vadd.f32 %v3434_v15, %v3386_v42 }
 0x3d7   :  { %v3339_v28 = vadd.f32 %v3338_v53, %v3290_v5 }
 0x3db   :  { %v3387_v30 = vpop.f32.mrf.mxu2 }
 0x3dc   :  { %v3388_v8 = vadd.f32 %v3387_v30, %v3339_v28  ;;  %v3436_v16 = vpop.f32.mrf.mxu3  ;;  %v3292_v39 = vpop.f32.mrf.mxu0 }
 0x3dd   :  { %v3293_v20 = vadd.f32 %v3292_v39, %v17003_v55  ;;  %v3341_v0 = vpop.f32.mrf.mxu1 }
 0x3de   :  { %v17043_v31 = vadd.f32 %v3436_v16, %v3388_v8 }
 0x3df   :  { %v3342_v23 = vadd.f32 %v3341_v0, %v3293_v20  ;;  %3487 = vmatmul.bf16.gmra.mxu0 %v17998_v25  ;;  %v18000_v20 = vld [vmem:[#allocation48_spill] sm:$0xff]  ;;  %v13489_v0 = vld [vmem:[%s17669_s2 + $0x464] sm:$0xf] }
 0x3e0   :  { %3536 = vmatmul.bf16.gmra.mxu1 %v17999_v10  ;;  %3585 = vmatmul.bf16.gmra.mxu2 %v17977_v35 }
 0x3e1   :  { %3634 = vmatmul.bf16.gmra.mxu3 %v17978_v24 }
 0x3e3   :  { %v3390_v4 = vpop.f32.mrf.mxu2 }
 0x3e4   :  { %v3391_v11 = vadd.f32 %v3390_v4, %v3342_v23  ;;  %v3439_v19 = vpop.f32.mrf.mxu3  ;;  %v3294_v12 = vpop.f32.mrf.mxu0  ;;  %v10417_v23 = vld [vmem:[%s17669_s2 + $0x478] sm:$0xf0]  ;;  %v13537_v4 = vld [vmem:[%s17669_s2 + $0x5e4] sm:$0xf] }
 0x3e5   :  { %v3295_v42 = vadd.f32 %v3294_v12, %v17003_v55  ;;  %v3343_v15 = vpop.f32.mrf.mxu1  ;;  %v10609_v12 = vld [vmem:[%s17669_s2 + $0x5f8] sm:$0xf0] }
 0x3e6   :  { %v17050_v63 = vadd.f32 %v3439_v19, %v3391_v11  ;;  %v18001_v11 = vld [vmem:[#allocation49_spill] sm:$0xff]  ;;  %v10420_v19 = vor.u32 %v13489_v0, %v10417_v23 }
 0x3e7   :  { %v3344_v5 = vadd.f32 %v3343_v15, %v3295_v42  ;;  %v13585_v42 = vld [vmem:[%s17669_s2 + $0x764] sm:$0xf]  ;;  %v10801_v15 = vld [vmem:[%s17669_s2 + $0x778] sm:$0xf0] }
 0x3e8   :  { %3660 = vmatpush.bf16.msra.mxu0 %v10420_v19 }
 0x3eb   :  { %v3392_v53 = vpop.f32.mrf.mxu2 }
 0x3ec   :  { %v3393_v28 = vadd.f32 %v3392_v53, %v3344_v5  ;;  %v3441_v30 = vpop.f32.mrf.mxu3  ;;  %v3297_v8 = vpop.f32.mrf.mxu0  ;;  %v10612_v5 = vor.u32 %v13537_v4, %v10609_v12  ;;  %v10804_v53 = vor.u32 %v13585_v42, %v10801_v15  ;;  %v10585_v12 = vld [vmem:[%s17669_s2 + $0x5c8] sm:$0xf0]  ;;  %v13579_v42 = vld [vmem:[%s17669_s2 + $0x734] sm:$0xf] }
 0x3ed   :  { %v3298_v16 = vadd.f32 %v3297_v8, %v17003_v55  ;;  %v3346_v39 = vpop.f32.mrf.mxu1  ;;  %v10777_v15 = vld [vmem:[%s17669_s2 + $0x748] sm:$0xf0] }
 0x3ee   :  { %v17053_v35 = vadd.f32 %v3441_v30, %v3393_v28  ;;  %v10993_v28 = vld [vmem:[%s17669_s2 + $0x8f8] sm:$0xf0]  ;;  %3709 = vmatpush.bf16.msra.mxu1 %v10612_v5  ;;  %3758 = vmatpush.bf16.msra.mxu2 %v10804_v53 }
 0x3ef   :  { %v3347_v24 = vadd.f32 %v3346_v39, %v3298_v16  ;;  %3492 = vmatmul.bf16.gmra.mxu0 %v18000_v20  ;;  %v13483_v16 = vld [vmem:[%s17669_s2 + $0x434] sm:$0xf] }
 0x3f0   :  { %3541 = vmatmul.bf16.gmra.mxu1 %v18001_v11  ;;  %3590 = vmatmul.bf16.gmra.mxu2 %v17979_v52  ;;  %v13633_v52 = vld [vmem:[%s17669_s2 + $0x8e4] sm:$0xf]  ;;  %v13531_v39 = vld [vmem:[%s17669_s2 + $0x5b4] sm:$0xf] }
 0x3f1   :  { %3639 = vmatmul.bf16.gmra.mxu3 %v17980_v34  ;;  %v10996_v30 = vor.u32 %v13633_v52, %v10993_v28  ;;  %v10393_v34 = vld [vmem:[%s17669_s2 + $0x448] sm:$0xf0]  ;;  %v10780_v52 = vor.u32 %v13579_v42, %v10777_v15  ;;  %v13627_v28 = vld [vmem:[%s17669_s2 + $0x8b4] sm:$0xf]  ;;  %v10753_v42 = vld [vmem:[%s17669_s2 + $0x718] sm:$0xf0] }
 0x3f2   :  { %v10396_v19 = vor.u32 %v13483_v16, %v10393_v34 }
 0x3f3   :  { %v3395_v8 = vpop.f32.mrf.mxu2  ;;  %3807 = vmatpush.bf16.msra.mxu3 %v10996_v30  ;;  %v10969_v30 = vld [vmem:[%s17669_s2 + $0x8c8] sm:$0xf0]  ;;  %3759 = vmatpush.bf16.msra.mxu2 %v10780_v52 }
 0x3f4   :  { %v3396_v0 = vadd.f32 %v3395_v8, %v3347_v24  ;;  %v3444_v23 = vpop.f32.mrf.mxu3  ;;  %v3299_v4 = vpop.f32.mrf.mxu0  ;;  %v10588_v24 = vor.u32 %v13531_v39, %v10585_v12  ;;  %3661 = vmatpush.bf16.msra.mxu0 %v10396_v19  ;;  %v10972_v16 = vor.u32 %v13627_v28, %v10969_v30  ;;  %v13477_v39 = vld [vmem:[%s17669_s2 + $0x404] sm:$0xf]  ;;  %v13471_v30 = vld [vmem:[%s17669_s2 + $0x3d4] sm:$0xf] }
 0x3f5   :  { %v3300_v5 = vadd.f32 %v3299_v4, %v17003_v55  ;;  %v3348_v53 = vpop.f32.mrf.mxu1  ;;  %v10369_v4 = vld [vmem:[%s17669_s2 + $0x418] sm:$0xf0]  ;;  %v13525_v12 = vld [vmem:[%s17669_s2 + $0x584] sm:$0xf] }
 0x3f6   :  { %v17108_v8 = vadd.f32 %v3444_v23, %v3396_v0  ;;  %3710 = vmatpush.bf16.msra.mxu1 %v10588_v24  ;;  %v10372_v0 = vor.u32 %v13477_v39, %v10369_v4  ;;  %v10561_v23 = vld [vmem:[%s17669_s2 + $0x598] sm:$0xf0]  ;;  %v13573_v19 = vld [vmem:[%s17669_s2 + $0x704] sm:$0xf]  ;;  %v13519_v39 = vld [vmem:[%s17669_s2 + $0x554] sm:$0xf] }
 0x3f7   :  { %v3349_v34 = vadd.f32 %v3348_v53, %v3300_v5  ;;  %3808 = vmatpush.bf16.msra.mxu3 %v10972_v16  ;;  %v10564_v15 = vor.u32 %v13525_v12, %v10561_v23  ;;  %v10756_v5 = vor.u32 %v13573_v19, %v10753_v42  ;;  %v13621_v53 = vld [vmem:[%s17669_s2 + $0x884] sm:$0xf]  ;;  %v10945_v24 = vld [vmem:[%s17669_s2 + $0x898] sm:$0xf0]  ;;  %v10345_v16 = vld [vmem:[%s17669_s2 + $0x3e8] sm:$0xf0] }
 0x3f8   :  { %3662 = vmatpush.bf16.msra.mxu0 %v10372_v0  ;;  %v10948_v52 = vor.u32 %v13621_v53, %v10945_v24  ;;  %v10348_v0 = vor.u32 %v13471_v30, %v10345_v16  ;;  %v10537_v19 = vld [vmem:[%s17669_s2 + $0x568] sm:$0xf0]  ;;  %v13567_v42 = vld [vmem:[%s17669_s2 + $0x6d4] sm:$0xf] }
 0x3f9   :  { %3760 = vmatpush.bf16.msra.mxu2 %v10756_v5 }
 0x3fa   :  { %3711 = vmatpush.bf16.msra.mxu1 %v10564_v15  ;;  %v10729_v15 = vld [vmem:[%s17669_s2 + $0x6e8] sm:$0xf0] }
 0x3fb   :  { %v3397_v28 = vpop.f32.mrf.mxu2  ;;  %3809 = vmatpush.bf16.msra.mxu3 %v10948_v52  ;;  %v10732_v24 = vor.u32 %v13567_v42, %v10729_v15  ;;  %v13615_v52 = vld [vmem:[%s17669_s2 + $0x854] sm:$0xf]  ;;  %v13561_v42 = vld [vmem:[%s17669_s2 + $0x6a4] sm:$0xf]  ;;  %v10705_v15 = vld [vmem:[%s17669_s2 + $0x6b8] sm:$0xf0] }
 0x3fc   :  { %v3398_v4 = vadd.f32 %v3397_v28, %v3349_v34  ;;  %v3446_v12 = vpop.f32.mrf.mxu3  ;;  %v3302_v23 = vpop.f32.mrf.mxu0  ;;  %v10540_v34 = vor.u32 %v13519_v39, %v10537_v19  ;;  %v10921_v28 = vld [vmem:[%s17669_s2 + $0x868] sm:$0xf0]  ;;  %3663 = vmatpush.bf16.msra.mxu0 %v10348_v0  ;;  %v13465_v39 = vld [vmem:[%s17669_s2 + $0x3a4] sm:$0xf]  ;;  %v10513_v0 = vld [vmem:[%s17669_s2 + $0x538] sm:$0xf0] }
 0x3fd   :  { %v3303_v5 = vadd.f32 %v3302_v23, %v17003_v55  ;;  %v3351_v53 = vpop.f32.mrf.mxu1  ;;  %v10924_v16 = vor.u32 %v13615_v52, %v10921_v28  ;;  %v10321_v23 = vld [vmem:[%s17669_s2 + $0x3b8] sm:$0xf0]  ;;  %v13513_v19 = vld [vmem:[%s17669_s2 + $0x524] sm:$0xf]  ;;  %3761 = vmatpush.bf16.msra.mxu2 %v10732_v24  ;;  %v10297_v24 = vld [vmem:[%s17669_s2 + $0x388] sm:$0xf0] }
 0x3fe   :  { %v17159_v30 = vadd.f32 %v3446_v12, %v3398_v4  ;;  %3712 = vmatpush.bf16.msra.mxu1 %v10540_v34  ;;  %v18003_v4 = vld [vmem:[#allocation51_spill] sm:$0xff]  ;;  %v10324_v12 = vor.u32 %v13465_v39, %v10321_v23  ;;  %v10897_v34 = vld [vmem:[%s17669_s2 + $0x838] sm:$0xf0]  ;;  %v13507_v39 = vld [vmem:[%s17669_s2 + $0x4f4] sm:$0xf] }
 0x3ff   :  { %v3352_v40 = vadd.f32 %v3351_v53, %v3303_v5  ;;  %3497 = vmatmul.bf16.gmra.mxu0 %v18002_v60  ;;  %v10516_v5 = vor.u32 %v13513_v19, %v10513_v0  ;;  %v10708_v53 = vor.u32 %v13561_v42, %v10705_v15  ;;  %3810 = vmatpush.bf16.msra.mxu3 %v10924_v16  ;;  %v13555_v42 = vld [vmem:[%s17669_s2 + $0x674] sm:$0xf]  ;;  %v10681_v15 = vld [vmem:[%s17669_s2 + $0x688] sm:$0xf0] }
 0x400   :  { %3546 = vmatmul.bf16.gmra.mxu1 %v18003_v4  ;;  %3595 = vmatmul.bf16.gmra.mxu2 %v17981_v21  ;;  %v13609_v21 = vld [vmem:[%s17669_s2 + $0x824] sm:$0xf] }
 0x401   :  { %3644 = vmatmul.bf16.gmra.mxu3 %v17982_v32  ;;  %3664 = vmatpush.bf16.msra.mxu0 %v10324_v12  ;;  %v10900_v52 = vor.u32 %v13609_v21, %v10897_v34  ;;  %v13459_v32 = vld [vmem:[%s17669_s2 + $0x374] sm:$0xf]  ;;  %v10489_v12 = vld [vmem:[%s17669_s2 + $0x508] sm:$0xf0]  ;;  %v10684_v34 = vor.u32 %v13555_v42, %v10681_v15  ;;  %v13597_v15 = vld [vmem:[%s17669_s2 + $0x7c4] sm:$0xf] }
 0x402   :  { %3713 = vmatpush.bf16.msra.mxu1 %v10516_v5  ;;  %v10300_v16 = vor.u32 %v13459_v32, %v10297_v24  ;;  %3762 = vmatpush.bf16.msra.mxu2 %v10708_v53  ;;  %v10873_v32 = vld [vmem:[%s17669_s2 + $0x808] sm:$0xf0]  ;;  %v13453_v53 = vld [vmem:[%s17669_s2 + $0x344] sm:$0xf] }
 0x403   :  { %v3400_v28 = vpop.f32.mrf.mxu2  ;;  %3811 = vmatpush.bf16.msra.mxu3 %v10900_v52  ;;  %v10465_v52 = vld [vmem:[%s17669_s2 + $0x4d8] sm:$0xf0] }
 0x404   :  { %v3401_v23 = vadd.f32 %v3400_v28, %v3352_v40  ;;  %v3449_v19 = vpop.f32.mrf.mxu3  ;;  %v3304_v0 = vpop.f32.mrf.mxu0  ;;  %v10492_v40 = vor.u32 %v13507_v39, %v10489_v12  ;;  %v13603_v28 = vld [vmem:[%s17669_s2 + $0x7f4] sm:$0xf]  ;;  %v10273_v39 = vld [vmem:[%s17669_s2 + $0x358] sm:$0xf0] }
 0x405   :  { %v3305_v5 = vadd.f32 %v3304_v0, %v17003_v55  ;;  %v3353_v21 = vpop.f32.mrf.mxu1  ;;  %3665 = vmatpush.bf16.msra.mxu0 %v10300_v16  ;;  %v10876_v2 = vor.u32 %v13603_v28, %v10873_v32  ;;  %v13501_v0 = vld [vmem:[%s17669_s2 + $0x4c4] sm:$0xf]  ;;  %v10276_v12 = vor.u32 %v13453_v53, %v10273_v39  ;;  %v13447_v28 = vld [vmem:[%s17669_s2 + $0x314] sm:$0xf] }
 0x406   :  { %v17214_v24 = vadd.f32 %v3449_v19, %v3401_v23  ;;  %3714 = vmatpush.bf16.msra.mxu1 %v10492_v40  ;;  %v13549_v23 = vld [vmem:[%s17669_s2 + $0x644] sm:$0xf]  ;;  %v10657_v19 = vld [vmem:[%s17669_s2 + $0x658] sm:$0xf0]  ;;  %3763 = vmatpush.bf16.msra.mxu2 %v10684_v34  ;;  %v10468_v16 = vor.u32 %v13501_v0, %v10465_v52  ;;  %v10249_v34 = vld [vmem:[%s17669_s2 + $0x328] sm:$0xf0] }
 0x407   :  { %v3354_v44 = vadd.f32 %v3353_v21, %v3305_v5  ;;  %v10660_v42 = vor.u32 %v13549_v23, %v10657_v19  ;;  %v10849_v5 = vld [vmem:[%s17669_s2 + $0x7d8] sm:$0xf0]  ;;  %3812 = vmatpush.bf16.msra.mxu3 %v10876_v2  ;;  %v13495_v32 = vld [vmem:[%s17669_s2 + $0x494] sm:$0xf]  ;;  %v10252_v2 = vor.u32 %v13447_v28, %v10249_v34  ;;  %v10633_v23 = vld [vmem:[%s17669_s2 + $0x628] sm:$0xf0] }
 0x408   :  { %v10852_v21 = vor.u32 %v13597_v15, %v10849_v5  ;;  %v13543_v52 = vld [vmem:[%s17669_s2 + $0x614] sm:$0xf] }
 0x409   :  { %3666 = vmatpush.bf16.msra.mxu0 %v10276_v12  ;;  %v10441_v12 = vld [vmem:[%s17669_s2 + $0x4a8] sm:$0xf0]  ;;  %v10636_v15 = vor.u32 %v13543_v52, %v10633_v23  ;;  %v13591_v5 = vld [vmem:[%s17669_s2 + $0x794] sm:$0xf] }
 0x40a   :  { %3715 = vmatpush.bf16.msra.mxu1 %v10468_v16  ;;  %3764 = vmatpush.bf16.msra.mxu2 %v10660_v42  ;;  %v18005_v42 = vld [vmem:[#allocation53_spill] sm:$0xff] }
 0x40b   :  { %v3402_v40 = vpop.f32.mrf.mxu2  ;;  %3813 = vmatpush.bf16.msra.mxu3 %v10852_v21 }
 0x40c   :  { %v3403_v53 = vadd.f32 %v3402_v40, %v3354_v44  ;;  %v3451_v39 = vpop.f32.mrf.mxu3  ;;  %v3307_v0 = vpop.f32.mrf.mxu0  ;;  %v10444_v44 = vor.u32 %v13495_v32, %v10441_v12  ;;  %v10825_v40 = vld [vmem:[%s17669_s2 + $0x7a8] sm:$0xf0] }
 0x40d   :  { %v3308_v19 = vadd.f32 %v3307_v0, %v17003_v55  ;;  %v3356_v16 = vpop.f32.mrf.mxu1  ;;  %3667 = vmatpush.bf16.msra.mxu0 %v10252_v2  ;;  %v10828_v34 = vor.u32 %v13591_v5, %v10825_v40  ;;  %v18006_v40 = vld [vmem:[#allocation54_spill] sm:$0xff] }
 0x40e   :  { %v17265_v28 = vadd.f32 %v3451_v39, %v3403_v53  ;;  %3716 = vmatpush.bf16.msra.mxu1 %v10444_v44  ;;  %3765 = vmatpush.bf16.msra.mxu2 %v10636_v15 }
 0x40f   :  { %v3357_v61 = vadd.f32 %v3356_v16, %v3308_v19  ;;  %3502 = vmatmul.bf16.gmra.mxu0 %v18004_v41  ;;  %3814 = vmatpush.bf16.msra.mxu3 %v10828_v34 }
 0x410   :  { %3551 = vmatmul.bf16.gmra.mxu1 %v18005_v42  ;;  %3600 = vmatmul.bf16.gmra.mxu2 %v17983_v14 }
 0x411   :  { %3649 = vmatmul.bf16.gmra.mxu3 %v17984_v22 }
 0x413   :  { %v3405_v32 = vpop.f32.mrf.mxu2 }
 0x414   :  { %v3406_v0 = vadd.f32 %v3405_v32, %v3357_v61  ;;  %v3454_v12 = vpop.f32.mrf.mxu3  ;;  %v3309_v53 = vpop.f32.mrf.mxu0  ;;  %v18007_v61 = vld [vmem:[#allocation55_spill] sm:$0xff] }
 0x415   :  { %v3310_v21 = vadd.f32 %v3309_v53, %v17003_v55  ;;  %v3358_v39 = vpop.f32.mrf.mxu1 }
 0x416   :  { %v17272_v2 = vadd.f32 %v3454_v12, %v3406_v0 }
 0x417   :  { %v3359_v52 = vadd.f32 %v3358_v39, %v3310_v21 }
 0x41b   :  { %v3407_v23 = vpop.f32.mrf.mxu2 }
 0x41c   :  { %v3408_v19 = vadd.f32 %v3407_v23, %v3359_v52  ;;  %v3456_v16 = vpop.f32.mrf.mxu3  ;;  %v3312_v44 = vpop.f32.mrf.mxu0 }
 0x41d   :  { %v3313_v14 = vadd.f32 %v3312_v44, %v17003_v55  ;;  %v3361_v5 = vpop.f32.mrf.mxu1 }
 0x41e   :  { %v17275_v22 = vadd.f32 %v3456_v16, %v3408_v19 }
 0x41f   :  { %v3362_v15 = vadd.f32 %v3361_v5, %v3313_v14  ;;  %3507 = vmatmul.bf16.gmra.mxu0 %v18006_v40 }
 0x420   :  { %3556 = vmatmul.bf16.gmra.mxu1 %v18007_v61  ;;  %3605 = vmatmul.bf16.gmra.mxu2 %v17986_v59  ;;  %v18009_v61 = vld [vmem:[#allocation13_spill] sm:$0xff] }
 0x421   :  { %3654 = vmatmul.bf16.gmra.mxu3 %v17987_v37 }
 0x423   :  { %v3410_v34 = vpop.f32.mrf.mxu2 }
 0x424   :  { %v3411_v32 = vadd.f32 %v3410_v34, %v3362_v15  ;;  %v3459_v0 = vpop.f32.mrf.mxu3  ;;  %v3314_v12 = vpop.f32.mrf.mxu0  ;;  %v18010_v15 = vld [vmem:[#allocation14_spill] sm:$0xff] }
 0x425   :  { %v3315_v53 = vadd.f32 %v3314_v12, %v17003_v55  ;;  %v3363_v21 = vpop.f32.mrf.mxu1  ;;  %v17291_v55 = vperm.slane %v17000_v46, 5 }
 0x426   :  { %v17282_v39 = vadd.f32 %v3459_v0, %v3411_v32  ;;  %v18011_v32 = vld [vmem:[#allocation56_spill] sm:$0xff] }
 0x427   :  { %v3364_v52 = vadd.f32 %v3363_v21, %v3315_v53 }
 0x42b   :  { %v3412_v23 = vpop.f32.mrf.mxu2 }
 0x42c   :  { %v3413_v19 = vadd.f32 %v3412_v23, %v3364_v52  ;;  %v3461_v16 = vpop.f32.mrf.mxu3  ;;  %v3473_v44 = vpop.f32.mrf.mxu0 }
 0x42d   :  { %v3474_v14 = vadd.f32 %v3473_v44, %v17015_v47  ;;  %v3522_v5 = vpop.f32.mrf.mxu1 }
 0x42e   :  { %v17285_v59 = vadd.f32 %v3461_v16, %v3413_v19 }
 0x42f   :  { %v3523_v37 = vadd.f32 %v3522_v5, %v3474_v14  ;;  %3668 = vmatmul.bf16.vlgmr.msra.gmra.mxu0 %v18009_v61  ;;  %v18012_v5 = vld [vmem:[#allocation57_spill] sm:$0xff] }
 0x430   :  { %18008 = vst [vmem:[#allocation21_spill] sm:$0xff] %v17285_v59  ;;  %3717 = vmatmul.bf16.vlgmr.msra.gmra.mxu1 %v18010_v15  ;;  %3766 = vmatmul.bf16.vlgmr.msra.gmra.mxu2 %v17989_v13 }
 0x431   :  { %v3860_v34 = vmax.f32 %v3523_v37, 0.0  ;;  %3815 = vmatmul.bf16.vlgmr.msra.gmra.mxu3 %v17990_v45 }
 0x433   :  { %v4052_v0 = vmul.f32 %v18011_v32, %v3860_v34  ;;  %v3571_v12 = vpop.f32.mrf.mxu2 }
 0x434   :  { %v3572_v47 = vadd.f32 %v3571_v12, %v17291_v55  ;;  %v3620_v53 = vpop.f32.mrf.mxu3  ;;  %v3475_v21 = vpop.f32.mrf.mxu0 }
 0x435   :  { %v4168_v52 = vrot.slane %v4052_v0, 4  ;;  %v3476_v61 = vadd.f32 %v3475_v21, %v17019_v18  ;;  %v3524_v23 = vpop.f32.mrf.mxu1  ;;  %v18013_v21 = vld [vmem:[#allocation17_spill] sm:$0xff] }
 0x436   :  { %v17297_v19 = vadd.f32 %v3620_v53, %v3572_v47 }
 0x437   :  { %v4169_v13 = vadd.f32 %v4168_v52, %v4052_v0  ;;  %v3525_v16 = vadd.f32 %v3524_v23, %v3476_v61  ;;  %v18014_v52 = vld [vmem:[#allocation18_spill] sm:$0xff] }
 0x439   :  { %v4170_v46 = vrot.slane %v4169_v13, 2  ;;  %v3866_v44 = vmax.f32 %v3525_v16, 0.0 }
 0x43b   :  { %v4171_v14 = vadd.f32 %v4170_v46, %v4169_v13  ;;  %v4058_v45 = vmul.f32 %v18012_v5, %v3866_v44  ;;  %v3573_v37 = vpop.f32.mrf.mxu2 }
 0x43c   :  { %v3574_v15 = vadd.f32 %v3573_v37, %v17291_v55  ;;  %v3622_v34 = vpop.f32.mrf.mxu3  ;;  %v3478_v12 = vpop.f32.mrf.mxu0 }
 0x43d   :  { %v4204_v32 = vrot.slane %v4058_v45, 4  ;;  %v3479_v59 = vadd.f32 %v3478_v12, %v17030_v54  ;;  %v3527_v40 = vpop.f32.mrf.mxu1  ;;  %v4172_v47 = vrot.slane %v4171_v14, 1 }
 0x43e   :  { %v17302_v18 = vadd.f32 %v3622_v34, %v3574_v15 }
 0x43f   :  { %v4205_v53 = vadd.f32 %v4204_v32, %v4058_v45  ;;  %v3528_v0 = vadd.f32 %v3527_v40, %v3479_v59  ;;  %3673 = vmatmul.bf16.gmra.mxu0 %v18013_v21  ;;  %v4173_v13 = vadd.f32 %v4172_v47, %v4171_v14 }
 0x440   :  { %3722 = vmatmul.bf16.gmra.mxu1 %v18014_v52  ;;  %3771 = vmatmul.bf16.gmra.mxu2 %v17992_v33 }
 0x441   :  { %v4206_v61 = vrot.slane %v4205_v53, 2  ;;  %v3872_v23 = vmax.f32 %v3528_v0, 0.0  ;;  %3820 = vmatmul.bf16.gmra.mxu3 %v17993_v57  ;;  %v4724_v33 = vpack.c.bf16 %v4173_v13, %v4173_v13 }
 0x443   :  { %v4207_v16 = vadd.f32 %v4206_v61, %v4205_v53  ;;  %v4064_v54 = vmul.f32 %v17974_v62, %v3872_v23  ;;  %v3576_v46 = vpop.f32.mrf.mxu2  ;;  %v5218_v21 = vunpack.c.l.b16 %v4724_v33 }
 0x444   :  { %v3577_v44 = vadd.f32 %v3576_v46, %v17291_v55  ;;  %v3625_v37 = vpop.f32.mrf.mxu3  ;;  %v3480_v32 = vpop.f32.mrf.mxu0 }
 0x445   :  { %v4208_v40 = vrot.slane %v4207_v16, 1  ;;  %v4240_v59 = vrot.slane %v4064_v54, 4  ;;  %v3481_v45 = vadd.f32 %v3480_v32, %v17033_v56  ;;  %v3529_v15 = vpop.f32.mrf.mxu1 }
 0x446   :  { %v17311_v34 = vadd.f32 %v3625_v37, %v3577_v44 }
 0x447   :  { %v4209_v12 = vadd.f32 %v4208_v40, %v4207_v16  ;;  %v4241_v0 = vadd.f32 %v4240_v59, %v4064_v54  ;;  %v3530_v57 = vadd.f32 %v3529_v15, %v3481_v45  ;;  %v18015_v15 = vld [vmem:[#allocation22_spill] sm:$0xff] }
 0x449   :  { %v4730_v14 = vpack.c.bf16 %v4209_v12, %v4209_v12  ;;  %v4242_v47 = vrot.slane %v4241_v0, 2  ;;  %v3878_v53 = vmax.f32 %v3530_v57, 0.0 }
 0x44b   :  { %v5224_v52 = vunpack.c.l.b16 %v4730_v14  ;;  %v4243_v61 = vadd.f32 %v4242_v47, %v4241_v0  ;;  %v4070_v23 = vmul.f32 %v15531_v1, %v3878_v53  ;;  %v3578_v46 = vpop.f32.mrf.mxu2 }
 0x44c   :  { %v3579_v62 = vadd.f32 %v3578_v46, %v17291_v55  ;;  %v3627_v5 = vpop.f32.mrf.mxu3  ;;  %v3483_v56 = vpop.f32.mrf.mxu0 }
 0x44d   :  { %v5345_v44 = vsel %vm5310_vm0, %v5224_v52, %v5218_v21  ;;  %v4244_v37 = vrot.slane %v4243_v61, 1  ;;  %v4276_v13 = vrot.slane %v4070_v23, 4  ;;  %v3484_v16 = vadd.f32 %v3483_v56, %v17040_v6  ;;  %v3532_v54 = vpop.f32.mrf.mxu1  ;;  %v11167_v21 = vld [vmem:[#allocation2 + $0x150] sm:$0xf] }
 0x44e   :  { %v17317_v32 = vadd.f32 %v3627_v5, %v3579_v62  ;;  %v11551_v52 = vld [vmem:[#allocation2 + $0x450] sm:$0xf] }
 0x44f   :  { %v4245_v40 = vadd.f32 %v4244_v37, %v4243_v61  ;;  %v4277_v59 = vadd.f32 %v4276_v13, %v4070_v23  ;;  %v3533_v45 = vadd.f32 %v3532_v54, %v3484_v16  ;;  %3678 = vmatmul.bf16.gmra.mxu0 %v17949_v50  ;;  %v13682_v50 = vld [vmem:[#allocation2 + $0x164] sm:$0xf0] }
 0x450   :  { %3727 = vmatmul.bf16.gmra.mxu1 %v18015_v15  ;;  %3776 = vmatmul.bf16.gmra.mxu2 %v17996_v38  ;;  %v11168_v13 = vor.u32 %v13682_v50, %v11167_v21  ;;  %v13676_v15 = vld [vmem:[#allocation2 + $0x134] sm:$0xf0]  ;;  %v11119_v50 = vld [vmem:[#allocation2 + $0xf0] sm:$0xf] }
 0x451   :  { %v4736_v33 = vpack.c.bf16 %v4245_v40, %v4245_v40  ;;  %v4278_v12 = vrot.slane %v4277_v59, 2  ;;  %v3884_v0 = vmax.f32 %v3533_v45, 0.0  ;;  %3825 = vmatmul.bf16.gmra.mxu3 %v17997_v48  ;;  %v13778_v48 = vld [vmem:[#allocation2 + $0x464] sm:$0xf0]  ;;  %v11143_v45 = vld [vmem:[#allocation2 + $0x120] sm:$0xf] }
 0x452   :  { %v11552_v16 = vor.u32 %v13778_v48, %v11551_v52  ;;  %6853 = vmatpush.bf16.msrb.mxu0 %v11168_v13  ;;  %v13670_v52 = vld [vmem:[#allocation2 + $0x104] sm:$0xf0] }
 0x453   :  { %v5230_v57 = vunpack.c.l.b16 %v4736_v33  ;;  %v4279_v14 = vadd.f32 %v4278_v12, %v4277_v59  ;;  %v4076_v6 = vmul.f32 %v17911_v9, %v3884_v0  ;;  %v3581_v62 = vpop.f32.mrf.mxu2  ;;  %v11527_v33 = vld [vmem:[#allocation2 + $0x420] sm:$0xf] }
 0x454   :  { %v3582_v5 = vadd.f32 %v3581_v62, %v17291_v55  ;;  %v3630_v47 = vpop.f32.mrf.mxu3  ;;  %v3485_v53 = vpop.f32.mrf.mxu0  ;;  %6881 = vmatpush.bf16.msrb.mxu2 %v11552_v16  ;;  %v13772_v62 = vld [vmem:[#allocation2 + $0x434] sm:$0xf0]  ;;  %v13766_v16 = vld [vmem:[#allocation2 + $0x404] sm:$0xf0] }
 0x455   :  { %v5346_v61 = vsel %vm5312_vm1, %v5230_v57, %v5345_v44  ;;  %v4280_v38 = vrot.slane %v4279_v14, 1  ;;  %v4312_v23 = vrot.slane %v4076_v6, 4  ;;  %v3486_v46 = vadd.f32 %v3485_v53, %v17043_v31  ;;  %v3534_v56 = vpop.f32.mrf.mxu1 }
 0x456   :  { %v17327_v37 = vadd.f32 %v3630_v47, %v3582_v5  ;;  %v11144_v57 = vor.u32 %v13676_v15, %v11143_v45  ;;  %v11528_v31 = vor.u32 %v13772_v62, %v11527_v33 }
 0x457   :  { %v4281_v54 = vadd.f32 %v4280_v38, %v4279_v14  ;;  %v4313_v40 = vadd.f32 %v4312_v23, %v4076_v6  ;;  %v3535_v59 = vadd.f32 %v3534_v56, %v3486_v46  ;;  %v11503_v38 = vld [vmem:[#allocation2 + $0x3f0] sm:$0xf] }
 0x458   :  { %6854 = vmatpush.bf16.msrb.mxu0 %v11144_v57  ;;  %6882 = vmatpush.bf16.msrb.mxu2 %v11528_v31  ;;  %v13760_v31 = vld [vmem:[#allocation2 + $0x3d4] sm:$0xf0] }
 0x459   :  { %v4742_v12 = vpack.c.bf16 %v4281_v54, %v4281_v54  ;;  %v4314_v44 = vrot.slane %v4313_v40, 2  ;;  %v3890_v0 = vmax.f32 %v3535_v59, 0.0  ;;  %v11504_v59 = vor.u32 %v13766_v16, %v11503_v38  ;;  %v13658_v38 = vld [vmem:[#allocation2 + $0xa4] sm:$0xf0] }
 0x45b   :  { %v5236_v53 = vunpack.c.l.b16 %v4742_v12  ;;  %v4315_v9 = vadd.f32 %v4314_v44, %v4313_v40  ;;  %v4082_v5 = vmul.f32 %v17914_v43, %v3890_v0  ;;  %v3583_v47 = vpop.f32.mrf.mxu2  ;;  %v11120_v40 = vor.u32 %v13670_v52, %v11119_v50  ;;  %v13664_v12 = vld [vmem:[#allocation2 + $0xd4] sm:$0xf0]  ;;  %v11479_v44 = vld [vmem:[#allocation2 + $0x3c0] sm:$0xf]  ;;  %v11071_v52 = vld [vmem:[#allocation2 + $0x90] sm:$0xf] }
 0x45c   :  { %v3584_v14 = vadd.f32 %v3583_v47, %v17291_v55  ;;  %v3632_v6 = vpop.f32.mrf.mxu3  ;;  %v3488_v21 = vpop.f32.mrf.mxu0  ;;  %6883 = vmatpush.bf16.msrb.mxu2 %v11504_v59 }
 0x45d   :  { %v5347_v23 = vsel %vm5314_vm2, %v5236_v53, %v5346_v61  ;;  %v4316_v46 = vrot.slane %v4315_v9, 1  ;;  %v4348_v56 = vrot.slane %v4082_v5, 4  ;;  %v3489_v48 = vadd.f32 %v3488_v21, %v17050_v63  ;;  %v3537_v13 = vpop.f32.mrf.mxu1  ;;  %v11095_v61 = vld [vmem:[#allocation2 + $0xc0] sm:$0xf]  ;;  %6855 = vmatpush.bf16.msrb.mxu0 %v11120_v40  ;;  %v11743_v53 = vld [vmem:[#allocation2 + $0x5d0] sm:$0xf] }
 0x45e   :  { %v17333_v54 = vadd.f32 %v3632_v6, %v3584_v14  ;;  %v11096_v62 = vor.u32 %v13664_v12, %v11095_v61  ;;  %v13754_v40 = vld [vmem:[#allocation2 + $0x3a4] sm:$0xf0]  ;;  %v13820_v61 = vld [vmem:[#allocation2 + $0x5b4] sm:$0xf0] }
 0x45f   :  { %v4317_v45 = vadd.f32 %v4316_v46, %v4315_v9  ;;  %v4349_v15 = vadd.f32 %v4348_v56, %v4082_v5  ;;  %v3538_v33 = vadd.f32 %v3537_v13, %v3489_v48  ;;  %3683 = vmatmul.bf16.gmra.mxu0 %v17951_v58  ;;  %v11480_v9 = vor.u32 %v13760_v31, %v11479_v44  ;;  %v13826_v5 = vld [vmem:[#allocation2 + $0x5e4] sm:$0xf0]  ;;  %v11431_v31 = vld [vmem:[#allocation2 + $0x360] sm:$0xf] }
 0x460   :  { %3732 = vmatmul.bf16.gmra.mxu1 %v17952_v3  ;;  %3781 = vmatmul.bf16.gmra.mxu2 %v17998_v25  ;;  %v11744_v14 = vor.u32 %v13826_v5, %v11743_v53 }
 0x461   :  { %v4748_v0 = vpack.c.bf16 %v4317_v45, %v4317_v45  ;;  %v4350_v63 = vrot.slane %v4349_v15, 2  ;;  %v3896_v57 = vmax.f32 %v3538_v33, 0.0  ;;  %3830 = vmatmul.bf16.gmra.mxu3 %v17999_v10  ;;  %v11455_v10 = vld [vmem:[#allocation2 + $0x390] sm:$0xf]  ;;  %6856 = vmatpush.bf16.msrb.mxu0 %v11096_v62  ;;  %v11072_v45 = vor.u32 %v13658_v38, %v11071_v52  ;;  %v11719_v33 = vld [vmem:[#allocation2 + $0x5a0] sm:$0xf] }
 0x462   :  { %6895 = vmatpush.bf16.msrb.mxu3 %v11744_v14  ;;  %6884 = vmatpush.bf16.msrb.mxu2 %v11480_v9  ;;  %v13814_v14 = vld [vmem:[#allocation2 + $0x584] sm:$0xf0] }
 0x463   :  { %v5242_v58 = vunpack.c.l.b16 %v4748_v0  ;;  %v4351_v47 = vadd.f32 %v4350_v63, %v4349_v15  ;;  %v4088_v3 = vmul.f32 %v17915_v17, %v3896_v57  ;;  %v3586_v25 = vpop.f32.mrf.mxu2  ;;  %v11456_v15 = vor.u32 %v13754_v40, %v11455_v10  ;;  %v13652_v57 = vld [vmem:[#allocation2 + $0x74] sm:$0xf0] }
 0x464   :  { %v3587_v6 = vadd.f32 %v3586_v25, %v17291_v55  ;;  %v3635_v21 = vpop.f32.mrf.mxu3  ;;  %v3490_v50 = vpop.f32.mrf.mxu0  ;;  %v11720_v63 = vor.u32 %v13820_v61, %v11719_v33  ;;  %v11695_v25 = vld [vmem:[#allocation2 + $0x570] sm:$0xf]  ;;  %v13742_v61 = vld [vmem:[#allocation2 + $0x344] sm:$0xf0] }
 0x465   :  { %v5348_v46 = vsel %vm5316_vm3, %v5242_v58, %v5347_v23  ;;  %v4352_v56 = vrot.slane %v4351_v47, 1  ;;  %v4384_v48 = vrot.slane %v4088_v3, 4  ;;  %v3491_v13 = vadd.f32 %v3490_v50, %v17053_v35  ;;  %v3539_v16 = vpop.f32.mrf.mxu1  ;;  %v11047_v23 = vld [vmem:[#allocation2 + $0x60] sm:$0xf]  ;;  %6857 = vmatpush.bf16.msrb.mxu0 %v11072_v45  ;;  %v13748_v58 = vld [vmem:[#allocation2 + $0x374] sm:$0xf0] }
 0x466   :  { %v17343_v59 = vadd.f32 %v3635_v21, %v3587_v6  ;;  %6896 = vmatpush.bf16.msrb.mxu3 %v11720_v63  ;;  %v11048_v62 = vor.u32 %v13652_v57, %v11047_v23  ;;  %6885 = vmatpush.bf16.msrb.mxu2 %v11456_v15  ;;  %v11432_v9 = vor.u32 %v13748_v58, %v11431_v31  ;;  %v11671_v63 = vld [vmem:[#allocation2 + $0x540] sm:$0xf]  ;;  %v13808_v23 = vld [vmem:[#allocation2 + $0x554] sm:$0xf0] }
 0x467   :  { %v4353_v12 = vadd.f32 %v4352_v56, %v4351_v47  ;;  %v4385_v44 = vadd.f32 %v4384_v48, %v4088_v3  ;;  %v3540_v0 = vadd.f32 %v3539_v16, %v3491_v13  ;;  %v11696_v50 = vor.u32 %v13814_v14, %v11695_v25  ;;  %v11023_v56 = vld [vmem:[#allocation2 + $0x30] sm:$0xf]  ;;  %v13646_v48 = vld [vmem:[#allocation2 + $0x44] sm:$0xf0]  ;;  %v13640_v58 = vld [vmem:[#allocation2 + $0x14] sm:$0xf0] }
 0x468   :  { %v11407_v13 = vld [vmem:[#allocation2 + $0x330] sm:$0xf] }
 0x469   :  { %v4754_v53 = vpack.c.bf16 %v4353_v12, %v4353_v12  ;;  %v4386_v35 = vrot.slane %v4385_v44, 2  ;;  %v3902_v5 = vmax.f32 %v3540_v0, 0.0  ;;  %6858 = vmatpush.bf16.msrb.mxu0 %v11048_v62  ;;  %v11408_v0 = vor.u32 %v13742_v61, %v11407_v13  ;;  %v10999_v62 = vld [vmem:[#allocation2] sm:$0xf]  ;;  %v11647_v13 = vld [vmem:[#allocation2 + $0x510] sm:$0xf] }
 0x46a   :  { %6897 = vmatpush.bf16.msrb.mxu3 %v11696_v50  ;;  %6886 = vmatpush.bf16.msrb.mxu2 %v11432_v9  ;;  %v11383_v9 = vld [vmem:[#allocation2 + $0x300] sm:$0xf]  ;;  %v13874_v50 = vld [vmem:[#allocation2 + $0x764] sm:$0xf0] }
 0x46b   :  { %v5248_v6 = vunpack.c.l.b16 %v4754_v53  ;;  %v4387_v21 = vadd.f32 %v4386_v35, %v4385_v44  ;;  %v4094_v47 = vmul.f32 %v15577_v49, %v3902_v5  ;;  %v3588_v3 = vpop.f32.mrf.mxu2  ;;  %v11024_v44 = vor.u32 %v13646_v48, %v11023_v56  ;;  %v11359_v35 = vld [vmem:[#allocation2 + $0x2d0] sm:$0xf]  ;;  %v13730_v5 = vld [vmem:[#allocation2 + $0x2e4] sm:$0xf0] }
 0x46c   :  { %v3589_v52 = vadd.f32 %v3588_v3, %v17291_v55  ;;  %v3637_v38 = vpop.f32.mrf.mxu3  ;;  %v3493_v10 = vpop.f32.mrf.mxu0 }
 0x46d   :  { %v5349_v16 = vsel %vm5318_vm4, %v5248_v6, %v5348_v46  ;;  %v4388_v40 = vrot.slane %v4387_v21, 1  ;;  %v4420_v45 = vrot.slane %v4094_v47, 4  ;;  %v3494_v15 = vadd.f32 %v3493_v10, %v17108_v8  ;;  %v3542_v33 = vpop.f32.mrf.mxu1  ;;  %6859 = vmatpush.bf16.msrb.mxu0 %v11024_v44 }
 0x46e   :  { %v17349_v12 = vadd.f32 %v3637_v38, %v3589_v52  ;;  %v11672_v46 = vor.u32 %v13808_v23, %v11671_v63  ;;  %v11360_v8 = vor.u32 %v13730_v5, %v11359_v35  ;;  %6887 = vmatpush.bf16.msrb.mxu2 %v11408_v0  ;;  %v11169_v52 = vld [vmem:[#allocation2 + $0x168] sm:$0xf0]  ;;  %v13724_v0 = vld [vmem:[#allocation2 + $0x2b4] sm:$0xf0] }
 0x46f   :  { %v4389_v57 = vadd.f32 %v4388_v40, %v4387_v21  ;;  %v4421_v31 = vadd.f32 %v4420_v45, %v4094_v47  ;;  %v3543_v53 = vadd.f32 %v3542_v33, %v3494_v15  ;;  %3688 = vmatmul.bf16.gmra.mxu0 %v14728_v26  ;;  %v11000_v21 = vor.u32 %v13640_v58, %v10999_v62  ;;  %v13736_v47 = vld [vmem:[#allocation2 + $0x314] sm:$0xf0]  ;;  %v11935_v26 = vld [vmem:[#allocation2 + $0x750] sm:$0xf]  ;;  %v13802_v40 = vld [vmem:[#allocation2 + $0x524] sm:$0xf0] }
 0x470   :  { %3737 = vmatmul.bf16.gmra.mxu1 %v14730_v27  ;;  %3786 = vmatmul.bf16.gmra.mxu2 %v18000_v20  ;;  %v11384_v3 = vor.u32 %v13736_v47, %v11383_v9  ;;  %v13679_v27 = vld [vmem:[#allocation2 + $0x154] sm:$0xf]  ;;  %v11936_v48 = vor.u32 %v13874_v50, %v11935_v26  ;;  %v11648_v44 = vor.u32 %v13802_v40, %v11647_v13  ;;  %v13868_v35 = vld [vmem:[#allocation2 + $0x734] sm:$0xf0]  ;;  %v13673_v58 = vld [vmem:[#allocation2 + $0x124] sm:$0xf] }
 0x471   :  { %v4760_v25 = vpack.c.bf16 %v4389_v57, %v4389_v57  ;;  %v4422_v14 = vrot.slane %v4421_v31, 2  ;;  %v3908_v6 = vmax.f32 %v3543_v53, 0.0  ;;  %3835 = vmatmul.bf16.gmra.mxu3 %v18001_v11  ;;  %6867 = vmatpush.bf16.msrb.mxu1 %v11360_v8  ;;  %v11335_v11 = vld [vmem:[#allocation2 + $0x2a0] sm:$0xf]  ;;  %v11172_v61 = vor.u32 %v13679_v27, %v11169_v52  ;;  %v11145_v9 = vld [vmem:[#allocation2 + $0x138] sm:$0xf0] }
 0x472   :  { %6898 = vmatpush.bf16.msrb.mxu3 %v11672_v46  ;;  %6860 = vmatpush.bf16.msrb.mxu0 %v11000_v21  ;;  %v11911_v46 = vld [vmem:[#allocation2 + $0x720] sm:$0xf]  ;;  %v11336_v8 = vor.u32 %v13724_v0, %v11335_v11  ;;  %v13796_v47 = vld [vmem:[#allocation2 + $0x4f4] sm:$0xf0]  ;;  %v13718_v26 = vld [vmem:[#allocation2 + $0x284] sm:$0xf0]  ;;  %v11148_v21 = vor.u32 %v13673_v58, %v11145_v9 }
 0x473   :  { %v5254_v20 = vunpack.c.l.b16 %v4760_v25  ;;  %v4423_v38 = vadd.f32 %v4422_v14, %v4421_v31  ;;  %v4100_v10 = vmul.f32 %v17918_v7, %v3908_v6  ;;  %v3591_v56 = vpop.f32.mrf.mxu2  ;;  %6888 = vmatpush.bf16.msrb.mxu2 %v11384_v3  ;;  %v11912_v62 = vor.u32 %v13868_v35, %v11911_v46  ;;  %v11623_v25 = vld [vmem:[#allocation2 + $0x4e0] sm:$0xf]  ;;  %v13667_v40 = vld [vmem:[#allocation2 + $0xf4] sm:$0xf] }
 0x474   :  { %v3592_v45 = vadd.f32 %v3591_v56, %v17291_v55  ;;  %v3640_v15 = vpop.f32.mrf.mxu3  ;;  %v3495_v33 = vpop.f32.mrf.mxu0  ;;  %v11624_v50 = vor.u32 %v13796_v47, %v11623_v25  ;;  %v11887_v56 = vld [vmem:[#allocation2 + $0x6f0] sm:$0xf]  ;;  %v11287_v0 = vld [vmem:[#allocation2 + $0x240] sm:$0xf] }
 0x475   :  { %v5350_v63 = vsel %vm5320_vm5, %v5254_v20, %v5349_v16  ;;  %v4424_v23 = vrot.slane %v4423_v38, 1  ;;  %v4456_v57 = vrot.slane %v4100_v10, 4  ;;  %v3496_v31 = vadd.f32 %v3495_v33, %v17159_v30  ;;  %v3544_v53 = vpop.f32.mrf.mxu1  ;;  %v11311_v30 = vld [vmem:[#allocation2 + $0x270] sm:$0xf]  ;;  %6868 = vmatpush.bf16.msrb.mxu1 %v11336_v8  ;;  %v11863_v25 = vld [vmem:[#allocation2 + $0x6c0] sm:$0xf] }
 0x476   :  { %v17359_v5 = vadd.f32 %v3640_v15, %v3592_v45  ;;  %6909 = vmatpush.bf16.msra.mxu0 %v11936_v48  ;;  %6899 = vmatpush.bf16.msrb.mxu3 %v11648_v44  ;;  %v11312_v27 = vor.u32 %v13718_v26, %v11311_v30  ;;  %v13862_v48 = vld [vmem:[#allocation2 + $0x704] sm:$0xf0]  ;;  %v13661_v30 = vld [vmem:[#allocation2 + $0xc4] sm:$0xf]  ;;  %v11097_v26 = vld [vmem:[#allocation2 + $0xd8] sm:$0xf0] }
 0x477   :  { %v4425_v14 = vadd.f32 %v4424_v23, %v4423_v38  ;;  %v4457_v6 = vadd.f32 %v4456_v57, %v4100_v10  ;;  %v3545_v16 = vadd.f32 %v3544_v53, %v3496_v31  ;;  %6937 = vmatpush.bf16.msra.mxu2 %v11172_v61  ;;  %v11888_v13 = vor.u32 %v13862_v48, %v11887_v56  ;;  %v11121_v38 = vld [vmem:[#allocation2 + $0x108] sm:$0xf0]  ;;  %v11599_v10 = vld [vmem:[#allocation2 + $0x4b0] sm:$0xf]  ;;  %v13790_v44 = vld [vmem:[#allocation2 + $0x4c4] sm:$0xf0] }
 0x478   :  { %v11124_v61 = vor.u32 %v13667_v40, %v11121_v38  ;;  %v13712_v23 = vld [vmem:[#allocation2 + $0x254] sm:$0xf0]  ;;  %v13727_v56 = vld [vmem:[#allocation2 + $0x2d4] sm:$0xf]  ;;  %v11361_v48 = vld [vmem:[#allocation2 + $0x2e8] sm:$0xf0] }
 0x479   :  { %v4766_v52 = vpack.c.bf16 %v4425_v14, %v4425_v14  ;;  %v4458_v3 = vrot.slane %v4457_v6, 2  ;;  %v3914_v20 = vmax.f32 %v3545_v16, 0.0  ;;  %6869 = vmatpush.bf16.msrb.mxu1 %v11312_v27  ;;  %v11288_v46 = vor.u32 %v13712_v23, %v11287_v0  ;;  %v13856_v14 = vld [vmem:[#allocation2 + $0x6d4] sm:$0xf0] }
 0x47a   :  { %6910 = vmatpush.bf16.msra.mxu0 %v11912_v62  ;;  %6900 = vmatpush.bf16.msrb.mxu3 %v11624_v50  ;;  %v11600_v16 = vor.u32 %v13790_v44, %v11599_v10  ;;  %v11864_v47 = vor.u32 %v13856_v14, %v11863_v25  ;;  %v13850_v10 = vld [vmem:[#allocation2 + $0x6a4] sm:$0xf0]  ;;  %v11364_v0 = vor.u32 %v13727_v56, %v11361_v48  ;;  %v11215_v56 = vld [vmem:[#allocation2 + $0x1b0] sm:$0xf] }
 0x47b   :  { %v5260_v11 = vunpack.c.l.b16 %v4766_v52  ;;  %v4459_v45 = vadd.f32 %v4458_v3, %v4457_v6  ;;  %v4106_v15 = vmul.f32 %v15523_v51, %v3914_v20  ;;  %v3593_v33 = vpop.f32.mrf.mxu2  ;;  %6938 = vmatpush.bf16.msra.mxu2 %v11148_v21  ;;  %v11575_v21 = vld [vmem:[#allocation2 + $0x480] sm:$0xf]  ;;  %v11263_v52 = vld [vmem:[#allocation2 + $0x210] sm:$0xf]  ;;  %v13706_v3 = vld [vmem:[#allocation2 + $0x224] sm:$0xf0]  ;;  %v11100_v20 = vor.u32 %v13661_v30, %v11097_v26 }
 0x47c   :  { %v3594_v57 = vadd.f32 %v3593_v33, %v17291_v55  ;;  %v3642_v31 = vpop.f32.mrf.mxu3  ;;  %v3498_v53 = vpop.f32.mrf.mxu0  ;;  %v11264_v38 = vor.u32 %v13706_v3, %v11263_v52  ;;  %v11073_v33 = vld [vmem:[#allocation2 + $0xa8] sm:$0xf0]  ;;  %v11815_v30 = vld [vmem:[#allocation2 + $0x660] sm:$0xf]  ;;  %v13844_v26 = vld [vmem:[#allocation2 + $0x674] sm:$0xf0] }
 0x47d   :  { %v17364_v35 = vsel %vm5322_vm6, %v5260_v11, %v5350_v63  ;;  %v4460_v8 = vrot.slane %v4459_v45, 1  ;;  %v4492_v62 = vrot.slane %v4106_v15, 4  ;;  %v3499_v58 = vadd.f32 %v3498_v53, %v17214_v24  ;;  %v3547_v9 = vpop.f32.mrf.mxu1  ;;  %v13784_v63 = vld [vmem:[#allocation2 + $0x494] sm:$0xf0]  ;;  %6870 = vmatpush.bf16.msrb.mxu1 %v11288_v46  ;;  %v11049_v52 = vld [vmem:[#allocation2 + $0x78] sm:$0xf0] }
 0x47e   :  { %v17367_v6 = vadd.f32 %v3642_v31, %v3594_v57  ;;  %6911 = vmatpush.bf16.msra.mxu0 %v11888_v13  ;;  %6901 = vmatpush.bf16.msrb.mxu3 %v11600_v16  ;;  %v11576_v11 = vor.u32 %v13784_v63, %v11575_v21  ;;  %v11239_v57 = vld [vmem:[#allocation2 + $0x1e0] sm:$0xf]  ;;  %v13700_v31 = vld [vmem:[#allocation2 + $0x1f4] sm:$0xf0]  ;;  %v13649_v63 = vld [vmem:[#allocation2 + $0x64] sm:$0xf] }
 0x47f   :  { %v4493_v50 = vadd.f32 %v4492_v62, %v4106_v15  ;;  %v3548_v27 = vadd.f32 %v3547_v9, %v3499_v58  ;;  %3693 = vmatmul.bf16.gmra.mxu0 %v14854_v36  ;;  %6939 = vmatpush.bf16.msra.mxu2 %v11124_v61  ;;  %v17370_v24 = vadd.f32 %v4460_v8, %v4459_v45  ;;  %v11839_v36 = vld [vmem:[#allocation2 + $0x690] sm:$0xf]  ;;  %v13655_v15 = vld [vmem:[#allocation2 + $0x94] sm:$0xf]  ;;  %v18016_v61 = vld [vmem:[#allocation62_spill] sm:$0xff] }
 0x480   :  { %3742 = vmatmul.bf16.gmra.mxu1 %v17953_v29  ;;  %3791 = vmatmul.bf16.gmra.mxu2 %v18002_v60  ;;  %v11840_v45 = vor.u32 %v13850_v10, %v11839_v36  ;;  %v11076_v23 = vor.u32 %v13655_v15, %v11073_v33  ;;  %v11337_v58 = vld [vmem:[#allocation2 + $0x2b8] sm:$0xf0]  ;;  %v11052_v48 = vor.u32 %v13649_v63, %v11049_v52  ;;  %v13838_v15 = vld [vmem:[#allocation2 + $0x644] sm:$0xf0]  ;;  %v13832_v52 = vld [vmem:[#allocation2 + $0x614] sm:$0xf0] }
 0x481   :  { %v4494_v13 = vrot.slane %v4493_v50, 2  ;;  %v3920_v40 = vmax.f32 %v3548_v27, 0.0  ;;  %3840 = vmatmul.bf16.gmra.mxu3 %v18003_v4  ;;  %v13721_v4 = vld [vmem:[#allocation2 + $0x2a4] sm:$0xf]  ;;  %v4772_v53 = vpack.c.bf16 %v17370_v24, %v17370_v24  ;;  %6871 = vmatpush.bf16.msrb.mxu1 %v11264_v38  ;;  %v11816_v27 = vor.u32 %v13844_v26, %v11815_v30 }
 0x482   :  { %6912 = vmatpush.bf16.msra.mxu0 %v11864_v47  ;;  %v11240_v47 = vor.u32 %v13700_v31, %v11239_v57  ;;  %6902 = vmatpush.bf16.msrb.mxu3 %v11576_v11 }
 0x483   :  { %v4495_v29 = vadd.f32 %v4494_v13, %v4493_v50  ;;  %v4112_v60 = vmul.f32 %v18016_v61, %v3920_v40  ;;  %v3596_v44 = vpop.f32.mrf.mxu2  ;;  %6940 = vmatpush.bf16.msra.mxu2 %v11100_v20  ;;  %v11340_v50 = vor.u32 %v13721_v4, %v11337_v58  ;;  %v13715_v13 = vld [vmem:[#allocation2 + $0x274] sm:$0xf]  ;;  %v11313_v40 = vld [vmem:[#allocation2 + $0x288] sm:$0xf0]  ;;  %v5266_v33 = vunpack.c.l.b16 %v4772_v53  ;;  %v13709_v58 = vld [vmem:[#allocation2 + $0x244] sm:$0xf] }
 0x484   :  { %v3597_v46 = vadd.f32 %v3596_v44, %v17291_v55  ;;  %v3645_v8 = vpop.f32.mrf.mxu3  ;;  %v3500_v62 = vpop.f32.mrf.mxu0 }
 0x485   :  { %v4496_v9 = vrot.slane %v4495_v29, 1  ;;  %v4528_v25 = vrot.slane %v4112_v60, 4  ;;  %v3501_v14 = vadd.f32 %v3500_v62, %v17265_v28  ;;  %v3549_v16 = vpop.f32.mrf.mxu1  ;;  %v13694_v28 = vld [vmem:[#allocation2 + $0x1c4] sm:$0xf0]  ;;  %6872 = vmatpush.bf16.msrb.mxu1 %v11240_v47  ;;  %v13688_v62 = vld [vmem:[#allocation2 + $0x194] sm:$0xf0] }
 0x486   :  { %v17380_v21 = vadd.f32 %v3645_v8, %v3597_v46  ;;  %6913 = vmatpush.bf16.msra.mxu0 %v11840_v45  ;;  %6951 = vmatpush.bf16.msra.mxu3 %v11364_v0  ;;  %v11216_v11 = vor.u32 %v13694_v28, %v11215_v56  ;;  %v11791_v45 = vld [vmem:[#allocation2 + $0x630] sm:$0xf]  ;;  %v11316_v46 = vor.u32 %v13715_v13, %v11313_v40  ;;  %v11191_v8 = vld [vmem:[#allocation2 + $0x180] sm:$0xf]  ;;  %v13637_v28 = vld [vmem:[#allocation2 + $0x4] sm:$0xf] }
 0x487   :  { %v4497_v3 = vadd.f32 %v4496_v9, %v4495_v29  ;;  %v4529_v24 = vadd.f32 %v4528_v25, %v4112_v60  ;;  %v3550_v20 = vadd.f32 %v3549_v16, %v3501_v14  ;;  %6941 = vmatpush.bf16.msra.mxu2 %v11076_v23  ;;  %v11792_v44 = vor.u32 %v13838_v15, %v11791_v45  ;;  %v13643_v29 = vld [vmem:[#allocation2 + $0x34] sm:$0xf]  ;;  %v11025_v60 = vld [vmem:[#allocation2 + $0x48] sm:$0xf0]  ;;  %v18017_v23 = vld [vmem:[#allocation63_spill] sm:$0xff] }
 0x488   :  { %v11028_v53 = vor.u32 %v13643_v29, %v11025_v60  ;;  %v11289_v16 = vld [vmem:[#allocation2 + $0x258] sm:$0xf0] }
 0x489   :  { %v4778_v38 = vpack.c.bf16 %v4497_v3, %v4497_v3  ;;  %v4530_v36 = vrot.slane %v4529_v24, 2  ;;  %v3926_v10 = vmax.f32 %v3550_v20, 0.0  ;;  %6873 = vmatpush.bf16.msrb.mxu1 %v11216_v11  ;;  %v11292_v20 = vor.u32 %v13709_v58, %v11289_v16  ;;  %v11265_v11 = vld [vmem:[#allocation2 + $0x228] sm:$0xf0]  ;;  %v11241_v58 = vld [vmem:[#allocation2 + $0x1f8] sm:$0xf0] }
 0x48a   :  { %6914 = vmatpush.bf16.msra.mxu0 %v11816_v27  ;;  %6952 = vmatpush.bf16.msra.mxu3 %v11340_v50  ;;  %v11767_v50 = vld [vmem:[#allocation2 + $0x600] sm:$0xf] }
 0x48b   :  { %v5272_v57 = vunpack.c.l.b16 %v4778_v38  ;;  %v4531_v0 = vadd.f32 %v4530_v36, %v4529_v24  ;;  %v4118_v31 = vmul.f32 %v18017_v23, %v3926_v10  ;;  %v3598_v4 = vpop.f32.mrf.mxu2  ;;  %6942 = vmatpush.bf16.msra.mxu2 %v11052_v48  ;;  %v11192_v24 = vor.u32 %v13688_v62, %v11191_v8  ;;  %v11001_v48 = vld [vmem:[#allocation2 + $0x18] sm:$0xf0]  ;;  %v18019_v10 = vld [vmem:[#allocation35_spill] sm:$0xff] }
 0x48c   :  { %v3599_v9 = vadd.f32 %v3598_v4, %v17291_v55  ;;  %v3647_v25 = vpop.f32.mrf.mxu3  ;;  %v3503_v14 = vpop.f32.mrf.mxu0  ;;  %v11768_v56 = vor.u32 %v13832_v52, %v11767_v50  ;;  %v18018_v36 = vld [vmem:[#allocation34_spill] sm:$0xff]  ;;  %v13697_v62 = vld [vmem:[#allocation2 + $0x1e4] sm:$0xf]  ;;  %v13691_v50 = vld [vmem:[#allocation2 + $0x1b4] sm:$0xf] }
 0x48d   :  { %v5387_v47 = vsel %vm5310_vm0, %v5272_v57, %v5266_v33  ;;  %v4532_v30 = vrot.slane %v4531_v0, 1  ;;  %v4564_v26 = vrot.slane %v4118_v31, 4  ;;  %v3504_v27 = vadd.f32 %v3503_v14, %v17272_v2  ;;  %v3552_v63 = vpop.f32.mrf.mxu1  ;;  %v13703_v2 = vld [vmem:[#allocation2 + $0x214] sm:$0xf]  ;;  %6874 = vmatpush.bf16.msrb.mxu1 %v11192_v24  ;;  %v11217_v52 = vld [vmem:[#allocation2 + $0x1c8] sm:$0xf0] }
 0x48e   :  { %v17386_v3 = vadd.f32 %v3647_v25, %v3599_v9  ;;  %6915 = vmatpush.bf16.msra.mxu0 %v11792_v44  ;;  %6953 = vmatpush.bf16.msra.mxu3 %v11316_v46  ;;  %v11004_v44 = vor.u32 %v13637_v28, %v11001_v48  ;;  %v18020_v57 = vld [vmem:[#allocation65_spill] sm:$0xff]  ;;  %v11268_v4 = vor.u32 %v13703_v2, %v11265_v11  ;;  %v18021_v48 = vld [vmem:[#allocation67_spill] sm:$0xff]  ;;  %v11193_v2 = vld [vmem:[#allocation2 + $0x198] sm:$0xf0] }
 0x48f   :  { %v4533_v13 = vadd.f32 %v4532_v30, %v4531_v0  ;;  %v4565_v40 = vadd.f32 %v4564_v26, %v4118_v31  ;;  %v3553_v38 = vadd.f32 %v3552_v63, %v3504_v27  ;;  %3698 = vmatmul.bf16.gmra.mxu0 %v18018_v36  ;;  %6943 = vmatpush.bf16.msra.mxu2 %v11028_v53 }
 0x490   :  { %3747 = vmatmul.bf16.gmra.mxu1 %v18019_v10  ;;  %3796 = vmatmul.bf16.gmra.mxu2 %v18004_v41  ;;  %v11244_v63 = vor.u32 %v13697_v62, %v11241_v58  ;;  %v13685_v10 = vld [vmem:[#allocation2 + $0x184] sm:$0xf] }
 0x491   :  { %v4784_v45 = vpack.c.bf16 %v4533_v13, %v4533_v13  ;;  %v4566_v15 = vrot.slane %v4565_v40, 2  ;;  %v3932_v33 = vmax.f32 %v3553_v38, 0.0  ;;  %3845 = vmatmul.bf16.gmra.mxu3 %v18005_v42 }
 0x492   :  { %6916 = vmatpush.bf16.msra.mxu0 %v11768_v56  ;;  %6954 = vmatpush.bf16.msra.mxu3 %v11292_v20 }
 0x493   :  { %v5278_v29 = vunpack.c.l.b16 %v4784_v45  ;;  %v4567_v60 = vadd.f32 %v4566_v15, %v4565_v40  ;;  %v4124_v0 = vmul.f32 %v18020_v57, %v3932_v33  ;;  %v3601_v31 = vpop.f32.mrf.mxu2  ;;  %6944 = vmatpush.bf16.msra.mxu2 %v11004_v44 }
 0x494   :  { %v3602_v41 = vadd.f32 %v3601_v31, %v17291_v55  ;;  %v3650_v46 = vpop.f32.mrf.mxu3  ;;  %v3505_v8 = vpop.f32.mrf.mxu0 }
 0x495   :  { %v5388_v9 = vsel %vm5312_vm1, %v5278_v29, %v5387_v47  ;;  %v4568_v42 = vrot.slane %v4567_v60, 1  ;;  %v4600_v25 = vrot.slane %v4124_v0, 4  ;;  %v3506_v14 = vadd.f32 %v3505_v8, %v17275_v22  ;;  %v3554_v53 = vpop.f32.mrf.mxu1 }
 0x496   :  { %v17396_v16 = vadd.f32 %v3650_v46, %v3602_v41  ;;  %6955 = vmatpush.bf16.msra.mxu3 %v11268_v4  ;;  %v11220_v22 = vor.u32 %v13691_v50, %v11217_v52  ;;  %v11196_v29 = vor.u32 %v13685_v10, %v11193_v2  ;;  %v18022_v4 = vld [vmem:[#allocation38_spill] sm:$0xff]  ;;  %v18023_v41 = vld [vmem:[#allocation39_spill] sm:$0xff] }
 0x497   :  { %v4569_v30 = vadd.f32 %v4568_v42, %v4567_v60  ;;  %v4601_v26 = vadd.f32 %v4600_v25, %v4124_v0  ;;  %v3555_v27 = vadd.f32 %v3554_v53, %v3506_v14  ;;  %v18024_v46 = vld [vmem:[#allocation54_spill] sm:$0xff] }
 0x499   :  { %v4790_v24 = vpack.c.bf16 %v4569_v30, %v4569_v30  ;;  %v4602_v20 = vrot.slane %v4601_v26, 2  ;;  %v3938_v56 = vmax.f32 %v3555_v27, 0.0 }
 0x49a   :  { %6956 = vmatpush.bf16.msra.mxu3 %v11244_v63 }
 0x49b   :  { %v5284_v28 = vunpack.c.l.b16 %v4790_v24  ;;  %v4603_v47 = vadd.f32 %v4602_v20, %v4601_v26  ;;  %v4130_v13 = vmul.f32 %v18021_v48, %v3938_v56  ;;  %v17399_v40 = vpop.f32.mrf.mxu2  ;;  %v18027_v24 = vld [vmem:[#allocation21_spill] sm:$0xff] }
 0x49c   :  { %v17401_v38 = vpop.f32.mrf.mxu3  ;;  %v3508_v36 = vpop.f32.mrf.mxu0 }
 0x49d   :  { %v5389_v11 = vsel %vm5314_vm2, %v5284_v28, %v5388_v9  ;;  %v4604_v45 = vrot.slane %v4603_v47, 1  ;;  %v4636_v15 = vrot.slane %v4130_v13, 4  ;;  %v3509_v33 = vadd.f32 %v3508_v36, %v17282_v39  ;;  %v3557_v44 = vpop.f32.mrf.mxu1  ;;  %v18025_v9 = vld [vmem:[#allocation55_spill] sm:$0xff]  ;;  %v18026_v39 = vld [vmem:[#allocation69_spill] sm:$0xff] }
 0x49e   :  { %6957 = vmatpush.bf16.msra.mxu3 %v11220_v22 }
 0x49f   :  { %v4605_v60 = vadd.f32 %v4604_v45, %v4603_v47  ;;  %v4637_v0 = vadd.f32 %v4636_v15, %v4130_v13  ;;  %v3558_v31 = vadd.f32 %v3557_v44, %v3509_v33  ;;  %3703 = vmatmul.bf16.gmra.mxu0 %v18022_v4  ;;  %v13775_v45 = vld [vmem:[#allocation2 + $0x454] sm:$0xf]  ;;  %v11553_v15 = vld [vmem:[#allocation2 + $0x468] sm:$0xf0] }
 0x4a0   :  { %3752 = vmatmul.bf16.gmra.mxu1 %v18023_v41  ;;  %3801 = vmatmul.bf16.gmra.mxu2 %v18024_v46  ;;  %v11556_v46 = vor.u32 %v13775_v45, %v11553_v15 }
 0x4a1   :  { %v4796_v8 = vpack.c.bf16 %v4605_v60, %v4605_v60  ;;  %v4638_v62 = vrot.slane %v4637_v0, 2  ;;  %v3944_v58 = vmax.f32 %v3558_v31, 0.0  ;;  %3850 = vmatmul.bf16.gmra.mxu3 %v18025_v9  ;;  %v11937_v31 = vld [vmem:[#allocation2 + $0x768] sm:$0xf0] }
 0x4a2   :  { %6958 = vmatpush.bf16.msra.mxu3 %v11196_v29  ;;  %v18028_v29 = vld [vmem:[#allocation70_spill] sm:$0xff] }
 0x4a3   :  { %v5290_v42 = vunpack.c.l.b16 %v4796_v8  ;;  %v4639_v25 = vadd.f32 %v4638_v62, %v4637_v0  ;;  %v4136_v14 = vmul.f32 %v18026_v39, %v3944_v58  ;;  %v3606_v53 = vpop.f32.mrf.mxu2  ;;  %v13871_v0 = vld [vmem:[#allocation2 + $0x754] sm:$0xf] }
 0x4a4   :  { %v3607_v30 = vadd.f32 %v3606_v53, %v17291_v55  ;;  %v3655_v26 = vpop.f32.mrf.mxu3  ;;  %v3510_v27 = vpop.f32.mrf.mxu0  ;;  %v11529_v53 = vld [vmem:[#allocation2 + $0x438] sm:$0xf0] }
 0x4a5   :  { %v5390_v63 = vsel %vm5316_vm3, %v5290_v42, %v5389_v11  ;;  %v4640_v50 = vrot.slane %v4639_v25, 1  ;;  %v4672_v52 = vrot.slane %v4136_v14, 4  ;;  %v3511_v20 = vadd.f32 %v3510_v27, %v18027_v24  ;;  %v3559_v56 = vpop.f32.mrf.mxu1  ;;  %v11913_v24 = vld [vmem:[#allocation2 + $0x738] sm:$0xf0] }
 0x4a6   :  { %v17413_v28 = vadd.f32 %v3655_v26, %v3607_v30 }
 0x4a7   :  { %v4641_v47 = vadd.f32 %v4640_v50, %v4639_v25  ;;  %v4673_v13 = vadd.f32 %v4672_v52, %v4136_v14  ;;  %v3560_v22 = vadd.f32 %v3559_v56, %v3511_v20  ;;  %v11940_v25 = vor.u32 %v13871_v0, %v11937_v31  ;;  %v13769_v14 = vld [vmem:[#allocation2 + $0x424] sm:$0xf]  ;;  %v18029_v50 = vld [vmem:[#allocation60_spill] sm:$0xff]  ;;  %v18030_v20 = vld [vmem:[#allocation61_spill] sm:$0xff] }
 0x4a8   :  { %v13865_v52 = vld [vmem:[#allocation2 + $0x724] sm:$0xf]  ;;  %v18031_v56 = vld [vmem:[#allocation68_spill] sm:$0xff] }
 0x4a9   :  { %v4802_v36 = vpack.c.bf16 %v4641_v47, %v4641_v47  ;;  %v4674_v10 = vrot.slane %v4673_v13, 2  ;;  %v3950_v2 = vmax.f32 %v3560_v22, 0.0  ;;  %v11916_v22 = vor.u32 %v13865_v52, %v11913_v24  ;;  %v11865_v52 = vld [vmem:[#allocation2 + $0x6d8] sm:$0xf0] }
 0x4ab   :  { %v5296_v33 = vunpack.c.l.b16 %v4802_v36  ;;  %v4675_v44 = vadd.f32 %v4674_v10, %v4673_v13  ;;  %v4142_v60 = vmul.f32 %v18028_v29, %v3950_v2  ;;  %v17416_v11 = vpop.f32.mrf.mxu2  ;;  %v18032_v13 = vld [vmem:[#allocation58_spill] sm:$0xff]  ;;  %v13763_v36 = vld [vmem:[#allocation2 + $0x3f4] sm:$0xf]  ;;  %v11505_v10 = vld [vmem:[#allocation2 + $0x408] sm:$0xf0] }
 0x4ac   :  { %v17418_v4 = vpop.f32.mrf.mxu3  ;;  %v3669_v41 = vpop.f32.mrf.mxu0  ;;  %v11535_v29 = vld [vmem:[#allocation2 + $0x428] sm:$0xf] }
 0x4ad   :  { %v5391_v8 = vsel %vm5318_vm4, %v5296_v33, %v5390_v63  ;;  %v4676_v62 = vrot.slane %v4675_v44, 1  ;;  %v4708_v58 = vrot.slane %v4142_v60, 4  ;;  %v3670_v9 = vadd.f32 %v3669_v41, %v17297_v19  ;;  %v3718_v42 = vpop.f32.mrf.mxu1  ;;  %v13859_v33 = vld [vmem:[#allocation2 + $0x6f4] sm:$0xf] }
 0x4ae   :  { %v11532_v19 = vor.u32 %v13769_v14, %v11529_v53  ;;  %v13757_v14 = vld [vmem:[#allocation2 + $0x3c4] sm:$0xf]  ;;  %v11481_v53 = vld [vmem:[#allocation2 + $0x3d8] sm:$0xf0] }
 0x4af   :  { %v4677_v30 = vadd.f32 %v4676_v62, %v4675_v44  ;;  %v4709_v26 = vadd.f32 %v4708_v58, %v4142_v60  ;;  %v3719_v27 = vadd.f32 %v3718_v42, %v3670_v9  ;;  %6861 = vmatmul.bf16.vlgmr.msrb.gmra.mxu0 %v18029_v50  ;;  %v11889_v44 = vld [vmem:[#allocation2 + $0x708] sm:$0xf0]  ;;  %v11508_v9 = vor.u32 %v13763_v36, %v11505_v10  ;;  %v13751_v36 = vld [vmem:[#allocation2 + $0x394] sm:$0xf] }
 0x4b0   :  { %6875 = vmatmul.bf16.vlgmr.msrb.gmra.mxu1 %v18030_v20  ;;  %6889 = vmatmul.bf16.vlgmr.msrb.gmra.mxu2 %v18031_v56  ;;  %v11457_v10 = vld [vmem:[#allocation2 + $0x3a8] sm:$0xf0] }
 0x4b1   :  { %v4808_v63 = vpack.c.bf16 %v4677_v30, %v4677_v30  ;;  %v4710_v47 = vrot.slane %v4709_v26, 2  ;;  %6903 = vmatmul.bf16.vlgmr.msrb.gmra.mxu3 %v18032_v13  ;;  %6965 = vmatpush.bf16.msrb.mxu0 %v11556_v46 }
 0x4b2   :  { %6993 = vmatpush.bf16.msrb.mxu2 %v11940_v25  ;;  %v11892_v25 = vor.u32 %v13859_v33, %v11889_v44  ;;  %v11841_v33 = vld [vmem:[#allocation2 + $0x6a8] sm:$0xf0] }
 0x4b3   :  { %v5302_v2 = vunpack.c.l.b16 %v4808_v63  ;;  %v4711_v45 = vadd.f32 %v4710_v47, %v4709_v26  ;;  %v3767_v15 = vpop.f32.mrf.mxu2  ;;  %v13853_v26 = vld [vmem:[#allocation2 + $0x6c4] sm:$0xf]  ;;  %v11484_v63 = vor.u32 %v13757_v14, %v11481_v53  ;;  %v18033_v47 = vld [vmem:[#allocation56_spill] sm:$0xff] }
 0x4b4   :  { %v3768_v60 = vadd.f32 %v3767_v15, %v3719_v27  ;;  %v3816_v0 = vpop.f32.mrf.mxu3  ;;  %v3671_v31 = vpop.f32.mrf.mxu0  ;;  %v13745_v53 = vld [vmem:[#allocation2 + $0x364] sm:$0xf] }
 0x4b5   :  { %v5392_v41 = vsel %vm5320_vm5, %v5302_v2, %v5391_v8  ;;  %v4712_v62 = vrot.slane %v4711_v45, 1  ;;  %6966 = vmatpush.bf16.msrb.mxu0 %v11532_v19  ;;  %v3720_v58 = vpop.f32.mrf.mxu1  ;;  %v3672_v42 = vadd.f32 %v3671_v31, %v17302_v18  ;;  %v11868_v19 = vor.u32 %v13853_v26, %v11865_v52  ;;  %v13847_v18 = vld [vmem:[#allocation2 + $0x694] sm:$0xf]  ;;  %v13841_v52 = vld [vmem:[#allocation2 + $0x664] sm:$0xf] }
 0x4b6   :  { %v3817_v46 = vadd.f32 %v3816_v0, %v3768_v60  ;;  %6994 = vmatpush.bf16.msrb.mxu2 %v11916_v22  ;;  %v11844_v14 = vor.u32 %v13847_v18, %v11841_v33 }
 0x4b7   :  { %v4713_v30 = vadd.f32 %v4712_v62, %v4711_v45  ;;  %v3721_v2 = vadd.f32 %v3720_v58, %v3672_v42 }
 0x4b8   :  { %v3861_v24 = vmax.f32 %v3817_v46, 0.0  ;;  %v11460_v46 = vor.u32 %v13751_v36, %v11457_v10  ;;  %v13835_v10 = vld [vmem:[#allocation2 + $0x634] sm:$0xf] }
 0x4b9   :  { %v4814_v27 = vpack.c.bf16 %v4713_v30, %v4713_v30  ;;  %6967 = vmatpush.bf16.msrb.mxu0 %v11508_v9  ;;  %v11433_v30 = vld [vmem:[#allocation2 + $0x378] sm:$0xf0] }
 0x4ba   :  { %v4053_v8 = vmul.f32 %v18033_v47, %v3861_v24  ;;  %6995 = vmatpush.bf16.msrb.mxu2 %v11892_v25  ;;  %v11817_v24 = vld [vmem:[#allocation2 + $0x678] sm:$0xf0] }
 0x4bb   :  { %v5308_v22 = vunpack.c.l.b16 %v4814_v27  ;;  %v3769_v15 = vpop.f32.mrf.mxu2 }
 0x4bc   :  { %v4174_v44 = vrot.slane %v4053_v8, 4  ;;  %v3770_v60 = vadd.f32 %v3769_v15, %v3721_v2  ;;  %v3818_v45 = vpop.f32.mrf.mxu3  ;;  %v3674_v0 = vpop.f32.mrf.mxu0  ;;  %v13739_v2 = vld [vmem:[#allocation2 + $0x334] sm:$0xf] }
 0x4bd   :  { %v5393_v31 = vsel %vm5322_vm6, %v5308_v22, %v5392_v41  ;;  %6968 = vmatpush.bf16.msrb.mxu0 %v11484_v63  ;;  %v3675_v62 = vadd.f32 %v3674_v0, %v17311_v34  ;;  %v3723_v9 = vpop.f32.mrf.mxu1  ;;  %v11436_v34 = vor.u32 %v13745_v53, %v11433_v30  ;;  %v18034_v41 = vld [vmem:[#allocation57_spill] sm:$0xff]  ;;  %v11793_v22 = vld [vmem:[#allocation2 + $0x648] sm:$0xf0]  ;;  %v11769_v53 = vld [vmem:[#allocation2 + $0x618] sm:$0xf0] }
 0x4be   :  { %v17432_v58 = vpack.c.b16 %v5393_v31, %v17364_v35  ;;  %v4175_v42 = vadd.f32 %v4174_v44, %v4053_v8  ;;  %v3819_v25 = vadd.f32 %v3818_v45, %v3770_v60  ;;  %6996 = vmatpush.bf16.msrb.mxu2 %v11868_v19  ;;  %v11820_v8 = vor.u32 %v13841_v52, %v11817_v24  ;;  %v11409_v19 = vld [vmem:[#allocation2 + $0x348] sm:$0xf0]  ;;  %v13733_v31 = vld [vmem:[#allocation2 + $0x304] sm:$0xf]  ;;  %v11175_v30 = vld [vmem:[#allocation2 + $0x158] sm:$0xf] }
 0x4bf   :  { %v3724_v26 = vadd.f32 %v3723_v9, %v3675_v62  ;;  %v11412_v0 = vor.u32 %v13739_v2, %v11409_v19  ;;  %v13683_v52 = vld [vmem:[#allocation2 + $0x16c] sm:$0xf0] }
 0x4c0   :  { %v4176_v27 = vrot.slane %v4175_v42, 2  ;;  %v3867_v47 = vmax.f32 %v3819_v25, 0.0  ;;  %6945 = vmatmul.bf16.vlgmr.msra.gmra.mxu2 %v18029_v50  ;;  %6917 = vmatmul.bf16.vlgmr.msra.gmra.mxu0 %v17432_v58  ;;  %v11385_v25 = vld [vmem:[#allocation2 + $0x318] sm:$0xf0] }
 0x4c1   :  { %6959 = vmatmul.bf16.vlgmr.msra.gmra.mxu3 %v18030_v20  ;;  %6969 = vmatpush.bf16.msrb.mxu0 %v11460_v46 }
 0x4c2   :  { %v4177_v35 = vadd.f32 %v4176_v27, %v4175_v42  ;;  %v4059_v63 = vmul.f32 %v18034_v41, %v3867_v47  ;;  %6997 = vmatpush.bf16.msrb.mxu2 %v11844_v14  ;;  %v11796_v42 = vor.u32 %v13835_v10, %v11793_v22  ;;  %v13829_v14 = vld [vmem:[#allocation2 + $0x604] sm:$0xf]  ;;  %v11559_v27 = vld [vmem:[#allocation2 + $0x458] sm:$0xf]  ;;  %v13779_v47 = vld [vmem:[#allocation2 + $0x46c] sm:$0xf0] }
 0x4c3   :  { %v3772_v36 = vpop.f32.mrf.mxu2  ;;  %v11772_v2 = vor.u32 %v13829_v14, %v11769_v53  ;;  %v11151_v10 = vld [vmem:[#allocation2 + $0x128] sm:$0xf]  ;;  %v13677_v22 = vld [vmem:[#allocation2 + $0x13c] sm:$0xf0]  ;;  %v13671_v14 = vld [vmem:[#allocation2 + $0x10c] sm:$0xf0] }
 0x4c4   :  { %v4210_v15 = vrot.slane %v4059_v63, 4  ;;  %v3773_v18 = vadd.f32 %v3772_v36, %v3724_v26  ;;  %v3821_v33 = vpop.f32.mrf.mxu3  ;;  %v3676_v44 = vpop.f32.mrf.mxu0  ;;  %v4178_v60 = vrot.slane %v4177_v35, 1 }
 0x4c5   :  { %6970 = vmatpush.bf16.msrb.mxu0 %v11436_v34  ;;  %v3725_v45 = vpop.f32.mrf.mxu1  ;;  %v3677_v46 = vadd.f32 %v3676_v44, %v17317_v32  ;;  %v11388_v34 = vor.u32 %v13733_v31, %v11385_v25  ;;  %v11176_v32 = vor.u32 %v13683_v52, %v11175_v30  ;;  %v11127_v25 = vld [vmem:[#allocation2 + $0xf8] sm:$0xf] }
 0x4c6   :  { %v4211_v62 = vadd.f32 %v4210_v15, %v4059_v63  ;;  %v3822_v9 = vadd.f32 %v3821_v33, %v3773_v18  ;;  %6998 = vmatpush.bf16.msrb.mxu2 %v11820_v8  ;;  %v4179_v41 = vadd.f32 %v4178_v60, %v4177_v35  ;;  %v18035_v63 = vld [vmem:[#allocation59_spill] sm:$0xff]  ;;  %v11560_v18 = vor.u32 %v13779_v47, %v11559_v27  ;;  %v11511_v27 = vld [vmem:[#allocation2 + $0x3f8] sm:$0xf]  ;;  %v13767_v47 = vld [vmem:[#allocation2 + $0x40c] sm:$0xf0] }
 0x4c7   :  { %v3726_v8 = vadd.f32 %v3725_v45, %v3677_v46  ;;  %v13773_v35 = vld [vmem:[#allocation2 + $0x43c] sm:$0xf0] }
 0x4c8   :  { %v4212_v24 = vrot.slane %v4211_v62, 2  ;;  %v3873_v26 = vmax.f32 %v3822_v9, 0.0  ;;  %v4725_v60 = vpack.c.bf16 %v4179_v41, %v4179_v41  ;;  %v11536_v30 = vor.u32 %v13773_v35, %v11535_v29 }
 0x4c9   :  { %6971 = vmatpush.bf16.msrb.mxu0 %v11412_v0 }
 0x4ca   :  { %v4213_v19 = vadd.f32 %v4212_v24, %v4211_v62  ;;  %v4065_v36 = vmul.f32 %v18035_v63, %v3873_v26  ;;  %6999 = vmatpush.bf16.msrb.mxu2 %v11796_v42  ;;  %v11152_v62 = vor.u32 %v13677_v22, %v11151_v10  ;;  %v11512_v63 = vor.u32 %v13767_v47, %v11511_v27 }
 0x4cb   :  { %v3774_v15 = vpop.f32.mrf.mxu2 }
 0x4cc   :  { %v4214_v33 = vrot.slane %v4213_v19, 1  ;;  %v4246_v44 = vrot.slane %v4065_v36, 4  ;;  %v3775_v20 = vadd.f32 %v3774_v15, %v3726_v8  ;;  %v3823_v9 = vpop.f32.mrf.mxu3  ;;  %v3679_v13 = vpop.f32.mrf.mxu0 }
 0x4cd   :  { %6972 = vmatpush.bf16.msrb.mxu0 %v11388_v34  ;;  %v3680_v0 = vadd.f32 %v3679_v13, %v17327_v37  ;;  %v3728_v31 = vpop.f32.mrf.mxu1  ;;  %v11128_v37 = vor.u32 %v13671_v14, %v11127_v25  ;;  %v5219_v13 = vunpack.c.l.b16 %v4725_v60  ;;  %v11463_v14 = vld [vmem:[#allocation2 + $0x398] sm:$0xf] }
 0x4ce   :  { %v4215_v45 = vadd.f32 %v4214_v33, %v4213_v19  ;;  %v4247_v46 = vadd.f32 %v4246_v44, %v4065_v36  ;;  %v3824_v42 = vadd.f32 %v3823_v9, %v3775_v20  ;;  %7000 = vmatpush.bf16.msrb.mxu2 %v11772_v2  ;;  %v11103_v2 = vld [vmem:[#allocation2 + $0xc8] sm:$0xf]  ;;  %v13665_v19 = vld [vmem:[#allocation2 + $0xdc] sm:$0xf0] }
 0x4cf   :  { %v3729_v53 = vadd.f32 %v3728_v31, %v3680_v0  ;;  %v13761_v33 = vld [vmem:[#allocation2 + $0x3dc] sm:$0xf0]  ;;  %v11104_v9 = vor.u32 %v13665_v19, %v11103_v2  ;;  %v11079_v31 = vld [vmem:[#allocation2 + $0x98] sm:$0xf] }
 0x4d0   :  { %v4731_v52 = vpack.c.bf16 %v4215_v45, %v4215_v45  ;;  %v4248_v24 = vrot.slane %v4247_v46, 2  ;;  %v3879_v26 = vmax.f32 %v3824_v42, 0.0  ;;  %6973 = vmatmul.bf16.vlgmr.msrb.gmra.mxu0 %v18031_v56 }
 0x4d1   :  { %7021 = vmatpush.bf16.msra.mxu0 %v11176_v32  ;;  %7001 = vmatmul.bf16.vlgmr.msrb.gmra.mxu2 %v17432_v58 }
 0x4d2   :  { %7049 = vmatpush.bf16.msra.mxu2 %v11560_v18  ;;  %v5225_v41 = vunpack.c.l.b16 %v4731_v52  ;;  %v4249_v20 = vadd.f32 %v4248_v24, %v4247_v46  ;;  %v4071_v34 = vmul.f32 %v15531_v1, %v3879_v26  ;;  %v11487_v18 = vld [vmem:[#allocation2 + $0x3c8] sm:$0xf] }
 0x4d3   :  { %v3777_v29 = vpop.f32.mrf.mxu2  ;;  %v11488_v45 = vor.u32 %v13761_v33, %v11487_v18  ;;  %v18036_v26 = vld [vmem:[#allocation64_spill] sm:$0xff] }
 0x4d4   :  { %v5352_v36 = vsel %vm5310_vm0, %v5225_v41, %v5219_v13  ;;  %v4250_v8 = vrot.slane %v4249_v20, 1  ;;  %v4282_v32 = vrot.slane %v4071_v34, 4  ;;  %v3778_v10 = vadd.f32 %v3777_v29, %v3729_v53  ;;  %v3826_v22 = vpop.f32.mrf.mxu3  ;;  %v3681_v15 = vpop.f32.mrf.mxu0  ;;  %v13755_v53 = vld [vmem:[#allocation2 + $0x3ac] sm:$0xf0]  ;;  %v13653_v41 = vld [vmem:[#allocation2 + $0x7c] sm:$0xf0] }
 0x4d5   :  { %7022 = vmatpush.bf16.msra.mxu0 %v11152_v62  ;;  %v3730_v44 = vpop.f32.mrf.mxu1  ;;  %v3682_v0 = vadd.f32 %v3681_v15, %v17333_v54  ;;  %v13659_v62 = vld [vmem:[#allocation2 + $0xac] sm:$0xf0]  ;;  %v11464_v54 = vor.u32 %v13755_v53, %v11463_v14  ;;  %v11007_v14 = vld [vmem:[#allocation2 + $0x8] sm:$0xf]  ;;  %v13641_v53 = vld [vmem:[#allocation2 + $0x1c] sm:$0xf0] }
 0x4d6   :  { %7050 = vmatpush.bf16.msra.mxu2 %v11536_v30  ;;  %v4251_v35 = vadd.f32 %v4250_v8, %v4249_v20  ;;  %v4283_v60 = vadd.f32 %v4282_v32, %v4071_v34  ;;  %v3827_v1 = vadd.f32 %v3826_v22, %v3778_v10  ;;  %v11080_v30 = vor.u32 %v13659_v62, %v11079_v31  ;;  %v11439_v8 = vld [vmem:[#allocation2 + $0x368] sm:$0xf]  ;;  %v13749_v32 = vld [vmem:[#allocation2 + $0x37c] sm:$0xf0]  ;;  %v11415_v62 = vld [vmem:[#allocation2 + $0x338] sm:$0xf] }
 0x4d7   :  { %v3731_v47 = vadd.f32 %v3730_v44, %v3682_v0 }
 0x4d8   :  { %v4737_v46 = vpack.c.bf16 %v4251_v35, %v4251_v35  ;;  %v4284_v42 = vrot.slane %v4283_v60, 2  ;;  %v3885_v25 = vmax.f32 %v3827_v1, 0.0  ;;  %v11440_v35 = vor.u32 %v13749_v32, %v11439_v8 }
 0x4d9   :  { %7023 = vmatpush.bf16.msra.mxu0 %v11128_v37  ;;  %v11055_v37 = vld [vmem:[#allocation2 + $0x68] sm:$0xf] }
 0x4da   :  { %7051 = vmatpush.bf16.msra.mxu2 %v11512_v63  ;;  %v5231_v52 = vunpack.c.l.b16 %v4737_v46  ;;  %v4285_v24 = vadd.f32 %v4284_v42, %v4283_v60  ;;  %v4077_v27 = vmul.f32 %v18036_v26, %v3885_v25  ;;  %v11056_v44 = vor.u32 %v13653_v41, %v11055_v37  ;;  %v11031_v60 = vld [vmem:[#allocation2 + $0x38] sm:$0xf]  ;;  %v13737_v26 = vld [vmem:[#allocation2 + $0x31c] sm:$0xf0] }
 0x4db   :  { %v3779_v13 = vpop.f32.mrf.mxu2 }
 0x4dc   :  { %v5353_v20 = vsel %vm5312_vm1, %v5231_v52, %v5352_v36  ;;  %v4286_v34 = vrot.slane %v4285_v24, 1  ;;  %v4318_v2 = vrot.slane %v4077_v27, 4  ;;  %v3780_v19 = vadd.f32 %v3779_v13, %v3731_v47  ;;  %v3828_v29 = vpop.f32.mrf.mxu3  ;;  %v3684_v63 = vpop.f32.mrf.mxu0  ;;  %v13647_v36 = vld [vmem:[#allocation2 + $0x4c] sm:$0xf0] }
 0x4dd   :  { %7024 = vmatpush.bf16.msra.mxu0 %v11104_v9  ;;  %v3685_v10 = vadd.f32 %v3684_v63, %v17343_v59  ;;  %v3733_v22 = vpop.f32.mrf.mxu1  ;;  %v11032_v25 = vor.u32 %v13647_v36, %v11031_v60  ;;  %v11177_v63 = vld [vmem:[#allocation2 + $0x170] sm:$0xf0]  ;;  %v13674_v36 = vld [vmem:[#allocation2 + $0x12c] sm:$0xf] }
 0x4de   :  { %7052 = vmatpush.bf16.msra.mxu2 %v11488_v45  ;;  %v4287_v15 = vadd.f32 %v4286_v34, %v4285_v24  ;;  %v4319_v18 = vadd.f32 %v4318_v2, %v4077_v27  ;;  %v3829_v33 = vadd.f32 %v3828_v29, %v3780_v19  ;;  %v13743_v45 = vld [vmem:[#allocation2 + $0x34c] sm:$0xf0]  ;;  %v11391_v24 = vld [vmem:[#allocation2 + $0x308] sm:$0xf]  ;;  %v11943_v34 = vld [vmem:[#allocation2 + $0x758] sm:$0xf] }
 0x4df   :  { %v3734_v9 = vadd.f32 %v3733_v22, %v3685_v10  ;;  %v11416_v52 = vor.u32 %v13743_v45, %v11415_v62  ;;  %v13875_v2 = vld [vmem:[#allocation2 + $0x76c] sm:$0xf0]  ;;  %v13680_v29 = vld [vmem:[#allocation2 + $0x15c] sm:$0xf] }
 0x4e0   :  { %v4743_v1 = vpack.c.bf16 %v4287_v15, %v4287_v15  ;;  %v4320_v0 = vrot.slane %v4319_v18, 2  ;;  %v3891_v31 = vmax.f32 %v3829_v33, 0.0  ;;  %v11392_v15 = vor.u32 %v13737_v26, %v11391_v24  ;;  %v13869_v33 = vld [vmem:[#allocation2 + $0x73c] sm:$0xf0] }
 0x4e1   :  { %7025 = vmatpush.bf16.msra.mxu0 %v11080_v30  ;;  %v11180_v60 = vor.u32 %v13680_v29, %v11177_v63  ;;  %v11871_v63 = vld [vmem:[#allocation2 + $0x6c8] sm:$0xf] }
 0x4e2   :  { %7053 = vmatpush.bf16.msra.mxu2 %v11464_v54  ;;  %v5237_v46 = vunpack.c.l.b16 %v4743_v1  ;;  %v4321_v42 = vadd.f32 %v4320_v0, %v4319_v18  ;;  %v4083_v59 = vmul.f32 %v17914_v43, %v3891_v31  ;;  %v11008_v43 = vor.u32 %v13641_v53, %v11007_v14  ;;  %v11919_v18 = vld [vmem:[#allocation2 + $0x728] sm:$0xf]  ;;  %v11153_v1 = vld [vmem:[#allocation2 + $0x140] sm:$0xf0]  ;;  %v13668_v14 = vld [vmem:[#allocation2 + $0xfc] sm:$0xf] }
 0x4e3   :  { %v3782_v30 = vpop.f32.mrf.mxu2 }
 0x4e4   :  { %v5354_v27 = vsel %vm5314_vm2, %v5237_v46, %v5353_v20  ;;  %v4322_v47 = vrot.slane %v4321_v42, 1  ;;  %v4354_v13 = vrot.slane %v4083_v59, 4  ;;  %v3783_v54 = vadd.f32 %v3782_v30, %v3734_v9  ;;  %v3831_v37 = vpop.f32.mrf.mxu3  ;;  %v3686_v41 = vpop.f32.mrf.mxu0 }
 0x4e5   :  { %7026 = vmatpush.bf16.msra.mxu0 %v11056_v44  ;;  %v3735_v19 = vpop.f32.mrf.mxu1  ;;  %v3687_v22 = vadd.f32 %v3686_v41, %v17349_v12  ;;  %v11944_v20 = vor.u32 %v13875_v2, %v11943_v34  ;;  %v11920_v46 = vor.u32 %v13869_v33, %v11919_v18  ;;  %v11129_v41 = vld [vmem:[#allocation2 + $0x110] sm:$0xf0] }
 0x4e6   :  { %7054 = vmatpush.bf16.msra.mxu2 %v11440_v35  ;;  %v4323_v8 = vadd.f32 %v4322_v47, %v4321_v42  ;;  %v4355_v32 = vadd.f32 %v4354_v13, %v4083_v59  ;;  %v3832_v10 = vadd.f32 %v3831_v37, %v3783_v54  ;;  %v11156_v42 = vor.u32 %v13674_v36, %v11153_v1  ;;  %v11895_v59 = vld [vmem:[#allocation2 + $0x6f8] sm:$0xf]  ;;  %v12127_v13 = vld [vmem:[#allocation2 + $0x8d0] sm:$0xf]  ;;  %v13919_v2 = vld [vmem:[#allocation2 + $0x8d4] sm:$0xf] }
 0x4e7   :  { %v3736_v45 = vadd.f32 %v3735_v19, %v3687_v22  ;;  %v12129_v19 = vld [vmem:[#allocation2 + $0x8e8] sm:$0xf0]  ;;  %v11132_v33 = vor.u32 %v13668_v14, %v11129_v41  ;;  %v13913_v36 = vld [vmem:[#allocation2 + $0x8a4] sm:$0xf]  ;;  %v12105_v1 = vld [vmem:[#allocation2 + $0x8b8] sm:$0xf0] }
 0x4e8   :  { %v4749_v44 = vpack.c.bf16 %v4323_v8, %v4323_v8  ;;  %v4356_v9 = vrot.slane %v4355_v32, 2  ;;  %v3897_v35 = vmax.f32 %v3832_v10, 0.0  ;;  %v12132_v8 = vor.u32 %v13919_v2, %v12129_v19  ;;  %v13857_v10 = vld [vmem:[#allocation2 + $0x6dc] sm:$0xf0]  ;;  %v13662_v22 = vld [vmem:[#allocation2 + $0xcc] sm:$0xf] }
 0x4e9   :  { %7027 = vmatpush.bf16.msra.mxu0 %v11032_v25  ;;  %v13863_v25 = vld [vmem:[#allocation2 + $0x70c] sm:$0xf0]  ;;  %v11081_v41 = vld [vmem:[#allocation2 + $0xb0] sm:$0xf0]  ;;  %v12081_v19 = vld [vmem:[#allocation2 + $0x888] sm:$0xf0] }
 0x4ea   :  { %7055 = vmatpush.bf16.msra.mxu2 %v11416_v52  ;;  %v5243_v0 = vunpack.c.l.b16 %v4749_v44  ;;  %v4357_v31 = vadd.f32 %v4356_v9, %v4355_v32  ;;  %v4089_v62 = vmul.f32 %v17915_v17, %v3897_v35  ;;  %v13922_v17 = vld [vmem:[#allocation2 + $0x8e4] sm:$0xf0]  ;;  %v11896_v32 = vor.u32 %v13863_v25, %v11895_v59  ;;  %7007 = vmatpush.bf16.msrb.mxu3 %v12132_v8  ;;  %v12103_v44 = vld [vmem:[#allocation2 + $0x8a0] sm:$0xf]  ;;  %v13916_v9 = vld [vmem:[#allocation2 + $0x8b4] sm:$0xf0] }
 0x4eb   :  { %v3784_v12 = vpop.f32.mrf.mxu2  ;;  %v12128_v34 = vor.u32 %v13922_v17, %v12127_v13  ;;  %v11847_v25 = vld [vmem:[#allocation2 + $0x698] sm:$0xf]  ;;  %v12079_v17 = vld [vmem:[#allocation2 + $0x870] sm:$0xf]  ;;  %v13907_v2 = vld [vmem:[#allocation2 + $0x874] sm:$0xf] }
 0x4ec   :  { %v5355_v53 = vsel %vm5316_vm3, %v5243_v0, %v5354_v27  ;;  %v4358_v30 = vrot.slane %v4357_v31, 1  ;;  %v4390_v52 = vrot.slane %v4089_v62, 4  ;;  %v3785_v24 = vadd.f32 %v3784_v12, %v3736_v45  ;;  %v3833_v26 = vpop.f32.mrf.mxu3  ;;  %v3689_v47 = vpop.f32.mrf.mxu0 }
 0x4ed   :  { %7028 = vmatpush.bf16.msra.mxu0 %v11008_v43  ;;  %v3690_v54 = vadd.f32 %v3689_v47, %v17359_v5  ;;  %v3738_v37 = vpop.f32.mrf.mxu1  ;;  %6923 = vmatpush.bf16.msra.mxu1 %v12128_v34  ;;  %v12108_v45 = vor.u32 %v13913_v36, %v12105_v1 }
 0x4ee   :  { %7056 = vmatpush.bf16.msra.mxu2 %v11392_v15  ;;  %v4359_v43 = vadd.f32 %v4358_v30, %v4357_v31  ;;  %v4391_v29 = vadd.f32 %v4390_v52, %v4089_v62  ;;  %v3834_v27 = vadd.f32 %v3833_v26, %v3785_v24  ;;  %v11105_v15 = vld [vmem:[#allocation2 + $0xe0] sm:$0xf0]  ;;  %v13851_v30 = vld [vmem:[#allocation2 + $0x6ac] sm:$0xf0] }
 0x4ef   :  { %v3739_v35 = vadd.f32 %v3738_v37, %v3690_v54  ;;  %v11108_v59 = vor.u32 %v13662_v22, %v11105_v15  ;;  %7008 = vmatpush.bf16.msrb.mxu3 %v12108_v45  ;;  %v11848_v8 = vor.u32 %v13851_v30, %v11847_v25  ;;  %v11057_v22 = vld [vmem:[#allocation2 + $0x80] sm:$0xf0]  ;;  %v13839_v25 = vld [vmem:[#allocation2 + $0x64c] sm:$0xf0] }
 0x4f0   :  { %7029 = vmatmul.bf16.vlgmr.msra.gmra.mxu0 %v18029_v50  ;;  %v4392_v5 = vrot.slane %v4391_v29, 2  ;;  %v3903_v18 = vmax.f32 %v3834_v27, 0.0 }
 0x4f1   :  { %7077 = vmatpush.bf16.msrb.mxu0 %v11944_v20  ;;  %7057 = vmatmul.bf16.vlgmr.msra.gmra.mxu2 %v18031_v56  ;;  %v4755_v20 = vpack.c.bf16 %v4359_v43, %v4359_v43 }
 0x4f2   :  { %7105 = vmatpush.bf16.msrb.mxu2 %v11180_v60  ;;  %v12104_v60 = vor.u32 %v13916_v9, %v12103_v44  ;;  %v4393_v31 = vadd.f32 %v4392_v5, %v4391_v29  ;;  %v4095_v62 = vmul.f32 %v15577_v49, %v3903_v18  ;;  %v13910_v49 = vld [vmem:[#allocation2 + $0x884] sm:$0xf0]  ;;  %v12055_v18 = vld [vmem:[#allocation2 + $0x840] sm:$0xf] }
 0x4f3   :  { %v5249_v0 = vunpack.c.l.b16 %v4755_v20  ;;  %v3787_v12 = vpop.f32.mrf.mxu2  ;;  %v12080_v34 = vor.u32 %v13910_v49, %v12079_v17 }
 0x4f4   :  { %6924 = vmatpush.bf16.msra.mxu1 %v12104_v60  ;;  %v4394_v52 = vrot.slane %v4393_v31, 1  ;;  %v4426_v24 = vrot.slane %v4095_v62, 4  ;;  %v3788_v26 = vadd.f32 %v3787_v12, %v3739_v35  ;;  %v3836_v47 = vpop.f32.mrf.mxu3  ;;  %v3691_v13 = vpop.f32.mrf.mxu0  ;;  %v13901_v35 = vld [vmem:[#allocation2 + $0x844] sm:$0xf]  ;;  %v12057_v60 = vld [vmem:[#allocation2 + $0x858] sm:$0xf0] }
 0x4f5   :  { %7078 = vmatpush.bf16.msrb.mxu0 %v11920_v46  ;;  %v11872_v46 = vor.u32 %v13857_v10, %v11871_v63  ;;  %v5356_v14 = vsel %vm5318_vm4, %v5249_v0, %v5355_v53  ;;  %v3692_v54 = vadd.f32 %v3691_v13, %v17367_v6  ;;  %v3740_v37 = vpop.f32.mrf.mxu1  ;;  %v11823_v53 = vld [vmem:[#allocation2 + $0x668] sm:$0xf]  ;;  %v12084_v63 = vor.u32 %v13907_v2, %v12081_v19  ;;  %v13650_v10 = vld [vmem:[#allocation2 + $0x6c] sm:$0xf]  ;;  %v12031_v13 = vld [vmem:[#allocation2 + $0x810] sm:$0xf] }
 0x4f6   :  { %7106 = vmatpush.bf16.msrb.mxu2 %v11156_v42  ;;  %v13656_v42 = vld [vmem:[#allocation2 + $0x9c] sm:$0xf]  ;;  %v4395_v43 = vadd.f32 %v4394_v52, %v4393_v31  ;;  %v4427_v29 = vadd.f32 %v4426_v24, %v4095_v62  ;;  %v3837_v27 = vadd.f32 %v3836_v47, %v3788_v26  ;;  %v12060_v31 = vor.u32 %v13901_v35, %v12057_v60 }
 0x4f7   :  { %v11084_v6 = vor.u32 %v13656_v42, %v11081_v41  ;;  %7009 = vmatpush.bf16.msrb.mxu3 %v12084_v63  ;;  %v3741_v44 = vadd.f32 %v3740_v37, %v3692_v54  ;;  %v11060_v12 = vor.u32 %v13650_v10, %v11057_v22  ;;  %v11033_v54 = vld [vmem:[#allocation2 + $0x50] sm:$0xf0] }
 0x4f8   :  { %6925 = vmatpush.bf16.msra.mxu1 %v12080_v34  ;;  %v4761_v15 = vpack.c.bf16 %v4395_v43, %v4395_v43  ;;  %v4428_v20 = vrot.slane %v4427_v29, 2  ;;  %v3909_v5 = vmax.f32 %v3837_v27, 0.0  ;;  %v13895_v41 = vld [vmem:[#allocation2 + $0x814] sm:$0xf]  ;;  %v12033_v34 = vld [vmem:[#allocation2 + $0x828] sm:$0xf0] }
 0x4f9   :  { %7079 = vmatpush.bf16.msrb.mxu0 %v11896_v32  ;;  %v13845_v32 = vld [vmem:[#allocation2 + $0x67c] sm:$0xf0]  ;;  %v13638_v27 = vld [vmem:[#allocation2 + $0xc] sm:$0xf]  ;;  %v11561_v10 = vld [vmem:[#allocation2 + $0x470] sm:$0xf0] }
 0x4fa   :  { %7107 = vmatpush.bf16.msrb.mxu2 %v11132_v33  ;;  %v13904_v33 = vld [vmem:[#allocation2 + $0x854] sm:$0xf0]  ;;  %v5255_v36 = vunpack.c.l.b16 %v4761_v15  ;;  %v4429_v1 = vadd.f32 %v4428_v20, %v4427_v29  ;;  %v4101_v0 = vmul.f32 %v17918_v7, %v3909_v5  ;;  %v11824_v45 = vor.u32 %v13845_v32, %v11823_v53  ;;  %v13898_v7 = vld [vmem:[#allocation2 + $0x824] sm:$0xf0]  ;;  %v13833_v29 = vld [vmem:[#allocation2 + $0x61c] sm:$0xf0] }
 0x4fb   :  { %v12056_v9 = vor.u32 %v13904_v33, %v12055_v18  ;;  %v3789_v62 = vpop.f32.mrf.mxu2  ;;  %7010 = vmatpush.bf16.msrb.mxu3 %v12060_v31  ;;  %v12032_v37 = vor.u32 %v13898_v7, %v12031_v13  ;;  %v12036_v53 = vor.u32 %v13895_v41, %v12033_v34  ;;  %v13776_v32 = vld [vmem:[#allocation2 + $0x45c] sm:$0xf]  ;;  %v12007_v5 = vld [vmem:[#allocation2 + $0x7e0] sm:$0xf] }
 0x4fc   :  { %v5357_v30 = vsel %vm5320_vm5, %v5255_v36, %v5356_v14  ;;  %v4430_v42 = vrot.slane %v4429_v1, 1  ;;  %v4462_v52 = vrot.slane %v4101_v0, 4  ;;  %v3790_v24 = vadd.f32 %v3789_v62, %v3741_v44  ;;  %v3838_v26 = vpop.f32.mrf.mxu3  ;;  %v3694_v47 = vpop.f32.mrf.mxu0  ;;  %v11775_v14 = vld [vmem:[#allocation2 + $0x608] sm:$0xf]  ;;  %v13889_v44 = vld [vmem:[#allocation2 + $0x7e4] sm:$0xf] }
 0x4fd   :  { %7080 = vmatpush.bf16.msrb.mxu0 %v11872_v46  ;;  %v11799_v46 = vld [vmem:[#allocation2 + $0x638] sm:$0xf]  ;;  %6926 = vmatpush.bf16.msra.mxu1 %v12056_v9  ;;  %v3695_v17 = vadd.f32 %v3694_v47, %v17380_v21  ;;  %v3743_v49 = vpop.f32.mrf.mxu1  ;;  %v12009_v9 = vld [vmem:[#allocation2 + $0x7f8] sm:$0xf0]  ;;  %v13770_v47 = vld [vmem:[#allocation2 + $0x42c] sm:$0xf] }
 0x4fe   :  { %7108 = vmatpush.bf16.msrb.mxu2 %v11108_v59  ;;  %v13644_v59 = vld [vmem:[#allocation2 + $0x3c] sm:$0xf]  ;;  %v4431_v2 = vadd.f32 %v4430_v42, %v4429_v1  ;;  %v4463_v19 = vadd.f32 %v4462_v52, %v4101_v0  ;;  %v3839_v43 = vadd.f32 %v3838_v26, %v3790_v24  ;;  %v11800_v63 = vor.u32 %v13839_v25, %v11799_v46  ;;  %v11945_v0 = vld [vmem:[#allocation2 + $0x770] sm:$0xf0] }
 0x4ff   :  { %v11036_v20 = vor.u32 %v13644_v59, %v11033_v54  ;;  %7011 = vmatpush.bf16.msrb.mxu3 %v12036_v53  ;;  %v3744_v18 = vadd.f32 %v3743_v49, %v3695_v17  ;;  %v13872_v1 = vld [vmem:[#allocation2 + $0x75c] sm:$0xf]  ;;  %v12012_v31 = vor.u32 %v13889_v44, %v12009_v9  ;;  %v11983_v49 = vld [vmem:[#allocation2 + $0x7b0] sm:$0xf]  ;;  %v13886_v54 = vld [vmem:[#allocation2 + $0x7c4] sm:$0xf0] }
 0x500   :  { %v4767_v22 = vpack.c.bf16 %v4431_v2, %v4431_v2  ;;  %v4464_v21 = vrot.slane %v4463_v19, 2  ;;  %v3915_v15 = vmax.f32 %v3839_v43, 0.0  ;;  %v11948_v17 = vor.u32 %v13872_v1, %v11945_v0  ;;  %v11921_v2 = vld [vmem:[#allocation2 + $0x740] sm:$0xf0]  ;;  %v11985_v43 = vld [vmem:[#allocation2 + $0x7c8] sm:$0xf0] }
 0x501   :  { %7081 = vmatpush.bf16.msrb.mxu0 %v11848_v8  ;;  %v11009_v8 = vld [vmem:[#allocation2 + $0x20] sm:$0xf0]  ;;  %6927 = vmatpush.bf16.msra.mxu1 %v12032_v37  ;;  %v13883_v37 = vld [vmem:[#allocation2 + $0x7b4] sm:$0xf] }
 0x502   :  { %7109 = vmatpush.bf16.msrb.mxu2 %v11084_v6  ;;  %v13892_v6 = vld [vmem:[#allocation2 + $0x7f4] sm:$0xf0]  ;;  %v5261_v35 = vunpack.c.l.b16 %v4767_v22  ;;  %v4465_v60 = vadd.f32 %v4464_v21, %v4463_v19  ;;  %v4107_v36 = vmul.f32 %v15523_v51, %v3915_v15  ;;  %v11012_v46 = vor.u32 %v13638_v27, %v11009_v8  ;;  %v11537_v51 = vld [vmem:[#allocation2 + $0x440] sm:$0xf0]  ;;  %v17472_v8 = vld [vmem:[#allocation2 + $0x6fc] sm:$0xf] }
 0x503   :  { %v12008_v33 = vor.u32 %v13892_v6, %v12007_v5  ;;  %v3792_v62 = vpop.f32.mrf.mxu2  ;;  %7012 = vmatpush.bf16.msrb.mxu3 %v12012_v31  ;;  %v11984_v19 = vor.u32 %v13886_v54, %v11983_v49  ;;  %v11988_v27 = vor.u32 %v13883_v37, %v11985_v43  ;;  %v13877_v5 = vld [vmem:[#allocation2 + $0x784] sm:$0xf]  ;;  %v11961_v6 = vld [vmem:[#allocation2 + $0x798] sm:$0xf0]  ;;  %v13823_v9 = vld [vmem:[#allocation2 + $0x5d4] sm:$0xf] }
 0x504   :  { %v17465_v25 = vsel %vm5322_vm6, %v5261_v35, %v5357_v30  ;;  %v4466_v59 = vrot.slane %v4465_v60, 1  ;;  %v4498_v42 = vrot.slane %v4107_v36, 4  ;;  %v3793_v52 = vadd.f32 %v3792_v62, %v3744_v18  ;;  %v3841_v24 = vpop.f32.mrf.mxu3  ;;  %v3696_v26 = vpop.f32.mrf.mxu0  ;;  %v13866_v30 = vld [vmem:[#allocation2 + $0x72c] sm:$0xf]  ;;  %v13827_v62 = vld [vmem:[#allocation2 + $0x5ec] sm:$0xf0] }
 0x505   :  { %7082 = vmatpush.bf16.msrb.mxu0 %v11824_v45  ;;  %v11776_v45 = vor.u32 %v13833_v29, %v11775_v14  ;;  %6928 = vmatpush.bf16.msra.mxu1 %v12008_v33  ;;  %v3697_v13 = vadd.f32 %v3696_v26, %v17386_v3  ;;  %v3745_v7 = vpop.f32.mrf.mxu1  ;;  %v17468_v14 = vld [vmem:[#allocation2 + $0x3fc] sm:$0xf]  ;;  %v17470_v29 = vld [vmem:[#allocation2 + $0x410] sm:$0xf0]  ;;  %v11540_v3 = vor.u32 %v13770_v47, %v11537_v51  ;;  %v11745_v35 = vld [vmem:[#allocation2 + $0x5e8] sm:$0xf0] }
 0x506   :  { %7110 = vmatpush.bf16.msrb.mxu2 %v11060_v12  ;;  %v11564_v12 = vor.u32 %v13776_v32, %v11561_v10  ;;  %v4499_v41 = vadd.f32 %v4498_v42, %v4107_v36  ;;  %v3842_v34 = vadd.f32 %v3841_v24, %v3793_v52  ;;  %v17474_v32 = vld [vmem:[#allocation2 + $0x710] sm:$0xf0]  ;;  %v11959_v10 = vld [vmem:[#allocation2 + $0x780] sm:$0xf]  ;;  %v4467_v22 = vadd.f32 %v4466_v59, %v4465_v60  ;;  %v11751_v36 = vld [vmem:[#allocation2 + $0x5d8] sm:$0xf] }
 0x507   :  { %v3746_v21 = vadd.f32 %v3745_v7, %v3697_v13  ;;  %v11924_v15 = vor.u32 %v13866_v30, %v11921_v2  ;;  %7013 = vmatpush.bf16.msrb.mxu3 %v11988_v27  ;;  %v11516_v1 = vor.u32 %v17468_v14, %v17470_v29  ;;  %v11964_v0 = vor.u32 %v13877_v5, %v11961_v6  ;;  %v13758_v42 = vld [vmem:[#allocation2 + $0x3cc] sm:$0xf]  ;;  %v11489_v52 = vld [vmem:[#allocation2 + $0x3e0] sm:$0xf0]  ;;  %v11721_v49 = vld [vmem:[#allocation2 + $0x5b8] sm:$0xf0] }
 0x508   :  { %v4500_v53 = vrot.slane %v4499_v41, 2  ;;  %v11748_v31 = vor.u32 %v13823_v9, %v11745_v35  ;;  %v11752_v24 = vor.u32 %v13827_v62, %v11751_v36  ;;  %v4773_v26 = vpack.c.bf16 %v4467_v22, %v4467_v22  ;;  %v13854_v7 = vld [vmem:[#allocation2 + $0x6cc] sm:$0xf]  ;;  %v11727_v30 = vld [vmem:[#allocation2 + $0x5a8] sm:$0xf] }
 0x509   :  { %7083 = vmatpush.bf16.msrb.mxu0 %v11800_v63  ;;  %v3921_v63 = vmax.f32 %v3842_v34, 0.0  ;;  %6929 = vmatpush.bf16.msra.mxu1 %v11984_v19  ;;  %v11900_v13 = vor.u32 %v17472_v8, %v17474_v32  ;;  %v11873_v34 = vld [vmem:[#allocation2 + $0x6e0] sm:$0xf0]  ;;  %v13821_v2 = vld [vmem:[#allocation2 + $0x5bc] sm:$0xf0]  ;;  %v3604_v19 = vadd.f32 %v17399_v40, %v17291_v55 }
 0x50a   :  { %7111 = vmatpush.bf16.msrb.mxu2 %v11036_v20  ;;  %v13880_v20 = vld [vmem:[#allocation2 + $0x794] sm:$0xf0]  ;;  %v4501_v18 = vadd.f32 %v4500_v53, %v4499_v41  ;;  %v11728_v43 = vor.u32 %v13821_v2, %v11727_v30  ;;  %v11492_v53 = vor.u32 %v13758_v42, %v11489_v52  ;;  %v5267_v8 = vunpack.c.l.b16 %v4773_v26  ;;  %v13811_v22 = vld [vmem:[#allocation2 + $0x574] sm:$0xf]  ;;  %v13848_v6 = vld [vmem:[#allocation2 + $0x69c] sm:$0xf] }
 0x50b   :  { %v4113_v33 = vmul.f32 %v18016_v61, %v3921_v63  ;;  %v11960_v44 = vor.u32 %v13880_v20, %v11959_v10  ;;  %v3794_v60 = vpop.f32.mrf.mxu2  ;;  %7014 = vmatpush.bf16.msrb.mxu3 %v11964_v0  ;;  %v13752_v63 = vld [vmem:[#allocation2 + $0x39c] sm:$0xf]  ;;  %v11876_v10 = vor.u32 %v13854_v7, %v11873_v34  ;;  %v3653_v9 = vadd.f32 %v17401_v38, %v3604_v19  ;;  %v13805_v52 = vld [vmem:[#allocation2 + $0x544] sm:$0xf]  ;;  %v11417_v19 = vld [vmem:[#allocation2 + $0x350] sm:$0xf0] }
 0x50c   :  { %v3843_v61 = vpop.f32.mrf.mxu3  ;;  %v3699_v59 = vpop.f32.mrf.mxu0  ;;  %v11673_v38 = vld [vmem:[#allocation2 + $0x558] sm:$0xf0]  ;;  %v11825_v7 = vld [vmem:[#allocation2 + $0x680] sm:$0xf0] }
 0x50d   :  { %7084 = vmatpush.bf16.msrb.mxu0 %v11776_v45  ;;  %v4502_v45 = vrot.slane %v4501_v18, 1  ;;  %v3700_v47 = vadd.f32 %v3699_v59, %v17396_v16  ;;  %v3748_v51 = vpop.f32.mrf.mxu1  ;;  %6930 = vmatpush.bf16.msra.mxu1 %v11960_v44  ;;  %v13815_v44 = vld [vmem:[#allocation2 + $0x58c] sm:$0xf0]  ;;  %v13740_v2 = vld [vmem:[#allocation2 + $0x33c] sm:$0xf] }
 0x50e   :  { %7112 = vmatpush.bf16.msrb.mxu2 %v11012_v46  ;;  %v4534_v46 = vrot.slane %v4113_v33, 4 }
 0x50f   :  { %v4503_v54 = vadd.f32 %v4502_v45, %v4501_v18  ;;  %7063 = vmatpush.bf16.msra.mxu3 %v11752_v24  ;;  %v3749_v32 = vadd.f32 %v3748_v51, %v3700_v47  ;;  %v11849_v18 = vld [vmem:[#allocation2 + $0x6b0] sm:$0xf0]  ;;  %v11679_v24 = vld [vmem:[#allocation2 + $0x548] sm:$0xf] }
 0x510   :  { %7085 = vmatmul.bf16.vlgmr.msrb.gmra.mxu0 %v17432_v58  ;;  %v4535_v37 = vadd.f32 %v4534_v46, %v4113_v33  ;;  %v11852_v42 = vor.u32 %v13848_v6, %v11849_v18 }
 0x511   :  { %7133 = vmatpush.bf16.msra.mxu0 %v11564_v12  ;;  %7113 = vmatmul.bf16.vlgmr.msrb.gmra.mxu2 %v18029_v50  ;;  %v3795_v12 = vadd.f32 %v3794_v60, %v3746_v21  ;;  %v4779_v14 = vpack.c.bf16 %v4503_v54, %v4503_v54  ;;  %v11697_v21 = vld [vmem:[#allocation2 + $0x588] sm:$0xf0] }
 0x512   :  { %7161 = vmatpush.bf16.msra.mxu2 %v11948_v17  ;;  %v13817_v17 = vld [vmem:[#allocation2 + $0x5a4] sm:$0xf]  ;;  %6979 = vmatpush.bf16.msrb.mxu1 %v11748_v31  ;;  %v4536_v29 = vrot.slane %v4535_v37, 2  ;;  %v11700_v33 = vor.u32 %v13811_v22, %v11697_v21  ;;  %v13803_v22 = vld [vmem:[#allocation2 + $0x52c] sm:$0xf0] }
 0x513   :  { %v3844_v41 = vadd.f32 %v3843_v61, %v3795_v12  ;;  %v11724_v16 = vor.u32 %v13817_v17, %v11721_v49  ;;  %v5273_v20 = vunpack.c.l.b16 %v4779_v14  ;;  %v3797_v35 = vpop.f32.mrf.mxu2  ;;  %7064 = vmatpush.bf16.msra.mxu3 %v11728_v43  ;;  %v11441_v12 = vld [vmem:[#allocation2 + $0x380] sm:$0xf0]  ;;  %v11676_v17 = vor.u32 %v13805_v52, %v11673_v38  ;;  %v13809_v49 = vld [vmem:[#allocation2 + $0x55c] sm:$0xf0]  ;;  %v13799_v14 = vld [vmem:[#allocation2 + $0x514] sm:$0xf] }
 0x514   :  { %v4537_v5 = vadd.f32 %v4536_v29, %v4535_v37  ;;  %v3798_v62 = vadd.f32 %v3797_v35, %v3749_v32  ;;  %v3846_v45 = vpop.f32.mrf.mxu3  ;;  %v3701_v46 = vpop.f32.mrf.mxu0  ;;  %v11680_v54 = vor.u32 %v13809_v49, %v11679_v24  ;;  %v11649_v29 = vld [vmem:[#allocation2 + $0x528] sm:$0xf0]  ;;  %v11801_v32 = vld [vmem:[#allocation2 + $0x650] sm:$0xf0]  ;;  %v13797_v38 = vld [vmem:[#allocation2 + $0x4fc] sm:$0xf0]  ;;  %v3609_v24 = vadd.f32 %v17416_v11, %v17291_v55 }
 0x515   :  { %7134 = vmatpush.bf16.msra.mxu0 %v11540_v3  ;;  %v3927_v27 = vmax.f32 %v3844_v41, 0.0  ;;  %v11465_v3 = vld [vmem:[#allocation2 + $0x3b0] sm:$0xf0]  ;;  %v3702_v61 = vadd.f32 %v3701_v46, %v3653_v9  ;;  %v3750_v59 = vpop.f32.mrf.mxu1  ;;  %v13830_v35 = vld [vmem:[#allocation2 + $0x60c] sm:$0xf] }
 0x516   :  { %7162 = vmatpush.bf16.msra.mxu2 %v11924_v15  ;;  %v11703_v15 = vld [vmem:[#allocation2 + $0x578] sm:$0xf]  ;;  %6980 = vmatpush.bf16.msrb.mxu1 %v11724_v16  ;;  %v11468_v36 = vor.u32 %v13752_v63, %v11465_v3  ;;  %v4538_v0 = vrot.slane %v4537_v5, 1  ;;  %v3847_v51 = vadd.f32 %v3846_v45, %v3798_v62  ;;  %v13793_v45 = vld [vmem:[#allocation2 + $0x4e4] sm:$0xf] }
 0x517   :  { %v4119_v40 = vmul.f32 %v18017_v23, %v3927_v27  ;;  %v11704_v60 = vor.u32 %v13815_v44, %v11703_v15  ;;  %v13746_v23 = vld [vmem:[#allocation2 + $0x36c] sm:$0xf]  ;;  %v3751_v16 = vadd.f32 %v3750_v59, %v3702_v61  ;;  %v11655_v27 = vld [vmem:[#allocation2 + $0x518] sm:$0xf]  ;;  %v11420_v15 = vor.u32 %v13740_v2, %v11417_v19  ;;  %v11625_v46 = vld [vmem:[#allocation2 + $0x4f8] sm:$0xf0] }
 0x518   :  { %v4539_v26 = vadd.f32 %v4538_v0, %v4537_v5  ;;  %v3933_v34 = vmax.f32 %v3847_v51, 0.0  ;;  %v11444_v30 = vor.u32 %v13746_v23, %v11441_v12  ;;  %v17492_v5 = vld [vmem:[#allocation2 + $0x320] sm:$0xf0]  ;;  %v13684_v0 = vld [vmem:[#allocation2 + $0x174] sm:$0xf0]  ;;  %v11628_v52 = vor.u32 %v13793_v45, %v11625_v46 }
 0x519   :  { %7135 = vmatpush.bf16.msra.mxu0 %v11516_v1  ;;  %v5394_v1 = vsel %vm5310_vm0, %v5273_v20, %v5267_v8  ;;  %v4570_v31 = vrot.slane %v4119_v40, 4  ;;  %7065 = vmatpush.bf16.msra.mxu3 %v11704_v60  ;;  %v13836_v8 = vld [vmem:[#allocation2 + $0x63c] sm:$0xf]  ;;  %v17490_v20 = vld [vmem:[#allocation2 + $0x30c] sm:$0xf] }
 0x51a   :  { %7163 = vmatpush.bf16.msra.mxu2 %v11900_v13  ;;  %v13842_v13 = vld [vmem:[#allocation2 + $0x66c] sm:$0xf]  ;;  %6981 = vmatpush.bf16.msrb.mxu1 %v11700_v33  ;;  %v4785_v37 = vpack.c.bf16 %v4539_v26, %v4539_v26  ;;  %v4125_v3 = vmul.f32 %v18020_v57, %v3933_v34  ;;  %v11183_v60 = vld [vmem:[#allocation2 + $0x160] sm:$0xf]  ;;  %v11804_v62 = vor.u32 %v13836_v8, %v11801_v32  ;;  %v11631_v23 = vld [vmem:[#allocation2 + $0x4e8] sm:$0xf] }
 0x51b   :  { %v4571_v47 = vadd.f32 %v4570_v31, %v4119_v40  ;;  %v11828_v43 = vor.u32 %v13842_v13, %v11825_v7  ;;  %v3799_v21 = vpop.f32.mrf.mxu2  ;;  %v11656_v40 = vor.u32 %v13803_v22, %v11655_v27  ;;  %v11567_v59 = vld [vmem:[#allocation2 + $0x460] sm:$0xf]  ;;  %v11396_v7 = vor.u32 %v17490_v20, %v17492_v5  ;;  %v13678_v49 = vld [vmem:[#allocation2 + $0x144] sm:$0xf0]  ;;  %v11543_v34 = vld [vmem:[#allocation2 + $0x430] sm:$0xf] }
 0x51c   :  { %v4606_v33 = vrot.slane %v4125_v3, 4  ;;  %v3800_v44 = vadd.f32 %v3799_v21, %v3751_v16  ;;  %v3848_v9 = vpop.f32.mrf.mxu3  ;;  %v3704_v57 = vpop.f32.mrf.mxu0  ;;  %v13787_v16 = vld [vmem:[#allocation2 + $0x4b4] sm:$0xf] }
 0x51d   :  { %7136 = vmatpush.bf16.msra.mxu0 %v11492_v53  ;;  %v4572_v41 = vrot.slane %v4571_v47, 2  ;;  %v5279_v53 = vunpack.c.l.b16 %v4785_v37  ;;  %7066 = vmatpush.bf16.msra.mxu3 %v11680_v54  ;;  %v3705_v31 = vadd.f32 %v3704_v57, %v17413_v28  ;;  %v3753_v26 = vpop.f32.mrf.mxu1  ;;  %v11184_v37 = vor.u32 %v13684_v0, %v11183_v60  ;;  %v13785_v0 = vld [vmem:[#allocation2 + $0x49c] sm:$0xf0] }
 0x51e   :  { %7164 = vmatpush.bf16.msra.mxu2 %v11876_v10  ;;  %6982 = vmatpush.bf16.msrb.mxu1 %v11676_v17  ;;  %v11652_v10 = vor.u32 %v13799_v14, %v11649_v29  ;;  %v4607_v61 = vadd.f32 %v4606_v33, %v4125_v3  ;;  %v11159_v17 = vld [vmem:[#allocation2 + $0x130] sm:$0xf]  ;;  %v11607_v14 = vld [vmem:[#allocation2 + $0x4b8] sm:$0xf]  ;;  %v3658_v29 = vadd.f32 %v17418_v4, %v3609_v24  ;;  %v11519_v4 = vld [vmem:[#allocation2 + $0x400] sm:$0xf] }
 0x51f   :  { %v4573_v63 = vadd.f32 %v4572_v41, %v4571_v47  ;;  %v5395_v6 = vsel %vm5312_vm1, %v5279_v53, %v5394_v1  ;;  %v3849_v1 = vadd.f32 %v3848_v9, %v3800_v44  ;;  %v11632_v47 = vor.u32 %v13797_v38, %v11631_v23  ;;  %v13791_v3 = vld [vmem:[#allocation2 + $0x4cc] sm:$0xf0]  ;;  %v13666_v24 = vld [vmem:[#allocation2 + $0xe4] sm:$0xf0] }
 0x520   :  { %v4608_v28 = vrot.slane %v4607_v61, 2  ;;  %v3754_v19 = vadd.f32 %v3753_v26, %v3705_v31  ;;  %v11160_v53 = vor.u32 %v13678_v49, %v11159_v17  ;;  %v11608_v33 = vor.u32 %v13791_v3, %v11607_v14  ;;  %v11111_v38 = vld [vmem:[#allocation2 + $0xd0] sm:$0xf] }
 0x521   :  { %7137 = vmatpush.bf16.msra.mxu0 %v11468_v36  ;;  %v4574_v18 = vrot.slane %v4573_v63, 1  ;;  %v11777_v36 = vld [vmem:[#allocation2 + $0x620] sm:$0xf0]  ;;  %7067 = vmatpush.bf16.msra.mxu3 %v11656_v40  ;;  %v3939_v13 = vmax.f32 %v3849_v1, 0.0  ;;  %v13672_v40 = vld [vmem:[#allocation2 + $0x114] sm:$0xf0] }
 0x522   :  { %7165 = vmatpush.bf16.msra.mxu2 %v11852_v42  ;;  %v13780_v42 = vld [vmem:[#allocation2 + $0x474] sm:$0xf0]  ;;  %6983 = vmatpush.bf16.msrb.mxu1 %v11652_v10  ;;  %v11780_v54 = vor.u32 %v13830_v35, %v11777_v36  ;;  %v4609_v55 = vadd.f32 %v4608_v28, %v4607_v61  ;;  %v11577_v35 = vld [vmem:[#allocation2 + $0x498] sm:$0xf0]  ;;  %v11583_v36 = vld [vmem:[#allocation2 + $0x488] sm:$0xf] }
 0x523   :  { %v4575_v12 = vadd.f32 %v4574_v18, %v4573_v63  ;;  %v11568_v41 = vor.u32 %v13780_v42, %v11567_v59  ;;  %v4131_v11 = vmul.f32 %v18021_v48, %v3939_v13  ;;  %v3802_v27 = vpop.f32.mrf.mxu2  ;;  %v13768_v18 = vld [vmem:[#allocation2 + $0x414] sm:$0xf0]  ;;  %v11584_v46 = vor.u32 %v13785_v0, %v11583_v36 }
 0x524   :  { %v4610_v32 = vrot.slane %v4609_v55, 1  ;;  %v3803_v22 = vadd.f32 %v3802_v27, %v3754_v19  ;;  %v3851_v21 = vpop.f32.mrf.mxu3  ;;  %v3706_v48 = vpop.f32.mrf.mxu0  ;;  %v11520_v61 = vor.u32 %v13768_v18, %v11519_v4  ;;  %v11039_v18 = vld [vmem:[#allocation2 + $0x40] sm:$0xf] }
 0x525   :  { %7138 = vmatpush.bf16.msra.mxu0 %v11444_v30  ;;  %v4791_v51 = vpack.c.bf16 %v4575_v12, %v4575_v12  ;;  %v13774_v30 = vld [vmem:[#allocation2 + $0x444] sm:$0xf0]  ;;  %7068 = vmatpush.bf16.msra.mxu3 %v11632_v47  ;;  %v4642_v10 = vrot.slane %v4131_v11, 4  ;;  %v3707_v20 = vadd.f32 %v3706_v48, %v3658_v29  ;;  %v3755_v23 = vpop.f32.mrf.mxu1  ;;  %v11495_v47 = vld [vmem:[#allocation2 + $0x3d0] sm:$0xf] }
 0x526   :  { %7166 = vmatpush.bf16.msra.mxu2 %v11828_v43  ;;  %6984 = vmatpush.bf16.msrb.mxu1 %v11628_v52  ;;  %v11601_v43 = vld [vmem:[#allocation2 + $0x4c8] sm:$0xf0]  ;;  %v11544_v5 = vor.u32 %v13774_v30, %v11543_v34  ;;  %v4611_v44 = vadd.f32 %v4610_v32, %v4609_v55  ;;  %v3852_v57 = vadd.f32 %v3851_v21, %v3803_v22  ;;  %v11087_v30 = vld [vmem:[#allocation2 + $0xa0] sm:$0xf]  ;;  %v13654_v32 = vld [vmem:[#allocation2 + $0x84] sm:$0xf0] }
 0x527   :  { %v5285_v2 = vunpack.c.l.b16 %v4791_v51  ;;  %v11604_v63 = vor.u32 %v13787_v16, %v11601_v43  ;;  %v4643_v9 = vadd.f32 %v4642_v10, %v4131_v11  ;;  %v3756_v52 = vadd.f32 %v3755_v23, %v3707_v20  ;;  %v13762_v51 = vld [vmem:[#allocation2 + $0x3e4] sm:$0xf0]  ;;  %v11471_v55 = vld [vmem:[#allocation2 + $0x3a0] sm:$0xf]  ;;  %v13756_v11 = vld [vmem:[#allocation2 + $0x3b4] sm:$0xf0] }
 0x528   :  { %v4797_v31 = vpack.c.bf16 %v4611_v44, %v4611_v44  ;;  %v3945_v45 = vmax.f32 %v3852_v57, 0.0  ;;  %v11496_v34 = vor.u32 %v13762_v51, %v11495_v47  ;;  %v11472_v3 = vor.u32 %v13756_v11, %v11471_v55  ;;  %v11447_v10 = vld [vmem:[#allocation2 + $0x370] sm:$0xf]  ;;  %v13750_v22 = vld [vmem:[#allocation2 + $0x384] sm:$0xf0] }
 0x529   :  { %7139 = vmatpush.bf16.msra.mxu0 %v11420_v15  ;;  %v5396_v8 = vsel %vm5314_vm2, %v5285_v2, %v5395_v6  ;;  %v11135_v15 = vld [vmem:[#allocation2 + $0x100] sm:$0xf]  ;;  %v13781_v6 = vld [vmem:[#allocation2 + $0x484] sm:$0xf]  ;;  %7069 = vmatpush.bf16.msra.mxu3 %v11608_v33  ;;  %v13660_v2 = vld [vmem:[#allocation2 + $0xb4] sm:$0xf0]  ;;  %v11448_v4 = vor.u32 %v13750_v22, %v11447_v10 }
 0x52a   :  { %7167 = vmatpush.bf16.msra.mxu2 %v11804_v62  ;;  %6985 = vmatpush.bf16.msrb.mxu1 %v11604_v63  ;;  %v11580_v60 = vor.u32 %v13781_v6, %v11577_v35  ;;  %v4644_v62 = vrot.slane %v4643_v9, 2  ;;  %v11136_v12 = vor.u32 %v13672_v40, %v11135_v15  ;;  %v5291_v1 = vunpack.c.l.b16 %v4797_v31  ;;  %v13648_v33 = vld [vmem:[#allocation2 + $0x54] sm:$0xf0]  ;;  %v11423_v44 = vld [vmem:[#allocation2 + $0x340] sm:$0xf] }
 0x52b   :  { %v4137_v42 = vmul.f32 %v18026_v39, %v3945_v45  ;;  %v3804_v26 = vpop.f32.mrf.mxu2  ;;  %v11088_v14 = vor.u32 %v13660_v2, %v11087_v30  ;;  %v11040_v35 = vor.u32 %v13648_v33, %v11039_v18  ;;  %v11015_v31 = vld [vmem:[#allocation2 + $0x10] sm:$0xf]  ;;  %v11951_v23 = vld [vmem:[#allocation2 + $0x760] sm:$0xf]  ;;  %v13864_v55 = vld [vmem:[#allocation2 + $0x714] sm:$0xf0] }
 0x52c   :  { %v4645_v59 = vadd.f32 %v4644_v62, %v4643_v9  ;;  %v5397_v28 = vsel %vm5316_vm3, %v5291_v1, %v5396_v8  ;;  %v3805_v17 = vadd.f32 %v3804_v26, %v3756_v52  ;;  %v3853_v49 = vpop.f32.mrf.mxu3  ;;  %v11063_v8 = vld [vmem:[#allocation2 + $0x70] sm:$0xf]  ;;  %v13744_v9 = vld [vmem:[#allocation2 + $0x354] sm:$0xf0]  ;;  %v13642_v62 = vld [vmem:[#allocation2 + $0x24] sm:$0xf0] }
 0x52d   :  { %7140 = vmatpush.bf16.msra.mxu0 %v11396_v7  ;;  %7070 = vmatpush.bf16.msra.mxu3 %v11584_v46  ;;  %v4678_v7 = vrot.slane %v4137_v42, 4  ;;  %v11064_v20 = vor.u32 %v13654_v32, %v11063_v8  ;;  %v11424_v0 = vor.u32 %v13744_v9, %v11423_v44  ;;  %v11399_v45 = vld [vmem:[#allocation2 + $0x310] sm:$0xf]  ;;  %v13738_v46 = vld [vmem:[#allocation2 + $0x324] sm:$0xf0]  ;;  %v11016_v52 = vor.u32 %v13642_v62, %v11015_v31 }
 0x52e   :  { %7168 = vmatpush.bf16.msra.mxu2 %v11780_v54  ;;  %6986 = vmatpush.bf16.msrb.mxu1 %v11580_v60  ;;  %v4646_v13 = vrot.slane %v4645_v59, 1  ;;  %v11112_v54 = vor.u32 %v13666_v24, %v11111_v38  ;;  %v3854_v39 = vadd.f32 %v3853_v49, %v3805_v17  ;;  %v11400_v24 = vor.u32 %v13738_v46, %v11399_v45  ;;  %v11927_v51 = vld [vmem:[#allocation2 + $0x730] sm:$0xf]  ;;  %v11161_v17 = vld [vmem:[#allocation2 + $0x148] sm:$0xf0] }
 0x52f   :  { %v11367_v49 = vld [vmem:[#allocation2 + $0x2d8] sm:$0xf]  ;;  %v11903_v2 = vld [vmem:[#allocation2 + $0x700] sm:$0xf]  ;;  %v11345_v8 = vld [vmem:[#allocation2 + $0x2c0] sm:$0xf0] }
 0x530   :  { %7141 = vmatmul.bf16.vlgmr.msra.gmra.mxu0 %v18031_v56  ;;  %v3951_v43 = vmax.f32 %v3854_v39, 0.0  ;;  %v13728_v39 = vld [vmem:[#allocation2 + $0x2dc] sm:$0xf]  ;;  %v11879_v10 = vld [vmem:[#allocation2 + $0x6d0] sm:$0xf] }
 0x531   :  { %7189 = vmatpush.bf16.msrb.mxu0 %v11184_v37  ;;  %7169 = vmatmul.bf16.vlgmr.msra.gmra.mxu2 %v17432_v58  ;;  %v4647_v37 = vadd.f32 %v4646_v13, %v4645_v59  ;;  %v13681_v59 = vld [vmem:[#allocation2 + $0x164] sm:$0xf]  ;;  %v13858_v22 = vld [vmem:[#allocation2 + $0x6e4] sm:$0xf0]  ;;  %v11321_v18 = vld [vmem:[#allocation2 + $0x290] sm:$0xf0] }
 0x532   :  { %7217 = vmatpush.bf16.msrb.mxu2 %v11568_v41  ;;  %v4679_v41 = vadd.f32 %v4678_v7, %v4137_v42  ;;  %v11185_v42 = vld [vmem:[#allocation2 + $0x178] sm:$0xf0]  ;;  %v13675_v7 = vld [vmem:[#allocation2 + $0x134] sm:$0xf]  ;;  %v11855_v44 = vld [vmem:[#allocation2 + $0x6a0] sm:$0xf] }
 0x533   :  { %v4803_v19 = vpack.c.bf16 %v4647_v37, %v4647_v37  ;;  %v11188_v47 = vor.u32 %v13681_v59, %v11185_v42  ;;  %v11164_v30 = vor.u32 %v13675_v7, %v11161_v17  ;;  %v13852_v9 = vld [vmem:[#allocation2 + $0x6b4] sm:$0xf0]  ;;  %v13710_v62 = vld [vmem:[#allocation2 + $0x24c] sm:$0xf]  ;;  %v11297_v45 = vld [vmem:[#allocation2 + $0x260] sm:$0xf0] }
 0x534   :  { %v4680_v16 = vrot.slane %v4679_v41, 2  ;;  %v11856_v31 = vor.u32 %v13852_v9, %v11855_v44  ;;  %v11065_v59 = vld [vmem:[#allocation2 + $0x88] sm:$0xf0]  ;;  %v11300_v42 = vor.u32 %v13710_v62, %v11297_v45  ;;  %v13645_v17 = vld [vmem:[#allocation2 + $0x44] sm:$0xf] }
 0x535   :  { %7190 = vmatpush.bf16.msrb.mxu0 %v11160_v53  ;;  %v5297_v29 = vunpack.c.l.b16 %v4803_v19  ;;  %v18037_v53 = vld [vmem:[#allocation70_spill] sm:$0xff]  ;;  %v11199_v9 = vld [vmem:[#allocation2 + $0x188] sm:$0xf]  ;;  %v12137_v62 = vld [vmem:[#allocation2 + $0x8f0] sm:$0xf0] }
 0x536   :  { %7218 = vmatpush.bf16.msrb.mxu2 %v11544_v5  ;;  %v4681_v27 = vadd.f32 %v4680_v16, %v4679_v41  ;;  %v4143_v63 = vmul.f32 %v18037_v53, %v3951_v43  ;;  %v13669_v16 = vld [vmem:[#allocation2 + $0x104] sm:$0xf]  ;;  %v11137_v43 = vld [vmem:[#allocation2 + $0x118] sm:$0xf0]  ;;  %v13725_v53 = vld [vmem:[#allocation2 + $0x2bc] sm:$0xf0] }
 0x537   :  { %v5398_v21 = vsel %vm5318_vm4, %v5297_v29, %v5397_v28  ;;  %v13870_v28 = vld [vmem:[#allocation2 + $0x744] sm:$0xf0]  ;;  %v11140_v32 = vor.u32 %v13669_v16, %v11137_v43  ;;  %v13639_v16 = vld [vmem:[#allocation2 + $0x14] sm:$0xf]  ;;  %v11017_v43 = vld [vmem:[#allocation2 + $0x28] sm:$0xf0] }
 0x538   :  { %v4682_v48 = vrot.slane %v4681_v27, 1  ;;  %v4714_v15 = vrot.slane %v4143_v63, 4  ;;  %v11928_v41 = vor.u32 %v13870_v28, %v11927_v51  ;;  %v11807_v28 = vld [vmem:[#allocation2 + $0x640] sm:$0xf] }
 0x539   :  { %7191 = vmatpush.bf16.msrb.mxu0 %v11136_v12  ;;  %v13876_v12 = vld [vmem:[#allocation2 + $0x774] sm:$0xf0] }
 0x53a   :  { %7219 = vmatpush.bf16.msrb.mxu2 %v11520_v61  ;;  %v4683_v5 = vadd.f32 %v4682_v48, %v4681_v27  ;;  %v4715_v40 = vadd.f32 %v4714_v15, %v4143_v63  ;;  %v11952_v26 = vor.u32 %v13876_v12, %v11951_v23  ;;  %v11343_v27 = vld [vmem:[#allocation2 + $0x2a8] sm:$0xf]  ;;  %v11904_v63 = vor.u32 %v13864_v55, %v11903_v2  ;;  %v11113_v48 = vld [vmem:[#allocation2 + $0xe8] sm:$0xf0]  ;;  %v11831_v23 = vld [vmem:[#allocation2 + $0x670] sm:$0xf] }
 0x53b   :  { %v13846_v12 = vld [vmem:[#allocation2 + $0x684] sm:$0xf0]  ;;  %v11783_v2 = vld [vmem:[#allocation2 + $0x610] sm:$0xf]  ;;  %v18038_v55 = vld [vmem:[#allocation58_spill] sm:$0xff] }
 0x53c   :  { %v4809_v57 = vpack.c.bf16 %v4683_v5, %v4683_v5  ;;  %v4716_v6 = vrot.slane %v4715_v40, 2  ;;  %v13719_v5 = vld [vmem:[#allocation2 + $0x28c] sm:$0xf0] }
 0x53d   :  { %7192 = vmatpush.bf16.msrb.mxu0 %v11112_v54  ;;  %v13731_v54 = vld [vmem:[#allocation2 + $0x2ec] sm:$0xf0] }
 0x53e   :  { %7220 = vmatpush.bf16.msrb.mxu2 %v11496_v34  ;;  %v5303_v36 = vunpack.c.l.b16 %v4809_v57  ;;  %v4717_v60 = vadd.f32 %v4716_v6, %v4715_v40  ;;  %v11369_v34 = vld [vmem:[#allocation2 + $0x2f0] sm:$0xf0]  ;;  %v11368_v19 = vor.u32 %v13731_v54, %v11367_v49  ;;  %v11880_v40 = vor.u32 %v13858_v22, %v11879_v10  ;;  %v13657_v6 = vld [vmem:[#allocation2 + $0xa4] sm:$0xf]  ;;  %v11041_v49 = vld [vmem:[#allocation2 + $0x58] sm:$0xf0] }
 0x53f   :  { %v11372_v29 = vor.u32 %v13728_v39, %v11369_v34  ;;  %v13698_v34 = vld [vmem:[#allocation2 + $0x1ec] sm:$0xf]  ;;  %v13695_v10 = vld [vmem:[#allocation2 + $0x1cc] sm:$0xf0] }
 0x540   :  { %v5399_v61 = vsel %vm5320_vm5, %v5303_v36, %v5398_v21  ;;  %v4718_v1 = vrot.slane %v4717_v60, 1  ;;  %v13663_v21 = vld [vmem:[#allocation2 + $0xd4] sm:$0xf] }
 0x541   :  { %7193 = vmatpush.bf16.msrb.mxu0 %v11088_v14  ;;  %v11116_v33 = vor.u32 %v13663_v21, %v11113_v48  ;;  %v11225_v21 = vld [vmem:[#allocation2 + $0x1d0] sm:$0xf0]  ;;  %v11020_v48 = vor.u32 %v13639_v16, %v11017_v43  ;;  %v11473_v16 = vld [vmem:[#allocation2 + $0x3b8] sm:$0xf0] }
 0x542   :  { %7221 = vmatpush.bf16.msrb.mxu2 %v11472_v3  ;;  %v4719_v38 = vadd.f32 %v4718_v1, %v4717_v60  ;;  %v13722_v3 = vld [vmem:[#allocation2 + $0x2ac] sm:$0xf]  ;;  %v11295_v60 = vld [vmem:[#allocation2 + $0x248] sm:$0xf]  ;;  %v13651_v1 = vld [vmem:[#allocation2 + $0x74] sm:$0xf] }
 0x543   :  { %v11348_v15 = vor.u32 %v13722_v3, %v11345_v8  ;;  %v11068_v51 = vor.u32 %v13651_v1, %v11065_v59  ;;  %v11953_v8 = vld [vmem:[#allocation2 + $0x778] sm:$0xf0]  ;;  %v13861_v59 = vld [vmem:[#allocation2 + $0x704] sm:$0xf] }
 0x544   :  { %v4815_v13 = vpack.c.bf16 %v4719_v38, %v4719_v38  ;;  %v13707_v38 = vld [vmem:[#allocation2 + $0x22c] sm:$0xf0] }
 0x545   :  { %7194 = vmatpush.bf16.msrb.mxu0 %v11064_v20  ;;  %v11319_v20 = vld [vmem:[#allocation2 + $0x278] sm:$0xf] }
 0x546   :  { %7222 = vmatpush.bf16.msrb.mxu2 %v11448_v4  ;;  %v5309_v37 = vunpack.c.l.b16 %v4815_v13  ;;  %v13716_v4 = vld [vmem:[#allocation2 + $0x27c] sm:$0xf]  ;;  %v11320_v57 = vor.u32 %v13719_v5, %v11319_v20  ;;  %v13840_v13 = vld [vmem:[#allocation2 + $0x654] sm:$0xf0]  ;;  %v13771_v20 = vld [vmem:[#allocation2 + $0x434] sm:$0xf] }
 0x547   :  { %v11324_v36 = vor.u32 %v13716_v4, %v11321_v18  ;;  %v11808_v39 = vor.u32 %v13840_v13, %v11807_v28  ;;  %v11545_v4 = vld [vmem:[#allocation2 + $0x448] sm:$0xf0]  ;;  %v13867_v18 = vld [vmem:[#allocation2 + $0x734] sm:$0xf] }
 0x548   :  { %v5400_v11 = vsel %vm5322_vm6, %v5309_v37, %v5399_v61  ;;  %v11247_v37 = vld [vmem:[#allocation2 + $0x1e8] sm:$0xf]  ;;  %v13759_v13 = vld [vmem:[#allocation2 + $0x3d4] sm:$0xf] }
 0x549   :  { %7195 = vmatpush.bf16.msrb.mxu0 %v11040_v35  ;;  %v17513_v14 = vpack.c.b16 %v5400_v11, %v17465_v25  ;;  %v11344_v25 = vor.u32 %v13725_v53, %v11343_v27  ;;  %v11089_v35 = vld [vmem:[#allocation2 + $0xb8] sm:$0xf0]  ;;  %v11044_v11 = vor.u32 %v13645_v17, %v11041_v49  ;;  %v13777_v27 = vld [vmem:[#allocation2 + $0x464] sm:$0xf]  ;;  %v13855_v49 = vld [vmem:[#allocation2 + $0x6d4] sm:$0xf] }
 0x54a   :  { %7223 = vmatpush.bf16.msrb.mxu2 %v11424_v0  ;;  %v13713_v0 = vld [vmem:[#allocation2 + $0x25c] sm:$0xf0]  ;;  %v11092_v46 = vor.u32 %v13657_v6, %v11089_v35  ;;  %v11569_v53 = vld [vmem:[#allocation2 + $0x478] sm:$0xf0]  ;;  %v13686_v6 = vld [vmem:[#allocation2 + $0x18c] sm:$0xf] }
 0x54b   :  { %6931 = vmatmul.bf16.vlgmr.msra.gmra.mxu1 %v17513_v14  ;;  %7015 = vmatmul.bf16.vlgmr.msrb.gmra.mxu3 %v17513_v14  ;;  %v11296_v61 = vor.u32 %v13713_v0, %v11295_v60  ;;  %v11201_v35 = vld [vmem:[#allocation2 + $0x1a0] sm:$0xf0]  ;;  %v13923_v60 = vld [vmem:[#allocation2 + $0x8ec] sm:$0xf0]  ;;  %v11548_v0 = vor.u32 %v13771_v20, %v11545_v4  ;;  %v11833_v20 = vld [vmem:[#allocation2 + $0x688] sm:$0xf0] }
 0x54c   :  { %7035 = vmatpush.bf16.msra.mxu1 %v11368_v19  ;;  %7119 = vmatpush.bf16.msrb.mxu3 %v11372_v29  ;;  %v13834_v19 = vld [vmem:[#allocation2 + $0x624] sm:$0xf0]  ;;  %v13899_v4 = vld [vmem:[#allocation2 + $0x82c] sm:$0xf0] }
 0x54d   :  { %7196 = vmatpush.bf16.msrb.mxu0 %v11016_v52  ;;  %v11271_v52 = vld [vmem:[#allocation2 + $0x218] sm:$0xf]  ;;  %v11784_v22 = vor.u32 %v13834_v19, %v11783_v2  ;;  %v12089_v2 = vld [vmem:[#allocation2 + $0x890] sm:$0xf0]  ;;  %v13753_v19 = vld [vmem:[#allocation2 + $0x3a4] sm:$0xf] }
 0x54e   :  { %7224 = vmatpush.bf16.msrb.mxu2 %v11400_v24  ;;  %v11832_v24 = vor.u32 %v13846_v12, %v11831_v23  ;;  %v11272_v7 = vor.u32 %v13707_v38, %v11271_v52  ;;  %v13765_v23 = vld [vmem:[#allocation2 + $0x404] sm:$0xf]  ;;  %v11521_v12 = vld [vmem:[#allocation2 + $0x418] sm:$0xf0]  ;;  %v12111_v38 = vld [vmem:[#allocation2 + $0x8a8] sm:$0xf] }
 0x550   :  { %7197 = vmatmul.bf16.vlgmr.msrb.gmra.mxu0 %v18029_v50  ;;  %7036 = vmatpush.bf16.msra.mxu1 %v11344_v25  ;;  %v13692_v25 = vld [vmem:[#allocation2 + $0x1bc] sm:$0xf] }
 0x551   :  { %7245 = vmatpush.bf16.msra.mxu0 %v11952_v26  ;;  %7225 = vmatmul.bf16.vlgmr.msrb.gmra.mxu2 %v18031_v56  ;;  %v13704_v26 = vld [vmem:[#allocation2 + $0x21c] sm:$0xf]  ;;  %v11228_v44 = vor.u32 %v13692_v25, %v11225_v21  ;;  %v13747_v25 = vld [vmem:[#allocation2 + $0x374] sm:$0xf]  ;;  %v11449_v21 = vld [vmem:[#allocation2 + $0x388] sm:$0xf0] }
 0x552   :  { %7273 = vmatpush.bf16.msra.mxu2 %v11188_v47  ;;  %7120 = vmatpush.bf16.msrb.mxu3 %v11348_v15  ;;  %v11273_v47 = vld [vmem:[#allocation2 + $0x230] sm:$0xf0]  ;;  %v11572_v15 = vor.u32 %v13777_v27, %v11569_v53  ;;  %v11857_v27 = vld [vmem:[#allocation2 + $0x6b8] sm:$0xf0] }
 0x553   :  { %v11276_v54 = vor.u32 %v13704_v26, %v11273_v47  ;;  %v11524_v26 = vor.u32 %v13765_v23, %v11521_v12  ;;  %v13914_v47 = vld [vmem:[#allocation2 + $0x8ac] sm:$0xf]  ;;  %v12017_v23 = vld [vmem:[#allocation2 + $0x800] sm:$0xf0] }
 0x554   :  { %7037 = vmatpush.bf16.msra.mxu1 %v11320_v57  ;;  %v13689_v57 = vld [vmem:[#allocation2 + $0x19c] sm:$0xf0] }
 0x555   :  { %7246 = vmatpush.bf16.msra.mxu0 %v11928_v41  ;;  %v13701_v41 = vld [vmem:[#allocation2 + $0x1fc] sm:$0xf0] }
 0x556   :  { %7274 = vmatpush.bf16.msra.mxu2 %v11164_v30  ;;  %7121 = vmatpush.bf16.msrb.mxu3 %v11324_v36  ;;  %v11249_v30 = vld [vmem:[#allocation2 + $0x200] sm:$0xf0]  ;;  %v11248_v29 = vor.u32 %v13701_v41, %v11247_v37  ;;  %v12135_v36 = vld [vmem:[#allocation2 + $0x8d8] sm:$0xf]  ;;  %v13911_v41 = vld [vmem:[#allocation2 + $0x88c] sm:$0xf0] }
 0x557   :  { %v11252_v3 = vor.u32 %v13698_v34, %v11249_v30  ;;  %v12136_v1 = vor.u32 %v13923_v60, %v12135_v36  ;;  %v13908_v30 = vld [vmem:[#allocation2 + $0x87c] sm:$0xf]  ;;  %v13837_v36 = vld [vmem:[#allocation2 + $0x644] sm:$0xf] }
 0x558   :  { %7038 = vmatpush.bf16.msra.mxu1 %v11296_v61  ;;  %v11204_v61 = vor.u32 %v13686_v6, %v11201_v35  ;;  %v12092_v53 = vor.u32 %v13908_v30, %v12089_v2  ;;  %v11425_v6 = vld [vmem:[#allocation2 + $0x358] sm:$0xf0]  ;;  %v11759_v30 = vld [vmem:[#allocation2 + $0x5e0] sm:$0xf]  ;;  %v13828_v2 = vld [vmem:[#allocation2 + $0x5f4] sm:$0xf0] }
 0x559   :  { %7247 = vmatpush.bf16.msra.mxu0 %v11904_v63  ;;  %v13873_v63 = vld [vmem:[#allocation2 + $0x764] sm:$0xf]  ;;  %v11809_v60 = vld [vmem:[#allocation2 + $0x658] sm:$0xf0] }
 0x55a   :  { %7275 = vmatpush.bf16.msra.mxu2 %v11140_v32  ;;  %7122 = vmatpush.bf16.msrb.mxu3 %v11300_v42  ;;  %v11223_v32 = vld [vmem:[#allocation2 + $0x1b8] sm:$0xf]  ;;  %v11956_v5 = vor.u32 %v13873_v63, %v11953_v8  ;;  %v11905_v42 = vld [vmem:[#allocation2 + $0x718] sm:$0xf0]  ;;  %v12063_v63 = vld [vmem:[#allocation2 + $0x848] sm:$0xf]  ;;  %v11476_v8 = vor.u32 %v13753_v19, %v11473_v16  ;;  %v11812_v12 = vor.u32 %v13837_v36, %v11809_v60 }
 0x55b   :  { %6987 = vmatmul.bf16.vlgmr.msrb.gmra.mxu1 %v18038_v55  ;;  %7071 = vmatmul.bf16.vlgmr.msra.gmra.mxu3 %v18038_v55  ;;  %v11908_v28 = vor.u32 %v13861_v59, %v11905_v42  ;;  %v13831_v42 = vld [vmem:[#allocation2 + $0x614] sm:$0xf]  ;;  %v11639_v36 = vld [vmem:[#allocation2 + $0x4f0] sm:$0xf]  ;;  %v13798_v60 = vld [vmem:[#allocation2 + $0x504] sm:$0xf0] }
 0x55c   :  { %7039 = vmatpush.bf16.msra.mxu1 %v11272_v7  ;;  %v11497_v7 = vld [vmem:[#allocation2 + $0x3e8] sm:$0xf0] }
 0x55d   :  { %7248 = vmatpush.bf16.msra.mxu0 %v11880_v40  ;;  %v11224_v40 = vor.u32 %v13695_v10, %v11223_v32  ;;  %v11500_v34 = vor.u32 %v13759_v13, %v11497_v7  ;;  %v13902_v32 = vld [vmem:[#allocation2 + $0x84c] sm:$0xf]  ;;  %v12065_v10 = vld [vmem:[#allocation2 + $0x860] sm:$0xf0] }
 0x55e   :  { %7276 = vmatpush.bf16.msra.mxu2 %v11116_v33  ;;  %7123 = vmatpush.bf16.msrb.mxu3 %v11276_v54  ;;  %v11929_v33 = vld [vmem:[#allocation2 + $0x748] sm:$0xf0] }
 0x55f   :  { %v11932_v45 = vor.u32 %v13867_v18, %v11929_v33  ;;  %v11881_v54 = vld [vmem:[#allocation2 + $0x6e8] sm:$0xf0]  ;;  %v11452_v18 = vor.u32 %v13747_v25, %v11449_v21  ;;  %v13896_v33 = vld [vmem:[#allocation2 + $0x81c] sm:$0xf] }
 0x560   :  { %7040 = vmatpush.bf16.msra.mxu1 %v11248_v29  ;;  %v13849_v29 = vld [vmem:[#allocation2 + $0x6a4] sm:$0xf]  ;;  %v13806_v21 = vld [vmem:[#allocation2 + $0x54c] sm:$0xf] }
 0x561   :  { %7249 = vmatpush.bf16.msra.mxu0 %v11856_v31  ;;  %v13920_v31 = vld [vmem:[#allocation2 + $0x8dc] sm:$0xf] }
 0x562   :  { %7277 = vmatpush.bf16.msra.mxu2 %v11092_v46  ;;  %7124 = vmatpush.bf16.msrb.mxu3 %v11252_v3  ;;  %v11200_v46 = vor.u32 %v13689_v57, %v11199_v9  ;;  %v12140_v52 = vor.u32 %v13920_v31, %v12137_v62  ;;  %v13905_v3 = vld [vmem:[#allocation2 + $0x85c] sm:$0xf0]  ;;  %v13741_v57 = vld [vmem:[#allocation2 + $0x344] sm:$0xf]  ;;  %v12015_v31 = vld [vmem:[#allocation2 + $0x7e8] sm:$0xf] }
 0x563   :  { %v13893_v62 = vld [vmem:[#allocation2 + $0x7fc] sm:$0xf0] }
 0x564   :  { %7041 = vmatpush.bf16.msra.mxu1 %v11224_v40  ;;  %v12039_v40 = vld [vmem:[#allocation2 + $0x818] sm:$0xf]  ;;  %v12016_v59 = vor.u32 %v13893_v62, %v12015_v31  ;;  %v13788_v31 = vld [vmem:[#allocation2 + $0x4bc] sm:$0xf]  ;;  %v11640_v62 = vor.u32 %v13798_v60, %v11639_v36  ;;  %v6862_v60 = vpop.f32.mrf.mxu0 }
 0x565   :  { %7250 = vmatpush.bf16.msra.mxu0 %v11832_v24  ;;  %v13917_v24 = vld [vmem:[#allocation2 + $0x8bc] sm:$0xf0]  ;;  %v12040_v35 = vor.u32 %v13899_v4, %v12039_v40  ;;  %v13800_v4 = vld [vmem:[#allocation2 + $0x51c] sm:$0xf] }
 0x566   :  { %7278 = vmatpush.bf16.msra.mxu2 %v11068_v51  ;;  %7125 = vmatpush.bf16.msrb.mxu3 %v11228_v44  ;;  %v12113_v51 = vld [vmem:[#allocation2 + $0x8c0] sm:$0xf0]  ;;  %v12112_v17 = vor.u32 %v13917_v24, %v12111_v38  ;;  %v12041_v44 = vld [vmem:[#allocation2 + $0x830] sm:$0xf0]  ;;  %v11991_v24 = vld [vmem:[#allocation2 + $0x7b8] sm:$0xf] }
 0x567   :  { %v12116_v37 = vor.u32 %v13914_v47, %v12113_v51  ;;  %v13884_v51 = vld [vmem:[#allocation2 + $0x7bc] sm:$0xf] }
 0x568   :  { %7042 = vmatpush.bf16.msra.mxu1 %v11200_v46  ;;  %v13890_v46 = vld [vmem:[#allocation2 + $0x7ec] sm:$0xf]  ;;  %v11281_v36 = vld [vmem:[#allocation2 + $0x238] sm:$0xf0] }
 0x569   :  { %7251 = vmatpush.bf16.msra.mxu0 %v11808_v39  ;;  %v18039_v39 = vld [vmem:[#allocation61_spill] sm:$0xff]  ;;  %v12020_v38 = vor.u32 %v13890_v46, %v12017_v23  ;;  %v13970_v23 = vld [vmem:[#allocation5 + $0x164] sm:$0xf0] }
 0x56a   :  { %7279 = vmatpush.bf16.msra.mxu2 %v11044_v11  ;;  %7126 = vmatpush.bf16.msrb.mxu3 %v11204_v61  ;;  %v11884_v11 = vor.u32 %v13855_v49, %v11881_v54  ;;  %v13735_v61 = vld [vmem:[#allocation2 + $0x314] sm:$0xf]  ;;  %v11967_v49 = vld [vmem:[#allocation2 + $0x788] sm:$0xf]  ;;  %v13881_v54 = vld [vmem:[#allocation2 + $0x79c] sm:$0xf0] }
 0x56b   :  { %7043 = vmatmul.bf16.vlgmr.msra.gmra.mxu1 %v18039_v39  ;;  %v12319_v46 = vld [vmem:[#allocation5 + $0x150] sm:$0xf] }
 0x56c   :  { %7091 = vmatpush.bf16.msrb.mxu1 %v12136_v1  ;;  %v11401_v1 = vld [vmem:[#allocation2 + $0x328] sm:$0xf0] }
 0x56d   :  { %7252 = vmatpush.bf16.msra.mxu0 %v11784_v22  ;;  %7127 = vmatmul.bf16.vlgmr.msrb.gmra.mxu3 %v18039_v39  ;;  %v11860_v22 = vor.u32 %v13849_v29, %v11857_v27  ;;  %v11404_v47 = vor.u32 %v13735_v61, %v11401_v1  ;;  %v13818_v29 = vld [vmem:[#allocation2 + $0x5ac] sm:$0xf]  ;;  %v11729_v27 = vld [vmem:[#allocation2 + $0x5c0] sm:$0xf0]  ;;  %v13792_v61 = vld [vmem:[#allocation2 + $0x4d4] sm:$0xf0]  ;;  %v12320_v1 = vor.u32 %v13970_v23, %v12319_v46 }
 0x56e   :  { %7280 = vmatpush.bf16.msra.mxu2 %v11020_v48  ;;  %7175 = vmatpush.bf16.msra.mxu3 %v12140_v52  ;;  %v12064_v48 = vor.u32 %v13905_v3, %v12063_v63  ;;  %v11785_v52 = vld [vmem:[#allocation2 + $0x628] sm:$0xf0]  ;;  %v13822_v63 = vld [vmem:[#allocation2 + $0x5c4] sm:$0xf0]  ;;  %v11732_v3 = vor.u32 %v13818_v29, %v11729_v27  ;;  %v12247_v27 = vld [vmem:[#allocation5 + $0xc0] sm:$0xf] }
 0x56f   :  { %v11788_v13 = vor.u32 %v13831_v42, %v11785_v52  ;;  %v13782_v42 = vld [vmem:[#allocation2 + $0x48c] sm:$0xf]  ;;  %v11585_v52 = vld [vmem:[#allocation2 + $0x4a0] sm:$0xf0]  ;;  %v11255_v46 = vld [vmem:[#allocation2 + $0x1f0] sm:$0xf] }
 0x570   :  { %7253 = vmatmul.bf16.vlgmr.msra.gmra.mxu0 %v17432_v58  ;;  %7092 = vmatpush.bf16.msrb.mxu1 %v12112_v17  ;;  %v13702_v23 = vld [vmem:[#allocation2 + $0x204] sm:$0xf0] }
 0x571   :  { %7301 = vmatpush.bf16.msrb.mxu0 %v11572_v15  ;;  %7281 = vmatmul.bf16.vlgmr.msra.gmra.mxu2 %v18029_v50  ;;  %v12087_v50 = vld [vmem:[#allocation2 + $0x878] sm:$0xf]  ;;  %v13843_v15 = vld [vmem:[#allocation2 + $0x674] sm:$0xf] }
 0x572   :  { %7329 = vmatpush.bf16.msrb.mxu2 %v11956_v5  ;;  %v12088_v43 = vor.u32 %v13911_v41, %v12087_v50  ;;  %7176 = vmatpush.bf16.msra.mxu3 %v12116_v37  ;;  %v12068_v5 = vor.u32 %v13902_v32, %v12065_v10  ;;  %v11836_v9 = vor.u32 %v13843_v15, %v11833_v20  ;;  %v13878_v37 = vld [vmem:[#allocation2 + $0x78c] sm:$0xf]  ;;  %v11969_v50 = vld [vmem:[#allocation2 + $0x7a0] sm:$0xf0]  ;;  %v13824_v41 = vld [vmem:[#allocation2 + $0x5dc] sm:$0xf] }
 0x573   :  { %v11972_v19 = vor.u32 %v13878_v37, %v11969_v50  ;;  %v13812_v32 = vld [vmem:[#allocation2 + $0x57c] sm:$0xf]  ;;  %v11705_v10 = vld [vmem:[#allocation2 + $0x590] sm:$0xf0]  ;;  %v11687_v15 = vld [vmem:[#allocation2 + $0x550] sm:$0xf] }
 0x574   :  { %7093 = vmatpush.bf16.msrb.mxu1 %v12088_v43  ;;  %v11760_v43 = vor.u32 %v13828_v2, %v11759_v30  ;;  %v13810_v20 = vld [vmem:[#allocation2 + $0x564] sm:$0xf0]  ;;  %v11351_v2 = vld [vmem:[#allocation2 + $0x2b0] sm:$0xf] }
 0x575   :  { %7302 = vmatpush.bf16.msrb.mxu0 %v11548_v0  ;;  %v12044_v0 = vor.u32 %v13896_v33, %v12041_v44  ;;  %v11688_v40 = vor.u32 %v13810_v20, %v11687_v15  ;;  %v11663_v33 = vld [vmem:[#allocation2 + $0x520] sm:$0xf]  ;;  %v13804_v44 = vld [vmem:[#allocation2 + $0x534] sm:$0xf0]  ;;  %v13714_v15 = vld [vmem:[#allocation2 + $0x264] sm:$0xf0] }
 0x576   :  { %7330 = vmatpush.bf16.msrb.mxu2 %v11932_v45  ;;  %7177 = vmatpush.bf16.msra.mxu3 %v12092_v53  ;;  %v11428_v45 = vor.u32 %v13741_v57, %v11425_v6  ;;  %v11735_v53 = vld [vmem:[#allocation2 + $0x5b0] sm:$0xf]  ;;  %v11664_v57 = vor.u32 %v13804_v44, %v11663_v33  ;;  %v13794_v6 = vld [vmem:[#allocation2 + $0x4ec] sm:$0xf]  ;;  %v13940_v33 = vld [vmem:[#allocation5 + $0x74] sm:$0xf0] }
 0x578   :  { %7094 = vmatpush.bf16.msrb.mxu1 %v12064_v48  ;;  %v11681_v48 = vld [vmem:[#allocation2 + $0x560] sm:$0xf0] }
 0x579   :  { %7303 = vmatpush.bf16.msrb.mxu0 %v11524_v26  ;;  %v13887_v26 = vld [vmem:[#allocation2 + $0x7cc] sm:$0xf0] }
 0x57a   :  { %7331 = vmatpush.bf16.msrb.mxu2 %v11908_v28  ;;  %7178 = vmatpush.bf16.msra.mxu3 %v12068_v5  ;;  %v11993_v28 = vld [vmem:[#allocation2 + $0x7d0] sm:$0xf0]  ;;  %v11992_v7 = vor.u32 %v13887_v26, %v11991_v24  ;;  %v11684_v5 = vor.u32 %v13806_v21, %v11681_v48  ;;  %v11591_v24 = vld [vmem:[#allocation2 + $0x490] sm:$0xf]  ;;  %v12295_v26 = vld [vmem:[#allocation5 + $0x120] sm:$0xf] }
 0x57b   :  { %v11996_v17 = vor.u32 %v13884_v51, %v11993_v28  ;;  %v13786_v51 = vld [vmem:[#allocation2 + $0x4a4] sm:$0xf0]  ;;  %v11375_v28 = vld [vmem:[#allocation2 + $0x2e0] sm:$0xf]  ;;  %v11303_v48 = vld [vmem:[#allocation2 + $0x250] sm:$0xf] }
 0x57c   :  { %7095 = vmatpush.bf16.msrb.mxu1 %v12040_v35  ;;  %v11633_v35 = vld [vmem:[#allocation2 + $0x500] sm:$0xf0]  ;;  %v11592_v37 = vor.u32 %v13786_v51, %v11591_v24  ;;  %v11231_v24 = vld [vmem:[#allocation2 + $0x1c0] sm:$0xf] }
 0x57d   :  { %7304 = vmatpush.bf16.msrb.mxu0 %v11500_v34  ;;  %v11753_v34 = vld [vmem:[#allocation2 + $0x5f0] sm:$0xf0]  ;;  %v13693_v51 = vld [vmem:[#allocation2 + $0x1c4] sm:$0xf] }
 0x57e   :  { %7332 = vmatpush.bf16.msrb.mxu2 %v11884_v11  ;;  %7179 = vmatpush.bf16.msra.mxu3 %v12044_v0  ;;  %v11968_v11 = vor.u32 %v13881_v54, %v11967_v49  ;;  %v11756_v16 = vor.u32 %v13824_v41, %v11753_v34  ;;  %v11636_v0 = vor.u32 %v13794_v6, %v11633_v35  ;;  %v11377_v49 = vld [vmem:[#allocation2 + $0x2f8] sm:$0xf0]  ;;  %v12271_v41 = vld [vmem:[#allocation5 + $0xf0] sm:$0xf]  ;;  %v13958_v34 = vld [vmem:[#allocation5 + $0x104] sm:$0xf0] }
 0x57f   :  { %v11588_v54 = vor.u32 %v13782_v42, %v11585_v52  ;;  %v13705_v35 = vld [vmem:[#allocation2 + $0x224] sm:$0xf]  ;;  %v12151_v42 = vld [vmem:[#allocation5] sm:$0xf]  ;;  %v13928_v52 = vld [vmem:[#allocation5 + $0x14] sm:$0xf0] }
 0x580   :  { %7096 = vmatpush.bf16.msrb.mxu1 %v12016_v59 }
 0x581   :  { %7305 = vmatpush.bf16.msrb.mxu0 %v11476_v8  ;;  %v11736_v8 = vor.u32 %v13822_v63, %v11735_v53  ;;  %v13952_v53 = vld [vmem:[#allocation5 + $0xd4] sm:$0xf0] }
 0x582   :  { %7333 = vmatpush.bf16.msrb.mxu2 %v11860_v22  ;;  %7180 = vmatpush.bf16.msra.mxu3 %v12020_v38  ;;  %v13816_v22 = vld [vmem:[#allocation2 + $0x594] sm:$0xf0] }
 0x584   :  { %7097 = vmatpush.bf16.msrb.mxu1 %v11992_v7 }
 0x585   :  { %7306 = vmatpush.bf16.msrb.mxu0 %v11452_v18  ;;  %v11657_v18 = vld [vmem:[#allocation2 + $0x530] sm:$0xf0] }
 0x586   :  { %7334 = vmatpush.bf16.msrb.mxu2 %v11836_v9  ;;  %7181 = vmatpush.bf16.msra.mxu3 %v11996_v17  ;;  %v11660_v9 = vor.u32 %v13800_v4, %v11657_v18  ;;  %v13729_v17 = vld [vmem:[#allocation2 + $0x2e4] sm:$0xf]  ;;  %v11304_v4 = vor.u32 %v13714_v15, %v11303_v48  ;;  %v12199_v18 = vld [vmem:[#allocation5 + $0x60] sm:$0xf]  ;;  %v13912_v48 = vld [vmem:[#allocation2 + $0x894] sm:$0xf0]  ;;  %v6904_v15 = vpop.f32.mrf.mxu3 }
 0x587   :  { %v11380_v30 = vor.u32 %v13729_v17, %v11377_v49  ;;  %v12200_v6 = vor.u32 %v13940_v33, %v12199_v18  ;;  %v6864_v17 = vpop.f32.mrf.mxu0 }
 0x588   :  { %7098 = vmatpush.bf16.msrb.mxu1 %v11968_v11  ;;  %v13726_v11 = vld [vmem:[#allocation2 + $0x2c4] sm:$0xf0] }
 0x589   :  { %7307 = vmatpush.bf16.msrb.mxu0 %v11428_v45  ;;  %v11609_v45 = vld [vmem:[#allocation2 + $0x4d0] sm:$0xf0]  ;;  %v11352_v29 = vor.u32 %v13726_v11, %v11351_v2  ;;  %v17533_v2 = vld [vmem:[%s17672_s5] sm:$0x3f] }
 0x58a   :  { %7335 = vmatpush.bf16.msrb.mxu2 %v11812_v12  ;;  %7182 = vmatpush.bf16.msra.mxu3 %v11972_v19  ;;  %v11615_v12 = vld [vmem:[#allocation2 + $0x4c0] sm:$0xf]  ;;  %v11612_v59 = vor.u32 %v13788_v31, %v11609_v45  ;;  %v12272_v19 = vor.u32 %v13958_v34, %v12271_v41  ;;  %v12175_v31 = vld [vmem:[#allocation5 + $0x30] sm:$0xf]  ;;  %v11284_v45 = vor.u32 %v13705_v35, %v11281_v36  ;;  %v11209_v41 = vld [vmem:[#allocation2 + $0x1a8] sm:$0xf0] }
 0x58b   :  { %7099 = vmatmul.bf16.vlgmr.msrb.gmra.mxu1 %v17513_v14  ;;  %v11616_v38 = vor.u32 %v13792_v61, %v11615_v12  ;;  %v13699_v61 = vld [vmem:[#allocation2 + $0x1f4] sm:$0xf]  ;;  %v12143_v34 = vld [vmem:[#allocation2 + $0x8e0] sm:$0xf]  ;;  %v13921_v11 = vld [vmem:[#allocation2 + $0x8e4] sm:$0xf] }
 0x58c   :  { %7147 = vmatpush.bf16.msra.mxu1 %v11756_v16  ;;  %v13723_v16 = vld [vmem:[#allocation2 + $0x2b4] sm:$0xf]  ;;  %v12073_v36 = vld [vmem:[#allocation2 + $0x868] sm:$0xf0] }
 0x58d   :  { %7308 = vmatpush.bf16.msrb.mxu0 %v11404_v47  ;;  %7183 = vmatmul.bf16.vlgmr.msra.gmra.mxu3 %v17513_v14  ;;  %v13964_v47 = vld [vmem:[#allocation5 + $0x134] sm:$0xf0] }
 0x58e   :  { %7336 = vmatpush.bf16.msrb.mxu2 %v11788_v13  ;;  %7231 = vmatpush.bf16.msrb.mxu3 %v11760_v43  ;;  %v13732_v13 = vld [vmem:[#allocation2 + $0x2f4] sm:$0xf0]  ;;  %v12296_v7 = vor.u32 %v13964_v47, %v12295_v26  ;;  %v11353_v43 = vld [vmem:[#allocation2 + $0x2c8] sm:$0xf0]  ;;  %v12152_v47 = vor.u32 %v13928_v52, %v12151_v42  ;;  %v12049_v42 = vld [vmem:[#allocation2 + $0x838] sm:$0xf0] }
 0x58f   :  { %v11376_v50 = vor.u32 %v13732_v13, %v11375_v28  ;;  %v11356_v63 = vor.u32 %v13723_v16, %v11353_v43  ;;  %v13696_v26 = vld [vmem:[#allocation2 + $0x1d4] sm:$0xf0]  ;;  %v11233_v28 = vld [vmem:[#allocation2 + $0x1d8] sm:$0xf0]  ;;  %v6876_v13 = vpop.f32.mrf.mxu1  ;;  %v6890_v43 = vpop.f32.mrf.mxu2  ;;  %v12679_v52 = vld [vmem:[#allocation5 + $0x420] sm:$0xf] }
 0x590   :  { %7309 = vmatmul.bf16.vlgmr.msrb.gmra.mxu0 %v18031_v56  ;;  %v11711_v56 = vld [vmem:[#allocation2 + $0x580] sm:$0xf]  ;;  %7148 = vmatpush.bf16.msra.mxu1 %v11732_v3  ;;  %v11236_v49 = vor.u32 %v13693_v51, %v11233_v28 }
 0x591   :  { %7337 = vmatmul.bf16.vlgmr.msrb.gmra.mxu2 %v17432_v58  ;;  %v11708_v58 = vor.u32 %v13812_v32, %v11705_v10  ;;  %v11712_v25 = vor.u32 %v13816_v22, %v11711_v56  ;;  %9117 = vmatpush.bf16.msra.mxu0 %v12320_v1  ;;  %v11327_v3 = vld [vmem:[#allocation2 + $0x280] sm:$0xf]  ;;  %v12248_v32 = vor.u32 %v13952_v53, %v12247_v27  ;;  %v13717_v10 = vld [vmem:[#allocation2 + $0x284] sm:$0xf]  ;;  %v11329_v56 = vld [vmem:[#allocation2 + $0x298] sm:$0xf0] }
 0x592   :  { %7232 = vmatpush.bf16.msrb.mxu3 %v11736_v8  ;;  %v13720_v8 = vld [vmem:[#allocation2 + $0x294] sm:$0xf0]  ;;  %v11332_v21 = vor.u32 %v13717_v10, %v11329_v56  ;;  %v11257_v1 = vld [vmem:[#allocation2 + $0x208] sm:$0xf0]  ;;  %v5106_v53 = vperm.slane %v17533_v2, 0 }
 0x593   :  { %v11328_v22 = vor.u32 %v13720_v8, %v11327_v3  ;;  %v12119_v3 = vld [vmem:[#allocation2 + $0x8b0] sm:$0xf]  ;;  %v13918_v8 = vld [vmem:[#allocation2 + $0x8c4] sm:$0xf0]  ;;  %v12121_v10 = vld [vmem:[#allocation2 + $0x8c8] sm:$0xf0] }
 0x594   :  { %7149 = vmatpush.bf16.msra.mxu1 %v11708_v58  ;;  %v12223_v58 = vld [vmem:[#allocation5 + $0x90] sm:$0xf] }
 0x595   :  { %9118 = vmatpush.bf16.msra.mxu0 %v12296_v7  ;;  %v11232_v7 = vor.u32 %v13696_v26, %v11231_v24 }
 0x596   :  { %7233 = vmatpush.bf16.msrb.mxu3 %v11712_v25  ;;  %v13946_v25 = vld [vmem:[#allocation5 + $0xa4] sm:$0xf0] }
 0x597   :  { %v12224_v20 = vor.u32 %v13946_v25, %v12223_v58  ;;  %v6878_v56 = vpop.f32.mrf.mxu1  ;;  %v6863_v58 = vadd.f32 %v6862_v60, %v5106_v53  ;;  %v6892_v35 = vpop.f32.mrf.mxu2  ;;  %v12703_v60 = vld [vmem:[#allocation5 + $0x450] sm:$0xf] }
 0x598   :  { %7150 = vmatpush.bf16.msra.mxu1 %v11684_v5  ;;  %v13711_v5 = vld [vmem:[#allocation2 + $0x254] sm:$0xf] }
 0x599   :  { %9119 = vmatpush.bf16.msra.mxu0 %v12272_v19  ;;  %v12145_v19 = vld [vmem:[#allocation2 + $0x8f8] sm:$0xf0]  ;;  %v6877_v33 = vadd.f32 %v6876_v13, %v6863_v58 }
 0x59a   :  { %7234 = vmatpush.bf16.msrb.mxu3 %v11688_v40  ;;  %v11305_v40 = vld [vmem:[#allocation2 + $0x268] sm:$0xf0] }
 0x59b   :  { %v11308_v44 = vor.u32 %v13711_v5, %v11305_v40  ;;  %v13909_v5 = vld [vmem:[#allocation2 + $0x884] sm:$0xf]  ;;  %v12097_v40 = vld [vmem:[#allocation2 + $0x898] sm:$0xf0] }
 0x59c   :  { %7151 = vmatpush.bf16.msra.mxu1 %v11660_v9  ;;  %v11279_v9 = vld [vmem:[#allocation2 + $0x220] sm:$0xf] }
 0x59d   :  { %9120 = vmatpush.bf16.msra.mxu0 %v12248_v32  ;;  %v13915_v32 = vld [vmem:[#allocation2 + $0x8b4] sm:$0xf] }
 0x59e   :  { %7235 = vmatpush.bf16.msrb.mxu3 %v11664_v57  ;;  %v13708_v57 = vld [vmem:[#allocation2 + $0x234] sm:$0xf0]  ;;  %v12124_v25 = vor.u32 %v13915_v32, %v12121_v10  ;;  %v12631_v32 = vld [vmem:[#allocation5 + $0x3c0] sm:$0xf] }
 0x59f   :  { %v14048_v10 = vld [vmem:[#allocation5 + $0x3d4] sm:$0xf0] }
 0x5a0   :  { %7152 = vmatpush.bf16.msra.mxu1 %v11636_v0  ;;  %v11280_v0 = vor.u32 %v13708_v57, %v11279_v9  ;;  %v12071_v9 = vld [vmem:[#allocation2 + $0x850] sm:$0xf]  ;;  %v13906_v57 = vld [vmem:[#allocation2 + $0x864] sm:$0xf0] }
 0x5a1   :  { %9121 = vmatpush.bf16.msra.mxu0 %v12224_v20  ;;  %v6918_v20 = vpop.f32.mrf.mxu0 }
 0x5a2   :  { %7236 = vmatpush.bf16.msrb.mxu3 %v11640_v62  ;;  %v13934_v62 = vld [vmem:[#allocation5 + $0x44] sm:$0xf0] }
 0x5a3   :  { %v12176_v12 = vor.u32 %v13934_v62, %v12175_v31  ;;  %v6891_v31 = vadd.f32 %v6890_v43, %v6877_v33  ;;  %v11761_v33 = vld [vmem:[#allocation2 + $0x5f8] sm:$0xf0] }
 0x5a4   :  { %7153 = vmatpush.bf16.msra.mxu1 %v11612_v59  ;;  %v11256_v59 = vor.u32 %v13702_v23, %v11255_v46  ;;  %v12072_v23 = vor.u32 %v13906_v57, %v12071_v9  ;;  %v14042_v9 = vld [vmem:[#allocation5 + $0x3a4] sm:$0xf0] }
 0x5a5   :  { %9122 = vmatpush.bf16.msra.mxu0 %v12200_v6  ;;  %v13903_v6 = vld [vmem:[#allocation2 + $0x854] sm:$0xf]  ;;  %v6905_v24 = vadd.f32 %v6904_v15, %v6891_v31  ;;  %v13882_v15 = vld [vmem:[#allocation2 + $0x7a4] sm:$0xf0]  ;;  %v11737_v31 = vld [vmem:[#allocation2 + $0x5c8] sm:$0xf0] }
 0x5a6   :  { %7237 = vmatpush.bf16.msrb.mxu3 %v11616_v38  ;;  %v11260_v38 = vor.u32 %v13699_v61, %v11257_v1  ;;  %v12047_v61 = vld [vmem:[#allocation2 + $0x820] sm:$0xf]  ;;  %v13900_v1 = vld [vmem:[#allocation2 + $0x834] sm:$0xf0] }
 0x5a7   :  { %v12048_v28 = vor.u32 %v13900_v1, %v12047_v61  ;;  %v13813_v61 = vld [vmem:[#allocation2 + $0x584] sm:$0xf]  ;;  %v11713_v1 = vld [vmem:[#allocation2 + $0x598] sm:$0xf0] }
 0x5a8   :  { %7154 = vmatpush.bf16.msra.mxu1 %v11588_v54  ;;  %v11207_v54 = vld [vmem:[#allocation2 + $0x190] sm:$0xf] }
 0x5a9   :  { %9123 = vmatpush.bf16.msra.mxu0 %v12176_v12  ;;  %v6920_v51 = vpop.f32.mrf.mxu0 }
 0x5aa   :  { %7238 = vmatpush.bf16.msrb.mxu3 %v11592_v37  ;;  %v13690_v37 = vld [vmem:[#allocation2 + $0x1a4] sm:$0xf0] }
 0x5ab   :  { %7155 = vmatmul.bf16.vlgmr.msra.gmra.mxu1 %v18038_v55  ;;  %v11208_v16 = vor.u32 %v13690_v37, %v11207_v54  ;;  %v13894_v54 = vld [vmem:[#allocation2 + $0x804] sm:$0xf0]  ;;  %v13891_v37 = vld [vmem:[#allocation2 + $0x7f4] sm:$0xf] }
 0x5ac   :  { %7203 = vmatpush.bf16.msrb.mxu1 %v11376_v50  ;;  %v13687_v50 = vld [vmem:[#allocation2 + $0x194] sm:$0xf] }
 0x5ad   :  { %7239 = vmatmul.bf16.vlgmr.msrb.gmra.mxu3 %v18038_v55  ;;  %9124 = vmatpush.bf16.msra.mxu0 %v12152_v47  ;;  %v6906_v47 = vpop.f32.mrf.mxu3 }
 0x5ae   :  { %7287 = vmatpush.bf16.msra.mxu3 %v11380_v30  ;;  %v13924_v30 = vld [vmem:[#allocation2 + $0x8f4] sm:$0xf0] }
 0x5af   :  { %v12144_v27 = vor.u32 %v13924_v30, %v12143_v34  ;;  %v14054_v34 = vld [vmem:[#allocation5 + $0x404] sm:$0xf0] }
 0x5b0   :  { %7204 = vmatpush.bf16.msrb.mxu1 %v11352_v29  ;;  %v11212_v29 = vor.u32 %v13687_v50, %v11209_v41  ;;  %v12025_v50 = vld [vmem:[#allocation2 + $0x808] sm:$0xf0]  ;;  %v12655_v41 = vld [vmem:[#allocation5 + $0x3f0] sm:$0xf] }
 0x5b2   :  { %7288 = vmatpush.bf16.msra.mxu3 %v11356_v63  ;;  %v12148_v63 = vor.u32 %v13921_v11, %v12145_v19  ;;  %v12656_v19 = vor.u32 %v14054_v34, %v12655_v41  ;;  %v11665_v41 = vld [vmem:[#allocation2 + $0x538] sm:$0xf0] }
 0x5b4   :  { %7205 = vmatpush.bf16.msrb.mxu1 %v11328_v22  ;;  %v12120_v22 = vor.u32 %v13918_v8, %v12119_v3  ;;  %v13885_v3 = vld [vmem:[#allocation2 + $0x7c4] sm:$0xf]  ;;  %v12001_v8 = vld [vmem:[#allocation2 + $0x7d8] sm:$0xf0] }
 0x5b5   :  { %v17542_v57 = vpop.f32.mrf.mxu3 }
 0x5b6   :  { %7289 = vmatpush.bf16.msra.mxu3 %v11332_v21  ;;  %v12095_v21 = vld [vmem:[#allocation2 + $0x880] sm:$0xf] }
 0x5b7   :  { %v12096_v18 = vor.u32 %v13912_v48, %v12095_v21  ;;  %v11975_v48 = vld [vmem:[#allocation2 + $0x790] sm:$0xf] }
 0x5b8   :  { %7206 = vmatpush.bf16.msrb.mxu1 %v11304_v4  ;;  %v6865_v4 = vadd.f32 %v6864_v17, %v5106_v53  ;;  %v11999_v53 = vld [vmem:[#allocation2 + $0x7c0] sm:$0xf] }
 0x5ba   :  { %7290 = vmatpush.bf16.msra.mxu3 %v11308_v44  ;;  %v12100_v44 = vor.u32 %v13909_v5, %v12097_v40  ;;  %v6879_v62 = vadd.f32 %v6878_v56, %v6865_v4  ;;  %v17538_v56 = vpop.f32.mrf.mxu2  ;;  %v12004_v5 = vor.u32 %v13885_v3, %v12001_v8  ;;  %v13879_v40 = vld [vmem:[#allocation2 + $0x794] sm:$0xf]  ;;  %v11977_v4 = vld [vmem:[#allocation2 + $0x7a8] sm:$0xf0] }
 0x5bb   :  { %v13795_v3 = vld [vmem:[#allocation2 + $0x4f4] sm:$0xf]  ;;  %v11641_v8 = vld [vmem:[#allocation2 + $0x508] sm:$0xf0] }
 0x5bc   :  { %7207 = vmatpush.bf16.msrb.mxu1 %v11280_v0  ;;  %v14066_v0 = vld [vmem:[#allocation5 + $0x464] sm:$0xf0]  ;;  %v6893_v12 = vadd.f32 %v6892_v35, %v6879_v62  ;;  %v11976_v35 = vor.u32 %v13882_v15, %v11975_v48  ;;  %v12583_v62 = vld [vmem:[#allocation5 + $0x360] sm:$0xf]  ;;  %v13789_v15 = vld [vmem:[#allocation2 + $0x4c4] sm:$0xf] }
 0x5be   :  { %7291 = vmatpush.bf16.msra.mxu3 %v11284_v45  ;;  %v12704_v45 = vor.u32 %v14066_v0, %v12703_v60  ;;  %v6907_v13 = vadd.f32 %v6906_v47, %v6893_v12  ;;  %v13819_v0 = vld [vmem:[#allocation2 + $0x5b4] sm:$0xf]  ;;  %v17547_v12 = vpop.f32.mrf.mxu0 }
 0x5bf   :  { %v13807_v47 = vld [vmem:[#allocation2 + $0x554] sm:$0xf] }
 0x5c0   :  { %7208 = vmatpush.bf16.msrb.mxu1 %v11256_v59  ;;  %v13897_v59 = vld [vmem:[#allocation2 + $0x824] sm:$0xf]  ;;  %9145 = vmatpush.bf16.msra.mxu2 %v12704_v45  ;;  %v6921_v30 = vadd.f32 %v6920_v51, %v6907_v13  ;;  %v14036_v45 = vld [vmem:[#allocation5 + $0x374] sm:$0xf0]  ;;  %v11689_v51 = vld [vmem:[#allocation2 + $0x568] sm:$0xf0] }
 0x5c1   :  { %v12052_v17 = vor.u32 %v13897_v59, %v12049_v42  ;;  %v12559_v59 = vld [vmem:[#allocation5 + $0x330] sm:$0xf]  ;;  %v14030_v42 = vld [vmem:[#allocation5 + $0x344] sm:$0xf0]  ;;  %v14024_v13 = vld [vmem:[#allocation5 + $0x314] sm:$0xf0] }
 0x5c2   :  { %7292 = vmatpush.bf16.msra.mxu3 %v11260_v38  ;;  %v14060_v38 = vld [vmem:[#allocation5 + $0x434] sm:$0xf0] }
 0x5c3   :  { %v12680_v26 = vor.u32 %v14060_v38, %v12679_v52  ;;  %v12560_v38 = vor.u32 %v14030_v42, %v12559_v59  ;;  %v12225_v42 = vld [vmem:[#allocation5 + $0xa8] sm:$0xf0] }
 0x5c4   :  { %7209 = vmatpush.bf16.msrb.mxu1 %v11232_v7  ;;  %v6919_v7 = vadd.f32 %v6918_v20, %v6905_v24  ;;  %v17553_v24 = vpop.f32.mrf.mxu3 }
 0x5c5   :  { %9146 = vmatpush.bf16.msra.mxu2 %v12680_v26  ;;  %v11716_v26 = vor.u32 %v13813_v61, %v11713_v1  ;;  %v14096_v61 = vld [vmem:[#allocation5 + $0x554] sm:$0xf0]  ;;  %v13943_v1 = vld [vmem:[#allocation5 + $0x94] sm:$0xf] }
 0x5c6   :  { %7293 = vmatpush.bf16.msra.mxu3 %v11236_v49  ;;  %v12023_v49 = vld [vmem:[#allocation2 + $0x7f0] sm:$0xf] }
 0x5c7   :  { %v12024_v43 = vor.u32 %v13894_v54, %v12023_v49  ;;  %v12321_v49 = vld [vmem:[#allocation5 + $0x168] sm:$0xf0] }
 0x5c8   :  { %7210 = vmatpush.bf16.msrb.mxu1 %v11208_v16  ;;  %v6932_v46 = vpop.f32.mrf.mxu1 }
 0x5c9   :  { %v6933_v11 = vadd.f32 %v6932_v46, %v6919_v7  ;;  %9147 = vmatpush.bf16.msra.mxu2 %v12656_v19  ;;  %v12584_v46 = vor.u32 %v14036_v45, %v12583_v62  ;;  %v14018_v62 = vld [vmem:[#allocation5 + $0x2e4] sm:$0xf0] }
 0x5ca   :  { %7294 = vmatpush.bf16.msra.mxu3 %v11212_v29 }
 0x5cb   :  { %7211 = vmatmul.bf16.vlgmr.msrb.gmra.mxu1 %v18039_v39 }
 0x5cc   :  { %7259 = vmatpush.bf16.msra.mxu1 %v12144_v27  ;;  %v12028_v27 = vor.u32 %v13891_v37, %v12025_v50  ;;  %v11692_v37 = vor.u32 %v13807_v47, %v11689_v51  ;;  %v13801_v50 = vld [vmem:[#allocation2 + $0x524] sm:$0xf]  ;;  %v12487_v51 = vld [vmem:[#allocation5 + $0x2a0] sm:$0xf] }
 0x5cd   :  { %7295 = vmatmul.bf16.vlgmr.msra.gmra.mxu3 %v18039_v39  ;;  %v12076_v39 = vor.u32 %v13903_v6, %v12073_v36  ;;  %v11980_v36 = vor.u32 %v13879_v40, %v11977_v4  ;;  %v12847_v4 = vld [vmem:[#allocation5 + $0x570] sm:$0xf] }
 0x5ce   :  { %7343 = vmatpush.bf16.msrb.mxu3 %v12148_v63  ;;  %v13888_v63 = vld [vmem:[#allocation2 + $0x7d4] sm:$0xf0] }
 0x5cf   :  { %v12000_v21 = vor.u32 %v13888_v63, %v11999_v53  ;;  %v11668_v53 = vor.u32 %v13801_v50, %v11665_v41  ;;  %v12201_v50 = vld [vmem:[#allocation5 + $0x78] sm:$0xf0] }
 0x5d0   :  { %7260 = vmatpush.bf16.msra.mxu1 %v12120_v22  ;;  %v6934_v16 = vpop.f32.mrf.mxu1  ;;  %v7357_v22 = vmax.f32 %v6933_v11, 0.0  ;;  %v14114_v11 = vld [vmem:[#allocation5 + $0x5e4] sm:$0xf0] }
 0x5d1   :  { %v6935_v29 = vadd.f32 %v6934_v16, %v6921_v30  ;;  %v12895_v30 = vld [vmem:[#allocation5 + $0x5d0] sm:$0xf]  ;;  %v13961_v16 = vld [vmem:[#allocation5 + $0x124] sm:$0xf] }
 0x5d2   :  { %7344 = vmatpush.bf16.msrb.mxu3 %v12124_v25  ;;  %v12632_v25 = vor.u32 %v14048_v10, %v12631_v32  ;;  %v12896_v19 = vor.u32 %v14114_v11, %v12895_v30  ;;  %v12871_v32 = vld [vmem:[#allocation5 + $0x5a0] sm:$0xf]  ;;  %v14108_v10 = vld [vmem:[#allocation5 + $0x5b4] sm:$0xf0] }
 0x5d3   :  { %v7363_v58 = vmax.f32 %v6935_v29, 0.0  ;;  %v17559_v29 = vpop.f32.mrf.mxu3 }
 0x5d4   :  { %7261 = vmatpush.bf16.msra.mxu1 %v12096_v18  ;;  %v13825_v18 = vld [vmem:[#allocation2 + $0x5e4] sm:$0xf]  ;;  %9148 = vmatpush.bf16.msra.mxu2 %v12632_v25  ;;  %v12273_v25 = vld [vmem:[#allocation5 + $0x108] sm:$0xf0] }
 0x5d5   :  { %v17540_v20 = vpack.c.bf16 %v7363_v58, %v7357_v22  ;;  %v11764_v60 = vor.u32 %v13825_v18, %v11761_v33  ;;  %v13955_v22 = vld [vmem:[#allocation5 + $0xf4] sm:$0xf]  ;;  %v12872_v58 = vor.u32 %v14108_v10, %v12871_v32  ;;  %v14102_v18 = vld [vmem:[#allocation5 + $0x584] sm:$0xf0]  ;;  %v13949_v33 = vld [vmem:[#allocation5 + $0xc4] sm:$0xf] }
 0x5d6   :  { %7345 = vmatpush.bf16.msrb.mxu3 %v12100_v44  ;;  %v12607_v44 = vld [vmem:[#allocation5 + $0x390] sm:$0xf]  ;;  %v12276_v48 = vor.u32 %v13955_v22, %v12273_v25  ;;  %v14006_v32 = vld [vmem:[#allocation5 + $0x284] sm:$0xf0] }
 0x5d7   :  { %9125 = vmatmul.bf16.vlgmr.msra.gmra.mxu0 %v17540_v20  ;;  %v12608_v6 = vor.u32 %v14042_v9, %v12607_v44  ;;  %v12848_v44 = vor.u32 %v14102_v18, %v12847_v4  ;;  %v12249_v9 = vld [vmem:[#allocation5 + $0xd8] sm:$0xf0]  ;;  %v12751_v22 = vld [vmem:[#allocation5 + $0x4b0] sm:$0xf] }
 0x5d8   :  { %7262 = vmatpush.bf16.msra.mxu1 %v12072_v23  ;;  %v17545_v23 = vpop.f32.mrf.mxu2  ;;  %v17549_v52 = vpop.f32.mrf.mxu1 }
 0x5d9   :  { %9149 = vmatpush.bf16.msra.mxu2 %v12608_v6 }
 0x5da   :  { %7346 = vmatpush.bf16.msrb.mxu3 %v12076_v39  ;;  %v11740_v39 = vor.u32 %v13819_v0, %v11737_v31  ;;  %v11593_v0 = vld [vmem:[#allocation2 + $0x4a8] sm:$0xf0]  ;;  %v12511_v31 = vld [vmem:[#allocation5 + $0x2d0] sm:$0xf] }
 0x5db   :  { %v17565_v45 = vpop.f32.mrf.mxu3  ;;  %v12512_v47 = vor.u32 %v14018_v62, %v12511_v31 }
 0x5dc   :  { %7263 = vmatpush.bf16.msra.mxu1 %v12048_v28  ;;  %v12535_v28 = vld [vmem:[#allocation5 + $0x300] sm:$0xf] }
 0x5dd   :  { %9150 = vmatpush.bf16.msra.mxu2 %v12584_v46  ;;  %v12536_v7 = vor.u32 %v14024_v13, %v12535_v28  ;;  %v14012_v28 = vld [vmem:[#allocation5 + $0x2b4] sm:$0xf0]  ;;  %v12799_v13 = vld [vmem:[#allocation5 + $0x510] sm:$0xf] }
 0x5de   :  { %7347 = vmatpush.bf16.msrb.mxu3 %v12052_v17  ;;  %v13967_v17 = vld [vmem:[#allocation5 + $0x154] sm:$0xf] }
 0x5df   :  { %v12324_v54 = vor.u32 %v13967_v17, %v12321_v49  ;;  %v13937_v17 = vld [vmem:[#allocation5 + $0x64] sm:$0xf]  ;;  %v5107_v49 = vperm.slane %v17533_v2, 1 }
 0x5e0   :  { %7264 = vmatpush.bf16.msra.mxu1 %v12024_v43  ;;  %v17555_v34 = vpop.f32.mrf.mxu2  ;;  %v12297_v43 = vld [vmem:[#allocation5 + $0x138] sm:$0xf0]  ;;  %v12204_v11 = vor.u32 %v13937_v17, %v12201_v50 }
 0x5e1   :  { %9151 = vmatpush.bf16.msra.mxu2 %v12560_v38  ;;  %v12300_v63 = vor.u32 %v13961_v16, %v12297_v43  ;;  %v14084_v16 = vld [vmem:[#allocation5 + $0x4f4] sm:$0xf0]  ;;  %v13931_v43 = vld [vmem:[#allocation5 + $0x34] sm:$0xf] }
 0x5e2   :  { %7348 = vmatpush.bf16.msrb.mxu3 %v12028_v27  ;;  %v17561_v27 = vpop.f32.mrf.mxu1 }
 0x5e3   :  { %v7072_v18 = vpop.f32.mrf.mxu3 }
 0x5e4   :  { %7265 = vmatpush.bf16.msra.mxu1 %v12000_v21  ;;  %v11644_v21 = vor.u32 %v13795_v3, %v11641_v8  ;;  %v12177_v8 = vld [vmem:[#allocation5 + $0x48] sm:$0xf0] }
 0x5e5   :  { %9152 = vmatpush.bf16.msra.mxu2 %v12536_v7  ;;  %v14090_v7 = vld [vmem:[#allocation5 + $0x524] sm:$0xf0]  ;;  %v12180_v10 = vor.u32 %v13931_v43, %v12177_v8  ;;  %v12367_v43 = vld [vmem:[#allocation5 + $0x1b0] sm:$0xf]  ;;  %v14003_v8 = vld [vmem:[#allocation5 + $0x274] sm:$0xf] }
 0x5e6   :  { %7349 = vmatpush.bf16.msrb.mxu3 %v12004_v5  ;;  %v11617_v5 = vld [vmem:[#allocation2 + $0x4d8] sm:$0xf0] }
 0x5e8   :  { %7266 = vmatpush.bf16.msra.mxu1 %v11976_v35  ;;  %v17563_v6 = vpop.f32.mrf.mxu2  ;;  %v11620_v35 = vor.u32 %v13789_v15, %v11617_v5  ;;  %v6947_v15 = vadd.f32 %v17538_v56, %v5107_v49  ;;  %v6949_v5 = vadd.f32 %v17545_v23, %v5107_v49 }
 0x5e9   :  { %9201 = vmatpush.bf16.msrb.mxu2 %v12324_v54  ;;  %v5108_v54 = vperm.slane %v17533_v2, 2 }
 0x5ea   :  { %7350 = vmatpush.bf16.msrb.mxu3 %v11980_v36  ;;  %v13783_v36 = vld [vmem:[#allocation2 + $0x494] sm:$0xf]  ;;  %v7044_v46 = vpop.f32.mrf.mxu1  ;;  %v6963_v56 = vadd.f32 %v17553_v24, %v6949_v5  ;;  %v14162_v5 = vld [vmem:[#allocation5 + $0x764] sm:$0xf0] }
 0x5eb   :  { %7267 = vmatmul.bf16.vlgmr.msra.gmra.mxu1 %v17513_v14  ;;  %v11596_v38 = vor.u32 %v13783_v36, %v11593_v0  ;;  %v12439_v36 = vld [vmem:[#allocation5 + $0x240] sm:$0xf]  ;;  %v7074_v49 = vpop.f32.mrf.mxu3 }
 0x5ec   :  { %7315 = vmatpush.bf16.msrb.mxu1 %v11764_v60  ;;  %v12252_v60 = vor.u32 %v13949_v33, %v12249_v9 }
 0x5ed   :  { %7351 = vmatmul.bf16.vlgmr.msrb.gmra.mxu3 %v17513_v14  ;;  %v17557_v14 = vpop.f32.mrf.mxu0  ;;  %9202 = vmatpush.bf16.msrb.mxu2 %v12300_v63  ;;  %v12463_v63 = vld [vmem:[#allocation5 + $0x270] sm:$0xf] }
 0x5ee   :  { %9159 = vmatpush.bf16.msra.mxu3 %v12896_v19  ;;  %v12775_v19 = vld [vmem:[#allocation5 + $0x4e0] sm:$0xf]  ;;  %v12464_v9 = vor.u32 %v14006_v32, %v12463_v63  ;;  %v12465_v32 = vld [vmem:[#allocation5 + $0x288] sm:$0xf0] }
 0x5ef   :  { %v12776_v3 = vor.u32 %v14084_v16, %v12775_v19 }
 0x5f0   :  { %7316 = vmatpush.bf16.msrb.mxu1 %v11740_v39  ;;  %v12823_v39 = vld [vmem:[#allocation5 + $0x540] sm:$0xf]  ;;  %v7058_v41 = vpop.f32.mrf.mxu2 }
 0x5f1   :  { %9203 = vmatpush.bf16.msrb.mxu2 %v12276_v48  ;;  %v12824_v59 = vor.u32 %v14096_v61, %v12823_v39  ;;  %v12153_v48 = vld [vmem:[#allocation5 + $0x18] sm:$0xf0]  ;;  %v12415_v39 = vld [vmem:[#allocation5 + $0x210] sm:$0xf] }
 0x5f2   :  { %9160 = vmatpush.bf16.msra.mxu3 %v12872_v58  ;;  %v14078_v58 = vld [vmem:[#allocation5 + $0x4c4] sm:$0xf0]  ;;  %v7046_v33 = vpop.f32.mrf.mxu1 }
 0x5f4   :  { %7317 = vmatpush.bf16.msrb.mxu1 %v11716_v26  ;;  %v12228_v26 = vor.u32 %v13943_v1, %v12225_v42  ;;  %v13994_v1 = vld [vmem:[#allocation5 + $0x224] sm:$0xf0]  ;;  %v14072_v42 = vld [vmem:[#allocation5 + $0x494] sm:$0xf0] }
 0x5f5   :  { %v7030_v40 = vpop.f32.mrf.mxu0  ;;  %9204 = vmatpush.bf16.msrb.mxu2 %v12252_v60  ;;  %v14000_v60 = vld [vmem:[#allocation5 + $0x254] sm:$0xf0] }
 0x5f6   :  { %9161 = vmatpush.bf16.msra.mxu3 %v12848_v44  ;;  %v7031_v25 = vadd.f32 %v7030_v40, %v5108_v54  ;;  %v12440_v23 = vor.u32 %v14000_v60, %v12439_v36  ;;  %v13997_v36 = vld [vmem:[#allocation5 + $0x244] sm:$0xf] }
 0x5f8   :  { %7318 = vmatpush.bf16.msrb.mxu1 %v11692_v37  ;;  %v12800_v37 = vor.u32 %v14090_v7, %v12799_v13  ;;  %v7045_v44 = vadd.f32 %v7044_v46, %v7031_v25  ;;  %v7060_v61 = vpop.f32.mrf.mxu2 }
 0x5f9   :  { %9205 = vmatpush.bf16.msrb.mxu2 %v12228_v26 }
 0x5fa   :  { %9162 = vmatpush.bf16.msra.mxu3 %v12824_v59  ;;  %v7059_v62 = vadd.f32 %v7058_v41, %v7045_v44  ;;  %v12727_v59 = vld [vmem:[#allocation5 + $0x480] sm:$0xf]  ;;  %v12489_v41 = vld [vmem:[#allocation5 + $0x2b8] sm:$0xf0] }
 0x5fc   :  { %7319 = vmatpush.bf16.msrb.mxu1 %v11668_v53  ;;  %v12488_v53 = vor.u32 %v14012_v28, %v12487_v51  ;;  %v12513_v51 = vld [vmem:[#allocation5 + $0x2e8] sm:$0xf0]  ;;  %v7073_v17 = vadd.f32 %v7072_v18, %v7059_v62  ;;  %v13063_v62 = vld [vmem:[#allocation5 + $0x720] sm:$0xf] }
 0x5fd   :  { %v7032_v30 = vpop.f32.mrf.mxu0  ;;  %9206 = vmatpush.bf16.msrb.mxu2 %v12204_v11 }
 0x5fe   :  { %9163 = vmatpush.bf16.msra.mxu3 %v12800_v37  ;;  %v7033_v4 = vadd.f32 %v7032_v30, %v5108_v54  ;;  %v12391_v54 = vld [vmem:[#allocation5 + $0x1e0] sm:$0xf]  ;;  %v13988_v37 = vld [vmem:[#allocation5 + $0x1f4] sm:$0xf0] }
 0x5ff   :  { %v12392_v16 = vor.u32 %v13988_v37, %v12391_v54  ;;  %v5109_v54 = vperm.slane %v17533_v2, 3 }
 0x600   :  { %7320 = vmatpush.bf16.msrb.mxu1 %v11644_v21  ;;  %v13925_v21 = vld [vmem:[#allocation5 + $0x4] sm:$0xf]  ;;  %v7047_v0 = vadd.f32 %v7046_v33, %v7033_v4  ;;  %v14159_v4 = vld [vmem:[#allocation5 + $0x754] sm:$0xf]  ;;  %v7114_v18 = vpop.f32.mrf.mxu2 }
 0x601   :  { %9207 = vmatpush.bf16.msrb.mxu2 %v12180_v10  ;;  %v12156_v40 = vor.u32 %v13925_v21, %v12153_v48  ;;  %v12343_v21 = vld [vmem:[#allocation5 + $0x180] sm:$0xf]  ;;  %v13976_v48 = vld [vmem:[#allocation5 + $0x194] sm:$0xf0] }
 0x602   :  { %9164 = vmatpush.bf16.msra.mxu3 %v12776_v3  ;;  %v7061_v26 = vadd.f32 %v7060_v61, %v7047_v0  ;;  %v13065_v61 = vld [vmem:[#allocation5 + $0x738] sm:$0xf0] }
 0x604   :  { %7321 = vmatpush.bf16.msrb.mxu1 %v11620_v35  ;;  %v12752_v35 = vor.u32 %v14078_v58, %v12751_v22  ;;  %v7075_v50 = vadd.f32 %v7074_v49, %v7061_v26  ;;  %v12468_v58 = vor.u32 %v14003_v8, %v12465_v32  ;;  %v13039_v26 = vld [vmem:[#allocation5 + $0x6f0] sm:$0xf]  ;;  %v14135_v8 = vld [vmem:[#allocation5 + $0x694] sm:$0xf] }
 0x605   :  { %v7086_v31 = vpop.f32.mrf.mxu0  ;;  %9208 = vmatpush.bf16.msrb.mxu2 %v12156_v40  ;;  %v12441_v40 = vld [vmem:[#allocation5 + $0x258] sm:$0xf0] }
 0x606   :  { %9165 = vmatpush.bf16.msra.mxu3 %v12752_v35  ;;  %v7087_v19 = vadd.f32 %v7086_v31, %v7073_v17  ;;  %v13089_v35 = vld [vmem:[#allocation5 + $0x768] sm:$0xf0]  ;;  %v12344_v31 = vor.u32 %v13976_v48, %v12343_v21  ;;  %v13015_v17 = vld [vmem:[#allocation5 + $0x6c0] sm:$0xf] }
 0x607   :  { %v13092_v60 = vor.u32 %v14159_v4, %v13089_v35  ;;  %v14132_v4 = vld [vmem:[#allocation5 + $0x674] sm:$0xf0] }
 0x608   :  { %7322 = vmatpush.bf16.msrb.mxu1 %v11596_v38  ;;  %v6977_v38 = vadd.f32 %v17557_v14, %v6963_v56  ;;  %v7100_v28 = vpop.f32.mrf.mxu1  ;;  %v14009_v14 = vld [vmem:[#allocation5 + $0x2a4] sm:$0xf]  ;;  %v12444_v56 = vor.u32 %v13997_v36, %v12441_v40  ;;  %v14126_v40 = vld [vmem:[#allocation5 + $0x644] sm:$0xf0] }
 0x609   :  { %v12492_v11 = vor.u32 %v14009_v14, %v12489_v41  ;;  %v7101_v63 = vadd.f32 %v7100_v28, %v7087_v19  ;;  %v13985_v28 = vld [vmem:[#allocation5 + $0x1e4] sm:$0xf]  ;;  %v12369_v14 = vld [vmem:[#allocation5 + $0x1c8] sm:$0xf0]  ;;  %v7116_v41 = vpop.f32.mrf.mxu2 }
 0x60a   :  { %v6991_v7 = vadd.f32 %v17561_v27, %v6977_v38  ;;  %v7117_v48 = vadd.f32 %v7116_v41, %v5109_v54  ;;  %v14210_v41 = vld [vmem:[#allocation5 + $0x8e4] sm:$0xf0] }
 0x60b   :  { %7323 = vmatmul.bf16.vlgmr.msrb.gmra.mxu1 %v18038_v55  ;;  %v6961_v55 = vadd.f32 %v17542_v57, %v6947_v15  ;;  %v14015_v57 = vld [vmem:[#allocation5 + $0x2d4] sm:$0xf]  ;;  %v13087_v15 = vld [vmem:[#allocation5 + $0x750] sm:$0xf]  ;;  %v7359_v33 = vmax.f32 %v7101_v63, 0.0 }
 0x60c   :  { %9131 = vmatpush.bf16.msra.mxu1 %v12512_v47  ;;  %v12728_v47 = vor.u32 %v14072_v42, %v12727_v59  ;;  %v12516_v13 = vor.u32 %v14015_v57, %v12513_v51  ;;  %v12417_v59 = vld [vmem:[#allocation5 + $0x228] sm:$0xf0]  ;;  %v14147_v57 = vld [vmem:[#allocation5 + $0x6f4] sm:$0xf]  ;;  %v12991_v63 = vld [vmem:[#allocation5 + $0x690] sm:$0xf] }
 0x60d   :  { %v6975_v46 = vadd.f32 %v17547_v12, %v6961_v55  ;;  %v12416_v12 = vor.u32 %v13994_v1, %v12415_v39  ;;  %v7088_v27 = vpop.f32.mrf.mxu0  ;;  %v14153_v39 = vld [vmem:[#allocation5 + $0x724] sm:$0xf]  ;;  %v13991_v1 = vld [vmem:[#allocation5 + $0x214] sm:$0xf] }
 0x60e   :  { %9166 = vmatpush.bf16.msra.mxu3 %v12728_v47  ;;  %v7089_v3 = vadd.f32 %v7088_v27, %v7075_v50  ;;  %v13068_v42 = vor.u32 %v14153_v39, %v13065_v61  ;;  %v12420_v38 = vor.u32 %v13991_v1, %v12417_v59  ;;  %v14150_v47 = vld [vmem:[#allocation5 + $0x704] sm:$0xf0]  ;;  %v13979_v50 = vld [vmem:[#allocation5 + $0x1b4] sm:$0xf]  ;;  %v7115_v27 = vadd.f32 %v7114_v18, %v5109_v54  ;;  %v14129_v18 = vld [vmem:[#allocation5 + $0x664] sm:$0xf] }
 0x60f   :  { %v6989_v24 = vadd.f32 %v17549_v52, %v6975_v46  ;;  %v7005_v52 = vadd.f32 %v17563_v6, %v6991_v7  ;;  %v13040_v51 = vor.u32 %v14150_v47, %v13039_v26  ;;  %v12919_v1 = vld [vmem:[#allocation5 + $0x600] sm:$0xf]  ;;  %v14120_v59 = vld [vmem:[#allocation5 + $0x614] sm:$0xf0]  ;;  %v12921_v47 = vld [vmem:[#allocation5 + $0x618] sm:$0xf0] }
 0x610   :  { %9132 = vmatpush.bf16.msra.mxu1 %v12488_v53  ;;  %v13982_v53 = vld [vmem:[#allocation5 + $0x1c4] sm:$0xf0]  ;;  %v7102_v22 = vpop.f32.mrf.mxu1  ;;  %v12920_v26 = vor.u32 %v14120_v59, %v12919_v1  ;;  %v14189_v1 = vld [vmem:[#allocation5 + $0x844] sm:$0xf]  ;;  %v13209_v59 = vld [vmem:[#allocation5 + $0x858] sm:$0xf0] }
 0x611   :  { %v7003_v30 = vadd.f32 %v17555_v34, %v6989_v24  ;;  %v7019_v34 = vadd.f32 %v17565_v45, %v7005_v52  ;;  %v7103_v25 = vadd.f32 %v7102_v22, %v7089_v3  ;;  %v12368_v6 = vor.u32 %v13982_v53, %v12367_v43  ;;  %v7128_v45 = vpop.f32.mrf.mxu3  ;;  %v13041_v24 = vld [vmem:[#allocation5 + $0x708] sm:$0xf0]  ;;  %v13017_v52 = vld [vmem:[#allocation5 + $0x6d8] sm:$0xf0]  ;;  %v14138_v3 = vld [vmem:[#allocation5 + $0x6a4] sm:$0xf0] }
 0x612   :  { %9215 = vmatpush.bf16.msrb.mxu3 %v12516_v13  ;;  %v12393_v13 = vld [vmem:[#allocation5 + $0x1f8] sm:$0xf0]  ;;  %v13044_v37 = vor.u32 %v14147_v57, %v13041_v24  ;;  %v7129_v2 = vadd.f32 %v7128_v45, %v7115_v27  ;;  %v12992_v32 = vor.u32 %v14138_v3, %v12991_v63  ;;  %v13973_v22 = vld [vmem:[#allocation5 + $0x184] sm:$0xf]  ;;  %v14063_v57 = vld [vmem:[#allocation5 + $0x454] sm:$0xf] }
 0x613   :  { %v7017_v10 = vadd.f32 %v17559_v29, %v7003_v30  ;;  %v7365_v44 = vmax.f32 %v7103_v25, 0.0  ;;  %v7364_v0 = vmax.f32 %v7019_v34, 0.0  ;;  %v12396_v49 = vor.u32 %v13985_v28, %v12393_v13  ;;  %v14061_v63 = vld [vmem:[#allocation5 + $0x43c] sm:$0xf0] }
 0x614   :  { %9133 = vmatpush.bf16.msra.mxu1 %v12464_v9  ;;  %v13088_v9 = vor.u32 %v14162_v5, %v13087_v15  ;;  %v12967_v5 = vld [vmem:[#allocation5 + $0x660] sm:$0xf] }
 0x615   :  { %v7358_v29 = vmax.f32 %v7017_v10, 0.0  ;;  %v17582_v55 = vpack.c.bf16 %v7365_v44, %v7359_v33  ;;  %v7142_v53 = vpop.f32.mrf.mxu0  ;;  %v12993_v10 = vld [vmem:[#allocation5 + $0x6a8] sm:$0xf0]  ;;  %v12968_v44 = vor.u32 %v14132_v4, %v12967_v5  ;;  %v12663_v5 = vld [vmem:[#allocation5 + $0x3f8] sm:$0xf] }
 0x616   :  { %9216 = vmatpush.bf16.msrb.mxu3 %v12492_v11  ;;  %9173 = vmatpush.bf16.msrb.mxu0 %v13088_v9  ;;  %v14141_v11 = vld [vmem:[#allocation5 + $0x6c4] sm:$0xf]  ;;  %v12996_v34 = vor.u32 %v14135_v8, %v12993_v10  ;;  %v7143_v15 = vadd.f32 %v7142_v53, %v7129_v2  ;;  %v12969_v9 = vld [vmem:[#allocation5 + $0x678] sm:$0xf0]  ;;  %v12687_v2 = vld [vmem:[#allocation5 + $0x428] sm:$0xf] }
 0x617   :  { %9153 = vmatmul.bf16.vlgmr.msra.gmra.mxu2 %v17582_v55  ;;  %v17585_v7 = vpack.c.bf16 %v7364_v0, %v7358_v29  ;;  %v13020_v43 = vor.u32 %v14141_v11, %v13017_v52  ;;  %v12972_v29 = vor.u32 %v14129_v18, %v12969_v9  ;;  %v14123_v0 = vld [vmem:[#allocation5 + $0x634] sm:$0xf]  ;;  %v12681_v52 = vld [vmem:[#allocation5 + $0x438] sm:$0xf0]  ;;  %v12688_v8 = vor.u32 %v14061_v63, %v12687_v2  ;;  %v13255_v10 = vld [vmem:[#allocation5 + $0x8a0] sm:$0xf] }
 0x618   :  { %9134 = vmatpush.bf16.msra.mxu1 %v12440_v23  ;;  %v14156_v23 = vld [vmem:[#allocation5 + $0x734] sm:$0xf0]  ;;  %9257 = vmatpush.bf16.msra.mxu2 %v13092_v60  ;;  %v12943_v60 = vld [vmem:[#allocation5 + $0x630] sm:$0xf]  ;;  %v14045_v9 = vld [vmem:[#allocation5 + $0x3c4] sm:$0xf] }
 0x619   :  { %v13064_v46 = vor.u32 %v14156_v23, %v13063_v62  ;;  %v7130_v19 = vpop.f32.mrf.mxu3  ;;  %v14055_v4 = vld [vmem:[#allocation5 + $0x40c] sm:$0xf0] }
 0x61a   :  { %9217 = vmatpush.bf16.msrb.mxu3 %v12468_v58  ;;  %v12345_v58 = vld [vmem:[#allocation5 + $0x198] sm:$0xf0]  ;;  %v7131_v35 = vadd.f32 %v7130_v19, %v7117_v48  ;;  %v14207_v19 = vld [vmem:[#allocation5 + $0x8d4] sm:$0xf]  ;;  %v13231_v18 = vld [vmem:[#allocation5 + $0x870] sm:$0xf] }
 0x61b   :  { %9174 = vmatpush.bf16.msrb.mxu0 %v13064_v46  ;;  %v12348_v25 = vor.u32 %v13973_v22, %v12345_v58  ;;  %v14204_v22 = vld [vmem:[#allocation5 + $0x8b4] sm:$0xf0]  ;;  %v14051_v58 = vld [vmem:[#allocation5 + $0x3f4] sm:$0xf] }
 0x61c   :  { %9135 = vmatpush.bf16.msra.mxu1 %v12416_v12  ;;  %v14144_v12 = vld [vmem:[#allocation5 + $0x6d4] sm:$0xf0]  ;;  %9258 = vmatpush.bf16.msra.mxu2 %v13068_v42  ;;  %v14117_v42 = vld [vmem:[#allocation5 + $0x604] sm:$0xf] }
 0x61d   :  { %v13016_v30 = vor.u32 %v14144_v12, %v13015_v17  ;;  %v7144_v45 = vpop.f32.mrf.mxu0  ;;  %v12924_v13 = vor.u32 %v14117_v42, %v12921_v47  ;;  %v12711_v12 = vld [vmem:[#allocation5 + $0x458] sm:$0xf]  ;;  %v14043_v47 = vld [vmem:[#allocation5 + $0x3ac] sm:$0xf0] }
 0x61e   :  { %9218 = vmatpush.bf16.msrb.mxu3 %v12444_v56  ;;  %v12945_v56 = vld [vmem:[#allocation5 + $0x648] sm:$0xf0]  ;;  %v7145_v23 = vadd.f32 %v7144_v45, %v7131_v35  ;;  %v12633_v35 = vld [vmem:[#allocation5 + $0x3d8] sm:$0xf0]  ;;  %v14049_v45 = vld [vmem:[#allocation5 + $0x3dc] sm:$0xf0] }
 0x61f   :  { %9175 = vmatpush.bf16.msrb.mxu0 %v13040_v51  ;;  %v12948_v39 = vor.u32 %v14123_v0, %v12945_v56  ;;  %v12705_v51 = vld [vmem:[#allocation5 + $0x468] sm:$0xf0]  ;;  %v12639_v0 = vld [vmem:[#allocation5 + $0x3c8] sm:$0xf] }
 0x620   :  { %9136 = vmatpush.bf16.msra.mxu1 %v12392_v16  ;;  %v12372_v16 = vor.u32 %v13979_v50, %v12369_v14  ;;  %9259 = vmatpush.bf16.msra.mxu2 %v13044_v37  ;;  %v12708_v17 = vor.u32 %v14063_v57, %v12705_v51  ;;  %v13279_v14 = vld [vmem:[#allocation5 + $0x8d0] sm:$0xf]  ;;  %v12640_v56 = vor.u32 %v14049_v45, %v12639_v0  ;;  %v12897_v0 = vld [vmem:[#allocation5 + $0x5e8] sm:$0xf0] }
 0x621   :  { %v7184_v33 = vpop.f32.mrf.mxu3  ;;  %v13280_v11 = vor.u32 %v14210_v41, %v13279_v14  ;;  %v13183_v51 = vld [vmem:[#allocation5 + $0x810] sm:$0xf]  ;;  %v14037_v14 = vld [vmem:[#allocation5 + $0x37c] sm:$0xf0] }
 0x622   :  { %9219 = vmatpush.bf16.msrb.mxu3 %v12420_v38 }
 0x623   :  { %9176 = vmatpush.bf16.msrb.mxu0 %v13016_v30  ;;  %v14057_v30 = vld [vmem:[#allocation5 + $0x424] sm:$0xf] }
 0x624   :  { %9137 = vmatpush.bf16.msra.mxu1 %v12368_v6  ;;  %9260 = vmatpush.bf16.msra.mxu2 %v13020_v43  ;;  %v7170_v6 = vpop.f32.mrf.mxu2  ;;  %v12684_v53 = vor.u32 %v14057_v30, %v12681_v52  ;;  %v13159_v30 = vld [vmem:[#allocation5 + $0x7e0] sm:$0xf]  ;;  %v14027_v52 = vld [vmem:[#allocation5 + $0x334] sm:$0xf] }
 0x626   :  { %9220 = vmatpush.bf16.msrb.mxu3 %v12396_v49  ;;  %v14067_v49 = vld [vmem:[#allocation5 + $0x46c] sm:$0xf0] }
 0x627   :  { %9177 = vmatpush.bf16.msrb.mxu0 %v12992_v32  ;;  %9209 = vmatmul.bf16.vlgmr.msrb.gmra.mxu2 %v17540_v20  ;;  %v12712_v37 = vor.u32 %v14067_v49, %v12711_v12  ;;  %v14183_v12 = vld [vmem:[#allocation5 + $0x814] sm:$0xf]  ;;  %v13185_v49 = vld [vmem:[#allocation5 + $0x828] sm:$0xf0] }
 0x628   :  { %9138 = vmatpush.bf16.msra.mxu1 %v12344_v31  ;;  %v7156_v21 = vpop.f32.mrf.mxu1  ;;  %9261 = vmatpush.bf16.msra.mxu2 %v12996_v34  ;;  %v12944_v31 = vor.u32 %v14126_v40, %v12943_v60  ;;  %v13256_v34 = vor.u32 %v14204_v22, %v13255_v10  ;;  %v14195_v60 = vld [vmem:[#allocation5 + $0x874] sm:$0xf]  ;;  %v13233_v40 = vld [vmem:[#allocation5 + $0x888] sm:$0xf0]  ;;  %v13135_v22 = vld [vmem:[#allocation5 + $0x7b0] sm:$0xf] }
 0x629   :  { %v7157_v36 = vadd.f32 %v7156_v21, %v7143_v15  ;;  %v7186_v54 = vpop.f32.mrf.mxu3  ;;  %v13257_v21 = vld [vmem:[#allocation5 + $0x8b8] sm:$0xf0] }
 0x62a   :  { %9221 = vmatpush.bf16.msrb.mxu3 %v12372_v16  ;;  %v13281_v16 = vld [vmem:[#allocation5 + $0x8e8] sm:$0xf0] }
 0x62b   :  { %9139 = vmatmul.bf16.vlgmr.msra.gmra.mxu1 %v17585_v7  ;;  %9178 = vmatpush.bf16.msrb.mxu0 %v12968_v44  ;;  %v7171_v62 = vadd.f32 %v7170_v6, %v7157_v36  ;;  %v13284_v3 = vor.u32 %v14207_v19, %v13281_v16  ;;  %v14201_v6 = vld [vmem:[#allocation5 + $0x8a4] sm:$0xf]  ;;  %v14198_v44 = vld [vmem:[#allocation5 + $0x884] sm:$0xf0]  ;;  %v12561_v16 = vld [vmem:[#allocation5 + $0x348] sm:$0xf0] }
 0x62c   :  { %9262 = vmatpush.bf16.msra.mxu2 %v12972_v29  ;;  %v7172_v38 = vpop.f32.mrf.mxu2  ;;  %9187 = vmatpush.bf16.msrb.mxu1 %v13280_v11  ;;  %v13260_v15 = vor.u32 %v14201_v6, %v13257_v21  ;;  %v13232_v36 = vor.u32 %v14198_v44, %v13231_v18  ;;  %v12636_v29 = vor.u32 %v14045_v9, %v12633_v35  ;;  %v14180_v11 = vld [vmem:[#allocation5 + $0x7f4] sm:$0xf0]  ;;  %v12537_v6 = vld [vmem:[#allocation5 + $0x318] sm:$0xf0]  ;;  %v14171_v21 = vld [vmem:[#allocation5 + $0x7b4] sm:$0xf] }
 0x62d   :  { %v7185_v24 = vadd.f32 %v7184_v33, %v7171_v62  ;;  %v12664_v33 = vor.u32 %v14055_v4, %v12663_v5  ;;  %v13207_v62 = vld [vmem:[#allocation5 + $0x840] sm:$0xf]  ;;  %v13160_v19 = vor.u32 %v14180_v11, %v13159_v30  ;;  %v12564_v2 = vor.u32 %v14027_v52, %v12561_v16  ;;  %v12543_v18 = vld [vmem:[#allocation5 + $0x308] sm:$0xf]  ;;  %v14168_v35 = vld [vmem:[#allocation5 + $0x794] sm:$0xf0] }
 0x62e   :  { %9222 = vmatpush.bf16.msrb.mxu3 %v12348_v25  ;;  %v12657_v25 = vld [vmem:[#allocation5 + $0x408] sm:$0xf0]  ;;  %v13111_v9 = vld [vmem:[#allocation5 + $0x780] sm:$0xf]  ;;  %v14093_v52 = vld [vmem:[#allocation5 + $0x544] sm:$0xf] }
 0x62f   :  { %9179 = vmatpush.bf16.msrb.mxu0 %v12944_v31  ;;  %v7360_v27 = vmax.f32 %v7185_v24, 0.0  ;;  %v12660_v48 = vor.u32 %v14051_v58, %v12657_v25  ;;  %v13236_v31 = vor.u32 %v14195_v60, %v13233_v40  ;;  %v14186_v24 = vld [vmem:[#allocation5 + $0x824] sm:$0xf0]  ;;  %v13113_v60 = vld [vmem:[#allocation5 + $0x798] sm:$0xf0] }
 0x630   :  { %v7158_v46 = vpop.f32.mrf.mxu1  ;;  %9263 = vmatpush.bf16.msra.mxu2 %v12948_v39  ;;  %9188 = vmatpush.bf16.msrb.mxu1 %v13256_v34  ;;  %v14039_v39 = vld [vmem:[#allocation5 + $0x394] sm:$0xf]  ;;  %v14174_v58 = vld [vmem:[#allocation5 + $0x7c4] sm:$0xf0]  ;;  %v14021_v34 = vld [vmem:[#allocation5 + $0x304] sm:$0xf] }
 0x631   :  { %v7159_v61 = vadd.f32 %v7158_v46, %v7145_v23  ;;  %v14192_v23 = vld [vmem:[#allocation5 + $0x854] sm:$0xf0]  ;;  %v13136_v25 = vor.u32 %v14174_v58, %v13135_v22  ;;  %v12540_v5 = vor.u32 %v14021_v34, %v12537_v6  ;;  %v14111_v40 = vld [vmem:[#allocation5 + $0x5d4] sm:$0xf]  ;;  %v12801_v22 = vld [vmem:[#allocation5 + $0x528] sm:$0xf0] }
 0x632   :  { %v13208_v46 = vor.u32 %v14192_v23, %v13207_v62  ;;  %v17597_v62 = vld [vmem:[%s17672_s5] sm:$0x3f]  ;;  %v14091_v6 = vld [vmem:[#allocation5 + $0x52c] sm:$0xf0] }
 0x633   :  { %v7173_v28 = vadd.f32 %v7172_v38, %v7159_v61  ;;  %9180 = vmatpush.bf16.msrb.mxu0 %v12920_v26  ;;  %v12609_v61 = vld [vmem:[#allocation5 + $0x3a8] sm:$0xf0]  ;;  %v13212_v38 = vor.u32 %v14189_v1, %v13209_v59  ;;  %v12615_v26 = vld [vmem:[#allocation5 + $0x398] sm:$0xf]  ;;  %v5110_v23 = vperm.slane %v17597_v62, 4 }
 0x634   :  { %9264 = vmatpush.bf16.msra.mxu2 %v12924_v13  ;;  %9189 = vmatpush.bf16.msrb.mxu1 %v13232_v36  ;;  %v12612_v42 = vor.u32 %v14039_v39, %v12609_v61  ;;  %v12616_v57 = vor.u32 %v14043_v47, %v12615_v26  ;;  %v13184_v13 = vor.u32 %v14186_v24, %v13183_v51  ;;  %v14165_v36 = vld [vmem:[#allocation5 + $0x784] sm:$0xf]  ;;  %v14115_v39 = vld [vmem:[#allocation5 + $0x5ec] sm:$0xf0]  ;;  %v12879_v26 = vld [vmem:[#allocation5 + $0x5a8] sm:$0xf]  ;;  %v7240_v24 = vpop.f32.mrf.mxu3 }
 0x635   :  { %v7187_v50 = vadd.f32 %v7186_v54, %v7173_v28  ;;  %v14033_v28 = vld [vmem:[#allocation5 + $0x364] sm:$0xf]  ;;  %v13116_v45 = vor.u32 %v14165_v36, %v13113_v60  ;;  %v14109_v47 = vld [vmem:[#allocation5 + $0x5bc] sm:$0xf0] }
 0x636   :  { %v14105_v59 = vld [vmem:[#allocation5 + $0x5a4] sm:$0xf]  ;;  %v12880_v51 = vor.u32 %v14109_v47, %v12879_v26 }
 0x637   :  { %9229 = vmatpush.bf16.msra.mxu0 %v12708_v17  ;;  %v7366_v43 = vmax.f32 %v7187_v50, 0.0  ;;  %v12585_v17 = vld [vmem:[#allocation5 + $0x378] sm:$0xf0]  ;;  %v12591_v50 = vld [vmem:[#allocation5 + $0x368] sm:$0xf] }
 0x638   :  { %9313 = vmatpush.bf16.msrb.mxu2 %v12712_v37  ;;  %9190 = vmatpush.bf16.msrb.mxu1 %v13208_v46  ;;  %v12588_v54 = vor.u32 %v14033_v28, %v12585_v17  ;;  %v13188_v37 = vor.u32 %v14183_v12, %v13185_v49  ;;  %v12592_v41 = vor.u32 %v14037_v14, %v12591_v50  ;;  %v7226_v46 = vpop.f32.mrf.mxu2  ;;  %v12849_v17 = vld [vmem:[#allocation5 + $0x588] sm:$0xf0]  ;;  %v14103_v50 = vld [vmem:[#allocation5 + $0x58c] sm:$0xf0] }
 0x639   :  { %v17590_v32 = vpack.c.bf16 %v7366_v43, %v7360_v27  ;;  %v14177_v27 = vld [vmem:[#allocation5 + $0x7e4] sm:$0xf]  ;;  %v13161_v43 = vld [vmem:[#allocation5 + $0x7f8] sm:$0xf0] }
 0x63a   :  { %v13164_v63 = vor.u32 %v14177_v27, %v13161_v43  ;;  %v12831_v43 = vld [vmem:[#allocation5 + $0x548] sm:$0xf] }
 0x63b   :  { %9230 = vmatpush.bf16.msra.mxu0 %v12684_v53  ;;  %9167 = vmatmul.bf16.vlgmr.msra.gmra.mxu3 %v17590_v32  ;;  %v7198_v53 = vpop.f32.mrf.mxu0 }
 0x63c   :  { %9271 = vmatpush.bf16.msra.mxu3 %v13284_v3  ;;  %9314 = vmatpush.bf16.msrb.mxu2 %v12688_v8  ;;  %v12567_v3 = vld [vmem:[#allocation5 + $0x338] sm:$0xf]  ;;  %v14031_v8 = vld [vmem:[#allocation5 + $0x34c] sm:$0xf0]  ;;  %v7242_v58 = vpop.f32.mrf.mxu3 }
 0x63d   :  { %9191 = vmatpush.bf16.msrb.mxu1 %v13184_v13  ;;  %v12568_v10 = vor.u32 %v14031_v8, %v12567_v3  ;;  %v14099_v13 = vld [vmem:[#allocation5 + $0x574] sm:$0xf] }
 0x63f   :  { %9231 = vmatpush.bf16.msra.mxu0 %v12660_v48  ;;  %v13137_v48 = vld [vmem:[#allocation5 + $0x7c8] sm:$0xf0] }
 0x640   :  { %9272 = vmatpush.bf16.msra.mxu3 %v13260_v15  ;;  %9315 = vmatpush.bf16.msrb.mxu2 %v12664_v33  ;;  %v13140_v4 = vor.u32 %v14171_v21, %v13137_v48  ;;  %v14025_v33 = vld [vmem:[#allocation5 + $0x31c] sm:$0xf0]  ;;  %v7228_v16 = vpop.f32.mrf.mxu2 }
 0x641   :  { %9192 = vmatpush.bf16.msrb.mxu1 %v13160_v19  ;;  %v12544_v44 = vor.u32 %v14025_v33, %v12543_v18  ;;  %v12825_v19 = vld [vmem:[#allocation5 + $0x558] sm:$0xf0] }
 0x642   :  { %v12828_v27 = vor.u32 %v14093_v52, %v12825_v19  ;;  %v13959_v52 = vld [vmem:[#allocation5 + $0x10c] sm:$0xf0]  ;;  %v13956_v19 = vld [vmem:[#allocation5 + $0xfc] sm:$0xf] }
 0x643   :  { %9232 = vmatpush.bf16.msra.mxu0 %v12636_v29  ;;  %v13112_v29 = vor.u32 %v14168_v35, %v13111_v9  ;;  %v7200_v61 = vpop.f32.mrf.mxu0  ;;  %v14085_v9 = vld [vmem:[#allocation5 + $0x4fc] sm:$0xf0] }
 0x644   :  { %9273 = vmatpush.bf16.msra.mxu3 %v13236_v31  ;;  %9316 = vmatpush.bf16.msrb.mxu2 %v12640_v56  ;;  %v12900_v31 = vor.u32 %v14111_v40, %v12897_v0  ;;  %v12903_v56 = vld [vmem:[#allocation5 + $0x5d8] sm:$0xf]  ;;  %v7201_v12 = vadd.f32 %v7200_v61, %v5110_v23  ;;  %v13971_v0 = vld [vmem:[#allocation5 + $0x16c] sm:$0xf0] }
 0x645   :  { %9193 = vmatpush.bf16.msrb.mxu1 %v13136_v25  ;;  %v12904_v1 = vor.u32 %v14115_v39, %v12903_v56  ;;  %v12807_v25 = vld [vmem:[#allocation5 + $0x518] sm:$0xf]  ;;  %v12329_v56 = vld [vmem:[#allocation5 + $0x170] sm:$0xf0]  ;;  %v12753_v39 = vld [vmem:[#allocation5 + $0x4c8] sm:$0xf0] }
 0x646   :  { %v12808_v48 = vor.u32 %v14091_v6, %v12807_v25  ;;  %v12327_v40 = vld [vmem:[#allocation5 + $0x158] sm:$0xf] }
 0x647   :  { %9233 = vmatpush.bf16.msra.mxu0 %v12612_v42  ;;  %v12873_v42 = vld [vmem:[#allocation5 + $0x5b8] sm:$0xf0]  ;;  %v12759_v61 = vld [vmem:[#allocation5 + $0x4b8] sm:$0xf]  ;;  %v12328_v26 = vor.u32 %v13971_v0, %v12327_v40  ;;  %v12209_v40 = vld [vmem:[#allocation5 + $0x80] sm:$0xf0] }
 0x648   :  { %9274 = vmatpush.bf16.msra.mxu3 %v13212_v38  ;;  %9317 = vmatpush.bf16.msrb.mxu2 %v12616_v57  ;;  %v7212_v15 = vpop.f32.mrf.mxu1  ;;  %v12876_v38 = vor.u32 %v14105_v59, %v12873_v42  ;;  %v7199_v57 = vadd.f32 %v7198_v53, %v5110_v23  ;;  %v14097_v53 = vld [vmem:[#allocation5 + $0x55c] sm:$0xf0]  ;;  %v14075_v23 = vld [vmem:[#allocation5 + $0x4b4] sm:$0xf]  ;;  %v7282_v59 = vpop.f32.mrf.mxu2 }
 0x649   :  { %9194 = vmatpush.bf16.msrb.mxu1 %v13112_v29 }
 0x64a   :  { %v7213_v49 = vadd.f32 %v7212_v15, %v7199_v57  ;;  %v12303_v57 = vld [vmem:[#allocation5 + $0x128] sm:$0xf] }
 0x64b   :  { %9234 = vmatpush.bf16.msra.mxu0 %v12588_v54  ;;  %9223 = vmatmul.bf16.vlgmr.msrb.gmra.mxu3 %v17585_v7  ;;  %v12852_v54 = vor.u32 %v14099_v13, %v12849_v17  ;;  %v7254_v30 = vpop.f32.mrf.mxu0  ;;  %v12305_v17 = vld [vmem:[#allocation5 + $0x140] sm:$0xf0] }
 0x64c   :  { %9275 = vmatpush.bf16.msra.mxu3 %v13188_v37  ;;  %9318 = vmatpush.bf16.msrb.mxu2 %v12592_v41  ;;  %v12855_v37 = vld [vmem:[#allocation5 + $0x578] sm:$0xf]  ;;  %v7227_v11 = vadd.f32 %v7226_v46, %v7213_v49  ;;  %v12756_v46 = vor.u32 %v14075_v23, %v12753_v39  ;;  %v14069_v49 = vld [vmem:[#allocation5 + $0x484] sm:$0xf] }
 0x64d   :  { %9243 = vmatpush.bf16.msra.mxu1 %v12900_v31  ;;  %v12856_v41 = vor.u32 %v14103_v50, %v12855_v37  ;;  %v12735_v50 = vld [vmem:[#allocation5 + $0x488] sm:$0xf] }
 0x64e   :  { %v7241_v8 = vadd.f32 %v7240_v24, %v7227_v11  ;;  %v13962_v24 = vld [vmem:[#allocation5 + $0x12c] sm:$0xf]  ;;  %v12279_v11 = vld [vmem:[#allocation5 + $0xf8] sm:$0xf] }
 0x64f   :  { %9235 = vmatpush.bf16.msra.mxu0 %v12564_v2 }
 0x650   :  { %9276 = vmatpush.bf16.msra.mxu3 %v13164_v63  ;;  %9319 = vmatpush.bf16.msrb.mxu2 %v12568_v10  ;;  %v7214_v28 = vpop.f32.mrf.mxu1  ;;  %v12832_v63 = vor.u32 %v14097_v53, %v12831_v43  ;;  %v14087_v10 = vld [vmem:[#allocation5 + $0x514] sm:$0xf]  ;;  %v7255_v15 = vadd.f32 %v7254_v30, %v7241_v8  ;;  %v12308_v30 = vor.u32 %v13962_v24, %v12305_v17  ;;  %v5111_v43 = vperm.slane %v17597_v62, 5  ;;  %v13953_v8 = vld [vmem:[#allocation5 + $0xdc] sm:$0xf0] }
 0x651   :  { %9244 = vmatpush.bf16.msra.mxu1 %v12876_v38  ;;  %v7215_v14 = vadd.f32 %v7214_v28, %v7201_v12  ;;  %v12804_v34 = vor.u32 %v14087_v10, %v12801_v22  ;;  %v7296_v28 = vpop.f32.mrf.mxu3  ;;  %v12280_v53 = vor.u32 %v13959_v52, %v12279_v11  ;;  %v13950_v10 = vld [vmem:[#allocation5 + $0xcc] sm:$0xf]  ;;  %v12257_v22 = vld [vmem:[#allocation5 + $0xe0] sm:$0xf0]  ;;  %v13944_v62 = vld [vmem:[#allocation5 + $0x9c] sm:$0xf] }
 0x652   :  { %v13929_v24 = vld [vmem:[#allocation5 + $0x1c] sm:$0xf0]  ;;  %v13926_v17 = vld [vmem:[#allocation5 + $0xc] sm:$0xf] }
 0x653   :  { %9236 = vmatpush.bf16.msra.mxu0 %v12540_v5  ;;  %v7229_v2 = vadd.f32 %v7228_v16, %v7215_v14  ;;  %v14081_v5 = vld [vmem:[#allocation5 + $0x4e4] sm:$0xf]  ;;  %v7256_v18 = vpop.f32.mrf.mxu0  ;;  %v14073_v14 = vld [vmem:[#allocation5 + $0x49c] sm:$0xf0]  ;;  %v12281_v16 = vld [vmem:[#allocation5 + $0x110] sm:$0xf0] }
 0x654   :  { %9277 = vmatpush.bf16.msra.mxu3 %v13140_v4  ;;  %9320 = vmatpush.bf16.msrb.mxu2 %v12544_v44  ;;  %v12777_v4 = vld [vmem:[#allocation5 + $0x4f8] sm:$0xf0]  ;;  %v12783_v44 = vld [vmem:[#allocation5 + $0x4e8] sm:$0xf] }
 0x655   :  { %9245 = vmatpush.bf16.msra.mxu1 %v12852_v54  ;;  %v7243_v21 = vadd.f32 %v7242_v58, %v7229_v2  ;;  %v12780_v33 = vor.u32 %v14081_v5, %v12777_v4  ;;  %v12784_v29 = vor.u32 %v14085_v9, %v12783_v44  ;;  %v12729_v54 = vld [vmem:[#allocation5 + $0x498] sm:$0xf0]  ;;  %v12284_v2 = vor.u32 %v13956_v19, %v12281_v16  ;;  %v12233_v5 = vld [vmem:[#allocation5 + $0xb0] sm:$0xf0]  ;;  %v12207_v44 = vld [vmem:[#allocation5 + $0x68] sm:$0xf] }
 0x656   :  { %v12732_v37 = vor.u32 %v14069_v49, %v12729_v54  ;;  %v13095_v49 = vld [vmem:[#allocation5 + $0x758] sm:$0xf] }
 0x657   :  { %v7257_v36 = vadd.f32 %v7256_v18, %v7243_v21  ;;  %v12260_v21 = vor.u32 %v13950_v10, %v12257_v22  ;;  %v14016_v10 = vld [vmem:[#allocation5 + $0x2dc] sm:$0xf]  ;;  %v12521_v22 = vld [vmem:[#allocation5 + $0x2f0] sm:$0xf0] }
 0x658   :  { %9278 = vmatpush.bf16.msra.mxu3 %v13116_v45  ;;  %v13968_v45 = vld [vmem:[#allocation5 + $0x15c] sm:$0xf] }
 0x659   :  { %9246 = vmatpush.bf16.msra.mxu1 %v12828_v27  ;;  %v12332_v47 = vor.u32 %v13968_v45, %v12329_v56  ;;  %v12736_v27 = vor.u32 %v14073_v14, %v12735_v50  ;;  %v7298_v58 = vpop.f32.mrf.mxu3  ;;  %v14160_v50 = vld [vmem:[#allocation5 + $0x75c] sm:$0xf]  ;;  %v13097_v14 = vld [vmem:[#allocation5 + $0x770] sm:$0xf0] }
 0x65b   :  { %v7310_v25 = vpop.f32.mrf.mxu0 }
 0x65c   :  { %9327 = vmatpush.bf16.msrb.mxu3 %v12904_v1  ;;  %v14079_v1 = vld [vmem:[#allocation5 + $0x4cc] sm:$0xf0] }
 0x65d   :  { %9247 = vmatpush.bf16.msra.mxu1 %v12804_v34  ;;  %v12760_v12 = vor.u32 %v14079_v1, %v12759_v61  ;;  %v7283_v34 = vadd.f32 %v7282_v59, %v5111_v43  ;;  %v13935_v61 = vld [vmem:[#allocation5 + $0x4c] sm:$0xf0]  ;;  %v13932_v1 = vld [vmem:[#allocation5 + $0x3c] sm:$0xf]  ;;  %v12185_v59 = vld [vmem:[#allocation5 + $0x50] sm:$0xf0] }
 0x65f   :  { %v7297_v4 = vadd.f32 %v7296_v28, %v7283_v34  ;;  %v13073_v34 = vld [vmem:[#allocation5 + $0x740] sm:$0xf0] }
 0x660   :  { %9328 = vmatpush.bf16.msrb.mxu3 %v12880_v51  ;;  %v13965_v51 = vld [vmem:[#allocation5 + $0x13c] sm:$0xf0] }
 0x661   :  { %9248 = vmatpush.bf16.msra.mxu1 %v12780_v33  ;;  %v12236_v33 = vor.u32 %v13944_v62, %v12233_v5  ;;  %v7311_v0 = vadd.f32 %v7310_v25, %v7297_v4  ;;  %v14013_v62 = vld [vmem:[#allocation5 + $0x2bc] sm:$0xf0]  ;;  %v12524_v4 = vor.u32 %v14016_v10, %v12521_v22 }
 0x664   :  { %9329 = vmatpush.bf16.msrb.mxu3 %v12856_v41  ;;  %v12304_v41 = vor.u32 %v13965_v51, %v12303_v57  ;;  %v12188_v57 = vor.u32 %v13932_v1, %v12185_v59  ;;  %v12159_v51 = vld [vmem:[#allocation5 + $0x8] sm:$0xf]  ;;  %v14142_v1 = vld [vmem:[#allocation5 + $0x6cc] sm:$0xf]  ;;  %v13025_v59 = vld [vmem:[#allocation5 + $0x6e0] sm:$0xf0] }
 0x665   :  { %9249 = vmatpush.bf16.msra.mxu1 %v12756_v46  ;;  %v12183_v46 = vld [vmem:[#allocation5 + $0x38] sm:$0xf] }
 0x668   :  { %v7268_v3 = vpop.f32.mrf.mxu1  ;;  %9330 = vmatpush.bf16.msrb.mxu3 %v12832_v63  ;;  %v12255_v63 = vld [vmem:[#allocation5 + $0xc8] sm:$0xf] }
 0x669   :  { %v7269_v35 = vadd.f32 %v7268_v3, %v7255_v15  ;;  %9250 = vmatpush.bf16.msra.mxu1 %v12732_v37  ;;  %v7284_v3 = vpop.f32.mrf.mxu2  ;;  %v12256_v6 = vor.u32 %v13953_v8, %v12255_v63  ;;  %v13947_v15 = vld [vmem:[#allocation5 + $0xac] sm:$0xf0]  ;;  %v14157_v8 = vld [vmem:[#allocation5 + $0x73c] sm:$0xf0] }
 0x66a   :  { %v7285_v9 = vadd.f32 %v7284_v3, %v5111_v43  ;;  %v14163_v37 = vld [vmem:[#allocation5 + $0x76c] sm:$0xf0]  ;;  %v13100_v43 = vor.u32 %v14160_v50, %v13097_v14  ;;  %v13071_v3 = vld [vmem:[#allocation5 + $0x728] sm:$0xf]  ;;  %v12423_v14 = vld [vmem:[#allocation5 + $0x218] sm:$0xf] }
 0x66b   :  { %v7361_v42 = vmax.f32 %v7269_v35, 0.0 }
 0x66c   :  { %9331 = vmatpush.bf16.msrb.mxu3 %v12808_v48  ;;  %v12231_v48 = vld [vmem:[#allocation5 + $0x98] sm:$0xf]  ;;  %v7299_v45 = vadd.f32 %v7298_v58, %v7285_v9  ;;  %v14154_v58 = vld [vmem:[#allocation5 + $0x72c] sm:$0xf] }
 0x66d   :  { %v12232_v18 = vor.u32 %v13947_v15, %v12231_v48  ;;  %v13072_v48 = vor.u32 %v14157_v8, %v13071_v3  ;;  %v12495_v15 = vld [vmem:[#allocation5 + $0x2a8] sm:$0xf]  ;;  %v14010_v9 = vld [vmem:[#allocation5 + $0x2ac] sm:$0xf]  ;;  %v13989_v8 = vld [vmem:[#allocation5 + $0x1fc] sm:$0xf0] }
 0x66e   :  { %v12399_v3 = vld [vmem:[#allocation5 + $0x1e8] sm:$0xf] }
 0x670   :  { %v7270_v60 = vpop.f32.mrf.mxu1  ;;  %9332 = vmatpush.bf16.msrb.mxu3 %v12784_v29  ;;  %v13941_v29 = vld [vmem:[#allocation5 + $0x7c] sm:$0xf0] }
 0x671   :  { %v7271_v31 = vadd.f32 %v7270_v60, %v7257_v36  ;;  %v7338_v35 = vpop.f32.mrf.mxu2  ;;  %v13938_v60 = vld [vmem:[#allocation5 + $0x6c] sm:$0xf]  ;;  %v12208_v23 = vor.u32 %v13941_v29, %v12207_v44  ;;  %v14151_v44 = vld [vmem:[#allocation5 + $0x70c] sm:$0xf0]  ;;  %v13049_v29 = vld [vmem:[#allocation5 + $0x710] sm:$0xf0] }
 0x672   :  { %v12212_v39 = vor.u32 %v13938_v60, %v12209_v40  ;;  %v12496_v60 = vor.u32 %v14013_v62, %v12495_v15  ;;  %v12400_v15 = vor.u32 %v13989_v8, %v12399_v3 }
 0x673   :  { %v7367_v38 = vmax.f32 %v7271_v31, 0.0  ;;  %v7352_v31 = vpop.f32.mrf.mxu3 }
 0x674   :  { %9333 = vmatpush.bf16.msrb.mxu3 %v12760_v12  ;;  %v12161_v12 = vld [vmem:[#allocation5 + $0x20] sm:$0xf0] }
 0x675   :  { %v17600_v13 = vpack.c.bf16 %v7367_v38, %v7361_v42  ;;  %v7312_v42 = vpop.f32.mrf.mxu0  ;;  %v12164_v19 = vor.u32 %v13926_v17, %v12161_v12  ;;  %v13998_v17 = vld [vmem:[#allocation5 + $0x24c] sm:$0xf]  ;;  %v12449_v12 = vld [vmem:[#allocation5 + $0x260] sm:$0xf0] }
 0x676   :  { %v7313_v38 = vadd.f32 %v7312_v42, %v7299_v45  ;;  %v14007_v45 = vld [vmem:[#allocation5 + $0x28c] sm:$0xf0] }
 0x677   :  { %9181 = vmatmul.bf16.vlgmr.msrb.gmra.mxu0 %v17600_v13  ;;  %9265 = vmatmul.bf16.vlgmr.msra.gmra.mxu2 %v17600_v13 }
 0x678   :  { %9285 = vmatpush.bf16.msrb.mxu0 %v12328_v26  ;;  %9369 = vmatpush.bf16.msra.mxu2 %v12332_v47  ;;  %v12184_v47 = vor.u32 %v13935_v61, %v12183_v46  ;;  %v14004_v46 = vld [vmem:[#allocation5 + $0x27c] sm:$0xf]  ;;  %v12473_v61 = vld [vmem:[#allocation5 + $0x290] sm:$0xf0] }
 0x679   :  { %9334 = vmatpush.bf16.msrb.mxu3 %v12736_v27  ;;  %v13096_v27 = vor.u32 %v14163_v37, %v13095_v49  ;;  %v14136_v49 = vld [vmem:[#allocation5 + $0x69c] sm:$0xf] }
 0x67b   :  { %v7354_v16 = vpop.f32.mrf.mxu3 }
 0x67c   :  { %9286 = vmatpush.bf16.msrb.mxu0 %v12304_v41  ;;  %9370 = vmatpush.bf16.msra.mxu2 %v12308_v30  ;;  %v7340_v41 = vpop.f32.mrf.mxu2  ;;  %v12160_v30 = vor.u32 %v13929_v24, %v12159_v51  ;;  %v13028_v51 = vor.u32 %v14142_v1, %v13025_v59  ;;  %v12999_v24 = vld [vmem:[#allocation5 + $0x698] sm:$0xf]  ;;  %v13977_v59 = vld [vmem:[#allocation5 + $0x19c] sm:$0xf0] }
 0x680   :  { %9287 = vmatpush.bf16.msrb.mxu0 %v12280_v53  ;;  %9371 = vmatpush.bf16.msra.mxu2 %v12284_v2  ;;  %v12519_v53 = vld [vmem:[#allocation5 + $0x2d8] sm:$0xf]  ;;  %v14019_v2 = vld [vmem:[#allocation5 + $0x2ec] sm:$0xf0] }
 0x684   :  { %9288 = vmatpush.bf16.msrb.mxu0 %v12256_v6  ;;  %9372 = vmatpush.bf16.msra.mxu2 %v12260_v21  ;;  %v12520_v21 = vor.u32 %v14019_v2, %v12519_v53  ;;  %v12977_v53 = vld [vmem:[#allocation5 + $0x680] sm:$0xf0] }
 0x687   :  { %9237 = vmatmul.bf16.vlgmr.msra.gmra.mxu0 %v17582_v55  ;;  %9321 = vmatmul.bf16.vlgmr.msrb.gmra.mxu2 %v17582_v55 }
 0x688   :  { %v7324_v36 = vpop.f32.mrf.mxu1  ;;  %9289 = vmatpush.bf16.msrb.mxu0 %v12232_v18  ;;  %9373 = vmatpush.bf16.msra.mxu2 %v12236_v33  ;;  %v13076_v18 = vor.u32 %v14154_v58, %v13073_v34  ;;  %v13047_v33 = vld [vmem:[#allocation5 + $0x6f8] sm:$0xf]  ;;  %v14127_v34 = vld [vmem:[#allocation5 + $0x64c] sm:$0xf0] }
 0x689   :  { %v7325_v56 = vadd.f32 %v7324_v36, %v7311_v0  ;;  %v14148_v36 = vld [vmem:[#allocation5 + $0x6fc] sm:$0xf]  ;;  %v13048_v40 = vor.u32 %v14151_v44, %v13047_v33  ;;  %v12471_v0 = vld [vmem:[#allocation5 + $0x278] sm:$0xf]  ;;  %v12927_v33 = vld [vmem:[#allocation5 + $0x608] sm:$0xf] }
 0x68a   :  { %v12472_v42 = vor.u32 %v14007_v45, %v12471_v0  ;;  %v12951_v58 = vld [vmem:[#allocation5 + $0x638] sm:$0xf]  ;;  %v14064_v0 = vld [vmem:[#allocation5 + $0x45c] sm:$0xf]  ;;  %v12713_v45 = vld [vmem:[#allocation5 + $0x470] sm:$0xf0] }
 0x68b   :  { %v7339_v26 = vadd.f32 %v7338_v35, %v7325_v56  ;;  %v12497_v35 = vld [vmem:[#allocation5 + $0x2c0] sm:$0xf0]  ;;  %v13052_v56 = vor.u32 %v14148_v36, %v13049_v29  ;;  %v12952_v62 = vor.u32 %v14127_v34, %v12951_v58  ;;  %v13980_v36 = vld [vmem:[#allocation5 + $0x1bc] sm:$0xf]  ;;  %v12377_v29 = vld [vmem:[#allocation5 + $0x1d0] sm:$0xf0] }
 0x68c   :  { %9290 = vmatpush.bf16.msrb.mxu0 %v12208_v23  ;;  %9374 = vmatpush.bf16.msra.mxu2 %v12212_v39  ;;  %v13023_v23 = vld [vmem:[#allocation5 + $0x6c8] sm:$0xf]  ;;  %v14145_v39 = vld [vmem:[#allocation5 + $0x6dc] sm:$0xf0]  ;;  %v14199_v58 = vld [vmem:[#allocation5 + $0x88c] sm:$0xf0] }
 0x68d   :  { %v7353_v11 = vadd.f32 %v7352_v31, %v7339_v26  ;;  %v12500_v31 = vor.u32 %v14010_v9, %v12497_v35  ;;  %v12447_v26 = vld [vmem:[#allocation5 + $0x248] sm:$0xf]  ;;  %v14121_v35 = vld [vmem:[#allocation5 + $0x61c] sm:$0xf0]  ;;  %v14046_v34 = vld [vmem:[#allocation5 + $0x3cc] sm:$0xf] }
 0x68f   :  { %v7362_v25 = vmax.f32 %v7353_v11, 0.0 }
 0x690   :  { %v7326_v28 = vpop.f32.mrf.mxu1  ;;  %9291 = vmatpush.bf16.msrb.mxu0 %v12184_v47  ;;  %9375 = vmatpush.bf16.msra.mxu2 %v12188_v57  ;;  %v14001_v47 = vld [vmem:[#allocation5 + $0x25c] sm:$0xf0]  ;;  %v12476_v57 = vor.u32 %v14004_v46, %v12473_v61  ;;  %v12351_v46 = vld [vmem:[#allocation5 + $0x188] sm:$0xf]  ;;  %v12380_v61 = vor.u32 %v13980_v36, %v12377_v29  ;;  %v12617_v29 = vld [vmem:[#allocation5 + $0x3b0] sm:$0xf0] }
 0x691   :  { %v7327_v54 = vadd.f32 %v7326_v28, %v7313_v38  ;;  %v13024_v38 = vor.u32 %v14145_v39, %v13023_v23  ;;  %v14139_v28 = vld [vmem:[#allocation5 + $0x6ac] sm:$0xf0]  ;;  %v12448_v37 = vor.u32 %v14001_v47, %v12447_v26  ;;  %v12928_v39 = vor.u32 %v14121_v35, %v12927_v33  ;;  %v14040_v35 = vld [vmem:[#allocation5 + $0x39c] sm:$0xf] }
 0x692   :  { %v13000_v50 = vor.u32 %v14139_v28, %v12999_v24  ;;  %v12716_v26 = vor.u32 %v14064_v0, %v12713_v45  ;;  %v14058_v24 = vld [vmem:[#allocation5 + $0x42c] sm:$0xf]  ;;  %v12689_v28 = vld [vmem:[#allocation5 + $0x440] sm:$0xf0]  ;;  %v12623_v0 = vld [vmem:[#allocation5 + $0x3a0] sm:$0xf] }
 0x693   :  { %v7341_v52 = vadd.f32 %v7340_v41, %v7327_v54  ;;  %v13001_v54 = vld [vmem:[#allocation5 + $0x6b0] sm:$0xf0]  ;;  %v13995_v41 = vld [vmem:[#allocation5 + $0x22c] sm:$0xf0]  ;;  %v14044_v45 = vld [vmem:[#allocation5 + $0x3b4] sm:$0xf0] }
 0x694   :  { %9292 = vmatpush.bf16.msrb.mxu0 %v12160_v30  ;;  %9376 = vmatpush.bf16.msra.mxu2 %v12164_v19  ;;  %v12452_v30 = vor.u32 %v13998_v17, %v12449_v12  ;;  %v13004_v11 = vor.u32 %v14136_v49, %v13001_v54  ;;  %v14133_v19 = vld [vmem:[#allocation5 + $0x67c] sm:$0xf0]  ;;  %v12424_v2 = vor.u32 %v13995_v41, %v12423_v14  ;;  %v14208_v17 = vld [vmem:[#allocation5 + $0x8dc] sm:$0xf]  ;;  %v13289_v12 = vld [vmem:[#allocation5 + $0x8f0] sm:$0xf0] }
 0x695   :  { %v7355_v63 = vadd.f32 %v7354_v16, %v7341_v52  ;;  %v12975_v52 = vld [vmem:[#allocation5 + $0x668] sm:$0xf]  ;;  %v13992_v16 = vld [vmem:[#allocation5 + $0x21c] sm:$0xf]  ;;  %v12352_v49 = vor.u32 %v13977_v59, %v12351_v46  ;;  %v12695_v54 = vld [vmem:[#allocation5 + $0x430] sm:$0xf]  ;;  %v12692_v41 = vor.u32 %v14058_v24, %v12689_v28 }
 0x696   :  { %v14187_v46 = vld [vmem:[#allocation5 + $0x82c] sm:$0xf0]  ;;  %v12593_v59 = vld [vmem:[#allocation5 + $0x380] sm:$0xf0]  ;;  %v13167_v28 = vld [vmem:[#allocation5 + $0x7e8] sm:$0xf] }
 0x697   :  { %v7368_v6 = vmax.f32 %v7355_v63, 0.0  ;;  %9293 = vmatmul.bf16.vlgmr.msrb.gmra.mxu0 %v17540_v20  ;;  %9377 = vmatmul.bf16.vlgmr.msra.gmra.mxu2 %v17540_v20  ;;  %v12976_v63 = vor.u32 %v14133_v19, %v12975_v52  ;;  %v14205_v52 = vld [vmem:[#allocation5 + $0x8bc] sm:$0xf0]  ;;  %v14052_v19 = vld [vmem:[#allocation5 + $0x3fc] sm:$0xf] }
 0x698   :  { %9341 = vmatpush.bf16.msra.mxu0 %v13096_v27  ;;  %9425 = vmatpush.bf16.msrb.mxu2 %v13100_v43  ;;  %v12425_v27 = vld [vmem:[#allocation5 + $0x230] sm:$0xf0]  ;;  %v14130_v43 = vld [vmem:[#allocation5 + $0x66c] sm:$0xf] }
 0x699   :  { %v17607_v5 = vpack.c.bf16 %v7368_v6, %v7362_v25  ;;  %v12428_v10 = vor.u32 %v13992_v16, %v12425_v27  ;;  %v12980_v22 = vor.u32 %v14130_v43, %v12977_v53  ;;  %v13986_v25 = vld [vmem:[#allocation5 + $0x1ec] sm:$0xf]  ;;  %v12401_v6 = vld [vmem:[#allocation5 + $0x200] sm:$0xf0]  ;;  %v12665_v27 = vld [vmem:[#allocation5 + $0x410] sm:$0xf0] }
 0x69a   :  { %v12404_v44 = vor.u32 %v13986_v25, %v12401_v6  ;;  %v14202_v43 = vld [vmem:[#allocation5 + $0x8ac] sm:$0xf]  ;;  %v13265_v53 = vld [vmem:[#allocation5 + $0x8c0] sm:$0xf0]  ;;  %v12668_v8 = vor.u32 %v14052_v19, %v12665_v27 }
 0x69b   :  { %9195 = vmatmul.bf16.vlgmr.msrb.gmra.mxu1 %v17607_v5  ;;  %9279 = vmatmul.bf16.vlgmr.msra.gmra.mxu3 %v17607_v5  ;;  %v12641_v6 = vld [vmem:[#allocation5 + $0x3e0] sm:$0xf0]  ;;  %v14022_v27 = vld [vmem:[#allocation5 + $0x30c] sm:$0xf] }
 0x69c   :  { %9299 = vmatpush.bf16.msrb.mxu1 %v12520_v21  ;;  %9342 = vmatpush.bf16.msra.mxu0 %v13072_v48  ;;  %v14124_v21 = vld [vmem:[#allocation5 + $0x63c] sm:$0xf]  ;;  %v12953_v48 = vld [vmem:[#allocation5 + $0x650] sm:$0xf0] }
 0x69d   :  { %9383 = vmatpush.bf16.msra.mxu3 %v12524_v4  ;;  %9426 = vmatpush.bf16.msrb.mxu2 %v13076_v18  ;;  %v12375_v4 = vld [vmem:[#allocation5 + $0x1b8] sm:$0xf]  ;;  %v13983_v18 = vld [vmem:[#allocation5 + $0x1cc] sm:$0xf0]  ;;  %v12956_v9 = vor.u32 %v14124_v21, %v12953_v48  ;;  %v14196_v21 = vld [vmem:[#allocation5 + $0x87c] sm:$0xf] }
 0x69e   :  { %v12376_v23 = vor.u32 %v13983_v18, %v12375_v4  ;;  %v13241_v48 = vld [vmem:[#allocation5 + $0x890] sm:$0xf0]  ;;  %v12644_v18 = vor.u32 %v14046_v34, %v12641_v6  ;;  %v13969_v34 = vld [vmem:[#allocation5 + $0x164] sm:$0xf] }
 0x69f   :  { %v13244_v33 = vor.u32 %v14196_v21, %v13241_v48  ;;  %v13119_v48 = vld [vmem:[#allocation5 + $0x788] sm:$0xf] }
 0x6a0   :  { %9300 = vmatpush.bf16.msrb.mxu1 %v12496_v60  ;;  %9343 = vmatpush.bf16.msra.mxu0 %v13048_v40  ;;  %v14118_v60 = vld [vmem:[#allocation5 + $0x60c] sm:$0xf]  ;;  %v12929_v40 = vld [vmem:[#allocation5 + $0x620] sm:$0xf0] }
 0x6a1   :  { %9384 = vmatpush.bf16.msra.mxu3 %v12500_v31  ;;  %9427 = vmatpush.bf16.msrb.mxu2 %v13052_v56  ;;  %v12719_v31 = vld [vmem:[#allocation5 + $0x460] sm:$0xf]  ;;  %v14068_v56 = vld [vmem:[#allocation5 + $0x474] sm:$0xf0]  ;;  %v12932_v1 = vor.u32 %v14118_v60, %v12929_v40  ;;  %v14190_v60 = vld [vmem:[#allocation5 + $0x84c] sm:$0xf] }
 0x6a2   :  { %v12720_v47 = vor.u32 %v14068_v56, %v12719_v31  ;;  %v13217_v40 = vld [vmem:[#allocation5 + $0x860] sm:$0xf0]  ;;  %v12620_v56 = vor.u32 %v14040_v35, %v12617_v29  ;;  %v13966_v29 = vld [vmem:[#allocation5 + $0x144] sm:$0xf0] }
 0x6a4   :  { %9301 = vmatpush.bf16.msrb.mxu1 %v12472_v42  ;;  %9344 = vmatpush.bf16.msra.mxu0 %v13024_v38  ;;  %v13974_v42 = vld [vmem:[#allocation5 + $0x18c] sm:$0xf]  ;;  %v12353_v38 = vld [vmem:[#allocation5 + $0x1a0] sm:$0xf0] }
 0x6a5   :  { %9385 = vmatpush.bf16.msra.mxu3 %v12476_v57  ;;  %9428 = vmatpush.bf16.msrb.mxu2 %v13028_v51  ;;  %v13287_v57 = vld [vmem:[#allocation5 + $0x8d8] sm:$0xf]  ;;  %v14211_v51 = vld [vmem:[#allocation5 + $0x8ec] sm:$0xf0] }
 0x6a6   :  { %v13288_v14 = vor.u32 %v14211_v51, %v13287_v57 }
 0x6a8   :  { %9302 = vmatpush.bf16.msrb.mxu1 %v12448_v37  ;;  %9345 = vmatpush.bf16.msra.mxu0 %v13000_v50  ;;  %v14062_v37 = vld [vmem:[#allocation5 + $0x444] sm:$0xf0]  ;;  %v12356_v50 = vor.u32 %v13974_v42, %v12353_v38  ;;  %v14184_v42 = vld [vmem:[#allocation5 + $0x81c] sm:$0xf]  ;;  %v13193_v38 = vld [vmem:[#allocation5 + $0x830] sm:$0xf0] }
 0x6a9   :  { %9386 = vmatpush.bf16.msra.mxu3 %v12452_v30  ;;  %9429 = vmatpush.bf16.msrb.mxu2 %v13004_v11  ;;  %v13292_v30 = vor.u32 %v14208_v17, %v13289_v12  ;;  %v13263_v11 = vld [vmem:[#allocation5 + $0x8a8] sm:$0xf]  ;;  %v12696_v16 = vor.u32 %v14062_v37, %v12695_v54  ;;  %v13196_v24 = vor.u32 %v14184_v42, %v13193_v38  ;;  %v14181_v17 = vld [vmem:[#allocation5 + $0x7fc] sm:$0xf0]  ;;  %v14028_v12 = vld [vmem:[#allocation5 + $0x33c] sm:$0xf] }
 0x6aa   :  { %v13264_v3 = vor.u32 %v14205_v52, %v13263_v11  ;;  %v12569_v54 = vld [vmem:[#allocation5 + $0x350] sm:$0xf0]  ;;  %v14178_v37 = vld [vmem:[#allocation5 + $0x7ec] sm:$0xf]  ;;  %v13143_v11 = vld [vmem:[#allocation5 + $0x7b8] sm:$0xf] }
 0x6ab   :  { %9251 = vmatmul.bf16.vlgmr.msra.gmra.mxu1 %v17590_v32  ;;  %9335 = vmatmul.bf16.vlgmr.msrb.gmra.mxu3 %v17590_v32  ;;  %v12572_v52 = vor.u32 %v14028_v12, %v12569_v54  ;;  %v12287_v42 = vld [vmem:[#allocation5 + $0x100] sm:$0xf]  ;;  %v13960_v38 = vld [vmem:[#allocation5 + $0x114] sm:$0xf0]  ;;  %v12857_v12 = vld [vmem:[#allocation5 + $0x590] sm:$0xf0] }
 0x6ac   :  { %9303 = vmatpush.bf16.msrb.mxu1 %v12424_v2  ;;  %9346 = vmatpush.bf16.msra.mxu0 %v12976_v63  ;;  %v12671_v2 = vld [vmem:[#allocation5 + $0x400] sm:$0xf]  ;;  %v14056_v63 = vld [vmem:[#allocation5 + $0x414] sm:$0xf0] }
 0x6ad   :  { %9387 = vmatpush.bf16.msra.mxu3 %v12428_v10  ;;  %9430 = vmatpush.bf16.msrb.mxu2 %v12980_v22  ;;  %v13268_v10 = vor.u32 %v14202_v43, %v13265_v53  ;;  %v13239_v22 = vld [vmem:[#allocation5 + $0x878] sm:$0xf]  ;;  %v12672_v25 = vor.u32 %v14056_v63, %v12671_v2  ;;  %v12545_v43 = vld [vmem:[#allocation5 + $0x320] sm:$0xf0]  ;;  %v14172_v2 = vld [vmem:[#allocation5 + $0x7bc] sm:$0xf] }
 0x6ae   :  { %v13240_v4 = vor.u32 %v14199_v58, %v13239_v22  ;;  %v13145_v63 = vld [vmem:[#allocation5 + $0x7d0] sm:$0xf0]  ;;  %v13972_v22 = vld [vmem:[#allocation5 + $0x174] sm:$0xf0]  ;;  %v12548_v6 = vor.u32 %v14022_v27, %v12545_v43  ;;  %v12833_v27 = vld [vmem:[#allocation5 + $0x560] sm:$0xf0] }
 0x6af   :  { %v13148_v21 = vor.u32 %v14172_v2, %v13145_v63  ;;  %v12239_v2 = vld [vmem:[#allocation5 + $0xa0] sm:$0xf]  ;;  %v13948_v63 = vld [vmem:[#allocation5 + $0xb4] sm:$0xf0] }
 0x6b0   :  { %9304 = vmatpush.bf16.msrb.mxu1 %v12400_v15  ;;  %9347 = vmatpush.bf16.msra.mxu0 %v12952_v62  ;;  %v12647_v15 = vld [vmem:[#allocation5 + $0x3d0] sm:$0xf]  ;;  %v14050_v62 = vld [vmem:[#allocation5 + $0x3e4] sm:$0xf0] }
 0x6b1   :  { %9388 = vmatpush.bf16.msra.mxu3 %v12404_v44  ;;  %9431 = vmatpush.bf16.msrb.mxu2 %v12956_v9  ;;  %v13215_v44 = vld [vmem:[#allocation5 + $0x848] sm:$0xf]  ;;  %v14193_v9 = vld [vmem:[#allocation5 + $0x85c] sm:$0xf0]  ;;  %v12648_v36 = vor.u32 %v14050_v62, %v12647_v15  ;;  %v14166_v62 = vld [vmem:[#allocation5 + $0x78c] sm:$0xf] }
 0x6b2   :  { %v13216_v31 = vor.u32 %v14193_v9, %v13215_v44  ;;  %v14169_v15 = vld [vmem:[#allocation5 + $0x79c] sm:$0xf0]  ;;  %v14112_v44 = vld [vmem:[#allocation5 + $0x5dc] sm:$0xf]  ;;  %v12905_v9 = vld [vmem:[#allocation5 + $0x5f0] sm:$0xf0] }
 0x6b4   :  { %9305 = vmatpush.bf16.msrb.mxu1 %v12376_v23  ;;  %9348 = vmatpush.bf16.msra.mxu0 %v12928_v39  ;;  %v13220_v23 = vor.u32 %v14190_v60, %v13217_v40  ;;  %v13191_v39 = vld [vmem:[#allocation5 + $0x818] sm:$0xf]  ;;  %v12911_v60 = vld [vmem:[#allocation5 + $0x5e0] sm:$0xf]  ;;  %v13120_v40 = vor.u32 %v14169_v15, %v13119_v48  ;;  %v12215_v15 = vld [vmem:[#allocation5 + $0x70] sm:$0xf] }
 0x6b5   :  { %9389 = vmatpush.bf16.msra.mxu3 %v12380_v61  ;;  %9432 = vmatpush.bf16.msrb.mxu2 %v12932_v1  ;;  %v14034_v61 = vld [vmem:[#allocation5 + $0x36c] sm:$0xf]  ;;  %v12624_v1 = vor.u32 %v14044_v45, %v12623_v0  ;;  %v13192_v57 = vor.u32 %v14187_v46, %v13191_v39  ;;  %v14116_v0 = vld [vmem:[#allocation5 + $0x5f4] sm:$0xf0]  ;;  %v13963_v45 = vld [vmem:[#allocation5 + $0x134] sm:$0xf] }
 0x6b6   :  { %v12596_v51 = vor.u32 %v14034_v61, %v12593_v59  ;;  %v14106_v46 = vld [vmem:[#allocation5 + $0x5ac] sm:$0xf]  ;;  %v12881_v61 = vld [vmem:[#allocation5 + $0x5c0] sm:$0xf0] }
 0x6b7   :  { %9349 = vmatmul.bf16.vlgmr.msra.gmra.mxu0 %v17600_v13 }
 0x6b8   :  { %9397 = vmatpush.bf16.msrb.mxu0 %v12716_v26  ;;  %9433 = vmatmul.bf16.vlgmr.msrb.gmra.mxu2 %v17600_v13  ;;  %v12599_v26 = vld [vmem:[#allocation5 + $0x370] sm:$0xf] }
 0x6b9   :  { %9481 = vmatpush.bf16.msra.mxu2 %v12720_v47  ;;  %9306 = vmatpush.bf16.msrb.mxu1 %v12352_v49  ;;  %v14038_v47 = vld [vmem:[#allocation5 + $0x384] sm:$0xf0] }
 0x6ba   :  { %9390 = vmatpush.bf16.msra.mxu3 %v12356_v50  ;;  %v12600_v49 = vor.u32 %v14038_v47, %v12599_v26  ;;  %v13169_v50 = vld [vmem:[#allocation5 + $0x800] sm:$0xf0]  ;;  %v12887_v26 = vld [vmem:[#allocation5 + $0x5b0] sm:$0xf]  ;;  %v14110_v47 = vld [vmem:[#allocation5 + $0x5c4] sm:$0xf0] }
 0x6bb   :  { %v13172_v19 = vor.u32 %v14178_v37, %v13169_v50  ;;  %v12263_v37 = vld [vmem:[#allocation5 + $0xd0] sm:$0xf]  ;;  %v13954_v50 = vld [vmem:[#allocation5 + $0xe4] sm:$0xf0] }
 0x6bc   :  { %9398 = vmatpush.bf16.msrb.mxu0 %v12692_v41  ;;  %9307 = vmatmul.bf16.vlgmr.msrb.gmra.mxu1 %v17585_v7  ;;  %v14032_v41 = vld [vmem:[#allocation5 + $0x354] sm:$0xf0] }
 0x6bd   :  { %9355 = vmatpush.bf16.msra.mxu1 %v13288_v14  ;;  %9482 = vmatpush.bf16.msra.mxu2 %v12696_v16  ;;  %v12575_v14 = vld [vmem:[#allocation5 + $0x340] sm:$0xf]  ;;  %v14175_v16 = vld [vmem:[#allocation5 + $0x7cc] sm:$0xf0] }
 0x6be   :  { %9439 = vmatpush.bf16.msrb.mxu3 %v13292_v30  ;;  %v13168_v30 = vor.u32 %v14181_v17, %v13167_v28  ;;  %v12576_v53 = vor.u32 %v14032_v41, %v12575_v14  ;;  %v13144_v58 = vor.u32 %v14175_v16, %v13143_v11  ;;  %v12288_v28 = vor.u32 %v13960_v38, %v12287_v42  ;;  %v14100_v17 = vld [vmem:[#allocation5 + $0x57c] sm:$0xf]  ;;  %v12863_v14 = vld [vmem:[#allocation5 + $0x580] sm:$0xf]  ;;  %v14104_v41 = vld [vmem:[#allocation5 + $0x594] sm:$0xf0] }
 0x6bf   :  { %9391 = vmatmul.bf16.vlgmr.msra.gmra.mxu3 %v17585_v7  ;;  %v12265_v11 = vld [vmem:[#allocation5 + $0xe8] sm:$0xf0]  ;;  %v12864_v43 = vor.u32 %v14104_v41, %v12863_v14  ;;  %v12167_v42 = vld [vmem:[#allocation5 + $0x10] sm:$0xf] }
 0x6c0   :  { %9399 = vmatpush.bf16.msrb.mxu0 %v12668_v8  ;;  %v14026_v8 = vld [vmem:[#allocation5 + $0x324] sm:$0xf0]  ;;  %v14094_v16 = vld [vmem:[#allocation5 + $0x54c] sm:$0xf] }
 0x6c1   :  { %9356 = vmatpush.bf16.msra.mxu1 %v13264_v3  ;;  %9483 = vmatpush.bf16.msra.mxu2 %v12672_v25  ;;  %v12551_v3 = vld [vmem:[#allocation5 + $0x310] sm:$0xf]  ;;  %v12337_v25 = vld [vmem:[#allocation5 + $0x178] sm:$0xf0]  ;;  %v14070_v14 = vld [vmem:[#allocation5 + $0x48c] sm:$0xf] }
 0x6c2   :  { %9440 = vmatpush.bf16.msrb.mxu3 %v13268_v10  ;;  %v12335_v10 = vld [vmem:[#allocation5 + $0x160] sm:$0xf]  ;;  %v12340_v35 = vor.u32 %v13969_v34, %v12337_v25  ;;  %v12240_v34 = vor.u32 %v13948_v63, %v12239_v2  ;;  %v14088_v25 = vld [vmem:[#allocation5 + $0x51c] sm:$0xf]  ;;  %v13079_v2 = vld [vmem:[#allocation5 + $0x730] sm:$0xf] }
 0x6c3   :  { %v14158_v63 = vld [vmem:[#allocation5 + $0x744] sm:$0xf0] }
 0x6c4   :  { %9400 = vmatpush.bf16.msrb.mxu0 %v12644_v18  ;;  %v12336_v18 = vor.u32 %v13972_v22, %v12335_v10  ;;  %v13945_v10 = vld [vmem:[#allocation5 + $0xa4] sm:$0xf]  ;;  %v12241_v22 = vld [vmem:[#allocation5 + $0xb8] sm:$0xf0] }
 0x6c5   :  { %9357 = vmatpush.bf16.msra.mxu1 %v13240_v4  ;;  %9484 = vmatpush.bf16.msra.mxu2 %v12648_v36  ;;  %v12552_v4 = vor.u32 %v14026_v8, %v12551_v3  ;;  %v12311_v36 = vld [vmem:[#allocation5 + $0x130] sm:$0xf]  ;;  %v14098_v8 = vld [vmem:[#allocation5 + $0x564] sm:$0xf0]  ;;  %v12244_v48 = vor.u32 %v13945_v10, %v12241_v22  ;;  %v14155_v22 = vld [vmem:[#allocation5 + $0x734] sm:$0xf] }
 0x6c6   :  { %9441 = vmatpush.bf16.msrb.mxu3 %v13244_v33  ;;  %v13121_v33 = vld [vmem:[#allocation5 + $0x7a0] sm:$0xf0]  ;;  %v12312_v39 = vor.u32 %v13966_v29, %v12311_v36  ;;  %v12839_v3 = vld [vmem:[#allocation5 + $0x550] sm:$0xf]  ;;  %v14082_v36 = vld [vmem:[#allocation5 + $0x4ec] sm:$0xf] }
 0x6c7   :  { %v12785_v29 = vld [vmem:[#allocation5 + $0x500] sm:$0xf0] }
 0x6c8   :  { %9401 = vmatpush.bf16.msrb.mxu0 %v12620_v56  ;;  %v13124_v56 = vor.u32 %v14166_v62, %v13121_v33  ;;  %v13942_v62 = vld [vmem:[#allocation5 + $0x84] sm:$0xf0]  ;;  %v13939_v33 = vld [vmem:[#allocation5 + $0x74] sm:$0xf] }
 0x6c9   :  { %9358 = vmatpush.bf16.msra.mxu1 %v13216_v31  ;;  %9485 = vmatpush.bf16.msra.mxu2 %v12624_v1  ;;  %v12313_v31 = vld [vmem:[#allocation5 + $0x148] sm:$0xf0]  ;;  %v12912_v1 = vor.u32 %v14116_v0, %v12911_v60  ;;  %v12191_v0 = vld [vmem:[#allocation5 + $0x40] sm:$0xf] }
 0x6ca   :  { %9442 = vmatpush.bf16.msrb.mxu3 %v13220_v23  ;;  %v12908_v23 = vor.u32 %v14112_v44, %v12905_v9  ;;  %v12316_v59 = vor.u32 %v13963_v45, %v12313_v31  ;;  %v12217_v44 = vld [vmem:[#allocation5 + $0x88] sm:$0xf0]  ;;  %v13936_v45 = vld [vmem:[#allocation5 + $0x54] sm:$0xf0]  ;;  %v12791_v31 = vld [vmem:[#allocation5 + $0x4f0] sm:$0xf] }
 0x6cc   :  { %9402 = vmatpush.bf16.msrb.mxu0 %v12596_v51  ;;  %v12289_v51 = vld [vmem:[#allocation5 + $0x118] sm:$0xf0] }
 0x6cd   :  { %9359 = vmatpush.bf16.msra.mxu1 %v13192_v57  ;;  %9486 = vmatpush.bf16.msra.mxu2 %v12600_v49  ;;  %v13957_v57 = vld [vmem:[#allocation5 + $0x104] sm:$0xf]  ;;  %v12888_v49 = vor.u32 %v14110_v47, %v12887_v26  ;;  %v13930_v47 = vld [vmem:[#allocation5 + $0x24] sm:$0xf0] }
 0x6ce   :  { %9443 = vmatpush.bf16.msrb.mxu3 %v13196_v24  ;;  %v12884_v24 = vor.u32 %v14106_v46, %v12881_v61  ;;  %v12292_v54 = vor.u32 %v13957_v57, %v12289_v51  ;;  %v12788_v46 = vor.u32 %v14082_v36, %v12785_v29  ;;  %v12192_v61 = vor.u32 %v13936_v45, %v12191_v0  ;;  %v12767_v57 = vld [vmem:[#allocation5 + $0x4c0] sm:$0xf]  ;;  %v14080_v51 = vld [vmem:[#allocation5 + $0x4d4] sm:$0xf0]  ;;  %v13031_v45 = vld [vmem:[#allocation5 + $0x6d0] sm:$0xf] }
 0x6cf   :  { %v12768_v41 = vor.u32 %v14080_v51, %v12767_v57  ;;  %v14008_v0 = vld [vmem:[#allocation5 + $0x294] sm:$0xf0]  ;;  %v13999_v51 = vld [vmem:[#allocation5 + $0x254] sm:$0xf] }
 0x6d0   :  { %9403 = vmatpush.bf16.msrb.mxu0 %v12572_v52  ;;  %v12860_v52 = vor.u32 %v14100_v17, %v12857_v12  ;;  %v13103_v17 = vld [vmem:[#allocation5 + $0x760] sm:$0xf]  ;;  %v14164_v12 = vld [vmem:[#allocation5 + $0x774] sm:$0xf0] }
 0x6d1   :  { %9360 = vmatpush.bf16.msra.mxu1 %v13168_v30  ;;  %9487 = vmatpush.bf16.msra.mxu2 %v12576_v53  ;;  %v13951_v30 = vld [vmem:[#allocation5 + $0xd4] sm:$0xf]  ;;  %v14140_v57 = vld [vmem:[#allocation5 + $0x6b4] sm:$0xf0] }
 0x6d2   :  { %9444 = vmatpush.bf16.msrb.mxu3 %v13172_v19  ;;  %v12264_v19 = vor.u32 %v13954_v50, %v12263_v37  ;;  %v12268_v53 = vor.u32 %v13951_v30, %v12265_v11  ;;  %v12168_v50 = vor.u32 %v13930_v47, %v12167_v42  ;;  %v12737_v11 = vld [vmem:[#allocation5 + $0x4a0] sm:$0xf0]  ;;  %v12455_v42 = vld [vmem:[#allocation5 + $0x250] sm:$0xf] }
 0x6d3   :  { %v12740_v10 = vor.u32 %v14070_v14, %v12737_v11  ;;  %v13996_v14 = vld [vmem:[#allocation5 + $0x234] sm:$0xf0]  ;;  %v14134_v11 = vld [vmem:[#allocation5 + $0x684] sm:$0xf0] }
 0x6d4   :  { %9404 = vmatpush.bf16.msrb.mxu0 %v12548_v6  ;;  %v12809_v6 = vld [vmem:[#allocation5 + $0x530] sm:$0xf0] }
 0x6d5   :  { %9361 = vmatpush.bf16.msra.mxu1 %v13144_v58  ;;  %9488 = vmatpush.bf16.msra.mxu2 %v12552_v4  ;;  %v12836_v58 = vor.u32 %v14094_v16, %v12833_v27  ;;  %v12815_v4 = vld [vmem:[#allocation5 + $0x520] sm:$0xf]  ;;  %v12812_v9 = vor.u32 %v14088_v25, %v12809_v6  ;;  %v13104_v16 = vor.u32 %v14164_v12, %v13103_v17  ;;  %v13009_v17 = vld [vmem:[#allocation5 + $0x6b8] sm:$0xf0]  ;;  %v17627_v12 = vpop.f32.mrf.mxu0 }
 0x6d6   :  { %9445 = vmatpush.bf16.msrb.mxu3 %v13148_v21  ;;  %v12840_v21 = vor.u32 %v14098_v8, %v12839_v3  ;;  %v14017_v3 = vld [vmem:[#allocation5 + $0x2e4] sm:$0xf]  ;;  %v12529_v8 = vld [vmem:[#allocation5 + $0x2f8] sm:$0xf0]  ;;  %v13080_v6 = vor.u32 %v14158_v63, %v13079_v2  ;;  %v12407_v63 = vld [vmem:[#allocation5 + $0x1f0] sm:$0xf] }
 0x6d7   :  { %9405 = vmatmul.bf16.vlgmr.msrb.gmra.mxu0 %v17582_v55 }
 0x6d8   :  { %9453 = vmatpush.bf16.msra.mxu0 %v12336_v18  ;;  %9489 = vmatmul.bf16.vlgmr.msra.gmra.mxu2 %v17582_v55  ;;  %v14092_v18 = vld [vmem:[#allocation5 + $0x534] sm:$0xf0] }
 0x6d9   :  { %9537 = vmatpush.bf16.msrb.mxu2 %v12340_v35  ;;  %9362 = vmatpush.bf16.msra.mxu1 %v13120_v40  ;;  %v12216_v35 = vor.u32 %v13942_v62, %v12215_v15  ;;  %v12816_v60 = vor.u32 %v14092_v18, %v12815_v4  ;;  %v12220_v40 = vor.u32 %v13939_v33, %v12217_v44  ;;  %v14014_v15 = vld [vmem:[#allocation5 + $0x2c4] sm:$0xf0]  ;;  %v13055_v62 = vld [vmem:[#allocation5 + $0x700] sm:$0xf]  ;;  %v14152_v18 = vld [vmem:[#allocation5 + $0x714] sm:$0xf0] }
 0x6da   :  { %9446 = vmatpush.bf16.msrb.mxu3 %v13124_v56  ;;  %v14086_v56 = vld [vmem:[#allocation5 + $0x504] sm:$0xf0]  ;;  %v14011_v33 = vld [vmem:[#allocation5 + $0x2b4] sm:$0xf]  ;;  %v12505_v44 = vld [vmem:[#allocation5 + $0x2c8] sm:$0xf0]  ;;  %v13056_v29 = vor.u32 %v14152_v18, %v13055_v62 }
 0x6db   :  { %v12792_v38 = vor.u32 %v14086_v56, %v12791_v31  ;;  %v14146_v56 = vld [vmem:[#allocation5 + $0x6e4] sm:$0xf0] }
 0x6dc   :  { %9454 = vmatpush.bf16.msra.mxu0 %v12312_v39  ;;  %9363 = vmatmul.bf16.vlgmr.msra.gmra.mxu1 %v17607_v5  ;;  %v12193_v39 = vld [vmem:[#allocation5 + $0x58] sm:$0xf0] }
 0x6dd   :  { %9411 = vmatpush.bf16.msrb.mxu1 %v12908_v23  ;;  %9538 = vmatpush.bf16.msrb.mxu2 %v12316_v59  ;;  %v13933_v23 = vld [vmem:[#allocation5 + $0x44] sm:$0xf]  ;;  %v12761_v59 = vld [vmem:[#allocation5 + $0x4d0] sm:$0xf0] }
 0x6de   :  { %9495 = vmatpush.bf16.msra.mxu3 %v12912_v1  ;;  %v14076_v1 = vld [vmem:[#allocation5 + $0x4bc] sm:$0xf]  ;;  %v12196_v26 = vor.u32 %v13933_v23, %v12193_v39  ;;  %v14005_v23 = vld [vmem:[#allocation5 + $0x284] sm:$0xf]  ;;  %v14143_v39 = vld [vmem:[#allocation5 + $0x6d4] sm:$0xf] }
 0x6df   :  { %9447 = vmatmul.bf16.vlgmr.msrb.gmra.mxu3 %v17607_v5  ;;  %v12764_v37 = vor.u32 %v14076_v1, %v12761_v59  ;;  %v13032_v1 = vor.u32 %v14146_v56, %v13031_v45  ;;  %v14119_v45 = vld [vmem:[#allocation5 + $0x614] sm:$0xf]  ;;  %v14065_v56 = vld [vmem:[#allocation5 + $0x464] sm:$0xf] }
 0x6e0   :  { %9455 = vmatpush.bf16.msra.mxu0 %v12288_v28  ;;  %v12169_v28 = vld [vmem:[#allocation5 + $0x28] sm:$0xf0] }
 0x6e1   :  { %9412 = vmatpush.bf16.msrb.mxu1 %v12884_v24  ;;  %9539 = vmatpush.bf16.msrb.mxu2 %v12292_v54  ;;  %v13927_v24 = vld [vmem:[#allocation5 + $0x14] sm:$0xf]  ;;  %v13105_v54 = vld [vmem:[#allocation5 + $0x778] sm:$0xf0] }
 0x6e2   :  { %9496 = vmatpush.bf16.msra.mxu3 %v12888_v49  ;;  %v14161_v49 = vld [vmem:[#allocation5 + $0x764] sm:$0xf]  ;;  %v12172_v30 = vor.u32 %v13927_v24, %v12169_v28  ;;  %v12457_v24 = vld [vmem:[#allocation5 + $0x268] sm:$0xf0] }
 0x6e3   :  { %v13108_v27 = vor.u32 %v14161_v49, %v13105_v54  ;;  %v14137_v28 = vld [vmem:[#allocation5 + $0x6a4] sm:$0xf] }
 0x6e4   :  { %9456 = vmatpush.bf16.msra.mxu0 %v12264_v19  ;;  %v14074_v19 = vld [vmem:[#allocation5 + $0x4a4] sm:$0xf0] }
 0x6e5   :  { %9413 = vmatpush.bf16.msrb.mxu1 %v12860_v52  ;;  %9540 = vmatpush.bf16.msrb.mxu2 %v12268_v53  ;;  %v12743_v52 = vld [vmem:[#allocation5 + $0x490] sm:$0xf]  ;;  %v14020_v53 = vld [vmem:[#allocation5 + $0x2f4] sm:$0xf0] }
 0x6e6   :  { %9497 = vmatpush.bf16.msra.mxu3 %v12864_v43  ;;  %v12527_v43 = vld [vmem:[#allocation5 + $0x2e0] sm:$0xf] }
 0x6e7   :  { %v12528_v25 = vor.u32 %v14020_v53, %v12527_v43 }
 0x6e8   :  { %9457 = vmatpush.bf16.msra.mxu0 %v12240_v34  ;;  %v12744_v34 = vor.u32 %v14074_v19, %v12743_v52  ;;  %v13993_v52 = vld [vmem:[#allocation5 + $0x224] sm:$0xf]  ;;  %v12433_v19 = vld [vmem:[#allocation5 + $0x238] sm:$0xf0] }
 0x6e9   :  { %9414 = vmatpush.bf16.msrb.mxu1 %v12836_v58  ;;  %9541 = vmatpush.bf16.msrb.mxu2 %v12244_v48  ;;  %v13081_v58 = vld [vmem:[#allocation5 + $0x748] sm:$0xf0]  ;;  %v12503_v48 = vld [vmem:[#allocation5 + $0x2b0] sm:$0xf]  ;;  %v12436_v2 = vor.u32 %v13993_v52, %v12433_v19 }
 0x6ea   :  { %9498 = vmatpush.bf16.msra.mxu3 %v12840_v21  ;;  %v12532_v21 = vor.u32 %v14017_v3, %v12529_v8  ;;  %v13084_v4 = vor.u32 %v14155_v22, %v13081_v58  ;;  %v12504_v36 = vor.u32 %v14014_v15, %v12503_v48  ;;  %v13990_v3 = vld [vmem:[#allocation5 + $0x204] sm:$0xf0]  ;;  %v12959_v8 = vld [vmem:[#allocation5 + $0x640] sm:$0xf]  ;;  %v14128_v58 = vld [vmem:[#allocation5 + $0x654] sm:$0xf0] }
 0x6eb   :  { %v12961_v48 = vld [vmem:[#allocation5 + $0x658] sm:$0xf0]  ;;  %v17636_v15 = vld [vmem:[%s17674_s7] sm:$0x3f]  ;;  %v12408_v62 = vor.u32 %v13990_v3, %v12407_v63  ;;  %v12960_v18 = vor.u32 %v14128_v58, %v12959_v8  ;;  %v13271_v19 = vld [vmem:[#allocation5 + $0x8b0] sm:$0xf] }
 0x6ec   :  { %9458 = vmatpush.bf16.msra.mxu0 %v12216_v35  ;;  %v13057_v35 = vld [vmem:[#allocation5 + $0x718] sm:$0xf0]  ;;  %v13273_v3 = vld [vmem:[#allocation5 + $0x8c8] sm:$0xf0]  ;;  %v13247_v58 = vld [vmem:[#allocation5 + $0x880] sm:$0xf] }
 0x6ed   :  { %9415 = vmatpush.bf16.msrb.mxu1 %v12812_v9  ;;  %9542 = vmatpush.bf16.msrb.mxu2 %v12220_v40  ;;  %v14149_v9 = vld [vmem:[#allocation5 + $0x704] sm:$0xf]  ;;  %v12479_v40 = vld [vmem:[#allocation5 + $0x280] sm:$0xf]  ;;  %s14310_s7 = smov [#allocation7]  }
 0x6ee   :  { %9499 = vmatpush.bf16.msra.mxu3 %v12816_v60  ;;  %v12508_v60 = vor.u32 %v14011_v33, %v12505_v44  ;;  %v13060_v31 = vor.u32 %v14149_v9, %v13057_v35  ;;  %v13984_v44 = vld [vmem:[#allocation5 + $0x1d4] sm:$0xf0]  ;;  %v12935_v9 = vld [vmem:[#allocation5 + $0x610] sm:$0xf]  ;;  %v14122_v35 = vld [vmem:[#allocation5 + $0x624] sm:$0xf0] }
 0x6ef   :  { %s9637_s17 = sshll.u32 %s14310_s7, 4  ;;  %s9638_s17 = int_to_ptr.vmem [resolvable:$true] %s9637_s17 }
 0x6f0   :  { %9459 = vmatpush.bf16.msra.mxu0 %v12192_v61  ;;  %v12480_v61 = vor.u32 %v14008_v0, %v12479_v40  ;;  %v13981_v40 = vld [vmem:[#allocation5 + $0x1c4] sm:$0xf]  ;;  %v12385_v0 = vld [vmem:[#allocation5 + $0x1d8] sm:$0xf0] }
 0x6f1   :  { %9416 = vmatpush.bf16.msrb.mxu1 %v12788_v46  ;;  %9543 = vmatpush.bf16.msrb.mxu2 %v12196_v26  ;;  %v13033_v46 = vld [vmem:[#allocation5 + $0x6e8] sm:$0xf0]  ;;  %v13007_v26 = vld [vmem:[#allocation5 + $0x6a0] sm:$0xf] }
 0x6f2   :  { %9500 = vmatpush.bf16.msra.mxu3 %v12792_v38  ;;  %v14002_v38 = vld [vmem:[#allocation5 + $0x264] sm:$0xf0]  ;;  %v13036_v47 = vor.u32 %v14143_v39, %v13033_v46  ;;  %v13008_v54 = vor.u32 %v14140_v57, %v13007_v26  ;;  %v7665_v39 = vperm.slane %v17636_v15, 0  ;;  %v12936_v46 = vor.u32 %v14122_v35, %v12935_v9  ;;  %v13975_v26 = vld [vmem:[#allocation5 + $0x194] sm:$0xf] }
 0x6f3   :  { %v12456_v49 = vor.u32 %v14002_v38, %v12455_v42  ;;  %v13295_v57 = vld [vmem:[#allocation5 + $0x8e0] sm:$0xf]  ;;  %v13223_v35 = vld [vmem:[#allocation5 + $0x850] sm:$0xf] }
 0x6f4   :  { %9460 = vmatpush.bf16.msra.mxu0 %v12168_v50  ;;  %v12431_v50 = vld [vmem:[#allocation5 + $0x220] sm:$0xf] }
 0x6f5   :  { %9417 = vmatpush.bf16.msrb.mxu1 %v12764_v37  ;;  %9544 = vmatpush.bf16.msrb.mxu2 %v12172_v30  ;;  %v12460_v37 = vor.u32 %v13999_v51, %v12457_v24  ;;  %v13012_v30 = vor.u32 %v14137_v28, %v13009_v17  ;;  %v12432_v43 = vor.u32 %v13996_v14, %v12431_v50  ;;  %v14212_v51 = vld [vmem:[#allocation5 + $0x8f4] sm:$0xf0]  ;;  %v14059_v24 = vld [vmem:[#allocation5 + $0x434] sm:$0xf]  ;;  %v12697_v28 = vld [vmem:[#allocation5 + $0x448] sm:$0xf0] }
 0x6f6   :  { %9501 = vmatpush.bf16.msra.mxu3 %v12768_v41  ;;  %v12983_v41 = vld [vmem:[#allocation5 + $0x670] sm:$0xf]  ;;  %v9127_v50 = vadd.f32 %v17627_v12, %v7665_v39  ;;  %v12700_v52 = vor.u32 %v14059_v24, %v12697_v28  ;;  %v14203_v12 = vld [vmem:[#allocation5 + $0x8b4] sm:$0xf]  ;;  %v7666_v24 = vperm.slane %v17636_v15, 1 }
 0x6f7   :  { %9461 = vmatmul.bf16.vlgmr.msra.gmra.mxu0 %v17540_v20  ;;  %v12984_v53 = vor.u32 %v14134_v11, %v12983_v41  ;;  %v13296_v11 = vor.u32 %v14212_v51, %v13295_v57  ;;  %v13201_v57 = vld [vmem:[#allocation5 + $0x838] sm:$0xf0] }
 0x6f8   :  { %9509 = vmatpush.bf16.msrb.mxu0 %v13104_v16  ;;  %9545 = vmatmul.bf16.vlgmr.msrb.gmra.mxu2 %v17540_v20  ;;  %v12481_v20 = vld [vmem:[#allocation5 + $0x298] sm:$0xf0]  ;;  %v14131_v16 = vld [vmem:[#allocation5 + $0x674] sm:$0xf] }
 0x6f9   :  { %9593 = vmatpush.bf16.msra.mxu2 %v13108_v27  ;;  %9418 = vmatpush.bf16.msrb.mxu1 %v12740_v10  ;;  %v12484_v59 = vor.u32 %v14005_v23, %v12481_v20  ;;  %v12985_v27 = vld [vmem:[#allocation5 + $0x688] sm:$0xf0]  ;;  %v17629_v10 = vpop.f32.mrf.mxu2  ;;  %v12721_v23 = vld [vmem:[#allocation5 + $0x478] sm:$0xf0] }
 0x6fa   :  { %9502 = vmatpush.bf16.msra.mxu3 %v12744_v34  ;;  %v12988_v22 = vor.u32 %v14131_v16, %v12985_v27  ;;  %v13987_v34 = vld [vmem:[#allocation5 + $0x1f4] sm:$0xf]  ;;  %v12724_v38 = vor.u32 %v14065_v56, %v12721_v23 }
 0x6fc   :  { %9510 = vmatpush.bf16.msrb.mxu0 %v13080_v6  ;;  %9419 = vmatmul.bf16.vlgmr.msrb.gmra.mxu1 %v17590_v32  ;;  %v17631_v6 = vpop.f32.mrf.mxu3 }
 0x6fd   :  { %9467 = vmatpush.bf16.msra.mxu1 %v12528_v25  ;;  %9594 = vmatpush.bf16.msra.mxu2 %v13084_v4  ;;  %v12409_v25 = vld [vmem:[#allocation5 + $0x208] sm:$0xf0]  ;;  %v12383_v4 = vld [vmem:[#allocation5 + $0x1c0] sm:$0xf] }
 0x6fe   :  { %9551 = vmatpush.bf16.msrb.mxu3 %v12532_v21  ;;  %v14125_v21 = vld [vmem:[#allocation5 + $0x644] sm:$0xf]  ;;  %v12412_v33 = vor.u32 %v13987_v34, %v12409_v25  ;;  %v12384_v20 = vor.u32 %v13984_v44, %v12383_v4  ;;  %v13276_v25 = vor.u32 %v14203_v12, %v13273_v3  ;;  %v14176_v12 = vld [vmem:[#allocation5 + $0x7d4] sm:$0xf0] }
 0x6ff   :  { %9503 = vmatmul.bf16.vlgmr.msra.gmra.mxu3 %v17590_v32  ;;  %v14197_v4 = vld [vmem:[#allocation5 + $0x884] sm:$0xf] }
 0x700   :  { %9511 = vmatpush.bf16.msrb.mxu0 %v13056_v29  ;;  %v9140_v29 = vpop.f32.mrf.mxu1 }
 0x701   :  { %9468 = vmatpush.bf16.msra.mxu1 %v12504_v36  ;;  %9595 = vmatpush.bf16.msra.mxu2 %v13060_v31  ;;  %v17638_v36 = vpop.f32.mrf.mxu0  ;;  %v12937_v31 = vld [vmem:[#allocation5 + $0x628] sm:$0xf0]  ;;  %v17641_v17 = vpop.f32.mrf.mxu2  ;;  %v9141_v16 = vadd.f32 %v9140_v29, %v9127_v50 }
 0x702   :  { %9552 = vmatpush.bf16.msrb.mxu3 %v12508_v60  ;;  %v12964_v60 = vor.u32 %v14125_v21, %v12961_v48  ;;  %v12940_v42 = vor.u32 %v14119_v45, %v12937_v31  ;;  %v14200_v21 = vld [vmem:[#allocation5 + $0x894] sm:$0xf0]  ;;  %v14047_v48 = vld [vmem:[#allocation5 + $0x3d4] sm:$0xf]  ;;  %v14194_v45 = vld [vmem:[#allocation5 + $0x864] sm:$0xf0] }
 0x703   :  { %v9155_v34 = vadd.f32 %v17629_v10, %v9141_v16  ;;  %v13248_v9 = vor.u32 %v14200_v21, %v13247_v58  ;;  %v14041_v31 = vld [vmem:[#allocation5 + $0x3a4] sm:$0xf]  ;;  %v13177_v16 = vld [vmem:[#allocation5 + $0x808] sm:$0xf0] }
 0x704   :  { %9512 = vmatpush.bf16.msrb.mxu0 %v13032_v1  ;;  %v12359_v1 = vld [vmem:[#allocation5 + $0x190] sm:$0xf]  ;;  %v17644_v14 = vpop.f32.mrf.mxu3  ;;  %v12553_v58 = vld [vmem:[#allocation5 + $0x328] sm:$0xf0] }
 0x705   :  { %9469 = vmatpush.bf16.msra.mxu1 %v12480_v61  ;;  %9596 = vmatpush.bf16.msra.mxu2 %v13036_v47  ;;  %v12388_v61 = vor.u32 %v13981_v40, %v12385_v0  ;;  %v12361_v47 = vld [vmem:[#allocation5 + $0x1a8] sm:$0xf0] }
 0x706   :  { %9553 = vmatpush.bf16.msrb.mxu3 %v12484_v59  ;;  %v13978_v59 = vld [vmem:[#allocation5 + $0x1a4] sm:$0xf0]  ;;  %v12364_v41 = vor.u32 %v13975_v26, %v12361_v47  ;;  %v12601_v26 = vld [vmem:[#allocation5 + $0x388] sm:$0xf0]  ;;  %v14185_v47 = vld [vmem:[#allocation5 + $0x824] sm:$0xf] }
 0x707   :  { %v13204_v50 = vor.u32 %v14185_v47, %v13201_v57 }
 0x708   :  { %9513 = vmatpush.bf16.msrb.mxu0 %v13008_v54  ;;  %v14209_v54 = vld [vmem:[#allocation5 + $0x8e4] sm:$0xf]  ;;  %v9142_v63 = vpop.f32.mrf.mxu1 }
 0x709   :  { %9470 = vmatpush.bf16.msra.mxu1 %v12456_v49  ;;  %9597 = vmatpush.bf16.msra.mxu2 %v13012_v30  ;;  %v12360_v49 = vor.u32 %v13978_v59, %v12359_v1  ;;  %v9182_v30 = vpop.f32.mrf.mxu0  ;;  %v9210_v44 = vpop.f32.mrf.mxu2  ;;  %v14188_v1 = vld [vmem:[#allocation5 + $0x834] sm:$0xf0] }
 0x70a   :  { %9554 = vmatpush.bf16.msrb.mxu3 %v12460_v37  ;;  %v13297_v37 = vld [vmem:[#allocation5 + $0x8f8] sm:$0xf0]  ;;  %v9211_v3 = vadd.f32 %v9210_v44, %v7666_v24 }
 0x70b   :  { %v13300_v27 = vor.u32 %v14209_v54, %v13297_v37  ;;  %v13175_v54 = vld [vmem:[#allocation5 + $0x7f0] sm:$0xf] }
 0x70c   :  { %9514 = vmatpush.bf16.msrb.mxu0 %v12984_v53  ;;  %v14053_v53 = vld [vmem:[#allocation5 + $0x404] sm:$0xf] }
 0x70d   :  { %9471 = vmatpush.bf16.msra.mxu1 %v12432_v43  ;;  %9598 = vmatpush.bf16.msra.mxu2 %v12988_v22  ;;  %v14206_v43 = vld [vmem:[#allocation5 + $0x8c4] sm:$0xf0] }
 0x70e   :  { %9555 = vmatpush.bf16.msrb.mxu3 %v12436_v2  ;;  %v12673_v2 = vld [vmem:[#allocation5 + $0x418] sm:$0xf0]  ;;  %v13272_v8 = vor.u32 %v14206_v43, %v13271_v19  ;;  %v14179_v19 = vld [vmem:[#allocation5 + $0x7f4] sm:$0xf] }
 0x70f   :  { %v12676_v22 = vor.u32 %v14053_v53, %v12673_v2 }
 0x710   :  { %9515 = vmatpush.bf16.msrb.mxu0 %v12960_v18  ;;  %v13249_v18 = vld [vmem:[#allocation5 + $0x898] sm:$0xf0] }
 0x711   :  { %9472 = vmatpush.bf16.msra.mxu1 %v12408_v62  ;;  %9599 = vmatpush.bf16.msra.mxu2 %v12964_v60  ;;  %v12649_v62 = vld [vmem:[#allocation5 + $0x3e8] sm:$0xf0]  ;;  %v9224_v60 = vpop.f32.mrf.mxu3  ;;  %v13252_v0 = vor.u32 %v14197_v4, %v13249_v18  ;;  %v9184_v56 = vpop.f32.mrf.mxu0 }
 0x712   :  { %9556 = vmatpush.bf16.msrb.mxu3 %v12412_v33  ;;  %v9169_v33 = vadd.f32 %v17631_v6, %v9155_v34  ;;  %v12652_v10 = vor.u32 %v14047_v48, %v12649_v62  ;;  %v13224_v6 = vor.u32 %v14194_v45, %v13223_v35  ;;  %v14173_v34 = vld [vmem:[#allocation5 + $0x7c4] sm:$0xf]  ;;  %v9225_v21 = vadd.f32 %v9224_v60, %v9211_v3  ;;  %v13129_v35 = vld [vmem:[#allocation5 + $0x7a8] sm:$0xf0] }
 0x714   :  { %9516 = vmatpush.bf16.msrb.mxu0 %v12936_v46  ;;  %v9183_v40 = vadd.f32 %v9182_v30, %v9169_v33  ;;  %v12577_v30 = vld [vmem:[#allocation5 + $0x358] sm:$0xf0]  ;;  %v14170_v33 = vld [vmem:[#allocation5 + $0x7a4] sm:$0xf0] }
 0x715   :  { %9473 = vmatpush.bf16.msra.mxu1 %v12384_v20  ;;  %9600 = vmatpush.bf16.msra.mxu2 %v12940_v42  ;;  %v14191_v20 = vld [vmem:[#allocation5 + $0x854] sm:$0xf] }
 0x716   :  { %9557 = vmatpush.bf16.msrb.mxu3 %v12388_v61  ;;  %v13199_v61 = vld [vmem:[#allocation5 + $0x820] sm:$0xf] }
 0x717   :  { %9517 = vmatmul.bf16.vlgmr.msrb.gmra.mxu0 %v17600_v13  ;;  %v13200_v28 = vor.u32 %v14188_v1, %v13199_v61 }
 0x718   :  { %9565 = vmatpush.bf16.msra.mxu0 %v12724_v38  ;;  %9601 = vmatmul.bf16.vlgmr.msra.gmra.mxu2 %v17600_v13  ;;  %v9129_v13 = vadd.f32 %v17638_v36, %v7665_v39  ;;  %v9196_v23 = vpop.f32.mrf.mxu1  ;;  %v13225_v36 = vld [vmem:[#allocation5 + $0x868] sm:$0xf0]  ;;  %v14035_v38 = vld [vmem:[#allocation5 + $0x374] sm:$0xf] }
 0x719   :  { %9474 = vmatpush.bf16.msra.mxu1 %v12360_v49  ;;  %v9197_v39 = vadd.f32 %v9196_v23, %v9183_v40  ;;  %v13228_v42 = vor.u32 %v14191_v20, %v13225_v36  ;;  %v12604_v49 = vor.u32 %v14035_v38, %v12601_v26  ;;  %v9226_v43 = vpop.f32.mrf.mxu3  ;;  %v12913_v40 = vld [vmem:[#allocation5 + $0x5f8] sm:$0xf0]  ;;  %v14107_v36 = vld [vmem:[#allocation5 + $0x5b4] sm:$0xf] }
 0x71a   :  { %9558 = vmatpush.bf16.msrb.mxu3 %v12364_v41  ;;  %v9143_v29 = vadd.f32 %v9142_v63, %v9129_v13  ;;  %v14029_v41 = vld [vmem:[#allocation5 + $0x344] sm:$0xf]  ;;  %v13151_v63 = vld [vmem:[#allocation5 + $0x7c0] sm:$0xf]  ;;  %v13127_v13 = vld [vmem:[#allocation5 + $0x790] sm:$0xf] }
 0x71b   :  { %9621 = vst [vmem:[#allocation7] sm:$0xff] %v9197_v39  ;;  %v12580_v2 = vor.u32 %v14029_v41, %v12577_v30  ;;  %v13152_v48 = vor.u32 %v14176_v12, %v13151_v63  ;;  %v13128_v60 = vor.u32 %v14170_v33, %v13127_v13  ;;  %v12889_v39 = vld [vmem:[#allocation5 + $0x5c8] sm:$0xf0]  ;;  %v12865_v38 = vld [vmem:[#allocation5 + $0x598] sm:$0xf0] }
 0x71c   :  { %9566 = vmatpush.bf16.msra.mxu0 %v12700_v52  ;;  %9475 = vmatmul.bf16.vlgmr.msra.gmra.mxu1 %v17585_v7  ;;  %v9157_v59 = vadd.f32 %v17641_v17, %v9143_v29  ;;  %v14182_v17 = vld [vmem:[#allocation5 + $0x804] sm:$0xf0]  ;;  %v14113_v29 = vld [vmem:[#allocation5 + $0x5e4] sm:$0xf]  ;;  %v12892_v1 = vor.u32 %v14107_v36, %v12889_v39  ;;  %v14083_v41 = vld [vmem:[#allocation5 + $0x4f4] sm:$0xf] }
 0x71d   :  { %9523 = vmatpush.bf16.msrb.mxu1 %v13296_v11  ;;  %9559 = vmatmul.bf16.vlgmr.msrb.gmra.mxu3 %v17585_v7  ;;  %v12625_v7 = vld [vmem:[#allocation5 + $0x3b8] sm:$0xf0]  ;;  %v9212_v11 = vpop.f32.mrf.mxu2  ;;  %v13176_v53 = vor.u32 %v14182_v17, %v13175_v54  ;;  %v12916_v23 = vor.u32 %v14113_v29, %v12913_v40  ;;  %v12793_v30 = vld [vmem:[#allocation5 + $0x508] sm:$0xf0] }
 0x71e   :  { %9607 = vmatpush.bf16.msra.mxu3 %v13300_v27  ;;  %v12628_v46 = vor.u32 %v14041_v31, %v12625_v7  ;;  %v9171_v51 = vadd.f32 %v17644_v14, %v9157_v59  ;;  %v9238_v14 = vpop.f32.mrf.mxu0  ;;  %v9213_v31 = vadd.f32 %v9212_v11, %v7666_v24  ;;  %v12796_v11 = vor.u32 %v14083_v41, %v12793_v30 }
 0x71f   :  { %v9239_v4 = vadd.f32 %v9238_v14, %v9225_v21  ;;  %v14071_v14 = vld [vmem:[#allocation5 + $0x494] sm:$0xf] }
 0x720   :  { %9567 = vmatpush.bf16.msra.mxu0 %v12676_v22  ;;  %v9185_v37 = vadd.f32 %v9184_v56, %v9171_v51  ;;  %v9198_v52 = vpop.f32.mrf.mxu1  ;;  %v14023_v22 = vld [vmem:[#allocation5 + $0x314] sm:$0xf] }
 0x721   :  { %9524 = vmatpush.bf16.msrb.mxu1 %v13272_v8  ;;  %v13180_v8 = vor.u32 %v14179_v19, %v13177_v16  ;;  %v12556_v62 = vor.u32 %v14023_v22, %v12553_v58  ;;  %v9280_v45 = vpop.f32.mrf.mxu3  ;;  %v12769_v19 = vld [vmem:[#allocation5 + $0x4d8] sm:$0xf0]  ;;  %v7667_v16 = vperm.slane %v17636_v15, 2 }
 0x722   :  { %9608 = vmatpush.bf16.msra.mxu3 %v13276_v25  ;;  %v9199_v27 = vadd.f32 %v9198_v52, %v9185_v37  ;;  %v13153_v25 = vld [vmem:[#allocation5 + $0x7d8] sm:$0xf0]  ;;  %v14089_v37 = vld [vmem:[#allocation5 + $0x524] sm:$0xf] }
 0x723   :  { %v13156_v18 = vor.u32 %v14173_v34, %v13153_v25 }
 0x724   :  { %9568 = vmatpush.bf16.msra.mxu0 %v12652_v10  ;;  %9627 = vst [vmem:[#allocation7 + $0x30] sm:$0xff] %v9199_v27 }
 0x725   :  { %9525 = vmatpush.bf16.msrb.mxu1 %v13248_v9  ;;  %v14167_v9 = vld [vmem:[#allocation5 + $0x794] sm:$0xf]  ;;  %v9266_v10 = vpop.f32.mrf.mxu2 }
 0x726   :  { %9609 = vmatpush.bf16.msra.mxu3 %v13252_v0  ;;  %v13132_v56 = vor.u32 %v14167_v9, %v13129_v35  ;;  %v9240_v20 = vpop.f32.mrf.mxu0 }
 0x728   :  { %9569 = vmatpush.bf16.msra.mxu0 %v12628_v46  ;;  %v9252_v44 = vpop.f32.mrf.mxu1 }
 0x729   :  { %9526 = vmatpush.bf16.msrb.mxu1 %v13224_v6  ;;  %v9253_v0 = vadd.f32 %v9252_v44, %v9239_v4  ;;  %v9227_v6 = vadd.f32 %v9226_v43, %v9213_v31  ;;  %v9282_v24 = vpop.f32.mrf.mxu3 }
 0x72a   :  { %9610 = vmatpush.bf16.msra.mxu3 %v13228_v42  ;;  %v14101_v42 = vld [vmem:[#allocation5 + $0x584] sm:$0xf] }
 0x72b   :  { %v9267_v7 = vadd.f32 %v9266_v10, %v9253_v0  ;;  %v9241_v61 = vadd.f32 %v9240_v20, %v9227_v6  ;;  %v12868_v51 = vor.u32 %v14101_v42, %v12865_v38 }
 0x72c   :  { %9570 = vmatpush.bf16.msra.mxu0 %v12604_v49 }
 0x72d   :  { %9527 = vmatpush.bf16.msrb.mxu1 %v13200_v28  ;;  %v9281_v46 = vadd.f32 %v9280_v45, %v9267_v7  ;;  %v9268_v47 = vpop.f32.mrf.mxu2  ;;  %v12841_v28 = vld [vmem:[#allocation5 + $0x568] sm:$0xf0] }
 0x72e   :  { %9611 = vmatpush.bf16.msra.mxu3 %v13204_v50  ;;  %v12817_v50 = vld [vmem:[#allocation5 + $0x538] sm:$0xf0]  ;;  %v9294_v52 = vpop.f32.mrf.mxu0 }
 0x72f   :  { %9622 = vst [vmem:[#allocation7 + $0x8] sm:$0xff] %v9281_v46  ;;  %v12820_v17 = vor.u32 %v14089_v37, %v12817_v50  ;;  %v7669_v37 = vperm.slane %v17636_v15, 4 }
 0x730   :  { %9571 = vmatpush.bf16.msra.mxu0 %v12580_v2  ;;  %v9254_v59 = vpop.f32.mrf.mxu1  ;;  %v9295_v2 = vadd.f32 %v9294_v52, %v7667_v16 }
 0x731   :  { %9528 = vmatpush.bf16.msrb.mxu1 %v13176_v53  ;;  %v9255_v26 = vadd.f32 %v9254_v59, %v9241_v61  ;;  %v12745_v53 = vld [vmem:[#allocation5 + $0x4a8] sm:$0xf0]  ;;  %v9336_v58 = vpop.f32.mrf.mxu3 }
 0x732   :  { %9612 = vmatpush.bf16.msra.mxu3 %v13180_v8  ;;  %v12748_v63 = vor.u32 %v14071_v14, %v12745_v53 }
 0x733   :  { %v9269_v57 = vadd.f32 %v9268_v47, %v9255_v26 }
 0x734   :  { %9572 = vmatpush.bf16.msra.mxu0 %v12556_v62 }
 0x735   :  { %9529 = vmatpush.bf16.msrb.mxu1 %v13152_v48  ;;  %v9283_v49 = vadd.f32 %v9282_v24, %v9269_v57  ;;  %v9322_v3 = vpop.f32.mrf.mxu2 }
 0x736   :  { %9613 = vmatpush.bf16.msra.mxu3 %v13156_v18  ;;  %v9296_v8 = vpop.f32.mrf.mxu0 }
 0x737   :  { %9573 = vmatmul.bf16.vlgmr.msra.gmra.mxu0 %v17582_v55  ;;  %v14095_v55 = vld [vmem:[#allocation5 + $0x554] sm:$0xf]  ;;  %9628 = vst [vmem:[#allocation7 + $0x38] sm:$0xff] %v9283_v49  ;;  %v9297_v25 = vadd.f32 %v9296_v8, %v7667_v16 }
 0x738   :  { %v12844_v54 = vor.u32 %v14095_v55, %v12841_v28 }
 0x739   :  { %9530 = vmatpush.bf16.msrb.mxu1 %v13128_v60  ;;  %v9308_v43 = vpop.f32.mrf.mxu1  ;;  %v9338_v10 = vpop.f32.mrf.mxu3 }
 0x73a   :  { %9614 = vmatpush.bf16.msra.mxu3 %v13132_v56  ;;  %v9309_v12 = vadd.f32 %v9308_v43, %v9295_v2 }
 0x73c   :  { %9531 = vmatmul.bf16.vlgmr.msrb.gmra.mxu1 %v17607_v5  ;;  %v9323_v22 = vadd.f32 %v9322_v3, %v9309_v12 }
 0x73d   :  { %9579 = vmatpush.bf16.msra.mxu1 %v12916_v23  ;;  %9615 = vmatmul.bf16.vlgmr.msra.gmra.mxu3 %v17607_v5  ;;  %v14077_v5 = vld [vmem:[#allocation5 + $0x4c4] sm:$0xf]  ;;  %v9324_v4 = vpop.f32.mrf.mxu2 }
 0x73e   :  { %v12772_v27 = vor.u32 %v14077_v5, %v12769_v19  ;;  %v9337_v48 = vadd.f32 %v9336_v58, %v9323_v22  ;;  %v9350_v62 = vpop.f32.mrf.mxu0 }
 0x740   :  { %v9351_v13 = vadd.f32 %v9350_v62, %v9337_v48 }
 0x741   :  { %9580 = vmatpush.bf16.msra.mxu1 %v12892_v1  ;;  %v9310_v34 = vpop.f32.mrf.mxu1 }
 0x742   :  { %v9311_v21 = vadd.f32 %v9310_v34, %v9297_v25  ;;  %v9392_v60 = vpop.f32.mrf.mxu3 }
 0x744   :  { %v9325_v18 = vadd.f32 %v9324_v4, %v9311_v21  ;;  %v7670_v4 = vperm.slane %v17636_v15, 5 }
 0x745   :  { %9581 = vmatpush.bf16.msra.mxu1 %v12868_v51  ;;  %v9378_v45 = vpop.f32.mrf.mxu2 }
 0x746   :  { %v9339_v44 = vadd.f32 %v9338_v10, %v9325_v18  ;;  %v9352_v35 = vpop.f32.mrf.mxu0 }
 0x748   :  { %v9353_v29 = vadd.f32 %v9352_v35, %v9339_v44 }
 0x749   :  { %9582 = vmatpush.bf16.msra.mxu1 %v12844_v54 }
 0x74a   :  { %v9394_v7 = vpop.f32.mrf.mxu3 }
 0x74d   :  { %9583 = vmatpush.bf16.msra.mxu1 %v12820_v17  ;;  %v9380_v31 = vpop.f32.mrf.mxu2 }
 0x751   :  { %9584 = vmatpush.bf16.msra.mxu1 %v12796_v11 }
 0x754   :  { %v9406_v56 = vpop.f32.mrf.mxu0 }
 0x755   :  { %9585 = vmatpush.bf16.msra.mxu1 %v12772_v27  ;;  %v9434_v39 = vpop.f32.mrf.mxu2 }
 0x759   :  { %9586 = vmatpush.bf16.msra.mxu1 %v12748_v63  ;;  %v9364_v33 = vpop.f32.mrf.mxu1 }
 0x75a   :  { %v9365_v9 = vadd.f32 %v9364_v33, %v9351_v13 }
 0x75c   :  { %9587 = vmatmul.bf16.vlgmr.msra.gmra.mxu1 %v17590_v32  ;;  %9623 = vst [vmem:[#allocation7 + $0x10] sm:$0xff] %v9365_v9  ;;  %v7668_v32 = vperm.slane %v17636_v15, 3  ;;  %v9408_v42 = vpop.f32.mrf.mxu0 }
 0x75d   :  { %v9436_v24 = vpop.f32.mrf.mxu2 }
 0x75e   :  { %v9379_v23 = vadd.f32 %v9378_v45, %v7668_v32  ;;  %v9381_v1 = vadd.f32 %v9380_v31, %v7668_v32 }
 0x760   :  { %v9393_v20 = vadd.f32 %v9392_v60, %v9379_v23  ;;  %v9395_v38 = vadd.f32 %v9394_v7, %v9381_v1 }
 0x761   :  { %v9366_v40 = vpop.f32.mrf.mxu1 }
 0x762   :  { %v9367_v0 = vadd.f32 %v9366_v40, %v9353_v29  ;;  %v9407_v36 = vadd.f32 %v9406_v56, %v9393_v20  ;;  %v9448_v61 = vpop.f32.mrf.mxu3  ;;  %v9409_v47 = vadd.f32 %v9408_v42, %v9395_v38 }
 0x764   :  { %9629 = vst [vmem:[#allocation7 + $0x40] sm:$0xff] %v9367_v0 }
 0x765   :  { %v9490_v30 = vpop.f32.mrf.mxu2 }
 0x76a   :  { %v9450_v28 = vpop.f32.mrf.mxu3 }
 0x76d   :  { %v9492_v53 = vpop.f32.mrf.mxu2 }
 0x774   :  { %v9462_v54 = vpop.f32.mrf.mxu0 }
 0x775   :  { %v9463_v17 = vadd.f32 %v9462_v54, %v7669_v37 }
 0x779   :  { %v9420_v6 = vpop.f32.mrf.mxu1 }
 0x77a   :  { %v9421_v46 = vadd.f32 %v9420_v6, %v9407_v36 }
 0x77b   :  { %v9546_v48 = vpop.f32.mrf.mxu2 }
 0x77c   :  { %v9435_v59 = vadd.f32 %v9434_v39, %v9421_v46  ;;  %v9464_v11 = vpop.f32.mrf.mxu0  ;;  %v9547_v9 = vadd.f32 %v9546_v48, %v7670_v4 }
 0x77d   :  { %v9465_v16 = vadd.f32 %v9464_v11, %v7669_v37 }
 0x77e   :  { %v9449_v26 = vadd.f32 %v9448_v61, %v9435_v59 }
 0x780   :  { %9624 = vst [vmem:[#allocation7 + $0x18] sm:$0xff] %v9449_v26 }
 0x781   :  { %v9422_v57 = vpop.f32.mrf.mxu1 }
 0x782   :  { %v9423_v51 = vadd.f32 %v9422_v57, %v9409_v47  ;;  %v9504_v5 = vpop.f32.mrf.mxu3 }
 0x783   :  { %v9548_v18 = vpop.f32.mrf.mxu2 }
 0x784   :  { %v9437_v55 = vadd.f32 %v9436_v24, %v9423_v51  ;;  %v9549_v45 = vadd.f32 %v9548_v18, %v7670_v4 }
 0x786   :  { %v9451_v49 = vadd.f32 %v9450_v28, %v9437_v55 }
 0x788   :  { %9630 = vst [vmem:[#allocation7 + $0x48] sm:$0xff] %v9451_v49 }
 0x78a   :  { %v9506_v8 = vpop.f32.mrf.mxu3 }
 0x794   :  { %v9518_v14 = vpop.f32.mrf.mxu0 }
 0x799   :  { %v9476_v50 = vpop.f32.mrf.mxu1 }
 0x79a   :  { %v9477_v41 = vadd.f32 %v9476_v50, %v9463_v17 }
 0x79b   :  { %v9602_v35 = vpop.f32.mrf.mxu2 }
 0x79c   :  { %v9491_v52 = vadd.f32 %v9490_v30, %v9477_v41  ;;  %v9520_v58 = vpop.f32.mrf.mxu0 }
 0x79e   :  { %v9505_v43 = vadd.f32 %v9504_v5, %v9491_v52 }
 0x7a0   :  { %v9519_v63 = vadd.f32 %v9518_v14, %v9505_v43  ;;  %v9560_v62 = vpop.f32.mrf.mxu3 }
 0x7a1   :  { %v9478_v19 = vpop.f32.mrf.mxu1  ;;  %v9561_v10 = vadd.f32 %v9560_v62, %v9547_v9 }
 0x7a2   :  { %v9479_v27 = vadd.f32 %v9478_v19, %v9465_v16 }
 0x7a3   :  { %v9604_v15 = vpop.f32.mrf.mxu2 }
 0x7a4   :  { %v9493_v2 = vadd.f32 %v9492_v53, %v9479_v27 }
 0x7a6   :  { %v9507_v22 = vadd.f32 %v9506_v8, %v9493_v2 }
 0x7a8   :  { %v9521_v34 = vadd.f32 %v9520_v58, %v9507_v22  ;;  %v9562_v13 = vpop.f32.mrf.mxu3 }
 0x7a9   :  { %v9563_v31 = vadd.f32 %v9562_v13, %v9549_v45 }
 0x7b4   :  { %v9574_v33 = vpop.f32.mrf.mxu0 }
 0x7b5   :  { %v9575_v44 = vadd.f32 %v9574_v33, %v9561_v10 }
 0x7b9   :  { %v9532_v12 = vpop.f32.mrf.mxu1 }
 0x7ba   :  { %v9533_v3 = vadd.f32 %v9532_v12, %v9519_v63 }
 0x7bc   :  { %9625 = vst [vmem:[#allocation7 + $0x20] sm:$0xff] %v9533_v3  ;;  %v9576_v32 = vpop.f32.mrf.mxu0 }
 0x7bd   :  { %v9577_v56 = vadd.f32 %v9576_v32, %v9563_v31 }
 0x7c0   :  { %v9616_v0 = vpop.f32.mrf.mxu3 }
 0x7c1   :  { %v9534_v25 = vpop.f32.mrf.mxu1 }
 0x7c2   :  { %v9535_v21 = vadd.f32 %v9534_v25, %v9521_v34 }
 0x7c4   :  { %9631 = vst [vmem:[#allocation7 + $0x50] sm:$0xff] %v9535_v21 }
 0x7c8   :  { %v9618_v39 = vpop.f32.mrf.mxu3 }
 0x7d9   :  { %v9588_v29 = vpop.f32.mrf.mxu1 }
 0x7da   :  { %v9589_v40 = vadd.f32 %v9588_v29, %v9575_v44 }
 0x7dc   :  { %v9603_v60 = vadd.f32 %v9602_v35, %v9589_v40 }
 0x7de   :  { %v9617_v7 = vadd.f32 %v9616_v0, %v9603_v60 }
 0x7e0   :  { %9626 = vst [vmem:[#allocation7 + $0x28] sm:$0xff] %v9617_v7 }
 0x7e1   :  { %v9590_v23 = vpop.f32.mrf.mxu1 }
 0x7e2   :  { %v9591_v20 = vadd.f32 %v9590_v23, %v9577_v56 }
 0x7e4   :  { %v9605_v36 = vadd.f32 %v9604_v15, %v9591_v20 }
 0x7e6   :  { %v9619_v6 = vadd.f32 %v9618_v39, %v9605_v36 }
 0x7e8   :  { %9632 = vst [vmem:[#allocation7 + $0x58] sm:$0xff] %v9619_v6 }
 0x7e9   :  { %9645 = dma.vmem_to_hbm [thread:$0]  %s9638_s17, 1536, %s9640_s3, [#allocation4], %s14311_s6, %s14311_s6, %s14312_s20  }
 0x7ea   :  { %14303 = dma.done.wait [#allocation4], 1536  }
 0x7eb   :  { %14304 = vsyncadd [#allocation4], 4294965760 }
 0x7ec   :  { %9650 = vsyncpa [#allocation3], 1 }
 0x7ed   :  { %9651 = vsyncpa [#allocation6], 1 }
 0x7ee   :  { %9652 = vsyncpa [#allocation4], 1 }

</bundles_post_ra>
